<compile_context>
chip_gen: v6e
topology: v6e:2x2x1
jax: 0.10.0
libtpu: 0.0.40
codegen_flags: <defaults>
</compile_context>

<pallas_src>
import functools
import math

import jax
import jax.numpy as jnp
from jax import lax
from jax.experimental import pallas as pl
from jax.experimental.pallas import tpu as pltpu


# ------------------------------ in-kernel helpers ------------------------------

def _sigmoid(x):
    return 1.0 / (1.0 + jnp.exp(-x))


def _silu(x):
    return x * _sigmoid(x)


def _softplus(x):
    return jnp.where(x > 20.0, x, jnp.log(1.0 + jnp.exp(jnp.minimum(x, 20.0))))


def _layernorm(x, gamma, beta, eps=1e-5):
    mu = jnp.mean(x, axis=-1, keepdims=True)
    var = jnp.mean((x - mu) ** 2, axis=-1, keepdims=True)
    return (x - mu) * lax.rsqrt(var + eps) * gamma + beta


def _mxu(a, b):
    # dense weight projection: bf16 operands, f32 accumulation on the MXU
    return jnp.dot(a.astype(jnp.bfloat16), b.astype(jnp.bfloat16),
                   preferred_element_type=jnp.float32)


def _mxu_f32(a, b):
    # exact f32 matmul: one-hot gathers / scatter-sums / coordinates / dt path
    return jnp.dot(a, b, preferred_element_type=jnp.float32)


# ------------------------------ slab layouts (8-sublane aligned) ------------------------------

_DT_PAD = 8          # dt_rank rows / columns padded to 8
_VEC_ROWS = 24       # per-layer block of conv taps + (1,H) vector params


def _sq_layout(hidden, d_state):
    """Row offsets inside the per-layer width-H slab; every offset is a multiple of 8."""
    H, S = hidden, d_state
    offs = {'we2': 0, 'wn1m': H, 'wn2': 2 * H, 'wout': 3 * H,
            'wdt': 4 * H, 'at': 4 * H + _DT_PAD, 'vec': 4 * H + _DT_PAD + S}
    return offs, 4 * H + _DT_PAD + S + _VEC_ROWS


def _vec_layout(d_conv):
    names = ['be1', 'be2', 'bn1', 'bn2', 'png', 'pnb', 'convb', 'dtb',
             'dvec', 'mng', 'mnb', 'wat', 'ba', 'w_rad', 'w_ea']
    assert d_conv + len(names) <= _VEC_ROWS
    return {n: d_conv + i for i, n in enumerate(names)}


def pack_params(gcl_params, eq_params, hidden, d_state, d_conv, dt_rank):
    """Pack all per-layer params into four 8-row-aligned slabs:
         w3   ((L)*H, 3H)      : h   @ [We1_src | We1_dst | Wn1_h]
         w2   ((L+1)*H, 2H)    : nh  @ [Winx | Winz]   (+ equiv [Wc1_dst | Wc1_src])
         wsq  (L*SQ + H+8, H)  : square weights, A^T, dt_proj, all bias/vector rows
         wbcd (L*H, 2S+8)      : x_proj = [B | C | dt(padded)]
    """
    H, S = hidden, d_state
    assert H % 8 == 0 and S % 8 == 0 and dt_rank <= _DT_PAD
    sq_offs, sq_rows = _sq_layout(H, S)
    vidx = _vec_layout(d_conv)

    w3_l, w2_l, wsq_l, wbcd_l = [], [], [], []
    for p in gcl_params:
        w3_l.append(jnp.concatenate(
            [p['we1'][0:H], p['we1'][H:2 * H], p['wn1'][H:2 * H]], axis=1))
        w2_l.append(jnp.concatenate([p['winx'], p['winz']], axis=1))

        vec = jnp.zeros((_VEC_ROWS, H), jnp.float32)
        vec = vec.at[0:d_conv].set(p['convw'])
        rows = {'be1': p['be1'], 'be2': p['be2'], 'bn1': p['bn1'], 'bn2': p['bn2'],
                'png': p['png'], 'pnb': p['pnb'], 'convb': p['convb'], 'dtb': p['dtb'],
                'dvec': p['dvec'], 'mng': p['mng'], 'mnb': p['mnb'],
                'wat': jnp.transpose(p['wa']),
                'ba': jnp.broadcast_to(p['ba'], (1, H)),
                'w_rad': p['we1'][2 * H:2 * H + 1],
                'w_ea': p['we1'][2 * H + 1:2 * H + 2]}
        for name, val in rows.items():
            vec = vec.at[vidx[name]:vidx[name] + 1].set(val.reshape(1, H))

        sq = jnp.concatenate(
            [p['we2'], p['wn1'][0:H], p['wn2'], p['wout'],
             jnp.pad(p['wdt'], ((0, _DT_PAD - dt_rank), (0, 0))),
             p['at'], vec], axis=0)
        assert sq.shape == (sq_rows, H)
        wsq_l.append(sq)

        wbcd_l.append(jnp.concatenate(
            [p['wxb'], p['wxc'],
             jnp.pad(p['wxdt'], ((0, 0), (0, _DT_PAD - dt_rank)))], axis=1))

    # EquivariantUpdate tail (8-aligned): wc2 then an (8,H) vector block
    q = eq_params
    eqvec = jnp.zeros((8, H), jnp.float32)
    eqvec = eqvec.at[0:1].set(q['wc1'][2 * H:2 * H + 1])          # radial row
    eqvec = eqvec.at[1:2].set(q['wc1'][2 * H + 1:2 * H + 2])      # edge-attr row
    eqvec = eqvec.at[2:3].set(q['bc1'])
    eqvec = eqvec.at[3:4].set(q['bc2'])
    eqvec = eqvec.at[4:5].set(jnp.transpose(q['wc3']))
    wsq_l.append(jnp.concatenate([q['wc2'], eqvec], axis=0))
    w2_l.append(jnp.concatenate([q['wc1'][0:H], q['wc1'][H:2 * H]], axis=1))

    return (jnp.concatenate(w3_l, axis=0), jnp.concatenate(w2_l, axis=0),
            jnp.concatenate(wsq_l, axis=0), jnp.concatenate(wbcd_l, axis=0))


# ------------------------------ fused EquivariantBlock kernel ------------------------------

def _block_kernel(h_ref, x_ref, eattr_ref, dmat_ref, gsrc_ref, gdst_ref, sdt_ref,
                  w3_ref, w2_ref, wsq_ref, wbcd_ref, h_out_ref, x_out_ref, *,
                  n_nodes, hidden, d_state, d_conv, dt_rank, n_layers,
                  norm_constant, norm_factor):
    H, S, N = hidden, d_state, n_nodes
    sq_offs, sq_rows = _sq_layout(H, S)
    vidx = _vec_layout(d_conv)

    gsrc = gsrc_ref[...]                                          # (E,N)
    gdst = gdst_ref[...]                                          # (E,N)
    sdt = sdt_ref[...]                                            # (N,E)
    eattr = eattr_ref[...]                                        # (E,1)
    x = x_ref[...]                                                # (N,3)

    # ---- coord2diff: fused gather matmul, f32 ----
    diff = _mxu_f32(dmat_ref[...], x)                             # x[dst]-x[src]  (E,3)
    radial = jnp.sum(diff * diff, axis=-1, keepdims=True)         # (E,1)
    cdiff = diff / (jnp.sqrt(radial + 1e-8) + norm_constant)      # (E,3)

    h = h_ref[...]
    row_iota = lax.broadcasted_iota(jnp.int32, (N, H), 0)

    for layer in range(n_layers):
        base = layer * sq_rows

        def SQ(name, rows, _b=base):
            o = _b + sq_offs[name]
            return wsq_ref[o:o + rows, :]

        vec = SQ('vec', _VEC_ROWS)                                # one aligned (24,H) load
        vr = lambda nm: vec[vidx[nm]:vidx[nm] + 1, :]             # noqa: E731
        convw = vec[0:d_conv, :]

        # ---- edge model: project-then-gather (gathers exact in f32) ----
        hw = _mxu(h, w3_ref[layer * H:(layer + 1) * H, :])        # (N,3H)
        m = (_mxu_f32(gsrc, hw[:, 0:H]) + _mxu_f32(gdst, hw[:, H:2 * H])
             + radial * vr('w_rad') + eattr * vr('w_ea') + vr('be1'))
        m = _silu(m)
        mij = _silu(_mxu(m, SQ('we2', H)) + vr('be2'))            # (E,H)
        att = _sigmoid(jnp.sum(mij * vr('wat'), axis=-1, keepdims=True)
                       + vr('ba')[:, 0:1])                        # (E,1)
        mi = _mxu_f32(sdt, mij * att)                             # scatter-sum over dst (N,H)

        # ---- node model -> pre_norm -> clamp ----
        nh = _silu(_mxu(mi, SQ('wn1m', H)) + hw[:, 2 * H:3 * H] + vr('bn1'))
        nh = _mxu(nh, SQ('wn2', H)) + vr('bn2')
        nh = _layernorm(nh, vr('png'), vr('pnb'))
        nh = jnp.clip(nh, -10.0, 10.0)

        # ---- Mamba (d_model=d_inner=H, d_state=S, d_conv, expand=1), batch=1, seq=N ----
        xz = _mxu(nh, w2_ref[layer * H:(layer + 1) * H, :])       # (N,2H) = [x | z]
        xm, z = xz[:, 0:H], xz[:, H:2 * H]

        # causal depthwise conv: XLU rolls + masked wrapped rows
        xc = vr('convb') + xm * convw[d_conv - 1:d_conv, :]
        for j in range(1, d_conv):
            shifted = pltpu.roll(xm, j, 0)                        # row t <- xm[(t-j) mod N]
            shifted = jnp.where(row_iota >= j, shifted, 0.0)
            xc = xc + shifted * convw[d_conv - 1 - j:d_conv - j, :]
        xa = _silu(xc)                                            # (N,H)

        # x_proj + dt path in f32 -> [B | C | dt]
        proj = _mxu_f32(xa, wbcd_ref[layer * H:(layer + 1) * H, :])   # (N, 2S+8)
        b_seq = proj[:, 0:S]                                      # (N,S)
        c_seq = proj[:, S:2 * S]                                  # (N,S)
        dt_pad = proj[:, 2 * S:2 * S + _DT_PAD]                   # (N,8) (zero-padded cols)
        delta = _softplus(_mxu_f32(dt_pad, SQ('wdt', _DT_PAD)) + vr('dtb'))   # (N,H)

        at = SQ('at', S)                                          # (S,H) = A^T, A=-exp(A_log)
        du = delta * xa
        # batched EUP / VPU precompute hoisted out of the recurrence
        dA = jnp.exp(delta[:, None, :] * at[None, :, :])          # (N,S,H)
        dBu = b_seq[:, :, None] * du[:, None, :]                  # (N,S,H)

        if N <= 16:
            # unrolled scan: carry chain is pure VPU FMAs; readout is one vectorized
            # C*states mul + sublane reduce (no (1,S)@(S,H) MXU pushes, no row concat).
            state = jnp.zeros((S, H), jnp.float32)
            states = []
            for t in range(N):
                state = dA[t] * state + dBu[t]
                states.append(state)
            states = jnp.stack(states, axis=0)                    # (N,S,H)
            y = jnp.sum(c_seq[:, :, None] * states, axis=1)       # (N,H)
        else:
            # rolled fallback: precomputed dA/dBu/ct, unroll=2 so the step-t readout
            # overlaps the step-(t+1) state FMA.
            ct_all = jnp.transpose(c_seq)                         # (S,N)

            def scan_body(t, carry):
                st, y_acc = carry
                st = (lax.dynamic_slice_in_dim(dA, t, 1, 0)[0] * st
                      + lax.dynamic_slice_in_dim(dBu, t, 1, 0)[0])
                ct = lax.dynamic_slice_in_dim(ct_all, t, 1, 1)    # (S,1)
                y_row = jnp.sum(ct * st, axis=0, keepdims=True)   # (1,H)
                y_acc = lax.dynamic_update_slice_in_dim(y_acc, y_row, t, 0)
                return st, y_acc

            _, y = lax.fori_loop(0, N, scan_body,
                                 (jnp.zeros((S, H), jnp.float32),
                                  jnp.zeros((N, H), jnp.float32)),
                                 unroll=2)

        y = y + xa * vr('dvec')                                   # + D * u
        y = y * _silu(z)                                          # gate
        out = _mxu(y, SQ('wout', H))                              # out_proj
        out = _layernorm(out, vr('mng'), vr('mnb'))               # mamba_norm
        h = jnp.clip(out, -10.0, 10.0)

    h_out_ref[...] = h

    # ---- EquivariantUpdate (tanh=False), project-then-gather ----
    eq_base = n_layers * sq_rows
    hw2 = _mxu(h, w2_ref[n_layers * H:(n_layers + 1) * H, :])     # (N,2H) = [->dst | ->src]
    eqv = wsq_ref[eq_base + H:eq_base + H + 8, :]
    mm = (_mxu_f32(gdst, hw2[:, 0:H]) + _mxu_f32(gsrc, hw2[:, H:2 * H])
          + radial * eqv[0:1, :] + eattr * eqv[1:2, :] + eqv[2:3, :])
    mm = _silu(mm)
    mm = _silu(_mxu(mm, wsq_ref[eq_base:eq_base + H, :]) + eqv[3:4, :])
    phi = jnp.sum(mm * eqv[4:5, :], axis=-1, keepdims=True)       # (E,1)
    agg = _mxu_f32(sdt, cdiff * phi) / norm_factor                # segment-sum / norm
    x_out_ref[...] = x + agg


# ------------------------------ full EquivariantBlock forward ------------------------------

def equivariant_block_forward(h, x, edge_attr, graph, params, *, norm_constant=1.0,
                              normalization_factor=100.0, d_state=64, d_conv=4):
    n, hidden = h.shape
    n_layers = len(params['gcl'])
    dt_rank = params['gcl'][0]['wxdt'].shape[1]

    w3, w2, wsq, wbcd = pack_params(params['gcl'], params['equiv'],
                                    hidden, d_state, d_conv, dt_rank)
    dmat = graph['g_dst'] - graph['g_src']                        # fused coord2diff gather

    kern = functools.partial(
        _block_kernel, n_nodes=n, hidden=hidden, d_state=d_state, d_conv=d_conv,
        dt_rank=dt_rank, n_layers=n_layers, norm_constant=norm_constant,
        norm_factor=normalization_factor)

    args = (h, x, edge_attr, dmat, graph['g_src'], graph['g_dst'], graph['s_dst_t'],
            w3, w2, wsq, wbcd)
    vspec = pl.BlockSpec(memory_space=pltpu.MemorySpace.VMEM)
    h_out, x_out = pl.pallas_call(
        kern,
        out_shape=(jax.ShapeDtypeStruct((n, hidden), jnp.float32),
                   jax.ShapeDtypeStruct((n, 3), jnp.float32)),
        in_specs=[vspec] * len(args),
        out_specs=(vspec, vspec),
    )(*args)
    return h_out, x_out


# ------------------------------ deterministic parameter init ------------------------------

def _glorot(key, shape, gain=1.0):
    fan_in, fan_out = shape[0], shape[1]
    scale = gain * math.sqrt(2.0 / (fan_in + fan_out))
    return scale * jax.random.normal(key, shape, jnp.float32)


def init_gcl_params(key, hidden, d_state, dt_rank, d_conv):
    ks = jax.random.split(key, 16)
    p = {}
    # edge_mlp / att_mlp / node_mlp / pre_norm
    p['we1'] = _glorot(ks[0], (2 * hidden + 2, hidden))
    p['be1'] = jnp.zeros((1, hidden), jnp.float32)
    p['we2'] = _glorot(ks[1], (hidden, hidden))
    p['be2'] = jnp.zeros((1, hidden), jnp.float32)
    p['wa'] = _glorot(ks[2], (hidden, 1))
    p['ba'] = jnp.zeros((1, 1), jnp.float32)
    p['wn1'] = _glorot(ks[3], (2 * hidden, hidden))
    p['bn1'] = jnp.zeros((1, hidden), jnp.float32)
    p['wn2'] = _glorot(ks[4], (hidden, hidden))
    p['bn2'] = jnp.zeros((1, hidden), jnp.float32)
    p['png'] = jnp.ones((1, hidden), jnp.float32)
    p['pnb'] = jnp.zeros((1, hidden), jnp.float32)
    # Mamba(d_model=hidden, d_state, d_conv, expand=1): d_inner = hidden
    p['winx'] = _glorot(ks[5], (hidden, hidden))          # in_proj -> x branch
    p['winz'] = _glorot(ks[6], (hidden, hidden))          # in_proj -> z branch
    p['convw'] = 0.5 * jax.random.normal(ks[7], (d_conv, hidden), jnp.float32)
    p['convb'] = jnp.zeros((1, hidden), jnp.float32)
    p['wxdt'] = _glorot(ks[8], (hidden, dt_rank))         # x_proj (dt part)
    p['wxb'] = _glorot(ks[9], (hidden, d_state))          # x_proj (B part)
    p['wxc'] = _glorot(ks[10], (hidden, d_state))         # x_proj (C part)
    p['wdt'] = _glorot(ks[11], (dt_rank, hidden))         # dt_proj weight
    p['dtb'] = jnp.full((1, hidden), -4.6, jnp.float32)   # dt_proj bias ~ softplus^-1(0.01)
    # A = -exp(A_log), S4D-real init A_log = log(1..d_state); stored as A^T : (S, H)
    p['at'] = -jnp.broadcast_to(
        jnp.arange(1, d_state + 1, dtype=jnp.float32)[:, None], (d_state, hidden))
    p['dvec'] = jnp.ones((1, hidden), jnp.float32)        # D skip parameter
    p['wout'] = _glorot(ks[12], (hidden, hidden))         # out_proj (no bias)
    p['mng'] = jnp.ones((1, hidden), jnp.float32)         # mamba_norm gamma
    p['mnb'] = jnp.zeros((1, hidden), jnp.float32)        # mamba_norm beta
    return p


def init_equiv_params(key, hidden):
    ks = jax.random.split(key, 3)
    return {
        'wc1': _glorot(ks[0], (2 * hidden + 2, hidden)),
        'bc1': jnp.zeros((1, hidden), jnp.float32),
        'wc2': _glorot(ks[1], (hidden, hidden)),
        'bc2': jnp.zeros((1, hidden), jnp.float32),
        'wc3': _glorot(ks[2], (hidden, 1), gain=0.001),   # xavier gain 0.001, no bias
    }


# ------------------------------ driver ------------------------------

if __name__ == "__main__":
    N, H = 8, 32                       # nodes, hidden_nf
    D_STATE, D_CONV = 64, 4
    DT_RANK = math.ceil(H / 16)
    key = jax.random.PRNGKey(0)
    k_h, k_x, k_ea, k_p0, k_p1, k_pe = jax.random.split(key, 6)

    # fully-connected graph without self loops; edge_index = (dst=row, src=col)
    dst_l, src_l = [], []
    for i in range(N):
        for j in range(N):
            if i != j:
                dst_l.append(i)
                src_l.append(j)
    dst = jnp.asarray(dst_l, jnp.int32)
    src = jnp.asarray(src_l, jnp.int32)
    E = int(dst.shape[0])

    g_dst = jax.nn.one_hot(dst, N, dtype=jnp.float32)     # (E,N): g_dst @ v = v[dst]
    g_src = jax.nn.one_hot(src, N, dtype=jnp.float32)     # (E,N): g_src @ v = v[src]
    s_dst_t = jnp.transpose(g_dst)                        # (N,E): scatter-add over dst
    graph = {'g_dst': g_dst, 'g_src': g_src, 's_dst_t': s_dst_t}

    h = jax.random.normal(k_h, (N, H), jnp.float32)
    x = jax.random.normal(k_x, (N, 3), jnp.float32)
    edge_attr = jax.random.normal(k_ea, (E, 1), jnp.float32)

    params = {
        'gcl': [init_gcl_params(k, H, D_STATE, DT_RANK, D_CONV) for k in (k_p0, k_p1)],
        'equiv': init_equiv_params(k_pe, H),
    }

    h_out, x_out = equivariant_block_forward(
        h, x, edge_attr, graph, params,
        norm_constant=1.0, normalization_factor=100.0,
        d_state=D_STATE, d_conv=D_CONV)
    jax.block_until_ready((h_out, x_out))

    assert h_out.shape == (N, H) and x_out.shape == (N, 3)
    assert bool(jnp.isfinite(h_out).all()) and bool(jnp.isfinite(x_out).all())
    print("KERNEL_OK")
</pallas_src>

<mosaic_0001>
module attributes {stable_mosaic.version = 11 : i64} {
  func.func @_block_kernel(%arg0: memref<8x32xf32, #tpu.memory_space<vmem>>, %arg1: memref<8x3xf32, #tpu.memory_space<vmem>>, %arg2: memref<56x1xf32, #tpu.memory_space<vmem>>, %arg3: memref<56x8xf32, #tpu.memory_space<vmem>>, %arg4: memref<56x8xf32, #tpu.memory_space<vmem>>, %arg5: memref<56x8xf32, #tpu.memory_space<vmem>>, %arg6: memref<8x56xf32, #tpu.memory_space<vmem>>, %arg7: memref<64x96xf32, #tpu.memory_space<vmem>>, %arg8: memref<96x64xf32, #tpu.memory_space<vmem>>, %arg9: memref<488x32xf32, #tpu.memory_space<vmem>>, %arg10: memref<64x136xf32, #tpu.memory_space<vmem>>, %arg11: memref<8x32xf32, #tpu.memory_space<vmem>>, %arg12: memref<8x3xf32, #tpu.memory_space<vmem>>) attributes {dimension_semantics = [], scalar_prefetch = 0 : i64, scratch_operands = 0 : i64, tpu.core_type = #tpu.core_type<tc>} {
    %c0 = arith.constant 0 : index
    %c0_0 = arith.constant 0 : index
    %0 = vector.load %arg4[%c0, %c0_0] : memref<56x8xf32, #tpu.memory_space<vmem>>, vector<56x8xf32>
    %c0_1 = arith.constant 0 : index
    %c0_2 = arith.constant 0 : index
    %1 = vector.load %arg5[%c0_1, %c0_2] : memref<56x8xf32, #tpu.memory_space<vmem>>, vector<56x8xf32>
    %c0_3 = arith.constant 0 : index
    %c0_4 = arith.constant 0 : index
    %2 = vector.load %arg6[%c0_3, %c0_4] : memref<8x56xf32, #tpu.memory_space<vmem>>, vector<8x56xf32>
    %c0_5 = arith.constant 0 : index
    %c0_6 = arith.constant 0 : index
    %3 = vector.load %arg2[%c0_5, %c0_6] : memref<56x1xf32, #tpu.memory_space<vmem>>, vector<56x1xf32>
    %c0_7 = arith.constant 0 : index
    %c0_8 = arith.constant 0 : index
    %4 = vector.load %arg1[%c0_7, %c0_8] : memref<8x3xf32, #tpu.memory_space<vmem>>, vector<8x3xf32>
    %c0_9 = arith.constant 0 : index
    %c0_10 = arith.constant 0 : index
    %5 = vector.load %arg3[%c0_9, %c0_10] : memref<56x8xf32, #tpu.memory_space<vmem>>, vector<56x8xf32>
    %cst = arith.constant dense<0.000000e+00> : vector<56x3xf32>
    %6 = tpu.matmul %5, %4, %cst {dimension_numbers = #tpu.dot_dimension_numbers<[1], [0], [0], [1], [0, 0, 1, 1], [], []>} : vector<56x8xf32>, vector<8x3xf32>, vector<56x3xf32> -> vector<56x3xf32>
    %7 = arith.mulf %6, %6 : vector<56x3xf32>
    %cst_11 = arith.constant dense<0.000000e+00> : vector<56xf32>
    %8 = vector.multi_reduction <add>, %7, %cst_11 [1] : vector<56x3xf32> to vector<56xf32>
    %9 = vector.shape_cast %8 : vector<56xf32> to vector<56x1xf32>
    %cst_12 = arith.constant 9.99999993E-9 : f32
    %10 = vector.broadcast %cst_12 : f32 to vector<56x1xf32>
    %11 = arith.addf %9, %10 : vector<56x1xf32>
    %12 = math.sqrt %11 : vector<56x1xf32>
    %cst_13 = arith.constant 1.000000e+00 : f32
    %13 = vector.broadcast %cst_13 : f32 to vector<56x1xf32>
    %14 = arith.addf %12, %13 : vector<56x1xf32>
    %15 = vector.broadcast %14 : vector<56x1xf32> to vector<56x3xf32>
    %16 = arith.divf %6, %15 : vector<56x3xf32>
    %c0_14 = arith.constant 0 : index
    %c0_15 = arith.constant 0 : index
    %17 = vector.load %arg0[%c0_14, %c0_15] : memref<8x32xf32, #tpu.memory_space<vmem>>, vector<8x32xf32>
    %18 = tpu.iota {dimensions = array<i32: 0>} : vector<8x32xi32>
    %c200 = arith.constant 200 : index
    %c0_16 = arith.constant 0 : index
    %19 = vector.load %arg9[%c200, %c0_16] : memref<488x32xf32, #tpu.memory_space<vmem>>, vector<24x32xf32>
    %20 = vector.extract_strided_slice %19 {offsets = [0, 0], sizes = [4, 32], strides = [1, 1]} : vector<24x32xf32> to vector<4x32xf32>
    %c0_17 = arith.constant 0 : index
    %c0_18 = arith.constant 0 : index
    %21 = vector.load %arg7[%c0_17, %c0_18] : memref<64x96xf32, #tpu.memory_space<vmem>>, vector<32x96xf32>
    %22 = arith.truncf %17 : vector<8x32xf32> to vector<8x32xbf16>
    %23 = arith.truncf %21 : vector<32x96xf32> to vector<32x96xbf16>
    %cst_19 = arith.constant dense<0.000000e+00> : vector<8x96xf32>
    %24 = tpu.matmul %22, %23, %cst_19 {dimension_numbers = #tpu.dot_dimension_numbers<[1], [0], [0], [1], [0, 0, 1, 1], [], []>} : vector<8x32xbf16>, vector<32x96xbf16>, vector<8x96xf32> -> vector<8x96xf32>
    %25 = vector.extract_strided_slice %24 {offsets = [0, 0], sizes = [8, 32], strides = [1, 1]} : vector<8x96xf32> to vector<8x32xf32>
    %cst_20 = arith.constant dense<0.000000e+00> : vector<56x32xf32>
    %26 = tpu.matmul %0, %25, %cst_20 {dimension_numbers = #tpu.dot_dimension_numbers<[1], [0], [0], [1], [0, 0, 1, 1], [], []>} : vector<56x8xf32>, vector<8x32xf32>, vector<56x32xf32> -> vector<56x32xf32>
    %27 = vector.extract_strided_slice %24 {offsets = [0, 32], sizes = [8, 32], strides = [1, 1]} : vector<8x96xf32> to vector<8x32xf32>
    %cst_21 = arith.constant dense<0.000000e+00> : vector<56x32xf32>
    %28 = tpu.matmul %1, %27, %cst_21 {dimension_numbers = #tpu.dot_dimension_numbers<[1], [0], [0], [1], [0, 0, 1, 1], [], []>} : vector<56x8xf32>, vector<8x32xf32>, vector<56x32xf32> -> vector<56x32xf32>
    %29 = arith.addf %26, %28 : vector<56x32xf32>
    %30 = vector.extract_strided_slice %19 {offsets = [17, 0], sizes = [1, 32], strides = [1, 1]} : vector<24x32xf32> to vector<1x32xf32>
    %31 = vector.broadcast %9 : vector<56x1xf32> to vector<56x32xf32>
    %32 = vector.broadcast %30 : vector<1x32xf32> to vector<56x32xf32>
    %33 = arith.mulf %31, %32 : vector<56x32xf32>
    %34 = arith.addf %29, %33 : vector<56x32xf32>
    %35 = vector.extract_strided_slice %19 {offsets = [18, 0], sizes = [1, 32], strides = [1, 1]} : vector<24x32xf32> to vector<1x32xf32>
    %36 = vector.broadcast %3 : vector<56x1xf32> to vector<56x32xf32>
    %37 = vector.broadcast %35 : vector<1x32xf32> to vector<56x32xf32>
    %38 = arith.mulf %36, %37 : vector<56x32xf32>
    %39 = arith.addf %34, %38 : vector<56x32xf32>
    %40 = vector.extract_strided_slice %19 {offsets = [4, 0], sizes = [1, 32], strides = [1, 1]} : vector<24x32xf32> to vector<1x32xf32>
    %41 = vector.broadcast %40 : vector<1x32xf32> to vector<56x32xf32>
    %42 = arith.addf %39, %41 : vector<56x32xf32>
    %cst_22 = arith.constant 0.000000e+00 : f32
    %43 = vector.broadcast %cst_22 : f32 to vector<56x32xf32>
    %44 = arith.subf %43, %42 : vector<56x32xf32>
    %45 = math.exp %44 : vector<56x32xf32>
    %cst_23 = arith.constant 1.000000e+00 : f32
    %46 = vector.broadcast %cst_23 : f32 to vector<56x32xf32>
    %47 = arith.addf %46, %45 : vector<56x32xf32>
    %cst_24 = arith.constant 1.000000e+00 : f32
    %48 = vector.broadcast %cst_24 : f32 to vector<56x32xf32>
    %49 = arith.divf %48, %47 : vector<56x32xf32>
    %50 = arith.mulf %42, %49 : vector<56x32xf32>
    %c0_25 = arith.constant 0 : index
    %c0_26 = arith.constant 0 : index
    %51 = vector.load %arg9[%c0_25, %c0_26] : memref<488x32xf32, #tpu.memory_space<vmem>>, vector<32x32xf32>
    %52 = arith.truncf %50 : vector<56x32xf32> to vector<56x32xbf16>
    %53 = arith.truncf %51 : vector<32x32xf32> to vector<32x32xbf16>
    %cst_27 = arith.constant dense<0.000000e+00> : vector<56x32xf32>
    %54 = tpu.matmul %52, %53, %cst_27 {dimension_numbers = #tpu.dot_dimension_numbers<[1], [0], [0], [1], [0, 0, 1, 1], [], []>} : vector<56x32xbf16>, vector<32x32xbf16>, vector<56x32xf32> -> vector<56x32xf32>
    %55 = vector.extract_strided_slice %19 {offsets = [5, 0], sizes = [1, 32], strides = [1, 1]} : vector<24x32xf32> to vector<1x32xf32>
    %56 = vector.broadcast %55 : vector<1x32xf32> to vector<56x32xf32>
    %57 = arith.addf %54, %56 : vector<56x32xf32>
    %cst_28 = arith.constant 0.000000e+00 : f32
    %58 = vector.broadcast %cst_28 : f32 to vector<56x32xf32>
    %59 = arith.subf %58, %57 : vector<56x32xf32>
    %60 = math.exp %59 : vector<56x32xf32>
    %cst_29 = arith.constant 1.000000e+00 : f32
    %61 = vector.broadcast %cst_29 : f32 to vector<56x32xf32>
    %62 = arith.addf %61, %60 : vector<56x32xf32>
    %cst_30 = arith.constant 1.000000e+00 : f32
    %63 = vector.broadcast %cst_30 : f32 to vector<56x32xf32>
    %64 = arith.divf %63, %62 : vector<56x32xf32>
    %65 = arith.mulf %57, %64 : vector<56x32xf32>
    %66 = vector.extract_strided_slice %19 {offsets = [15, 0], sizes = [1, 32], strides = [1, 1]} : vector<24x32xf32> to vector<1x32xf32>
    %67 = vector.broadcast %66 : vector<1x32xf32> to vector<56x32xf32>
    %68 = arith.mulf %65, %67 : vector<56x32xf32>
    %cst_31 = arith.constant dense<0.000000e+00> : vector<56xf32>
    %69 = vector.multi_reduction <add>, %68, %cst_31 [1] : vector<56x32xf32> to vector<56xf32>
    %70 = vector.shape_cast %69 : vector<56xf32> to vector<56x1xf32>
    %71 = vector.extract_strided_slice %19 {offsets = [16, 0], sizes = [1, 32], strides = [1, 1]} : vector<24x32xf32> to vector<1x32xf32>
    %72 = vector.extract_strided_slice %71 {offsets = [0, 0], sizes = [1, 1], strides = [1, 1]} : vector<1x32xf32> to vector<1x1xf32>
    %73 = vector.broadcast %72 : vector<1x1xf32> to vector<56x1xf32>
    %74 = arith.addf %70, %73 : vector<56x1xf32>
    %cst_32 = arith.constant 0.000000e+00 : f32
    %75 = vector.broadcast %cst_32 : f32 to vector<56x1xf32>
    %76 = arith.subf %75, %74 : vector<56x1xf32>
    %77 = math.exp %76 : vector<56x1xf32>
    %cst_33 = arith.constant 1.000000e+00 : f32
    %78 = vector.broadcast %cst_33 : f32 to vector<56x1xf32>
    %79 = arith.addf %78, %77 : vector<56x1xf32>
    %cst_34 = arith.constant 1.000000e+00 : f32
    %80 = vector.broadcast %cst_34 : f32 to vector<56x1xf32>
    %81 = arith.divf %80, %79 : vector<56x1xf32>
    %82 = vector.broadcast %81 : vector<56x1xf32> to vector<56x32xf32>
    %83 = arith.mulf %65, %82 : vector<56x32xf32>
    %cst_35 = arith.constant dense<0.000000e+00> : vector<8x32xf32>
    %84 = tpu.matmul %2, %83, %cst_35 {dimension_numbers = #tpu.dot_dimension_numbers<[1], [0], [0], [1], [0, 0, 1, 1], [], []>} : vector<8x56xf32>, vector<56x32xf32>, vector<8x32xf32> -> vector<8x32xf32>
    %c32 = arith.constant 32 : index
    %c0_36 = arith.constant 0 : index
    %85 = vector.load %arg9[%c32, %c0_36] : memref<488x32xf32, #tpu.memory_space<vmem>>, vector<32x32xf32>
    %86 = arith.truncf %84 : vector<8x32xf32> to vector<8x32xbf16>
    %87 = arith.truncf %85 : vector<32x32xf32> to vector<32x32xbf16>
    %cst_37 = arith.constant dense<0.000000e+00> : vector<8x32xf32>
    %88 = tpu.matmul %86, %87, %cst_37 {dimension_numbers = #tpu.dot_dimension_numbers<[1], [0], [0], [1], [0, 0, 1, 1], [], []>} : vector<8x32xbf16>, vector<32x32xbf16>, vector<8x32xf32> -> vector<8x32xf32>
    %89 = vector.extract_strided_slice %24 {offsets = [0, 64], sizes = [8, 32], strides = [1, 1]} : vector<8x96xf32> to vector<8x32xf32>
    %90 = arith.addf %88, %89 : vector<8x32xf32>
    %91 = vector.extract_strided_slice %19 {offsets = [6, 0], sizes = [1, 32], strides = [1, 1]} : vector<24x32xf32> to vector<1x32xf32>
    %92 = vector.broadcast %91 : vector<1x32xf32> to vector<8x32xf32>
    %93 = arith.addf %90, %92 : vector<8x32xf32>
    %cst_38 = arith.constant 0.000000e+00 : f32
    %94 = vector.broadcast %cst_38 : f32 to vector<8x32xf32>
    %95 = arith.subf %94, %93 : vector<8x32xf32>
    %96 = math.exp %95 : vector<8x32xf32>
    %cst_39 = arith.constant 1.000000e+00 : f32
    %97 = vector.broadcast %cst_39 : f32 to vector<8x32xf32>
    %98 = arith.addf %97, %96 : vector<8x32xf32>
    %cst_40 = arith.constant 1.000000e+00 : f32
    %99 = vector.broadcast %cst_40 : f32 to vector<8x32xf32>
    %100 = arith.divf %99, %98 : vector<8x32xf32>
    %101 = arith.mulf %93, %100 : vector<8x32xf32>
    %c64 = arith.constant 64 : index
    %c0_41 = arith.constant 0 : index
    %102 = vector.load %arg9[%c64, %c0_41] : memref<488x32xf32, #tpu.memory_space<vmem>>, vector<32x32xf32>
    %103 = arith.truncf %101 : vector<8x32xf32> to vector<8x32xbf16>
    %104 = arith.truncf %102 : vector<32x32xf32> to vector<32x32xbf16>
    %cst_42 = arith.constant dense<0.000000e+00> : vector<8x32xf32>
    %105 = tpu.matmul %103, %104, %cst_42 {dimension_numbers = #tpu.dot_dimension_numbers<[1], [0], [0], [1], [0, 0, 1, 1], [], []>} : vector<8x32xbf16>, vector<32x32xbf16>, vector<8x32xf32> -> vector<8x32xf32>
    %106 = vector.extract_strided_slice %19 {offsets = [7, 0], sizes = [1, 32], strides = [1, 1]} : vector<24x32xf32> to vector<1x32xf32>
    %107 = vector.broadcast %106 : vector<1x32xf32> to vector<8x32xf32>
    %108 = arith.addf %105, %107 : vector<8x32xf32>
    %109 = vector.extract_strided_slice %19 {offsets = [8, 0], sizes = [1, 32], strides = [1, 1]} : vector<24x32xf32> to vector<1x32xf32>
    %110 = vector.extract_strided_slice %19 {offsets = [9, 0], sizes = [1, 32], strides = [1, 1]} : vector<24x32xf32> to vector<1x32xf32>
    %cst_43 = arith.constant dense<0.000000e+00> : vector<8xf32>
    %111 = vector.multi_reduction <add>, %108, %cst_43 [1] : vector<8x32xf32> to vector<8xf32>
    %112 = vector.shape_cast %111 : vector<8xf32> to vector<8x1xf32>
    %cst_44 = arith.constant 3.200000e+01 : f32
    %113 = vector.broadcast %cst_44 : f32 to vector<8x1xf32>
    %114 = arith.divf %112, %113 : vector<8x1xf32>
    %115 = vector.broadcast %114 : vector<8x1xf32> to vector<8x32xf32>
    %116 = arith.subf %108, %115 : vector<8x32xf32>
    %117 = arith.mulf %116, %116 : vector<8x32xf32>
    %cst_45 = arith.constant dense<0.000000e+00> : vector<8xf32>
    %118 = vector.multi_reduction <add>, %117, %cst_45 [1] : vector<8x32xf32> to vector<8xf32>
    %119 = vector.shape_cast %118 : vector<8xf32> to vector<8x1xf32>
    %cst_46 = arith.constant 3.200000e+01 : f32
    %120 = vector.broadcast %cst_46 : f32 to vector<8x1xf32>
    %121 = arith.divf %119, %120 : vector<8x1xf32>
    %122 = vector.broadcast %114 : vector<8x1xf32> to vector<8x32xf32>
    %123 = arith.subf %108, %122 : vector<8x32xf32>
    %cst_47 = arith.constant 9.99999974E-6 : f32
    %124 = vector.broadcast %cst_47 : f32 to vector<8x1xf32>
    %125 = arith.addf %121, %124 : vector<8x1xf32>
    %126 = math.rsqrt %125 : vector<8x1xf32>
    %127 = vector.broadcast %126 : vector<8x1xf32> to vector<8x32xf32>
    %128 = arith.mulf %123, %127 : vector<8x32xf32>
    %129 = vector.broadcast %109 : vector<1x32xf32> to vector<8x32xf32>
    %130 = arith.mulf %128, %129 : vector<8x32xf32>
    %131 = vector.broadcast %110 : vector<1x32xf32> to vector<8x32xf32>
    %132 = arith.addf %130, %131 : vector<8x32xf32>
    %cst_48 = arith.constant -1.000000e+01 : f32
    %cst_49 = arith.constant 1.000000e+01 : f32
    %133 = vector.broadcast %cst_48 : f32 to vector<8x32xf32>
    %134 = arith.maximumf %133, %132 : vector<8x32xf32>
    %135 = vector.broadcast %cst_49 : f32 to vector<8x32xf32>
    %136 = arith.minimumf %135, %134 : vector<8x32xf32>
    %c0_50 = arith.constant 0 : index
    %c0_51 = arith.constant 0 : index
    %137 = vector.load %arg8[%c0_50, %c0_51] : memref<96x64xf32, #tpu.memory_space<vmem>>, vector<32x64xf32>
    %138 = arith.truncf %136 : vector<8x32xf32> to vector<8x32xbf16>
    %139 = arith.truncf %137 : vector<32x64xf32> to vector<32x64xbf16>
    %cst_52 = arith.constant dense<0.000000e+00> : vector<8x64xf32>
    %140 = tpu.matmul %138, %139, %cst_52 {dimension_numbers = #tpu.dot_dimension_numbers<[1], [0], [0], [1], [0, 0, 1, 1], [], []>} : vector<8x32xbf16>, vector<32x64xbf16>, vector<8x64xf32> -> vector<8x64xf32>
    %141 = vector.extract_strided_slice %140 {offsets = [0, 0], sizes = [8, 32], strides = [1, 1]} : vector<8x64xf32> to vector<8x32xf32>
    %142 = vector.extract_strided_slice %140 {offsets = [0, 32], sizes = [8, 32], strides = [1, 1]} : vector<8x64xf32> to vector<8x32xf32>
    %143 = vector.extract_strided_slice %19 {offsets = [10, 0], sizes = [1, 32], strides = [1, 1]} : vector<24x32xf32> to vector<1x32xf32>
    %144 = vector.extract_strided_slice %20 {offsets = [3, 0], sizes = [1, 32], strides = [1, 1]} : vector<4x32xf32> to vector<1x32xf32>
    %145 = vector.broadcast %144 : vector<1x32xf32> to vector<8x32xf32>
    %146 = arith.mulf %141, %145 : vector<8x32xf32>
    %147 = vector.broadcast %143 : vector<1x32xf32> to vector<8x32xf32>
    %148 = arith.addf %147, %146 : vector<8x32xf32>
    %c1_i32 = arith.constant 1 : i32
    %149 = tpu.dynamic_rotate %141 by %c1_i32 dim 0 : vector<8x32xf32>, i32 -> vector<8x32xf32>
    %c1_i32_53 = arith.constant 1 : i32
    %150 = vector.broadcast %c1_i32_53 : i32 to vector<8x32xi32>
    %151 = arith.cmpi sge, %18, %150 : vector<8x32xi32>
    %cst_54 = arith.constant 0.000000e+00 : f32
    %152 = vector.broadcast %cst_54 : f32 to vector<8x32xf32>
    %153 = arith.select %151, %149, %152 : vector<8x32xi1>, vector<8x32xf32>
    %154 = vector.extract_strided_slice %20 {offsets = [2, 0], sizes = [1, 32], strides = [1, 1]} : vector<4x32xf32> to vector<1x32xf32>
    %155 = vector.broadcast %154 : vector<1x32xf32> to vector<8x32xf32>
    %156 = arith.mulf %153, %155 : vector<8x32xf32>
    %157 = arith.addf %148, %156 : vector<8x32xf32>
    %c2_i32 = arith.constant 2 : i32
    %158 = tpu.dynamic_rotate %141 by %c2_i32 dim 0 : vector<8x32xf32>, i32 -> vector<8x32xf32>
    %c2_i32_55 = arith.constant 2 : i32
    %159 = vector.broadcast %c2_i32_55 : i32 to vector<8x32xi32>
    %160 = arith.cmpi sge, %18, %159 : vector<8x32xi32>
    %cst_56 = arith.constant 0.000000e+00 : f32
    %161 = vector.broadcast %cst_56 : f32 to vector<8x32xf32>
    %162 = arith.select %160, %158, %161 : vector<8x32xi1>, vector<8x32xf32>
    %163 = vector.extract_strided_slice %20 {offsets = [1, 0], sizes = [1, 32], strides = [1, 1]} : vector<4x32xf32> to vector<1x32xf32>
    %164 = vector.broadcast %163 : vector<1x32xf32> to vector<8x32xf32>
    %165 = arith.mulf %162, %164 : vector<8x32xf32>
    %166 = arith.addf %157, %165 : vector<8x32xf32>
    %c3_i32 = arith.constant 3 : i32
    %167 = tpu.dynamic_rotate %141 by %c3_i32 dim 0 : vector<8x32xf32>, i32 -> vector<8x32xf32>
    %c3_i32_57 = arith.constant 3 : i32
    %168 = vector.broadcast %c3_i32_57 : i32 to vector<8x32xi32>
    %169 = arith.cmpi sge, %18, %168 : vector<8x32xi32>
    %cst_58 = arith.constant 0.000000e+00 : f32
    %170 = vector.broadcast %cst_58 : f32 to vector<8x32xf32>
    %171 = arith.select %169, %167, %170 : vector<8x32xi1>, vector<8x32xf32>
    %172 = vector.extract_strided_slice %20 {offsets = [0, 0], sizes = [1, 32], strides = [1, 1]} : vector<4x32xf32> to vector<1x32xf32>
    %173 = vector.broadcast %172 : vector<1x32xf32> to vector<8x32xf32>
    %174 = arith.mulf %171, %173 : vector<8x32xf32>
    %175 = arith.addf %166, %174 : vector<8x32xf32>
    %cst_59 = arith.constant 0.000000e+00 : f32
    %176 = vector.broadcast %cst_59 : f32 to vector<8x32xf32>
    %177 = arith.subf %176, %175 : vector<8x32xf32>
    %178 = math.exp %177 : vector<8x32xf32>
    %cst_60 = arith.constant 1.000000e+00 : f32
    %179 = vector.broadcast %cst_60 : f32 to vector<8x32xf32>
    %180 = arith.addf %179, %178 : vector<8x32xf32>
    %cst_61 = arith.constant 1.000000e+00 : f32
    %181 = vector.broadcast %cst_61 : f32 to vector<8x32xf32>
    %182 = arith.divf %181, %180 : vector<8x32xf32>
    %183 = arith.mulf %175, %182 : vector<8x32xf32>
    %c0_62 = arith.constant 0 : index
    %c0_63 = arith.constant 0 : index
    %184 = vector.load %arg10[%c0_62, %c0_63] : memref<64x136xf32, #tpu.memory_space<vmem>>, vector<32x136xf32>
    %cst_64 = arith.constant dense<0.000000e+00> : vector<8x136xf32>
    %185 = tpu.matmul %183, %184, %cst_64 {dimension_numbers = #tpu.dot_dimension_numbers<[1], [0], [0], [1], [0, 0, 1, 1], [], []>} : vector<8x32xf32>, vector<32x136xf32>, vector<8x136xf32> -> vector<8x136xf32>
    %186 = vector.extract_strided_slice %185 {offsets = [0, 0], sizes = [8, 64], strides = [1, 1]} : vector<8x136xf32> to vector<8x64xf32>
    %187 = vector.extract_strided_slice %185 {offsets = [0, 64], sizes = [8, 64], strides = [1, 1]} : vector<8x136xf32> to vector<8x64xf32>
    %188 = vector.extract_strided_slice %185 {offsets = [0, 128], sizes = [8, 8], strides = [1, 1]} : vector<8x136xf32> to vector<8x8xf32>
    %c128 = arith.constant 128 : index
    %c0_65 = arith.constant 0 : index
    %189 = vector.load %arg9[%c128, %c0_65] : memref<488x32xf32, #tpu.memory_space<vmem>>, vector<8x32xf32>
    %cst_66 = arith.constant dense<0.000000e+00> : vector<8x32xf32>
    %190 = tpu.matmul %188, %189, %cst_66 {dimension_numbers = #tpu.dot_dimension_numbers<[1], [0], [0], [1], [0, 0, 1, 1], [], []>} : vector<8x8xf32>, vector<8x32xf32>, vector<8x32xf32> -> vector<8x32xf32>
    %191 = vector.extract_strided_slice %19 {offsets = [11, 0], sizes = [1, 32], strides = [1, 1]} : vector<24x32xf32> to vector<1x32xf32>
    %192 = vector.broadcast %191 : vector<1x32xf32> to vector<8x32xf32>
    %193 = arith.addf %190, %192 : vector<8x32xf32>
    %cst_67 = arith.constant 2.000000e+01 : f32
    %194 = vector.broadcast %cst_67 : f32 to vector<8x32xf32>
    %195 = arith.cmpf ogt, %193, %194 : vector<8x32xf32>
    %cst_68 = arith.constant 2.000000e+01 : f32
    %196 = vector.broadcast %cst_68 : f32 to vector<8x32xf32>
    %197 = arith.minimumf %193, %196 : vector<8x32xf32>
    %198 = math.exp %197 : vector<8x32xf32>
    %cst_69 = arith.constant 1.000000e+00 : f32
    %199 = vector.broadcast %cst_69 : f32 to vector<8x32xf32>
    %200 = arith.addf %199, %198 : vector<8x32xf32>
    %201 = math.log %200 : vector<8x32xf32>
    %202 = arith.select %195, %193, %201 : vector<8x32xi1>, vector<8x32xf32>
    %c136 = arith.constant 136 : index
    %c0_70 = arith.constant 0 : index
    %203 = vector.load %arg9[%c136, %c0_70] : memref<488x32xf32, #tpu.memory_space<vmem>>, vector<64x32xf32>
    %204 = arith.mulf %202, %183 : vector<8x32xf32>
    %205 = vector.shape_cast %202 : vector<8x32xf32> to vector<8x1x32xf32>
    %206 = vector.shape_cast %203 : vector<64x32xf32> to vector<1x64x32xf32>
    %207 = vector.broadcast %205 : vector<8x1x32xf32> to vector<8x64x32xf32>
    %208 = vector.broadcast %206 : vector<1x64x32xf32> to vector<8x64x32xf32>
    %209 = arith.mulf %207, %208 : vector<8x64x32xf32>
    %210 = math.exp %209 : vector<8x64x32xf32>
    %211 = vector.shape_cast %186 : vector<8x64xf32> to vector<8x64x1xf32>
    %212 = vector.shape_cast %204 : vector<8x32xf32> to vector<8x1x32xf32>
    %213 = vector.broadcast %211 : vector<8x64x1xf32> to vector<8x64x32xf32>
    %214 = vector.broadcast %212 : vector<8x1x32xf32> to vector<8x64x32xf32>
    %215 = arith.mulf %213, %214 : vector<8x64x32xf32>
    %cst_71 = arith.constant 0.000000e+00 : f32
    %216 = vector.broadcast %cst_71 : f32 to vector<64x32xf32>
    %217 = vector.extract_strided_slice %210 {offsets = [0, 0, 0], sizes = [1, 64, 32], strides = [1, 1, 1]} : vector<8x64x32xf32> to vector<1x64x32xf32>
    %218 = vector.shape_cast %217 : vector<1x64x32xf32> to vector<64x32xf32>
    %219 = arith.mulf %218, %216 : vector<64x32xf32>
    %220 = vector.extract_strided_slice %215 {offsets = [0, 0, 0], sizes = [1, 64, 32], strides = [1, 1, 1]} : vector<8x64x32xf32> to vector<1x64x32xf32>
    %221 = vector.shape_cast %220 : vector<1x64x32xf32> to vector<64x32xf32>
    %222 = arith.addf %219, %221 : vector<64x32xf32>
    %223 = vector.extract_strided_slice %210 {offsets = [1, 0, 0], sizes = [1, 64, 32], strides = [1, 1, 1]} : vector<8x64x32xf32> to vector<1x64x32xf32>
    %224 = vector.shape_cast %223 : vector<1x64x32xf32> to vector<64x32xf32>
    %225 = arith.mulf %224, %222 : vector<64x32xf32>
    %226 = vector.extract_strided_slice %215 {offsets = [1, 0, 0], sizes = [1, 64, 32], strides = [1, 1, 1]} : vector<8x64x32xf32> to vector<1x64x32xf32>
    %227 = vector.shape_cast %226 : vector<1x64x32xf32> to vector<64x32xf32>
    %228 = arith.addf %225, %227 : vector<64x32xf32>
    %229 = vector.extract_strided_slice %210 {offsets = [2, 0, 0], sizes = [1, 64, 32], strides = [1, 1, 1]} : vector<8x64x32xf32> to vector<1x64x32xf32>
    %230 = vector.shape_cast %229 : vector<1x64x32xf32> to vector<64x32xf32>
    %231 = arith.mulf %230, %228 : vector<64x32xf32>
    %232 = vector.extract_strided_slice %215 {offsets = [2, 0, 0], sizes = [1, 64, 32], strides = [1, 1, 1]} : vector<8x64x32xf32> to vector<1x64x32xf32>
    %233 = vector.shape_cast %232 : vector<1x64x32xf32> to vector<64x32xf32>
    %234 = arith.addf %231, %233 : vector<64x32xf32>
    %235 = vector.extract_strided_slice %210 {offsets = [3, 0, 0], sizes = [1, 64, 32], strides = [1, 1, 1]} : vector<8x64x32xf32> to vector<1x64x32xf32>
    %236 = vector.shape_cast %235 : vector<1x64x32xf32> to vector<64x32xf32>
    %237 = arith.mulf %236, %234 : vector<64x32xf32>
    %238 = vector.extract_strided_slice %215 {offsets = [3, 0, 0], sizes = [1, 64, 32], strides = [1, 1, 1]} : vector<8x64x32xf32> to vector<1x64x32xf32>
    %239 = vector.shape_cast %238 : vector<1x64x32xf32> to vector<64x32xf32>
    %240 = arith.addf %237, %239 : vector<64x32xf32>
    %241 = vector.extract_strided_slice %210 {offsets = [4, 0, 0], sizes = [1, 64, 32], strides = [1, 1, 1]} : vector<8x64x32xf32> to vector<1x64x32xf32>
    %242 = vector.shape_cast %241 : vector<1x64x32xf32> to vector<64x32xf32>
    %243 = arith.mulf %242, %240 : vector<64x32xf32>
    %244 = vector.extract_strided_slice %215 {offsets = [4, 0, 0], sizes = [1, 64, 32], strides = [1, 1, 1]} : vector<8x64x32xf32> to vector<1x64x32xf32>
    %245 = vector.shape_cast %244 : vector<1x64x32xf32> to vector<64x32xf32>
    %246 = arith.addf %243, %245 : vector<64x32xf32>
    %247 = vector.extract_strided_slice %210 {offsets = [5, 0, 0], sizes = [1, 64, 32], strides = [1, 1, 1]} : vector<8x64x32xf32> to vector<1x64x32xf32>
    %248 = vector.shape_cast %247 : vector<1x64x32xf32> to vector<64x32xf32>
    %249 = arith.mulf %248, %246 : vector<64x32xf32>
    %250 = vector.extract_strided_slice %215 {offsets = [5, 0, 0], sizes = [1, 64, 32], strides = [1, 1, 1]} : vector<8x64x32xf32> to vector<1x64x32xf32>
    %251 = vector.shape_cast %250 : vector<1x64x32xf32> to vector<64x32xf32>
    %252 = arith.addf %249, %251 : vector<64x32xf32>
    %253 = vector.extract_strided_slice %210 {offsets = [6, 0, 0], sizes = [1, 64, 32], strides = [1, 1, 1]} : vector<8x64x32xf32> to vector<1x64x32xf32>
    %254 = vector.shape_cast %253 : vector<1x64x32xf32> to vector<64x32xf32>
    %255 = arith.mulf %254, %252 : vector<64x32xf32>
    %256 = vector.extract_strided_slice %215 {offsets = [6, 0, 0], sizes = [1, 64, 32], strides = [1, 1, 1]} : vector<8x64x32xf32> to vector<1x64x32xf32>
    %257 = vector.shape_cast %256 : vector<1x64x32xf32> to vector<64x32xf32>
    %258 = arith.addf %255, %257 : vector<64x32xf32>
    %259 = vector.extract_strided_slice %210 {offsets = [7, 0, 0], sizes = [1, 64, 32], strides = [1, 1, 1]} : vector<8x64x32xf32> to vector<1x64x32xf32>
    %260 = vector.shape_cast %259 : vector<1x64x32xf32> to vector<64x32xf32>
    %261 = arith.mulf %260, %258 : vector<64x32xf32>
    %262 = vector.extract_strided_slice %215 {offsets = [7, 0, 0], sizes = [1, 64, 32], strides = [1, 1, 1]} : vector<8x64x32xf32> to vector<1x64x32xf32>
    %263 = vector.shape_cast %262 : vector<1x64x32xf32> to vector<64x32xf32>
    %264 = arith.addf %261, %263 : vector<64x32xf32>
    %265 = vector.shape_cast %222 : vector<64x32xf32> to vector<1x64x32xf32>
    %266 = vector.shape_cast %228 : vector<64x32xf32> to vector<1x64x32xf32>
    %267 = vector.shape_cast %234 : vector<64x32xf32> to vector<1x64x32xf32>
    %268 = vector.shape_cast %240 : vector<64x32xf32> to vector<1x64x32xf32>
    %269 = vector.shape_cast %246 : vector<64x32xf32> to vector<1x64x32xf32>
    %270 = vector.shape_cast %252 : vector<64x32xf32> to vector<1x64x32xf32>
    %271 = vector.shape_cast %258 : vector<64x32xf32> to vector<1x64x32xf32>
    %272 = vector.shape_cast %264 : vector<64x32xf32> to vector<1x64x32xf32>
    %273 = tpu.concatenate %265, %266, %267, %268, %269, %270, %271, %272 in 0 : vector<1x64x32xf32>, vector<1x64x32xf32>, vector<1x64x32xf32>, vector<1x64x32xf32>, vector<1x64x32xf32>, vector<1x64x32xf32>, vector<1x64x32xf32>, vector<1x64x32xf32> -> vector<8x64x32xf32>
    %274 = vector.shape_cast %187 : vector<8x64xf32> to vector<8x64x1xf32>
    %275 = vector.broadcast %274 : vector<8x64x1xf32> to vector<8x64x32xf32>
    %276 = arith.mulf %275, %273 : vector<8x64x32xf32>
    %cst_72 = arith.constant dense<0.000000e+00> : vector<8x32xf32>
    %277 = vector.multi_reduction <add>, %276, %cst_72 [1] : vector<8x64x32xf32> to vector<8x32xf32>
    %278 = vector.extract_strided_slice %19 {offsets = [12, 0], sizes = [1, 32], strides = [1, 1]} : vector<24x32xf32> to vector<1x32xf32>
    %279 = vector.broadcast %278 : vector<1x32xf32> to vector<8x32xf32>
    %280 = arith.mulf %183, %279 : vector<8x32xf32>
    %281 = arith.addf %277, %280 : vector<8x32xf32>
    %cst_73 = arith.constant 0.000000e+00 : f32
    %282 = vector.broadcast %cst_73 : f32 to vector<8x32xf32>
    %283 = arith.subf %282, %142 : vector<8x32xf32>
    %284 = math.exp %283 : vector<8x32xf32>
    %cst_74 = arith.constant 1.000000e+00 : f32
    %285 = vector.broadcast %cst_74 : f32 to vector<8x32xf32>
    %286 = arith.addf %285, %284 : vector<8x32xf32>
    %cst_75 = arith.constant 1.000000e+00 : f32
    %287 = vector.broadcast %cst_75 : f32 to vector<8x32xf32>
    %288 = arith.divf %287, %286 : vector<8x32xf32>
    %289 = arith.mulf %142, %288 : vector<8x32xf32>
    %290 = arith.mulf %281, %289 : vector<8x32xf32>
    %c96 = arith.constant 96 : index
    %c0_76 = arith.constant 0 : index
    %291 = vector.load %arg9[%c96, %c0_76] : memref<488x32xf32, #tpu.memory_space<vmem>>, vector<32x32xf32>
    %292 = arith.truncf %290 : vector<8x32xf32> to vector<8x32xbf16>
    %293 = arith.truncf %291 : vector<32x32xf32> to vector<32x32xbf16>
    %cst_77 = arith.constant dense<0.000000e+00> : vector<8x32xf32>
    %294 = tpu.matmul %292, %293, %cst_77 {dimension_numbers = #tpu.dot_dimension_numbers<[1], [0], [0], [1], [0, 0, 1, 1], [], []>} : vector<8x32xbf16>, vector<32x32xbf16>, vector<8x32xf32> -> vector<8x32xf32>
    %295 = vector.extract_strided_slice %19 {offsets = [13, 0], sizes = [1, 32], strides = [1, 1]} : vector<24x32xf32> to vector<1x32xf32>
    %296 = vector.extract_strided_slice %19 {offsets = [14, 0], sizes = [1, 32], strides = [1, 1]} : vector<24x32xf32> to vector<1x32xf32>
    %cst_78 = arith.constant dense<0.000000e+00> : vector<8xf32>
    %297 = vector.multi_reduction <add>, %294, %cst_78 [1] : vector<8x32xf32> to vector<8xf32>
    %298 = vector.shape_cast %297 : vector<8xf32> to vector<8x1xf32>
    %cst_79 = arith.constant 3.200000e+01 : f32
    %299 = vector.broadcast %cst_79 : f32 to vector<8x1xf32>
    %300 = arith.divf %298, %299 : vector<8x1xf32>
    %301 = vector.broadcast %300 : vector<8x1xf32> to vector<8x32xf32>
    %302 = arith.subf %294, %301 : vector<8x32xf32>
    %303 = arith.mulf %302, %302 : vector<8x32xf32>
    %cst_80 = arith.constant dense<0.000000e+00> : vector<8xf32>
    %304 = vector.multi_reduction <add>, %303, %cst_80 [1] : vector<8x32xf32> to vector<8xf32>
    %305 = vector.shape_cast %304 : vector<8xf32> to vector<8x1xf32>
    %cst_81 = arith.constant 3.200000e+01 : f32
    %306 = vector.broadcast %cst_81 : f32 to vector<8x1xf32>
    %307 = arith.divf %305, %306 : vector<8x1xf32>
    %308 = vector.broadcast %300 : vector<8x1xf32> to vector<8x32xf32>
    %309 = arith.subf %294, %308 : vector<8x32xf32>
    %cst_82 = arith.constant 9.99999974E-6 : f32
    %310 = vector.broadcast %cst_82 : f32 to vector<8x1xf32>
    %311 = arith.addf %307, %310 : vector<8x1xf32>
    %312 = math.rsqrt %311 : vector<8x1xf32>
    %313 = vector.broadcast %312 : vector<8x1xf32> to vector<8x32xf32>
    %314 = arith.mulf %309, %313 : vector<8x32xf32>
    %315 = vector.broadcast %295 : vector<1x32xf32> to vector<8x32xf32>
    %316 = arith.mulf %314, %315 : vector<8x32xf32>
    %317 = vector.broadcast %296 : vector<1x32xf32> to vector<8x32xf32>
    %318 = arith.addf %316, %317 : vector<8x32xf32>
    %cst_83 = arith.constant -1.000000e+01 : f32
    %cst_84 = arith.constant 1.000000e+01 : f32
    %319 = vector.broadcast %cst_83 : f32 to vector<8x32xf32>
    %320 = arith.maximumf %319, %318 : vector<8x32xf32>
    %321 = vector.broadcast %cst_84 : f32 to vector<8x32xf32>
    %322 = arith.minimumf %321, %320 : vector<8x32xf32>
    %c424 = arith.constant 424 : index
    %c0_85 = arith.constant 0 : index
    %323 = vector.load %arg9[%c424, %c0_85] : memref<488x32xf32, #tpu.memory_space<vmem>>, vector<24x32xf32>
    %324 = vector.extract_strided_slice %323 {offsets = [0, 0], sizes = [4, 32], strides = [1, 1]} : vector<24x32xf32> to vector<4x32xf32>
    %c32_86 = arith.constant 32 : index
    %c0_87 = arith.constant 0 : index
    %325 = vector.load %arg7[%c32_86, %c0_87] : memref<64x96xf32, #tpu.memory_space<vmem>>, vector<32x96xf32>
    %326 = arith.truncf %322 : vector<8x32xf32> to vector<8x32xbf16>
    %327 = arith.truncf %325 : vector<32x96xf32> to vector<32x96xbf16>
    %cst_88 = arith.constant dense<0.000000e+00> : vector<8x96xf32>
    %328 = tpu.matmul %326, %327, %cst_88 {dimension_numbers = #tpu.dot_dimension_numbers<[1], [0], [0], [1], [0, 0, 1, 1], [], []>} : vector<8x32xbf16>, vector<32x96xbf16>, vector<8x96xf32> -> vector<8x96xf32>
    %329 = vector.extract_strided_slice %328 {offsets = [0, 0], sizes = [8, 32], strides = [1, 1]} : vector<8x96xf32> to vector<8x32xf32>
    %cst_89 = arith.constant dense<0.000000e+00> : vector<56x32xf32>
    %330 = tpu.matmul %0, %329, %cst_89 {dimension_numbers = #tpu.dot_dimension_numbers<[1], [0], [0], [1], [0, 0, 1, 1], [], []>} : vector<56x8xf32>, vector<8x32xf32>, vector<56x32xf32> -> vector<56x32xf32>
    %331 = vector.extract_strided_slice %328 {offsets = [0, 32], sizes = [8, 32], strides = [1, 1]} : vector<8x96xf32> to vector<8x32xf32>
    %cst_90 = arith.constant dense<0.000000e+00> : vector<56x32xf32>
    %332 = tpu.matmul %1, %331, %cst_90 {dimension_numbers = #tpu.dot_dimension_numbers<[1], [0], [0], [1], [0, 0, 1, 1], [], []>} : vector<56x8xf32>, vector<8x32xf32>, vector<56x32xf32> -> vector<56x32xf32>
    %333 = arith.addf %330, %332 : vector<56x32xf32>
    %334 = vector.extract_strided_slice %323 {offsets = [17, 0], sizes = [1, 32], strides = [1, 1]} : vector<24x32xf32> to vector<1x32xf32>
    %335 = vector.broadcast %9 : vector<56x1xf32> to vector<56x32xf32>
    %336 = vector.broadcast %334 : vector<1x32xf32> to vector<56x32xf32>
    %337 = arith.mulf %335, %336 : vector<56x32xf32>
    %338 = arith.addf %333, %337 : vector<56x32xf32>
    %339 = vector.extract_strided_slice %323 {offsets = [18, 0], sizes = [1, 32], strides = [1, 1]} : vector<24x32xf32> to vector<1x32xf32>
    %340 = vector.broadcast %3 : vector<56x1xf32> to vector<56x32xf32>
    %341 = vector.broadcast %339 : vector<1x32xf32> to vector<56x32xf32>
    %342 = arith.mulf %340, %341 : vector<56x32xf32>
    %343 = arith.addf %338, %342 : vector<56x32xf32>
    %344 = vector.extract_strided_slice %323 {offsets = [4, 0], sizes = [1, 32], strides = [1, 1]} : vector<24x32xf32> to vector<1x32xf32>
    %345 = vector.broadcast %344 : vector<1x32xf32> to vector<56x32xf32>
    %346 = arith.addf %343, %345 : vector<56x32xf32>
    %cst_91 = arith.constant 0.000000e+00 : f32
    %347 = vector.broadcast %cst_91 : f32 to vector<56x32xf32>
    %348 = arith.subf %347, %346 : vector<56x32xf32>
    %349 = math.exp %348 : vector<56x32xf32>
    %cst_92 = arith.constant 1.000000e+00 : f32
    %350 = vector.broadcast %cst_92 : f32 to vector<56x32xf32>
    %351 = arith.addf %350, %349 : vector<56x32xf32>
    %cst_93 = arith.constant 1.000000e+00 : f32
    %352 = vector.broadcast %cst_93 : f32 to vector<56x32xf32>
    %353 = arith.divf %352, %351 : vector<56x32xf32>
    %354 = arith.mulf %346, %353 : vector<56x32xf32>
    %c224 = arith.constant 224 : index
    %c0_94 = arith.constant 0 : index
    %355 = vector.load %arg9[%c224, %c0_94] : memref<488x32xf32, #tpu.memory_space<vmem>>, vector<32x32xf32>
    %356 = arith.truncf %354 : vector<56x32xf32> to vector<56x32xbf16>
    %357 = arith.truncf %355 : vector<32x32xf32> to vector<32x32xbf16>
    %cst_95 = arith.constant dense<0.000000e+00> : vector<56x32xf32>
    %358 = tpu.matmul %356, %357, %cst_95 {dimension_numbers = #tpu.dot_dimension_numbers<[1], [0], [0], [1], [0, 0, 1, 1], [], []>} : vector<56x32xbf16>, vector<32x32xbf16>, vector<56x32xf32> -> vector<56x32xf32>
    %359 = vector.extract_strided_slice %323 {offsets = [5, 0], sizes = [1, 32], strides = [1, 1]} : vector<24x32xf32> to vector<1x32xf32>
    %360 = vector.broadcast %359 : vector<1x32xf32> to vector<56x32xf32>
    %361 = arith.addf %358, %360 : vector<56x32xf32>
    %cst_96 = arith.constant 0.000000e+00 : f32
    %362 = vector.broadcast %cst_96 : f32 to vector<56x32xf32>
    %363 = arith.subf %362, %361 : vector<56x32xf32>
    %364 = math.exp %363 : vector<56x32xf32>
    %cst_97 = arith.constant 1.000000e+00 : f32
    %365 = vector.broadcast %cst_97 : f32 to vector<56x32xf32>
    %366 = arith.addf %365, %364 : vector<56x32xf32>
    %cst_98 = arith.constant 1.000000e+00 : f32
    %367 = vector.broadcast %cst_98 : f32 to vector<56x32xf32>
    %368 = arith.divf %367, %366 : vector<56x32xf32>
    %369 = arith.mulf %361, %368 : vector<56x32xf32>
    %370 = vector.extract_strided_slice %323 {offsets = [15, 0], sizes = [1, 32], strides = [1, 1]} : vector<24x32xf32> to vector<1x32xf32>
    %371 = vector.broadcast %370 : vector<1x32xf32> to vector<56x32xf32>
    %372 = arith.mulf %369, %371 : vector<56x32xf32>
    %cst_99 = arith.constant dense<0.000000e+00> : vector<56xf32>
    %373 = vector.multi_reduction <add>, %372, %cst_99 [1] : vector<56x32xf32> to vector<56xf32>
    %374 = vector.shape_cast %373 : vector<56xf32> to vector<56x1xf32>
    %375 = vector.extract_strided_slice %323 {offsets = [16, 0], sizes = [1, 32], strides = [1, 1]} : vector<24x32xf32> to vector<1x32xf32>
    %376 = vector.extract_strided_slice %375 {offsets = [0, 0], sizes = [1, 1], strides = [1, 1]} : vector<1x32xf32> to vector<1x1xf32>
    %377 = vector.broadcast %376 : vector<1x1xf32> to vector<56x1xf32>
    %378 = arith.addf %374, %377 : vector<56x1xf32>
    %cst_100 = arith.constant 0.000000e+00 : f32
    %379 = vector.broadcast %cst_100 : f32 to vector<56x1xf32>
    %380 = arith.subf %379, %378 : vector<56x1xf32>
    %381 = math.exp %380 : vector<56x1xf32>
    %cst_101 = arith.constant 1.000000e+00 : f32
    %382 = vector.broadcast %cst_101 : f32 to vector<56x1xf32>
    %383 = arith.addf %382, %381 : vector<56x1xf32>
    %cst_102 = arith.constant 1.000000e+00 : f32
    %384 = vector.broadcast %cst_102 : f32 to vector<56x1xf32>
    %385 = arith.divf %384, %383 : vector<56x1xf32>
    %386 = vector.broadcast %385 : vector<56x1xf32> to vector<56x32xf32>
    %387 = arith.mulf %369, %386 : vector<56x32xf32>
    %cst_103 = arith.constant dense<0.000000e+00> : vector<8x32xf32>
    %388 = tpu.matmul %2, %387, %cst_103 {dimension_numbers = #tpu.dot_dimension_numbers<[1], [0], [0], [1], [0, 0, 1, 1], [], []>} : vector<8x56xf32>, vector<56x32xf32>, vector<8x32xf32> -> vector<8x32xf32>
    %c256 = arith.constant 256 : index
    %c0_104 = arith.constant 0 : index
    %389 = vector.load %arg9[%c256, %c0_104] : memref<488x32xf32, #tpu.memory_space<vmem>>, vector<32x32xf32>
    %390 = arith.truncf %388 : vector<8x32xf32> to vector<8x32xbf16>
    %391 = arith.truncf %389 : vector<32x32xf32> to vector<32x32xbf16>
    %cst_105 = arith.constant dense<0.000000e+00> : vector<8x32xf32>
    %392 = tpu.matmul %390, %391, %cst_105 {dimension_numbers = #tpu.dot_dimension_numbers<[1], [0], [0], [1], [0, 0, 1, 1], [], []>} : vector<8x32xbf16>, vector<32x32xbf16>, vector<8x32xf32> -> vector<8x32xf32>
    %393 = vector.extract_strided_slice %328 {offsets = [0, 64], sizes = [8, 32], strides = [1, 1]} : vector<8x96xf32> to vector<8x32xf32>
    %394 = arith.addf %392, %393 : vector<8x32xf32>
    %395 = vector.extract_strided_slice %323 {offsets = [6, 0], sizes = [1, 32], strides = [1, 1]} : vector<24x32xf32> to vector<1x32xf32>
    %396 = vector.broadcast %395 : vector<1x32xf32> to vector<8x32xf32>
    %397 = arith.addf %394, %396 : vector<8x32xf32>
    %cst_106 = arith.constant 0.000000e+00 : f32
    %398 = vector.broadcast %cst_106 : f32 to vector<8x32xf32>
    %399 = arith.subf %398, %397 : vector<8x32xf32>
    %400 = math.exp %399 : vector<8x32xf32>
    %cst_107 = arith.constant 1.000000e+00 : f32
    %401 = vector.broadcast %cst_107 : f32 to vector<8x32xf32>
    %402 = arith.addf %401, %400 : vector<8x32xf32>
    %cst_108 = arith.constant 1.000000e+00 : f32
    %403 = vector.broadcast %cst_108 : f32 to vector<8x32xf32>
    %404 = arith.divf %403, %402 : vector<8x32xf32>
    %405 = arith.mulf %397, %404 : vector<8x32xf32>
    %c288 = arith.constant 288 : index
    %c0_109 = arith.constant 0 : index
    %406 = vector.load %arg9[%c288, %c0_109] : memref<488x32xf32, #tpu.memory_space<vmem>>, vector<32x32xf32>
    %407 = arith.truncf %405 : vector<8x32xf32> to vector<8x32xbf16>
    %408 = arith.truncf %406 : vector<32x32xf32> to vector<32x32xbf16>
    %cst_110 = arith.constant dense<0.000000e+00> : vector<8x32xf32>
    %409 = tpu.matmul %407, %408, %cst_110 {dimension_numbers = #tpu.dot_dimension_numbers<[1], [0], [0], [1], [0, 0, 1, 1], [], []>} : vector<8x32xbf16>, vector<32x32xbf16>, vector<8x32xf32> -> vector<8x32xf32>
    %410 = vector.extract_strided_slice %323 {offsets = [7, 0], sizes = [1, 32], strides = [1, 1]} : vector<24x32xf32> to vector<1x32xf32>
    %411 = vector.broadcast %410 : vector<1x32xf32> to vector<8x32xf32>
    %412 = arith.addf %409, %411 : vector<8x32xf32>
    %413 = vector.extract_strided_slice %323 {offsets = [8, 0], sizes = [1, 32], strides = [1, 1]} : vector<24x32xf32> to vector<1x32xf32>
    %414 = vector.extract_strided_slice %323 {offsets = [9, 0], sizes = [1, 32], strides = [1, 1]} : vector<24x32xf32> to vector<1x32xf32>
    %cst_111 = arith.constant dense<0.000000e+00> : vector<8xf32>
    %415 = vector.multi_reduction <add>, %412, %cst_111 [1] : vector<8x32xf32> to vector<8xf32>
    %416 = vector.shape_cast %415 : vector<8xf32> to vector<8x1xf32>
    %cst_112 = arith.constant 3.200000e+01 : f32
    %417 = vector.broadcast %cst_112 : f32 to vector<8x1xf32>
    %418 = arith.divf %416, %417 : vector<8x1xf32>
    %419 = vector.broadcast %418 : vector<8x1xf32> to vector<8x32xf32>
    %420 = arith.subf %412, %419 : vector<8x32xf32>
    %421 = arith.mulf %420, %420 : vector<8x32xf32>
    %cst_113 = arith.constant dense<0.000000e+00> : vector<8xf32>
    %422 = vector.multi_reduction <add>, %421, %cst_113 [1] : vector<8x32xf32> to vector<8xf32>
    %423 = vector.shape_cast %422 : vector<8xf32> to vector<8x1xf32>
    %cst_114 = arith.constant 3.200000e+01 : f32
    %424 = vector.broadcast %cst_114 : f32 to vector<8x1xf32>
    %425 = arith.divf %423, %424 : vector<8x1xf32>
    %426 = vector.broadcast %418 : vector<8x1xf32> to vector<8x32xf32>
    %427 = arith.subf %412, %426 : vector<8x32xf32>
    %cst_115 = arith.constant 9.99999974E-6 : f32
    %428 = vector.broadcast %cst_115 : f32 to vector<8x1xf32>
    %429 = arith.addf %425, %428 : vector<8x1xf32>
    %430 = math.rsqrt %429 : vector<8x1xf32>
    %431 = vector.broadcast %430 : vector<8x1xf32> to vector<8x32xf32>
    %432 = arith.mulf %427, %431 : vector<8x32xf32>
    %433 = vector.broadcast %413 : vector<1x32xf32> to vector<8x32xf32>
    %434 = arith.mulf %432, %433 : vector<8x32xf32>
    %435 = vector.broadcast %414 : vector<1x32xf32> to vector<8x32xf32>
    %436 = arith.addf %434, %435 : vector<8x32xf32>
    %cst_116 = arith.constant -1.000000e+01 : f32
    %cst_117 = arith.constant 1.000000e+01 : f32
    %437 = vector.broadcast %cst_116 : f32 to vector<8x32xf32>
    %438 = arith.maximumf %437, %436 : vector<8x32xf32>
    %439 = vector.broadcast %cst_117 : f32 to vector<8x32xf32>
    %440 = arith.minimumf %439, %438 : vector<8x32xf32>
    %c32_118 = arith.constant 32 : index
    %c0_119 = arith.constant 0 : index
    %441 = vector.load %arg8[%c32_118, %c0_119] : memref<96x64xf32, #tpu.memory_space<vmem>>, vector<32x64xf32>
    %442 = arith.truncf %440 : vector<8x32xf32> to vector<8x32xbf16>
    %443 = arith.truncf %441 : vector<32x64xf32> to vector<32x64xbf16>
    %cst_120 = arith.constant dense<0.000000e+00> : vector<8x64xf32>
    %444 = tpu.matmul %442, %443, %cst_120 {dimension_numbers = #tpu.dot_dimension_numbers<[1], [0], [0], [1], [0, 0, 1, 1], [], []>} : vector<8x32xbf16>, vector<32x64xbf16>, vector<8x64xf32> -> vector<8x64xf32>
    %445 = vector.extract_strided_slice %444 {offsets = [0, 0], sizes = [8, 32], strides = [1, 1]} : vector<8x64xf32> to vector<8x32xf32>
    %446 = vector.extract_strided_slice %444 {offsets = [0, 32], sizes = [8, 32], strides = [1, 1]} : vector<8x64xf32> to vector<8x32xf32>
    %447 = vector.extract_strided_slice %323 {offsets = [10, 0], sizes = [1, 32], strides = [1, 1]} : vector<24x32xf32> to vector<1x32xf32>
    %448 = vector.extract_strided_slice %324 {offsets = [3, 0], sizes = [1, 32], strides = [1, 1]} : vector<4x32xf32> to vector<1x32xf32>
    %449 = vector.broadcast %448 : vector<1x32xf32> to vector<8x32xf32>
    %450 = arith.mulf %445, %449 : vector<8x32xf32>
    %451 = vector.broadcast %447 : vector<1x32xf32> to vector<8x32xf32>
    %452 = arith.addf %451, %450 : vector<8x32xf32>
    %c1_i32_121 = arith.constant 1 : i32
    %453 = tpu.dynamic_rotate %445 by %c1_i32_121 dim 0 : vector<8x32xf32>, i32 -> vector<8x32xf32>
    %c1_i32_122 = arith.constant 1 : i32
    %454 = vector.broadcast %c1_i32_122 : i32 to vector<8x32xi32>
    %455 = arith.cmpi sge, %18, %454 : vector<8x32xi32>
    %cst_123 = arith.constant 0.000000e+00 : f32
    %456 = vector.broadcast %cst_123 : f32 to vector<8x32xf32>
    %457 = arith.select %455, %453, %456 : vector<8x32xi1>, vector<8x32xf32>
    %458 = vector.extract_strided_slice %324 {offsets = [2, 0], sizes = [1, 32], strides = [1, 1]} : vector<4x32xf32> to vector<1x32xf32>
    %459 = vector.broadcast %458 : vector<1x32xf32> to vector<8x32xf32>
    %460 = arith.mulf %457, %459 : vector<8x32xf32>
    %461 = arith.addf %452, %460 : vector<8x32xf32>
    %c2_i32_124 = arith.constant 2 : i32
    %462 = tpu.dynamic_rotate %445 by %c2_i32_124 dim 0 : vector<8x32xf32>, i32 -> vector<8x32xf32>
    %c2_i32_125 = arith.constant 2 : i32
    %463 = vector.broadcast %c2_i32_125 : i32 to vector<8x32xi32>
    %464 = arith.cmpi sge, %18, %463 : vector<8x32xi32>
    %cst_126 = arith.constant 0.000000e+00 : f32
    %465 = vector.broadcast %cst_126 : f32 to vector<8x32xf32>
    %466 = arith.select %464, %462, %465 : vector<8x32xi1>, vector<8x32xf32>
    %467 = vector.extract_strided_slice %324 {offsets = [1, 0], sizes = [1, 32], strides = [1, 1]} : vector<4x32xf32> to vector<1x32xf32>
    %468 = vector.broadcast %467 : vector<1x32xf32> to vector<8x32xf32>
    %469 = arith.mulf %466, %468 : vector<8x32xf32>
    %470 = arith.addf %461, %469 : vector<8x32xf32>
    %c3_i32_127 = arith.constant 3 : i32
    %471 = tpu.dynamic_rotate %445 by %c3_i32_127 dim 0 : vector<8x32xf32>, i32 -> vector<8x32xf32>
    %c3_i32_128 = arith.constant 3 : i32
    %472 = vector.broadcast %c3_i32_128 : i32 to vector<8x32xi32>
    %473 = arith.cmpi sge, %18, %472 : vector<8x32xi32>
    %cst_129 = arith.constant 0.000000e+00 : f32
    %474 = vector.broadcast %cst_129 : f32 to vector<8x32xf32>
    %475 = arith.select %473, %471, %474 : vector<8x32xi1>, vector<8x32xf32>
    %476 = vector.extract_strided_slice %324 {offsets = [0, 0], sizes = [1, 32], strides = [1, 1]} : vector<4x32xf32> to vector<1x32xf32>
    %477 = vector.broadcast %476 : vector<1x32xf32> to vector<8x32xf32>
    %478 = arith.mulf %475, %477 : vector<8x32xf32>
    %479 = arith.addf %470, %478 : vector<8x32xf32>
    %cst_130 = arith.constant 0.000000e+00 : f32
    %480 = vector.broadcast %cst_130 : f32 to vector<8x32xf32>
    %481 = arith.subf %480, %479 : vector<8x32xf32>
    %482 = math.exp %481 : vector<8x32xf32>
    %cst_131 = arith.constant 1.000000e+00 : f32
    %483 = vector.broadcast %cst_131 : f32 to vector<8x32xf32>
    %484 = arith.addf %483, %482 : vector<8x32xf32>
    %cst_132 = arith.constant 1.000000e+00 : f32
    %485 = vector.broadcast %cst_132 : f32 to vector<8x32xf32>
    %486 = arith.divf %485, %484 : vector<8x32xf32>
    %487 = arith.mulf %479, %486 : vector<8x32xf32>
    %c32_133 = arith.constant 32 : index
    %c0_134 = arith.constant 0 : index
    %488 = vector.load %arg10[%c32_133, %c0_134] : memref<64x136xf32, #tpu.memory_space<vmem>>, vector<32x136xf32>
    %cst_135 = arith.constant dense<0.000000e+00> : vector<8x136xf32>
    %489 = tpu.matmul %487, %488, %cst_135 {dimension_numbers = #tpu.dot_dimension_numbers<[1], [0], [0], [1], [0, 0, 1, 1], [], []>} : vector<8x32xf32>, vector<32x136xf32>, vector<8x136xf32> -> vector<8x136xf32>
    %490 = vector.extract_strided_slice %489 {offsets = [0, 0], sizes = [8, 64], strides = [1, 1]} : vector<8x136xf32> to vector<8x64xf32>
    %491 = vector.extract_strided_slice %489 {offsets = [0, 64], sizes = [8, 64], strides = [1, 1]} : vector<8x136xf32> to vector<8x64xf32>
    %492 = vector.extract_strided_slice %489 {offsets = [0, 128], sizes = [8, 8], strides = [1, 1]} : vector<8x136xf32> to vector<8x8xf32>
    %c352 = arith.constant 352 : index
    %c0_136 = arith.constant 0 : index
    %493 = vector.load %arg9[%c352, %c0_136] : memref<488x32xf32, #tpu.memory_space<vmem>>, vector<8x32xf32>
    %cst_137 = arith.constant dense<0.000000e+00> : vector<8x32xf32>
    %494 = tpu.matmul %492, %493, %cst_137 {dimension_numbers = #tpu.dot_dimension_numbers<[1], [0], [0], [1], [0, 0, 1, 1], [], []>} : vector<8x8xf32>, vector<8x32xf32>, vector<8x32xf32> -> vector<8x32xf32>
    %495 = vector.extract_strided_slice %323 {offsets = [11, 0], sizes = [1, 32], strides = [1, 1]} : vector<24x32xf32> to vector<1x32xf32>
    %496 = vector.broadcast %495 : vector<1x32xf32> to vector<8x32xf32>
    %497 = arith.addf %494, %496 : vector<8x32xf32>
    %cst_138 = arith.constant 2.000000e+01 : f32
    %498 = vector.broadcast %cst_138 : f32 to vector<8x32xf32>
    %499 = arith.cmpf ogt, %497, %498 : vector<8x32xf32>
    %cst_139 = arith.constant 2.000000e+01 : f32
    %500 = vector.broadcast %cst_139 : f32 to vector<8x32xf32>
    %501 = arith.minimumf %497, %500 : vector<8x32xf32>
    %502 = math.exp %501 : vector<8x32xf32>
    %cst_140 = arith.constant 1.000000e+00 : f32
    %503 = vector.broadcast %cst_140 : f32 to vector<8x32xf32>
    %504 = arith.addf %503, %502 : vector<8x32xf32>
    %505 = math.log %504 : vector<8x32xf32>
    %506 = arith.select %499, %497, %505 : vector<8x32xi1>, vector<8x32xf32>
    %c360 = arith.constant 360 : index
    %c0_141 = arith.constant 0 : index
    %507 = vector.load %arg9[%c360, %c0_141] : memref<488x32xf32, #tpu.memory_space<vmem>>, vector<64x32xf32>
    %508 = arith.mulf %506, %487 : vector<8x32xf32>
    %509 = vector.shape_cast %506 : vector<8x32xf32> to vector<8x1x32xf32>
    %510 = vector.shape_cast %507 : vector<64x32xf32> to vector<1x64x32xf32>
    %511 = vector.broadcast %509 : vector<8x1x32xf32> to vector<8x64x32xf32>
    %512 = vector.broadcast %510 : vector<1x64x32xf32> to vector<8x64x32xf32>
    %513 = arith.mulf %511, %512 : vector<8x64x32xf32>
    %514 = math.exp %513 : vector<8x64x32xf32>
    %515 = vector.shape_cast %490 : vector<8x64xf32> to vector<8x64x1xf32>
    %516 = vector.shape_cast %508 : vector<8x32xf32> to vector<8x1x32xf32>
    %517 = vector.broadcast %515 : vector<8x64x1xf32> to vector<8x64x32xf32>
    %518 = vector.broadcast %516 : vector<8x1x32xf32> to vector<8x64x32xf32>
    %519 = arith.mulf %517, %518 : vector<8x64x32xf32>
    %cst_142 = arith.constant 0.000000e+00 : f32
    %520 = vector.broadcast %cst_142 : f32 to vector<64x32xf32>
    %521 = vector.extract_strided_slice %514 {offsets = [0, 0, 0], sizes = [1, 64, 32], strides = [1, 1, 1]} : vector<8x64x32xf32> to vector<1x64x32xf32>
    %522 = vector.shape_cast %521 : vector<1x64x32xf32> to vector<64x32xf32>
    %523 = arith.mulf %522, %520 : vector<64x32xf32>
    %524 = vector.extract_strided_slice %519 {offsets = [0, 0, 0], sizes = [1, 64, 32], strides = [1, 1, 1]} : vector<8x64x32xf32> to vector<1x64x32xf32>
    %525 = vector.shape_cast %524 : vector<1x64x32xf32> to vector<64x32xf32>
    %526 = arith.addf %523, %525 : vector<64x32xf32>
    %527 = vector.extract_strided_slice %514 {offsets = [1, 0, 0], sizes = [1, 64, 32], strides = [1, 1, 1]} : vector<8x64x32xf32> to vector<1x64x32xf32>
    %528 = vector.shape_cast %527 : vector<1x64x32xf32> to vector<64x32xf32>
    %529 = arith.mulf %528, %526 : vector<64x32xf32>
    %530 = vector.extract_strided_slice %519 {offsets = [1, 0, 0], sizes = [1, 64, 32], strides = [1, 1, 1]} : vector<8x64x32xf32> to vector<1x64x32xf32>
    %531 = vector.shape_cast %530 : vector<1x64x32xf32> to vector<64x32xf32>
    %532 = arith.addf %529, %531 : vector<64x32xf32>
    %533 = vector.extract_strided_slice %514 {offsets = [2, 0, 0], sizes = [1, 64, 32], strides = [1, 1, 1]} : vector<8x64x32xf32> to vector<1x64x32xf32>
    %534 = vector.shape_cast %533 : vector<1x64x32xf32> to vector<64x32xf32>
    %535 = arith.mulf %534, %532 : vector<64x32xf32>
    %536 = vector.extract_strided_slice %519 {offsets = [2, 0, 0], sizes = [1, 64, 32], strides = [1, 1, 1]} : vector<8x64x32xf32> to vector<1x64x32xf32>
    %537 = vector.shape_cast %536 : vector<1x64x32xf32> to vector<64x32xf32>
    %538 = arith.addf %535, %537 : vector<64x32xf32>
    %539 = vector.extract_strided_slice %514 {offsets = [3, 0, 0], sizes = [1, 64, 32], strides = [1, 1, 1]} : vector<8x64x32xf32> to vector<1x64x32xf32>
    %540 = vector.shape_cast %539 : vector<1x64x32xf32> to vector<64x32xf32>
    %541 = arith.mulf %540, %538 : vector<64x32xf32>
    %542 = vector.extract_strided_slice %519 {offsets = [3, 0, 0], sizes = [1, 64, 32], strides = [1, 1, 1]} : vector<8x64x32xf32> to vector<1x64x32xf32>
    %543 = vector.shape_cast %542 : vector<1x64x32xf32> to vector<64x32xf32>
    %544 = arith.addf %541, %543 : vector<64x32xf32>
    %545 = vector.extract_strided_slice %514 {offsets = [4, 0, 0], sizes = [1, 64, 32], strides = [1, 1, 1]} : vector<8x64x32xf32> to vector<1x64x32xf32>
    %546 = vector.shape_cast %545 : vector<1x64x32xf32> to vector<64x32xf32>
    %547 = arith.mulf %546, %544 : vector<64x32xf32>
    %548 = vector.extract_strided_slice %519 {offsets = [4, 0, 0], sizes = [1, 64, 32], strides = [1, 1, 1]} : vector<8x64x32xf32> to vector<1x64x32xf32>
    %549 = vector.shape_cast %548 : vector<1x64x32xf32> to vector<64x32xf32>
    %550 = arith.addf %547, %549 : vector<64x32xf32>
    %551 = vector.extract_strided_slice %514 {offsets = [5, 0, 0], sizes = [1, 64, 32], strides = [1, 1, 1]} : vector<8x64x32xf32> to vector<1x64x32xf32>
    %552 = vector.shape_cast %551 : vector<1x64x32xf32> to vector<64x32xf32>
    %553 = arith.mulf %552, %550 : vector<64x32xf32>
    %554 = vector.extract_strided_slice %519 {offsets = [5, 0, 0], sizes = [1, 64, 32], strides = [1, 1, 1]} : vector<8x64x32xf32> to vector<1x64x32xf32>
    %555 = vector.shape_cast %554 : vector<1x64x32xf32> to vector<64x32xf32>
    %556 = arith.addf %553, %555 : vector<64x32xf32>
    %557 = vector.extract_strided_slice %514 {offsets = [6, 0, 0], sizes = [1, 64, 32], strides = [1, 1, 1]} : vector<8x64x32xf32> to vector<1x64x32xf32>
    %558 = vector.shape_cast %557 : vector<1x64x32xf32> to vector<64x32xf32>
    %559 = arith.mulf %558, %556 : vector<64x32xf32>
    %560 = vector.extract_strided_slice %519 {offsets = [6, 0, 0], sizes = [1, 64, 32], strides = [1, 1, 1]} : vector<8x64x32xf32> to vector<1x64x32xf32>
    %561 = vector.shape_cast %560 : vector<1x64x32xf32> to vector<64x32xf32>
    %562 = arith.addf %559, %561 : vector<64x32xf32>
    %563 = vector.extract_strided_slice %514 {offsets = [7, 0, 0], sizes = [1, 64, 32], strides = [1, 1, 1]} : vector<8x64x32xf32> to vector<1x64x32xf32>
    %564 = vector.shape_cast %563 : vector<1x64x32xf32> to vector<64x32xf32>
    %565 = arith.mulf %564, %562 : vector<64x32xf32>
    %566 = vector.extract_strided_slice %519 {offsets = [7, 0, 0], sizes = [1, 64, 32], strides = [1, 1, 1]} : vector<8x64x32xf32> to vector<1x64x32xf32>
    %567 = vector.shape_cast %566 : vector<1x64x32xf32> to vector<64x32xf32>
    %568 = arith.addf %565, %567 : vector<64x32xf32>
    %569 = vector.shape_cast %526 : vector<64x32xf32> to vector<1x64x32xf32>
    %570 = vector.shape_cast %532 : vector<64x32xf32> to vector<1x64x32xf32>
    %571 = vector.shape_cast %538 : vector<64x32xf32> to vector<1x64x32xf32>
    %572 = vector.shape_cast %544 : vector<64x32xf32> to vector<1x64x32xf32>
    %573 = vector.shape_cast %550 : vector<64x32xf32> to vector<1x64x32xf32>
    %574 = vector.shape_cast %556 : vector<64x32xf32> to vector<1x64x32xf32>
    %575 = vector.shape_cast %562 : vector<64x32xf32> to vector<1x64x32xf32>
    %576 = vector.shape_cast %568 : vector<64x32xf32> to vector<1x64x32xf32>
    %577 = tpu.concatenate %569, %570, %571, %572, %573, %574, %575, %576 in 0 : vector<1x64x32xf32>, vector<1x64x32xf32>, vector<1x64x32xf32>, vector<1x64x32xf32>, vector<1x64x32xf32>, vector<1x64x32xf32>, vector<1x64x32xf32>, vector<1x64x32xf32> -> vector<8x64x32xf32>
    %578 = vector.shape_cast %491 : vector<8x64xf32> to vector<8x64x1xf32>
    %579 = vector.broadcast %578 : vector<8x64x1xf32> to vector<8x64x32xf32>
    %580 = arith.mulf %579, %577 : vector<8x64x32xf32>
    %cst_143 = arith.constant dense<0.000000e+00> : vector<8x32xf32>
    %581 = vector.multi_reduction <add>, %580, %cst_143 [1] : vector<8x64x32xf32> to vector<8x32xf32>
    %582 = vector.extract_strided_slice %323 {offsets = [12, 0], sizes = [1, 32], strides = [1, 1]} : vector<24x32xf32> to vector<1x32xf32>
    %583 = vector.broadcast %582 : vector<1x32xf32> to vector<8x32xf32>
    %584 = arith.mulf %487, %583 : vector<8x32xf32>
    %585 = arith.addf %581, %584 : vector<8x32xf32>
    %cst_144 = arith.constant 0.000000e+00 : f32
    %586 = vector.broadcast %cst_144 : f32 to vector<8x32xf32>
    %587 = arith.subf %586, %446 : vector<8x32xf32>
    %588 = math.exp %587 : vector<8x32xf32>
    %cst_145 = arith.constant 1.000000e+00 : f32
    %589 = vector.broadcast %cst_145 : f32 to vector<8x32xf32>
    %590 = arith.addf %589, %588 : vector<8x32xf32>
    %cst_146 = arith.constant 1.000000e+00 : f32
    %591 = vector.broadcast %cst_146 : f32 to vector<8x32xf32>
    %592 = arith.divf %591, %590 : vector<8x32xf32>
    %593 = arith.mulf %446, %592 : vector<8x32xf32>
    %594 = arith.mulf %585, %593 : vector<8x32xf32>
    %c320 = arith.constant 320 : index
    %c0_147 = arith.constant 0 : index
    %595 = vector.load %arg9[%c320, %c0_147] : memref<488x32xf32, #tpu.memory_space<vmem>>, vector<32x32xf32>
    %596 = arith.truncf %594 : vector<8x32xf32> to vector<8x32xbf16>
    %597 = arith.truncf %595 : vector<32x32xf32> to vector<32x32xbf16>
    %cst_148 = arith.constant dense<0.000000e+00> : vector<8x32xf32>
    %598 = tpu.matmul %596, %597, %cst_148 {dimension_numbers = #tpu.dot_dimension_numbers<[1], [0], [0], [1], [0, 0, 1, 1], [], []>} : vector<8x32xbf16>, vector<32x32xbf16>, vector<8x32xf32> -> vector<8x32xf32>
    %599 = vector.extract_strided_slice %323 {offsets = [13, 0], sizes = [1, 32], strides = [1, 1]} : vector<24x32xf32> to vector<1x32xf32>
    %600 = vector.extract_strided_slice %323 {offsets = [14, 0], sizes = [1, 32], strides = [1, 1]} : vector<24x32xf32> to vector<1x32xf32>
    %cst_149 = arith.constant dense<0.000000e+00> : vector<8xf32>
    %601 = vector.multi_reduction <add>, %598, %cst_149 [1] : vector<8x32xf32> to vector<8xf32>
    %602 = vector.shape_cast %601 : vector<8xf32> to vector<8x1xf32>
    %cst_150 = arith.constant 3.200000e+01 : f32
    %603 = vector.broadcast %cst_150 : f32 to vector<8x1xf32>
    %604 = arith.divf %602, %603 : vector<8x1xf32>
    %605 = vector.broadcast %604 : vector<8x1xf32> to vector<8x32xf32>
    %606 = arith.subf %598, %605 : vector<8x32xf32>
    %607 = arith.mulf %606, %606 : vector<8x32xf32>
    %cst_151 = arith.constant dense<0.000000e+00> : vector<8xf32>
    %608 = vector.multi_reduction <add>, %607, %cst_151 [1] : vector<8x32xf32> to vector<8xf32>
    %609 = vector.shape_cast %608 : vector<8xf32> to vector<8x1xf32>
    %cst_152 = arith.constant 3.200000e+01 : f32
    %610 = vector.broadcast %cst_152 : f32 to vector<8x1xf32>
    %611 = arith.divf %609, %610 : vector<8x1xf32>
    %612 = vector.broadcast %604 : vector<8x1xf32> to vector<8x32xf32>
    %613 = arith.subf %598, %612 : vector<8x32xf32>
    %cst_153 = arith.constant 9.99999974E-6 : f32
    %614 = vector.broadcast %cst_153 : f32 to vector<8x1xf32>
    %615 = arith.addf %611, %614 : vector<8x1xf32>
    %616 = math.rsqrt %615 : vector<8x1xf32>
    %617 = vector.broadcast %616 : vector<8x1xf32> to vector<8x32xf32>
    %618 = arith.mulf %613, %617 : vector<8x32xf32>
    %619 = vector.broadcast %599 : vector<1x32xf32> to vector<8x32xf32>
    %620 = arith.mulf %618, %619 : vector<8x32xf32>
    %621 = vector.broadcast %600 : vector<1x32xf32> to vector<8x32xf32>
    %622 = arith.addf %620, %621 : vector<8x32xf32>
    %cst_154 = arith.constant -1.000000e+01 : f32
    %cst_155 = arith.constant 1.000000e+01 : f32
    %623 = vector.broadcast %cst_154 : f32 to vector<8x32xf32>
    %624 = arith.maximumf %623, %622 : vector<8x32xf32>
    %625 = vector.broadcast %cst_155 : f32 to vector<8x32xf32>
    %626 = arith.minimumf %625, %624 : vector<8x32xf32>
    %c0_156 = arith.constant 0 : index
    %c0_157 = arith.constant 0 : index
    %627 = vector.load %arg11[%c0_156, %c0_157] : memref<8x32xf32, #tpu.memory_space<vmem>>, vector<8x32xf32>
    tpu.vector_store %arg11[%c0_156, %c0_157], %626 {strides = array<i32>} : memref<8x32xf32, #tpu.memory_space<vmem>>, vector<8x32xf32>,
    %c64_158 = arith.constant 64 : index
    %c0_159 = arith.constant 0 : index
    %628 = vector.load %arg8[%c64_158, %c0_159] : memref<96x64xf32, #tpu.memory_space<vmem>>, vector<32x64xf32>
    %629 = arith.truncf %626 : vector<8x32xf32> to vector<8x32xbf16>
    %630 = arith.truncf %628 : vector<32x64xf32> to vector<32x64xbf16>
    %cst_160 = arith.constant dense<0.000000e+00> : vector<8x64xf32>
    %631 = tpu.matmul %629, %630, %cst_160 {dimension_numbers = #tpu.dot_dimension_numbers<[1], [0], [0], [1], [0, 0, 1, 1], [], []>} : vector<8x32xbf16>, vector<32x64xbf16>, vector<8x64xf32> -> vector<8x64xf32>
    %c480 = arith.constant 480 : index
    %c0_161 = arith.constant 0 : index
    %632 = vector.load %arg9[%c480, %c0_161] : memref<488x32xf32, #tpu.memory_space<vmem>>, vector<8x32xf32>
    %633 = vector.extract_strided_slice %631 {offsets = [0, 0], sizes = [8, 32], strides = [1, 1]} : vector<8x64xf32> to vector<8x32xf32>
    %cst_162 = arith.constant dense<0.000000e+00> : vector<56x32xf32>
    %634 = tpu.matmul %1, %633, %cst_162 {dimension_numbers = #tpu.dot_dimension_numbers<[1], [0], [0], [1], [0, 0, 1, 1], [], []>} : vector<56x8xf32>, vector<8x32xf32>, vector<56x32xf32> -> vector<56x32xf32>
    %635 = vector.extract_strided_slice %631 {offsets = [0, 32], sizes = [8, 32], strides = [1, 1]} : vector<8x64xf32> to vector<8x32xf32>
    %cst_163 = arith.constant dense<0.000000e+00> : vector<56x32xf32>
    %636 = tpu.matmul %0, %635, %cst_163 {dimension_numbers = #tpu.dot_dimension_numbers<[1], [0], [0], [1], [0, 0, 1, 1], [], []>} : vector<56x8xf32>, vector<8x32xf32>, vector<56x32xf32> -> vector<56x32xf32>
    %637 = arith.addf %634, %636 : vector<56x32xf32>
    %638 = vector.extract_strided_slice %632 {offsets = [0, 0], sizes = [1, 32], strides = [1, 1]} : vector<8x32xf32> to vector<1x32xf32>
    %639 = vector.broadcast %9 : vector<56x1xf32> to vector<56x32xf32>
    %640 = vector.broadcast %638 : vector<1x32xf32> to vector<56x32xf32>
    %641 = arith.mulf %639, %640 : vector<56x32xf32>
    %642 = arith.addf %637, %641 : vector<56x32xf32>
    %643 = vector.extract_strided_slice %632 {offsets = [1, 0], sizes = [1, 32], strides = [1, 1]} : vector<8x32xf32> to vector<1x32xf32>
    %644 = vector.broadcast %3 : vector<56x1xf32> to vector<56x32xf32>
    %645 = vector.broadcast %643 : vector<1x32xf32> to vector<56x32xf32>
    %646 = arith.mulf %644, %645 : vector<56x32xf32>
    %647 = arith.addf %642, %646 : vector<56x32xf32>
    %648 = vector.extract_strided_slice %632 {offsets = [2, 0], sizes = [1, 32], strides = [1, 1]} : vector<8x32xf32> to vector<1x32xf32>
    %649 = vector.broadcast %648 : vector<1x32xf32> to vector<56x32xf32>
    %650 = arith.addf %647, %649 : vector<56x32xf32>
    %cst_164 = arith.constant 0.000000e+00 : f32
    %651 = vector.broadcast %cst_164 : f32 to vector<56x32xf32>
    %652 = arith.subf %651, %650 : vector<56x32xf32>
    %653 = math.exp %652 : vector<56x32xf32>
    %cst_165 = arith.constant 1.000000e+00 : f32
    %654 = vector.broadcast %cst_165 : f32 to vector<56x32xf32>
    %655 = arith.addf %654, %653 : vector<56x32xf32>
    %cst_166 = arith.constant 1.000000e+00 : f32
    %656 = vector.broadcast %cst_166 : f32 to vector<56x32xf32>
    %657 = arith.divf %656, %655 : vector<56x32xf32>
    %658 = arith.mulf %650, %657 : vector<56x32xf32>
    %c448 = arith.constant 448 : index
    %c0_167 = arith.constant 0 : index
    %659 = vector.load %arg9[%c448, %c0_167] : memref<488x32xf32, #tpu.memory_space<vmem>>, vector<32x32xf32>
    %660 = arith.truncf %658 : vector<56x32xf32> to vector<56x32xbf16>
    %661 = arith.truncf %659 : vector<32x32xf32> to vector<32x32xbf16>
    %cst_168 = arith.constant dense<0.000000e+00> : vector<56x32xf32>
    %662 = tpu.matmul %660, %661, %cst_168 {dimension_numbers = #tpu.dot_dimension_numbers<[1], [0], [0], [1], [0, 0, 1, 1], [], []>} : vector<56x32xbf16>, vector<32x32xbf16>, vector<56x32xf32> -> vector<56x32xf32>
    %663 = vector.extract_strided_slice %632 {offsets = [3, 0], sizes = [1, 32], strides = [1, 1]} : vector<8x32xf32> to vector<1x32xf32>
    %664 = vector.broadcast %663 : vector<1x32xf32> to vector<56x32xf32>
    %665 = arith.addf %662, %664 : vector<56x32xf32>
    %cst_169 = arith.constant 0.000000e+00 : f32
    %666 = vector.broadcast %cst_169 : f32 to vector<56x32xf32>
    %667 = arith.subf %666, %665 : vector<56x32xf32>
    %668 = math.exp %667 : vector<56x32xf32>
    %cst_170 = arith.constant 1.000000e+00 : f32
    %669 = vector.broadcast %cst_170 : f32 to vector<56x32xf32>
    %670 = arith.addf %669, %668 : vector<56x32xf32>
    %cst_171 = arith.constant 1.000000e+00 : f32
    %671 = vector.broadcast %cst_171 : f32 to vector<56x32xf32>
    %672 = arith.divf %671, %670 : vector<56x32xf32>
    %673 = arith.mulf %665, %672 : vector<56x32xf32>
    %674 = vector.extract_strided_slice %632 {offsets = [4, 0], sizes = [1, 32], strides = [1, 1]} : vector<8x32xf32> to vector<1x32xf32>
    %675 = vector.broadcast %674 : vector<1x32xf32> to vector<56x32xf32>
    %676 = arith.mulf %673, %675 : vector<56x32xf32>
    %cst_172 = arith.constant dense<0.000000e+00> : vector<56xf32>
    %677 = vector.multi_reduction <add>, %676, %cst_172 [1] : vector<56x32xf32> to vector<56xf32>
    %678 = vector.shape_cast %677 : vector<56xf32> to vector<56x1xf32>
    %679 = vector.broadcast %678 : vector<56x1xf32> to vector<56x3xf32>
    %680 = arith.mulf %16, %679 : vector<56x3xf32>
    %cst_173 = arith.constant dense<0.000000e+00> : vector<8x3xf32>
    %681 = tpu.matmul %2, %680, %cst_173 {dimension_numbers = #tpu.dot_dimension_numbers<[1], [0], [0], [1], [0, 0, 1, 1], [], []>} : vector<8x56xf32>, vector<56x3xf32>, vector<8x3xf32> -> vector<8x3xf32>
    %cst_174 = arith.constant 1.000000e+02 : f32
    %682 = vector.broadcast %cst_174 : f32 to vector<8x3xf32>
    %683 = arith.divf %681, %682 : vector<8x3xf32>
    %684 = arith.addf %4, %683 : vector<8x3xf32>
    %c0_175 = arith.constant 0 : index
    %c0_176 = arith.constant 0 : index
    %685 = vector.load %arg12[%c0_175, %c0_176] : memref<8x3xf32, #tpu.memory_space<vmem>>, vector<8x3xf32>
    tpu.vector_store %arg12[%c0_175, %c0_176], %684 {strides = array<i32>} : memref<8x3xf32, #tpu.memory_space<vmem>>, vector<8x3xf32>,
    return
  }
}

</mosaic_0001>

<bundles_post_ra>
// kernel: tpu_custom_call.1
= control target key start
LH: loop header
LB: loop body
LE: loop exit
PB: predicated region body
PF: predicated region fallthrough
CT: control target
= control target key end

     0   :  { %v11194_v2 = vmov 0.0   ;;  %vm72_vm0 = vcmask 64512   ;;  %vm7442_vm1 = vmmov 0   ;;  %s11181_s0 = inlined_call_operand.vmem [shape: f32[8,32], index: 0, kind: input, shape index: {}]   ;;  %s11182_s1 = inlined_call_operand.vmem [shape: f32[8,3], index: 1, kind: input, shape index: {}]   ;;  %s11183_s2 = inlined_call_operand.vmem [shape: f32[56,1], index: 2, kind: input, shape index: {}]   ;;  %s11184_s3 = inlined_call_operand.vmem [shape: f32[56,8], index: 3, kind: input, shape index: {}]   ;;  %s11185_s4 = inlined_call_operand.vmem [shape: f32[56,8], index: 4, kind: input, shape index: {}]   ;;  %s11186_s5 = inlined_call_operand.vmem [shape: f32[56,8], index: 5, kind: input, shape index: {}]   ;;  %s11187_s6 = inlined_call_operand.vmem [shape: f32[8,56], index: 6, kind: input, shape index: {}]   ;;  %s11188_s7 = inlined_call_operand.vmem [shape: f32[64,96], index: 7, kind: input, shape index: {}]   ;;  %s11189_s8 = inlined_call_operand.vmem [shape: f32[96,64], index: 8, kind: input, shape index: {}]   ;;  %s11190_s9 = inlined_call_operand.vmem [shape: f32[488,32], index: 9, kind: input, shape index: {}]   ;;  %s11191_s10 = inlined_call_operand.vmem [shape: f32[64,136], index: 10, kind: input, shape index: {}]   ;;  %s11192_s11 = inlined_call_operand.hbm [shape: f32[8,32], index: 11, kind: output, shape index: {0}]   ;;  %s11193_s12 = inlined_call_operand.vmem [shape: f32[8,3], index: 12, kind: output, shape index: {1}]  }
   0x1   :  { %v64_v0 = vld [vmem:[%s11182_s1] sm:$0xff]  ;;  %6480 = vmatprep.subr.mxu0 %v11194_v2  ;;  %6826 = vmatprep.subr.mxu1 %v11194_v2  ;;  %v70_v3 = vld [vmem:[%s11184_s3 + $0x28] sm:$0xff]  ;;  %v308_v4 = vld [vmem:[%s11188_s7 + $0x10] sm:$0xff] }
   0x2   :  { %v65_v1 = vld [vmem:[%s11184_s3] sm:$0xff]  ;;  %v309_v5 = vld [vmem:[%s11188_s7 + $0x18] sm:$0xff]  ;;  %6481 = vmatpush3.msra.mxu0 %v64_v0  ;;  %6827 = vmatpush3.msra.mxu1 %v64_v0  ;;  %v307_v8 = vld [vmem:[%s11188_s7 + $0x8] sm:$0xff] }
   0x3   :  { %v312_v6 = vpack.c.bf16 %v309_v5, %v308_v4  ;;  %6482 = vmatprep.mubr.msk.f32.mxu0 %vm7442_vm1, %v11194_v2  ;;  %6497 = vmatprep.mubr.msk.f32.mxu1 %vm7442_vm1, %v11194_v2  ;;  %v306_v7 = vld [vmem:[%s11188_s7] sm:$0xff] }
   0x4   :  { %6483 = vmatmul.mubr.msk.f32.vlgmr.msra.gmra.mxu0 %vm72_vm0, %v65_v1  ;;  %6498 = vmatmul.mubr.msk.f32.vlgmr.msra.gmra.mxu1 %vm72_vm0, %v70_v3 }
   0x5   :  { %18 = vsyncpa [#allocation3], 0  ;;  %6503 = vmatprep.subr.bf16.mxu1 %v11194_v2  ;;  %6485 = vmatprep.mubr.msk.f32.mxu0 %vm7442_vm1, %v11194_v2  ;;  %v66_v9 = vld [vmem:[%s11184_s3 + $0x8] sm:$0xff]  ;;  %v71_v10 = vld [vmem:[%s11184_s3 + $0x30] sm:$0xff]  ;;  %v311_v11 = vpack.c.bf16 %v307_v8, %v306_v7  ;;  %vm313_vm2 = vcmask 261120   ;;  %v7443_v17 = vmov 0  }
   0x6   :  { %6504 = vmatpush3.bf16.msra.mxu1 %v312_v6  ;;  %6500 = vmatprep.mubr.msk.f32.mxu1 %vm7442_vm1, %v11194_v2  ;;  %v300_v12 = vld [vmem:[%s11181_s0] sm:$0xff]  ;;  %v67_v14 = vld [vmem:[%s11184_s3 + $0x10] sm:$0xff]  ;;  %v68_v15 = vld [vmem:[%s11184_s3 + $0x18] sm:$0xff]  ;;  %vm201_vm3 = vcmask 23552   ;;  %s7444_s29 = smov 96   ;;  %s7445_s28 = smov 64  }
   0x7   :  { %6505 = vmatprep.subr.bf16.mxu1 %v11194_v2  ;;  %6534 = vmatprep.subr.mxu0 %v11194_v2  ;;  %v310_v13 = vpack.c.bf16 %v300_v12, %v300_v12  ;;  %v69_v16 = vld [vmem:[%s11184_s3 + $0x20] sm:$0xff]  ;;  %v43_v37 = vld [vmem:[%s11185_s4 + $0x8] sm:$0xff]  ;;  %v44_v43 = vld [vmem:[%s11185_s4 + $0x10] sm:$0xff]  ;;  %vm1000_vm4 = vcmask 457728   ;;  %vm2929_vm9 = vcmask 1041409   ;;  %vm2932_vm10 = vcmask 1042434  }
   0x8   :  { %6486 = vmatmul.mubr.msk.f32.gmra.mxu0 %vm72_vm0, %v66_v9  ;;  %6501 = vmatmul.mubr.msk.f32.gmra.mxu1 %vm72_vm0, %v71_v10  ;;  %v42_v30 = vld [vmem:[%s11185_s4] sm:$0xff]  ;;  %v45_v45 = vld [vmem:[%s11185_s4 + $0x18] sm:$0xff]  ;;  %v47_v47 = vld [vmem:[%s11185_s4 + $0x28] sm:$0xff]  ;;  %vm2935_vm11 = vcmask 1043459   ;;  %vm2938_vm12 = vcmask 1044484   ;;  %vm2941_vm13 = vcmask 1045509  }
   0x9   :  { %6507 = vmatprep.mubr.msk.bf16.mxu1 %vm7442_vm1, %v11194_v2  ;;  %6488 = vmatprep.mubr.msk.f32.mxu0 %vm7442_vm1, %v11194_v2  ;;  %v46_v46 = vld [vmem:[%s11185_s4 + $0x20] sm:$0xff]  ;;  %v48_v49 = vld [vmem:[%s11185_s4 + $0x30] sm:$0xff]  ;;  %v60_v53 = vld [vmem:[%s11183_s2 + $0x18] sm:$0xff]  ;;  %vm2944_vm14 = vcmask 1046534   ;;  %vm2947_vm15 = vcmask 1047559   ;;  %s7447_s14 = smov [#allocation2]  }
   0xa   :  { %6506 = vmatpush3.bf16.msra.mxu1 %v311_v11  ;;  %6835 = vset.pattern.permute.xlu1 %v7443_v17  ;;  %v57_v48 = vld [vmem:[%s11183_s2] sm:$0xff]  ;;  %v59_v51 = vld [vmem:[%s11183_s2 + $0x10] sm:$0xff]  ;;  %v62_v55 = vld [vmem:[%s11183_s2 + $0x28] sm:$0xff]  ;;  %s6250_s15 = sshll.u32 %s7447_s14, 4  ;;  %s6251_s15 = int_to_ptr.vmem [resolvable:$true] %s6250_s15 }
   0xb   :  { %6511 = vmatprep.subr.mxu1 %v11194_v2  ;;  %6836 = vset.pattern.permute.xlu0 %v7443_v17  ;;  %v61_v54 = vld [vmem:[%s11183_s2 + $0x20] sm:$0xff]  ;;  %v58_v56 = vld [vmem:[%s11183_s2 + $0x8] sm:$0xff]  ;;  %v63_v63 = vld [vmem:[%s11183_s2 + $0x30] sm:$0xff]  ;;  %s7419_s16 = scalar_lea.vmem %s6251_s15, 128  ;;  %p7424_p1 = scmp.lt.s32.totalorder %s6251_s15, %s6251_s15 }
   0xc   :  { %6489 = vmatmul.mubr.msk.f32.gmra.mxu0 %vm72_vm0, %v67_v14  ;;  %v49_v0 = vld [vmem:[%s11186_s5] sm:$0xff]  ;;  %v50_v3 = vld [vmem:[%s11186_s5 + $0x8] sm:$0xff]  ;;  %v51_v4 = vld [vmem:[%s11186_s5 + $0x10] sm:$0xff]  ;;  %p7420_p0 = scmp.ne.s32.totalorder %s6251_s15, %s7419_s16  ;;  %p7425_p2 = scmp.lt.s32.totalorder %s7419_s16, %s7419_s16 }
   0xd   :  { %6508 = vmatmul.mubr.msk.bf16.vlgmr.msra.gmra.mxu1 %vm313_vm2, %v310_v13  ;;  %6491 = vmatprep.mubr.msk.f32.mxu0 %vm7442_vm1, %v11194_v2  ;;  %v52_v5 = vld [vmem:[%s11186_s5 + $0x18] sm:$0xff]  ;;  %v53_v6 = vld [vmem:[%s11186_s5 + $0x20] sm:$0xff]  ;;  %v54_v7 = vld [vmem:[%s11186_s5 + $0x28] sm:$0xff] }
   0xe   :  { %6513 = vmatprep.mubr.msk.f32.mxu1 %vm7442_vm1, %v11194_v2  ;;  %v55_v8 = vld [vmem:[%s11186_s5 + $0x30] sm:$0xff]  ;;  %p7426_p3 = por %p7425_p2, %p7424_p1 }
  0x10   :  { %6492 = vmatmul.mubr.msk.f32.gmra.mxu0 %vm72_vm0, %v68_v15  ;;  %p7427_p4 = pnand %p7426_p3, %p7420_p0 }
  0x11   :  { %6494 = vmatprep.mubr.msk.f32.mxu0 %vm7442_vm1, %v11194_v2 }
  0x14   :  { %6495 = vmatmul.mubr.msk.f32.gmra.mxu0 %vm72_vm0, %v69_v16 }
  0x15   :  { %6536 = vmatprep.mubr.msk.f32.mxu0 %vm7442_vm1, %v11194_v2 }
  0xc4   :  { %v7586_v18 = vpop.f32.mrf.mxu0  ;;  %v7588_v19 = vpop.f32.mrf.mxu1 }
  0xc5   :  { %11302 = vst [vmem:[#allocation5_spill] sm:$0xff] %v7586_v18  ;;  %11303 = vst [vmem:[#allocation6_spill] sm:$0xff] %v7588_v19  ;;  %v199_v27 = vmul.f32 %v7588_v19, %v7588_v19  ;;  %v194_v50 = vmul.f32 %v7586_v18, %v7586_v18 }
  0xc6   :  { %v6484_v20 = vpop.f32.mrf.mxu0  ;;  %v6499_v21 = vpop.f32.mrf.mxu1 }
  0xc7   :  { %v217_v35 = vsel %vm201_vm3, %v199_v27, 0.0  ;;  %v202_v52 = vsel %vm201_vm3, %v194_v50, 0.0  ;;  %v736_v27 = vld [vmem:[%s11190_s9 + $0x10] sm:$0xff] }
  0xc8   :  { %v7590_v22 = vpop.f32.mrf.mxu0  ;;  %v7592_v23 = vpop.f32.mrf.mxu1 }
  0xc9   :  { %11304 = vst [vmem:[#allocation7_spill] sm:$0xff] %v7590_v22  ;;  %11305 = vst [vmem:[#allocation8_spill] sm:$0xff] %v7592_v23  ;;  %v195_v24 = vmul.f32 %v7590_v22, %v7590_v22  ;;  %v200_v33 = vmul.f32 %v7592_v23, %v7592_v23 }
  0xca   :  { %v6502_v25 = vpop.f32.mrf.mxu1  ;;  %v6487_v26 = vpop.f32.mrf.mxu0 }
  0xcb   :  { %v205_v28 = vsel %vm201_vm3, %v195_v24, 0.0  ;;  %v220_v41 = vsel %vm201_vm3, %v200_v33, 0.0  ;;  %v735_v33 = vld [vmem:[%s11190_s9 + $0x8] sm:$0xff] }
  0xcc   :  { %206 = vadd.xlane.f32.xlu1 %v205_v28  ;;  %v7599_v29 = vpop.f32.mrf.mxu0  ;;  %v737_v28 = vld [vmem:[%s11190_s9 + $0x18] sm:$0xff] }
  0xcd   :  { %11306 = vst [vmem:[#allocation9_spill] sm:$0xff] %v7599_v29  ;;  %v7604_v31 = vpop.f32.mrf.mxu1  ;;  %v196_v57 = vmul.f32 %v7599_v29, %v7599_v29 }
  0xce   :  { %358 = vrot.lane.b32.xlu0 %v7604_v31, %s7444_s29  ;;  %6535 = vmatpush3.msra.mxu0 %v7604_v31  ;;  %v6490_v32 = vpop.f32.mrf.mxu0 }
  0xcf   :  { %v6509_v34 = vpop.f32.mrf.mxu1  ;;  %6537 = vmatmul.mubr.msk.f32.vlgmr.msra.gmra.mxu0 %vm72_vm0, %v42_v30  ;;  %6569 = vmatprep.subr.mxu0 %v11194_v2  ;;  %v208_v59 = vsel %vm201_vm3, %v196_v57, 0.0  ;;  %v743_v30 = vpack.c.bf16 %v737_v28, %v736_v27  ;;  %v734_v32 = vld [vmem:[%s11190_s9] sm:$0xff] }
  0xd0   :  { %218 = vadd.xlane.f32.xlu1 %v217_v35  ;;  %v7614_v36 = vpop.f32.mrf.mxu0  ;;  %6539 = vmatprep.mubr.msk.f32.mxu0 %vm7442_vm1, %v11194_v2  ;;  %v742_v34 = vpack.c.bf16 %v735_v33, %v734_v32 }
  0xd1   :  { %11307 = vst [vmem:[#allocation10_spill] sm:$0xff] %v7614_v36  ;;  %v354_v38 = vpop.f32.mrf.mxu1  ;;  %v197_v58 = vmul.f32 %v7614_v36, %v7614_v36 }
  0xd2   :  { %v6493_v39 = vpop.f32.mrf.mxu0 }
  0xd3   :  { %v6510_v40 = vpop.f32.mrf.mxu1  ;;  %6540 = vmatmul.mubr.msk.f32.gmra.mxu0 %vm72_vm0, %v43_v37  ;;  %v211_v61 = vsel %vm201_vm3, %v197_v58, 0.0 }
  0xd4   :  { %221 = vadd.xlane.f32.xlu1 %v220_v41  ;;  %v7623_v42 = vpop.f32.mrf.mxu0  ;;  %6542 = vmatprep.mubr.msk.f32.mxu0 %vm7442_vm1, %v11194_v2 }
  0xd5   :  { %11308 = vst [vmem:[#allocation11_spill] sm:$0xff] %v7623_v42  ;;  %v198_v60 = vmul.f32 %v7623_v42, %v7623_v42 }
  0xd6   :  { %v6496_v44 = vpop.f32.mrf.mxu0 }
  0xd7   :  { %6543 = vmatmul.mubr.msk.f32.gmra.mxu0 %vm72_vm0, %v44_v43  ;;  %v214_v62 = vsel %vm201_vm3, %v198_v60, 0.0  ;;  %v301_v43 = vlaneseq }
  0xd8   :  { %6545 = vmatprep.mubr.msk.f32.mxu0 %vm7442_vm1, %v11194_v2 }
  0xdb   :  { %6546 = vmatmul.mubr.msk.f32.gmra.mxu0 %vm72_vm0, %v45_v45  ;;  %v7765_v45 = vshrl.u32 %v301_v43, 7 }
  0xdc   :  { %6548 = vmatprep.mubr.msk.f32.mxu0 %vm7442_vm1, %v11194_v2 }
  0xdd   :  { %11316 = vst [vmem:[#allocation19_spill] sm:$0xff] %v7765_v45  ;;  %vm1280_vm5 = vcmp.ge.s32.totalorder %v7765_v45, 1  ;;  %vm1289_vm6 = vcmp.ge.s32.totalorder %v7765_v45, 2  ;;  %vm1298_vm7 = vcmp.ge.s32.totalorder %v7765_v45, 3 }
  0xdf   :  { %6549 = vmatmul.mubr.msk.f32.gmra.mxu0 %vm72_vm0, %v46_v46  ;;  %v7768_v46 = vsub.s32 1, %v7765_v45 }
  0xe0   :  { %6551 = vmatprep.mubr.msk.f32.mxu0 %vm7442_vm1, %v11194_v2 }
  0xe1   :  { %11317 = vst [vmem:[#allocation20_spill] sm:$0xff] %v7768_v46 }
  0xe3   :  { %6552 = vmatmul.mubr.msk.f32.gmra.mxu0 %vm72_vm0, %v47_v47  ;;  %v7771_v47 = vsub.s32 2, %v7765_v45 }
  0xe4   :  { %6554 = vmatprep.mubr.msk.f32.mxu0 %vm7442_vm1, %v11194_v2 }
  0xe5   :  { %623 = vperm.xlu1 %6835, %v57_v48   ;;  %11318 = vst [vmem:[#allocation21_spill] sm:$0xff] %v7771_v47  ;;  %v7776_v48 = vld [vmem:[%s11190_s9 + $0xd8] sm:$0xff] }
  0xe7   :  { %6555 = vmatmul.mubr.msk.f32.gmra.mxu0 %vm72_vm0, %v48_v49 }
  0xe8   :  { %6583 = vmatprep.mubr.msk.f32.mxu0 %vm7442_vm1, %v11194_v2 }
  0xe9   :  { %633 = vperm.xlu1 %6835, %v59_v51   ;;  %v7784_v51 = vrot.slane %v7776_v48, %v7771_v47 }
  0xed   :  { %203 = vadd.xlane.f32.xlu0 %v202_v52  ;;  %638 = vperm.xlu1 %6835, %v60_v53   ;;  %v7788_v52 = vrot.slane %v7776_v48, %v7768_v46  ;;  %v7791_v53 = vsub.s32 4, %v7765_v45 }
  0xef   :  { %11321 = vst [vmem:[#allocation24_spill] sm:$0xff] %v7791_v53 }
  0xf1   :  { %643 = vperm.xlu1 %6835, %v61_v54   ;;  %v7796_v54 = vld [vmem:[%s11190_s9 + $0xc8] sm:$0xff] }
  0xf5   :  { %648 = vperm.xlu1 %6835, %v62_v55  }
 0x103   :  { %628 = vperm.xlu0 %6836, %v58_v56  }
 0x119   :  { %209 = vadd.xlane.f32.xlu1 %v208_v59 }
 0x11d   :  { %212 = vadd.xlane.f32.xlu1 %v211_v61 }
 0x121   :  { %215 = vadd.xlane.f32.xlu1 %v214_v62 }
 0x132   :  { %653 = vperm.xlu1 %6835, %v63_v63   ;;  %v7808_v63 = vrot.slane %v7796_v54, %v7791_v53 }
 0x140   :  { %v359_v1 = vpop.permute.xlu0 %358 }
 0x141   :  { %6512 = vmatpush3.msra.mxu1 %v359_v1 }
 0x142   :  { %6514 = vmatmul.mubr.msk.f32.vlgmr.msra.gmra.mxu1 %vm72_vm0, %v49_v0  ;;  %6557 = vmatprep.subr.bf16.mxu1 %v743_v30 }
 0x143   :  { %6516 = vmatprep.mubr.msk.f32.mxu1 %vm7442_vm1, %v11194_v2  ;;  %6558 = vmatpush3.bf16.msra.mxu1 %v743_v30 }
 0x144   :  { %6559 = vmatprep.subr.bf16.mxu1 %v742_v34 }
 0x146   :  { %6517 = vmatmul.mubr.msk.f32.gmra.mxu1 %vm72_vm0, %v50_v3 }
 0x147   :  { %6519 = vmatprep.mubr.msk.f32.mxu1 %vm7442_vm1, %v11194_v2  ;;  %6560 = vmatpush3.bf16.msra.mxu1 %v742_v34 }
 0x148   :  { %6586 = vmatprep.subr.bf16.mxu1 %v11194_v2 }
 0x14a   :  { %6520 = vmatmul.mubr.msk.f32.gmra.mxu1 %vm72_vm0, %v51_v4 }
 0x14b   :  { %6522 = vmatprep.mubr.msk.f32.mxu1 %vm7442_vm1, %v11194_v2 }
 0x14e   :  { %6523 = vmatmul.mubr.msk.f32.gmra.mxu1 %vm72_vm0, %v52_v5 }
 0x14f   :  { %6525 = vmatprep.mubr.msk.f32.mxu1 %vm7442_vm1, %v11194_v2 }
 0x152   :  { %6526 = vmatmul.mubr.msk.f32.gmra.mxu1 %vm72_vm0, %v53_v6 }
 0x153   :  { %6528 = vmatprep.mubr.msk.f32.mxu1 %vm7442_vm1, %v11194_v2 }
 0x155   :  { %v7751_v35 = vpop.xlane.xlu1 %206 }
 0x156   :  { %6529 = vmatmul.mubr.msk.f32.gmra.mxu1 %vm72_vm0, %v54_v7  ;;  %11309 = vst [vmem:[#allocation12_spill] sm:$0xff] %v7751_v35  ;;  %v608_v4 = vmul.f32 %v7788_v52, %v7751_v35 }
 0x157   :  { %6531 = vmatprep.mubr.msk.f32.mxu1 %vm7442_vm1, %v11194_v2 }
 0x159   :  { %v7753_v37 = vpop.xlane.xlu1 %218 }
 0x15a   :  { %6532 = vmatmul.mubr.msk.f32.gmra.mxu1 %vm72_vm0, %v55_v8  ;;  %11310 = vst [vmem:[#allocation13_spill] sm:$0xff] %v7753_v37 }
 0x15d   :  { %v7755_v38 = vpop.xlane.xlu1 %221 }
 0x15e   :  { %11311 = vst [vmem:[#allocation14_spill] sm:$0xff] %v7755_v38 }
 0x161   :  { %v7757_v39 = vpop.permute.xlu1 %623 }
 0x162   :  { %11312 = vst [vmem:[#allocation15_spill] sm:$0xff] %v7757_v39  ;;  %v660_v61 = vmul.f32 %v7784_v51, %v7757_v39 }
 0x165   :  { %v7759_v40 = vpop.permute.xlu1 %633 }
 0x166   :  { %11313 = vst [vmem:[#allocation16_spill] sm:$0xff] %v7759_v40 }
 0x169   :  { %v7761_v41 = vpop.permute.xlu1 %638 }
 0x16a   :  { %11314 = vst [vmem:[#allocation17_spill] sm:$0xff] %v7761_v41 }
 0x16d   :  { %v7763_v44 = vpop.permute.xlu1 %643 }
 0x16e   :  { %11315 = vst [vmem:[#allocation18_spill] sm:$0xff] %v7763_v44 }
 0x171   :  { %v7778_v49 = vpop.permute.xlu1 %648 }
 0x172   :  { %11319 = vst [vmem:[#allocation22_spill] sm:$0xff] %v7778_v49 }
 0x176   :  { %v7780_v50 = vpop.xlane.xlu0 %203 }
 0x177   :  { %11320 = vst [vmem:[#allocation23_spill] sm:$0xff] %v7780_v50  ;;  %v607_v57 = vmul.f32 %v7788_v52, %v7780_v50 }
 0x17e   :  { %v7800_v58 = vpop.permute.xlu0 %628 }
 0x17f   :  { %11322 = vst [vmem:[#allocation25_spill] sm:$0xff] %v7800_v58  ;;  %v661_v5 = vmul.f32 %v7784_v51, %v7800_v58 }
 0x18f   :  { %v569_v9 = vpop.f32.mrf.mxu0 }
 0x191   :  { %v6538_v10 = vpop.f32.mrf.mxu0 }
 0x193   :  { %v574_v11 = vpop.f32.mrf.mxu0 }
 0x195   :  { %v6541_v12 = vpop.f32.mrf.mxu0 }
 0x197   :  { %v579_v13 = vpop.f32.mrf.mxu0 }
 0x199   :  { %v6544_v14 = vpop.f32.mrf.mxu0 }
 0x19b   :  { %v7730_v15 = vpop.f32.mrf.mxu0 }
 0x19d   :  { %v6547_v16 = vpop.f32.mrf.mxu0 }
 0x19f   :  { %v7732_v17 = vpop.f32.mrf.mxu0 }
 0x1a1   :  { %v6550_v20 = vpop.f32.mrf.mxu0 }
 0x1a2   :  { %v7802_v59 = vpop.xlane.xlu1 %209  ;;  %v662_v20 = vmul.f32 %v7784_v51, %v7759_v40 }
 0x1a3   :  { %v7734_v21 = vpop.f32.mrf.mxu0  ;;  %11323 = vst [vmem:[#allocation26_spill] sm:$0xff] %v7802_v59 }
 0x1a5   :  { %v6553_v24 = vpop.f32.mrf.mxu0 }
 0x1a6   :  { %v7819_v10 = vpop.xlane.xlu1 %212 }
 0x1a7   :  { %v7736_v25 = vpop.f32.mrf.mxu0  ;;  %11324 = vst [vmem:[#allocation27_spill] sm:$0xff] %v7819_v10  ;;  %v610_v30 = vmul.f32 %v7788_v52, %v7819_v10 }
 0x1a9   :  { %v6556_v26 = vpop.f32.mrf.mxu0 }
 0x202   :  { %v448_v55 = vpop.f32.mrf.mxu1 }
 0x203   :  { %v570_v56 = vadd.f32 %v569_v9, %v448_v55  ;;  %v609_v9 = vmul.f32 %v7788_v52, %v7802_v59  ;;  %v7833_v55 = vpop.xlane.xlu1 %215 }
 0x204   :  { %v6515_v60 = vpop.f32.mrf.mxu1  ;;  %11325 = vst [vmem:[#allocation28_spill] sm:$0xff] %v7833_v55 }
 0x205   :  { %v614_v62 = vadd.f32 %v607_v57, %v570_v56 }
 0x206   :  { %v453_v0 = vpop.f32.mrf.mxu1 }
 0x207   :  { %v667_v1 = vadd.f32 %v660_v61, %v614_v62  ;;  %v575_v3 = vadd.f32 %v574_v11, %v453_v0  ;;  %v611_v62 = vmul.f32 %v7788_v52, %v7833_v55 }
 0x208   :  { %v6518_v6 = vpop.f32.mrf.mxu1 }
 0x209   :  { %v7815_v7 = vadd.f32 %v7808_v63, %v667_v1  ;;  %v615_v8 = vadd.f32 %v608_v4, %v575_v3 }
 0x20a   :  { %v458_v12 = vpop.f32.mrf.mxu1 }
 0x20b   :  { %v685_v14 = vsub.f32 0.0, %v7815_v7  ;;  %v668_v11 = vadd.f32 %v661_v5, %v615_v8  ;;  %v580_v16 = vadd.f32 %v579_v13, %v458_v12  ;;  %v663_v13 = vmul.f32 %v7784_v51, %v7761_v41 }
 0x20c   :  { %v6521_v24 = vpop.f32.mrf.mxu1  ;;  %v664_v5 = vmul.f32 %v7784_v51, %v7763_v44 }
 0x20d   :  { %v692_v26 = vmul.f32 1.442695, %v685_v14  ;;  %v7825_v27 = vadd.f32 %v7808_v63, %v668_v11  ;;  %v616_v28 = vadd.f32 %v609_v9, %v580_v16  ;;  %v612_v14 = vmul.f32 %v7788_v52, %v7753_v37 }
 0x20e   :  { %v463_v32 = vpop.f32.mrf.mxu1  ;;  %v665_v24 = vmul.f32 %v7784_v51, %v7778_v49 }
 0x20f   :  { %6837 = vpow2.f32 %v692_v26  ;;  %v686_v33 = vsub.f32 0.0, %v7825_v27  ;;  %v669_v34 = vadd.f32 %v662_v20, %v616_v28  ;;  %v585_v43 = vadd.f32 %v7730_v15, %v463_v32  ;;  %v7853_v26 = vpop.permute.xlu1 %653 }
 0x210   :  { %v6524_v56 = vpop.f32.mrf.mxu1  ;;  %11326 = vst [vmem:[#allocation29_spill] sm:$0xff] %v7853_v26 }
 0x211   :  { %v694_v57 = vmul.f32 1.442695, %v686_v33  ;;  %v7836_v60 = vadd.f32 %v7808_v63, %v669_v34  ;;  %v617_v61 = vadd.f32 %v610_v30, %v585_v43  ;;  %v613_v34 = vmul.f32 %v7788_v52, %v7755_v38 }
 0x212   :  { %v468_v0 = vpop.f32.mrf.mxu1 }
 0x213   :  { %6839 = vpow2.f32 %v694_v57  ;;  %v687_v1 = vsub.f32 0.0, %v7836_v60  ;;  %v670_v3 = vadd.f32 %v663_v13, %v617_v61  ;;  %v590_v15 = vadd.f32 %v7732_v17, %v468_v0 }
 0x214   :  { %v6527_v4 = vpop.f32.mrf.mxu1  ;;  %v666_v57 = vmul.f32 %v7784_v51, %v7853_v26 }
 0x215   :  { %v696_v6 = vmul.f32 1.442695, %v687_v1  ;;  %v7845_v8 = vadd.f32 %v7808_v63, %v670_v3  ;;  %v618_v9 = vadd.f32 %v611_v62, %v590_v15 }
 0x216   :  { %v473_v12 = vpop.f32.mrf.mxu1 }
 0x217   :  { %6841 = vpow2.f32 %v696_v6  ;;  %v688_v11 = vsub.f32 0.0, %v7845_v8  ;;  %v671_v16 = vadd.f32 %v664_v5, %v618_v9  ;;  %v595_v20 = vadd.f32 %v7734_v21, %v473_v12 }
 0x218   :  { %v6530_v17 = vpop.f32.mrf.mxu1 }
 0x219   :  { %v698_v28 = vmul.f32 1.442695, %v688_v11  ;;  %v682_v30 = vadd.f32 %v7808_v63, %v671_v16  ;;  %v619_v32 = vadd.f32 %v612_v14, %v595_v20 }
 0x21a   :  { %v478_v33 = vpop.f32.mrf.mxu1 }
 0x21b   :  { %6843 = vpow2.f32 %v698_v28  ;;  %v689_v43 = vsub.f32 0.0, %v682_v30  ;;  %v672_v13 = vadd.f32 %v665_v24, %v619_v32  ;;  %v600_v56 = vadd.f32 %v7736_v25, %v478_v33 }
 0x21c   :  { %v6838_v21 = vpop.eup %6837  ;;  %v6533_v61 = vpop.f32.mrf.mxu1 }
 0x21d   :  { %v706_v62 = vadd.f32 1.0, %v6838_v21  ;;  %v700_v0 = vmul.f32 1.442695, %v689_v43  ;;  %v683_v1 = vadd.f32 %v7808_v63, %v672_v13  ;;  %v620_v3 = vadd.f32 %v613_v34, %v600_v56 }
 0x21f   :  { %v690_v15 = vsub.f32 0.0, %v683_v1  ;;  %v673_v4 = vadd.f32 %v666_v57, %v620_v3  ;;  %6845 = vpow2.f32 %v700_v0 }
 0x220   :  { %v6840_v5 = vpop.eup %6839  ;;  %6847 = vrcp.f32 %v706_v62 }
 0x221   :  { %v707_v52 = vadd.f32 1.0, %v6840_v5  ;;  %v702_v6 = vmul.f32 1.442695, %v690_v15  ;;  %v684_v9 = vadd.f32 %v7808_v63, %v673_v4 }
 0x223   :  { %6849 = vrcp.f32 %v707_v52  ;;  %v691_v25 = vsub.f32 0.0, %v684_v9 }
 0x224   :  { %v6842_v12 = vpop.eup %6841  ;;  %6851 = vpow2.f32 %v702_v6 }
 0x225   :  { %v708_v51 = vadd.f32 1.0, %v6842_v12  ;;  %v704_v14 = vmul.f32 1.442695, %v691_v25 }
 0x227   :  { %6853 = vpow2.f32 %v704_v14 }
 0x228   :  { %v6844_v11 = vpop.eup %6843  ;;  %6855 = vrcp.f32 %v708_v51 }
 0x229   :  { %v709_v16 = vadd.f32 1.0, %v6844_v11 }
 0x22b   :  { %6857 = vrcp.f32 %v709_v16 }
 0x22c   :  { %v6846_v20 = vpop.eup %6845 }
 0x22d   :  { %v6848_v17 = vpop.eup %6847  ;;  %v710_v24 = vadd.f32 1.0, %v6846_v20 }
 0x22e   :  { %v727_v33 = vmul.f32 %v6848_v17, %v7815_v7 }
 0x22f   :  { %6859 = vrcp.f32 %v710_v24 }
 0x230   :  { %v6850_v28 = vpop.eup %6849 }
 0x231   :  { %v6852_v32 = vpop.eup %6851  ;;  %v728_v63 = vmul.f32 %v6850_v28, %v7825_v27 }
 0x232   :  { %v711_v34 = vadd.f32 1.0, %v6852_v32 }
 0x233   :  { %v738_v43 = vpack.c.bf16 %v728_v63, %v727_v33 }
 0x234   :  { %6861 = vrcp.f32 %v711_v34  ;;  %v6854_v13 = vpop.eup %6853 }
 0x235   :  { %6561 = vmatprep.mubr.msk.bf16.mxu1 %vm313_vm2, %v738_v43  ;;  %v6856_v56 = vpop.eup %6855  ;;  %v712_v21 = vadd.f32 1.0, %v6854_v13 }
 0x236   :  { %v729_v61 = vmul.f32 %v6856_v56, %v7836_v60  ;;  %v7874_v60 = vsub.s32 5, %v7765_v45 }
 0x237   :  { %6863 = vrcp.f32 %v712_v21 }
 0x238   :  { %v6858_v57 = vpop.eup %6857  ;;  %11327 = vst [vmem:[#allocation30_spill] sm:$0xff] %v7874_v60 }
 0x239   :  { %v730_v62 = vmul.f32 %v6858_v57, %v7845_v8 }
 0x23b   :  { %v739_v0 = vpack.c.bf16 %v730_v62, %v729_v61 }
 0x23c   :  { %v6860_v7 = vpop.eup %6859 }
 0x23d   :  { %6562 = vmatmul.mubr.msk.bf16.vlgmr.msra.gmra.mxu1 %vm313_vm2, %v739_v0  ;;  %v731_v3 = vmul.f32 %v6860_v7, %v682_v30  ;;  %v747_v30 = vrot.slane %v7796_v54, %v7874_v60 }
 0x241   :  { %v6862_v27 = vpop.eup %6861 }
 0x242   :  { %v732_v15 = vmul.f32 %v6862_v27, %v683_v1 }
 0x244   :  { %v740_v4 = vpack.c.bf16 %v732_v15, %v731_v3  ;;  %v6864_v5 = vpop.eup %6863 }
 0x245   :  { %v733_v52 = vmul.f32 %v6864_v5, %v684_v9 }
 0x246   :  { %6565 = vmatprep.mubr.msk.bf16.mxu1 %vm313_vm2, %v740_v4 }
 0x247   :  { %v741_v6 = vpack.c.bf16 %v733_v52, %v733_v52 }
 0x249   :  { %6566 = vmatmul.mubr.msk.bf16.gmra.mxu1 %vm313_vm2, %v741_v6 }
 0x24a   :  { %6590 = vmatprep.mubr.msk.bf16.mxu1 %vm7442_vm1, %v11194_v2 }
 0x2fd   :  { %v6563_v8 = vpop.f32.mrf.mxu1 }
 0x2fe   :  { %v7882_v9 = vadd.f32 %v6563_v8, %v747_v30 }
 0x2ff   :  { %v794_v25 = vpop.f32.mrf.mxu1 }
 0x300   :  { %v7880_v51 = vadd.f32 %v794_v25, %v747_v30  ;;  %v826_v20 = vsub.f32 0.0, %v7882_v9 }
 0x301   :  { %v6564_v1 = vpop.f32.mrf.mxu1 }
 0x302   :  { %v7878_v12 = vadd.f32 %v6564_v1, %v747_v30  ;;  %v824_v16 = vsub.f32 0.0, %v7880_v51  ;;  %v835_v13 = vmul.f32 1.442695, %v826_v20 }
 0x303   :  { %v797_v11 = vpop.f32.mrf.mxu1 }
 0x304   :  { %v827_v14 = vsub.f32 0.0, %v7878_v12  ;;  %v7887_v24 = vadd.f32 %v797_v11, %v747_v30  ;;  %v831_v33 = vmul.f32 1.442695, %v824_v16 }
 0x306   :  { %v837_v17 = vmul.f32 1.442695, %v827_v14  ;;  %v825_v56 = vsub.f32 0.0, %v7887_v24 }
 0x308   :  { %6865 = vpow2.f32 %v837_v17  ;;  %v833_v27 = vmul.f32 1.442695, %v825_v56 }
 0x309   :  { %v6567_v28 = vpop.f32.mrf.mxu1  ;;  %6867 = vpow2.f32 %v831_v33  ;;  %v7891_v33 = vsub.s32 7, %v7765_v45 }
 0x30a   :  { %v819_v32 = vadd.f32 %v6567_v28, %v747_v30 }
 0x30b   :  { %v810_v63 = vpop.f32.mrf.mxu1  ;;  %11328 = vst [vmem:[#allocation31_spill] sm:$0xff] %v7891_v33 }
 0x30c   :  { %v830_v34 = vsub.f32 0.0, %v819_v32  ;;  %v811_v43 = vadd.f32 %v810_v63, %v747_v30  ;;  %v7896_v63 = vld [vmem:[%s11190_s9 + $0xd0] sm:$0xff] }
 0x30d   :  { %v6568_v21 = vpop.f32.mrf.mxu1 }
 0x30e   :  { %v843_v57 = vmul.f32 1.442695, %v830_v34  ;;  %v828_v61 = vsub.f32 0.0, %v811_v43  ;;  %v876_v21 = vrot.slane %v7896_v63, %v7891_v33 }
 0x30f   :  { %v813_v62 = vpop.f32.mrf.mxu1 }
 0x310   :  { %6869 = vpow2.f32 %v843_v57  ;;  %v839_v0 = vmul.f32 1.442695, %v828_v61  ;;  %v814_v7 = vadd.f32 %v813_v62, %v747_v30 }
 0x311   :  { %6871 = vpow2.f32 %v835_v13 }
 0x312   :  { %6873 = vpow2.f32 %v839_v0  ;;  %v829_v3 = vsub.f32 0.0, %v814_v7 }
 0x313   :  { %6875 = vpow2.f32 %v833_v27 }
 0x314   :  { %v841_v15 = vmul.f32 1.442695, %v829_v3 }
 0x315   :  { %v6866_v4 = vpop.eup %6865 }
 0x316   :  { %6877 = vpow2.f32 %v841_v15  ;;  %v6868_v5 = vpop.eup %6867  ;;  %v848_v6 = vadd.f32 1.0, %v6866_v4 }
 0x317   :  { %v845_v14 = vadd.f32 1.0, %v6868_v5 }
 0x31d   :  { %v6870_v52 = vpop.eup %6869 }
 0x31e   :  { %v6872_v8 = vpop.eup %6871  ;;  %v851_v25 = vadd.f32 1.0, %v6870_v52 }
 0x31f   :  { %v6874_v1 = vpop.eup %6873  ;;  %v847_v16 = vadd.f32 1.0, %v6872_v8 }
 0x320   :  { %6879 = vrcp.f32 %v851_v25  ;;  %v849_v11 = vadd.f32 1.0, %v6874_v1  ;;  %v6876_v30 = vpop.eup %6875 }
 0x321   :  { %6881 = vrcp.f32 %v848_v6  ;;  %v846_v28 = vadd.f32 1.0, %v6876_v30 }
 0x322   :  { %6883 = vrcp.f32 %v849_v11 }
 0x323   :  { %v6878_v20 = vpop.eup %6877  ;;  %6885 = vrcp.f32 %v845_v14 }
 0x324   :  { %v850_v17 = vadd.f32 1.0, %v6878_v20  ;;  %6887 = vrcp.f32 %v847_v16 }
 0x326   :  { %6889 = vrcp.f32 %v850_v17  ;;  %v7933_v17 = vsub.s32 0, %v7765_v45 }
 0x327   :  { %6891 = vrcp.f32 %v846_v28 }
 0x328   :  { %11329 = vst [vmem:[#allocation32_spill] sm:$0xff] %v7933_v17 }
 0x32d   :  { %v6880_v34 = vpop.eup %6879 }
 0x32e   :  { %v6882_v13 = vpop.eup %6881  ;;  %v7898_v56 = vmul.f32 %v6880_v34, %v819_v32 }
 0x32f   :  { %v6884_v57 = vpop.eup %6883  ;;  %v7906_v3 = vmul.f32 %v6882_v13, %v7878_v12 }
 0x330   :  { %v7902_v61 = vmul.f32 %v6884_v57, %v811_v43  ;;  %v883_v62 = vmul.f32 %v876_v21, %v7898_v56  ;;  %v6886_v0 = vpop.eup %6885 }
 0x331   :  { %v6888_v27 = vpop.eup %6887  ;;  %v7911_v32 = vmul.f32 %v6886_v0, %v7880_v51  ;;  %v880_v12 = vmul.f32 %v876_v21, %v7906_v3 }
 0x332   :  { %v902_v15 = vsel %vm313_vm2, %v883_v62, 0.0  ;;  %v881_v4 = vmul.f32 %v876_v21, %v7902_v61  ;;  %v7916_v43 = vmul.f32 %v6888_v27, %v7882_v9 }
 0x333   :  { %v6890_v5 = vpop.eup %6889  ;;  %903 = vadd.xlane.f32.xlu1 %v902_v15  ;;  %v877_v14 = vmul.f32 %v876_v21, %v7911_v32 }
 0x334   :  { %v7913_v52 = vmul.f32 %v6890_v5, %v814_v7  ;;  %v896_v6 = vsel %vm313_vm2, %v881_v4, 0.0  ;;  %v6892_v25 = vpop.eup %6891  ;;  %v893_v7 = vsel %vm313_vm2, %v880_v12, 0.0  ;;  %v879_v9 = vmul.f32 %v876_v21, %v7916_v43 }
 0x335   :  { %v7924_v51 = vmul.f32 %v6892_v25, %v7887_v24  ;;  %v884_v11 = vsel %vm313_vm2, %v877_v14, 0.0  ;;  %v908_v24 = vrot.slane %v7776_v48, %v7933_v17 }
 0x336   :  { %v882_v8 = vmul.f32 %v876_v21, %v7913_v52  ;;  %v890_v16 = vsel %vm313_vm2, %v879_v9, 0.0 }
 0x337   :  { %897 = vadd.xlane.f32.xlu1 %v896_v6  ;;  %v878_v30 = vmul.f32 %v876_v21, %v7924_v51 }
 0x338   :  { %v899_v1 = vsel %vm313_vm2, %v882_v8, 0.0 }
 0x339   :  { %900 = vadd.xlane.f32.xlu0 %v899_v1  ;;  %v887_v20 = vsel %vm313_vm2, %v878_v30, 0.0 }
 0x33b   :  { %894 = vadd.xlane.f32.xlu1 %v893_v7 }
 0x33d   :  { %885 = vadd.xlane.f32.xlu0 %v884_v11 }
 0x33f   :  { %891 = vadd.xlane.f32.xlu1 %v890_v16 }
 0x343   :  { %888 = vadd.xlane.f32.xlu1 %v887_v20 }
 0x3bc   :  { %v904_v28 = vpop.xlane.xlu1 %903 }
 0x3bd   :  { %v915_v34 = vadd.f32 %v908_v24, %v904_v28 }
 0x3bf   :  { %v922_v13 = vsub.f32 0.0, %v915_v34 }
 0x3c0   :  { %v898_v57 = vpop.xlane.xlu1 %897 }
 0x3c1   :  { %v935_v62 = vmul.f32 1.442695, %v922_v13  ;;  %v913_v0 = vadd.f32 %v908_v24, %v898_v57 }
 0x3c2   :  { %v901_v27 = vpop.xlane.xlu0 %900 }
 0x3c3   :  { %6893 = vpow2.f32 %v935_v62  ;;  %v920_v15 = vsub.f32 0.0, %v913_v0  ;;  %v914_v21 = vadd.f32 %v908_v24, %v901_v27 }
 0x3c4   :  { %v895_v4 = vpop.xlane.xlu1 %894 }
 0x3c5   :  { %v931_v5 = vmul.f32 1.442695, %v920_v15  ;;  %v921_v6 = vsub.f32 0.0, %v914_v21  ;;  %v912_v8 = vadd.f32 %v908_v24, %v895_v4 }
 0x3c6   :  { %v886_v12 = vpop.xlane.xlu0 %885 }
 0x3c7   :  { %6895 = vpow2.f32 %v931_v5  ;;  %v933_v25 = vmul.f32 1.442695, %v921_v6  ;;  %v919_v1 = vsub.f32 0.0, %v912_v8  ;;  %v909_v14 = vadd.f32 %v908_v24, %v886_v12 }
 0x3c8   :  { %v892_v48 = vpop.xlane.xlu1 %891 }
 0x3c9   :  { %6897 = vpow2.f32 %v933_v25  ;;  %v929_v7 = vmul.f32 1.442695, %v919_v1  ;;  %v916_v9 = vsub.f32 0.0, %v909_v14  ;;  %v911_v11 = vadd.f32 %v908_v24, %v892_v48 }
 0x3cb   :  { %6899 = vpow2.f32 %v929_v7  ;;  %v923_v16 = vmul.f32 1.442695, %v916_v9  ;;  %v918_v30 = vsub.f32 0.0, %v911_v11 }
 0x3cc   :  { %v889_v20 = vpop.xlane.xlu1 %888 }
 0x3cd   :  { %v927_v28 = vmul.f32 1.442695, %v918_v30  ;;  %v910_v34 = vadd.f32 %v908_v24, %v889_v20  ;;  %6901 = vpow2.f32 %v923_v16 }
 0x3cf   :  { %6903 = vpow2.f32 %v927_v28  ;;  %v917_v13 = vsub.f32 0.0, %v910_v34  ;;  %v1076_v28 = vld [vmem:[%s11190_s9 + $0x30] sm:$0xff]  ;;  %v1077_v34 = vld [vmem:[%s11190_s9 + $0x38] sm:$0xff] }
 0x3d0   :  { %v6894_v57 = vpop.eup %6893 }
 0x3d1   :  { %v943_v62 = vadd.f32 1.0, %v6894_v57  ;;  %v925_v0 = vmul.f32 1.442695, %v917_v13  ;;  %v1080_v13 = vpack.c.bf16 %v1077_v34, %v1076_v28 }
 0x3d3   :  { %6905 = vrcp.f32 %v943_v62  ;;  %6587 = vmatpush3.bf16.msra.mxu1 %v1080_v13 }
 0x3d4   :  { %v6896_v27 = vpop.eup %6895  ;;  %6907 = vpow2.f32 %v925_v0  ;;  %6588 = vmatprep.subr.bf16.mxu1 %v11194_v2 }
 0x3d5   :  { %v941_v15 = vadd.f32 1.0, %v6896_v27 }
 0x3d6   :  { %v6898_v21 = vpop.eup %6897 }
 0x3d7   :  { %6909 = vrcp.f32 %v941_v15  ;;  %v942_v4 = vadd.f32 1.0, %v6898_v21 }
 0x3d8   :  { %v6900_v5 = vpop.eup %6899 }
 0x3d9   :  { %6911 = vrcp.f32 %v942_v4  ;;  %v940_v6 = vadd.f32 1.0, %v6900_v5 }
 0x3da   :  { %v6902_v8 = vpop.eup %6901 }
 0x3db   :  { %6913 = vrcp.f32 %v940_v6  ;;  %v937_v25 = vadd.f32 1.0, %v6902_v8 }
 0x3dc   :  { %v6904_v12 = vpop.eup %6903 }
 0x3dd   :  { %v939_v24 = vadd.f32 1.0, %v6904_v12 }
 0x3df   :  { %6915 = vrcp.f32 %v939_v24 }
 0x3e0   :  { %v6906_v1 = vpop.eup %6905  ;;  %6917 = vrcp.f32 %v937_v25 }
 0x3e1   :  { %v6908_v14 = vpop.eup %6907  ;;  %990 = vperm.xlu1 %6835, %v6906_v1   ;;  %v1141_v1 = vld [vmem:[%s11190_s9 + $0x50] sm:$0xff] }
 0x3e2   :  { %v938_v48 = vadd.f32 1.0, %v6908_v14  ;;  %v1142_v14 = vld [vmem:[%s11190_s9 + $0x58] sm:$0xff] }
 0x3e4   :  { %v6910_v7 = vpop.eup %6909  ;;  %6919 = vrcp.f32 %v938_v48  ;;  %v1145_v48 = vpack.c.bf16 %v1142_v14, %v1141_v1  ;;  %v1221_v14 = vld [vmem:[%s11189_s8 + $0x10] sm:$0xff] }
 0x3e5   :  { %980 = vperm.xlu1 %6835, %v6910_v7   ;;  %v1139_v7 = vld [vmem:[%s11190_s9 + $0x40] sm:$0xff] }
 0x3e6   :  { %v6912_v9 = vpop.eup %6911 }
 0x3e7   :  { %985 = vperm.xlu0 %6836, %v6912_v9   ;;  %v1140_v9 = vld [vmem:[%s11190_s9 + $0x48] sm:$0xff] }
 0x3e8   :  { %v6914_v11 = vpop.eup %6913 }
 0x3e9   :  { %975 = vperm.xlu1 %6835, %v6914_v11   ;;  %v1144_v11 = vpack.c.bf16 %v1140_v9, %v1139_v7  ;;  %v1219_v7 = vld [vmem:[%s11189_s8] sm:$0xff] }
 0x3ec   :  { %v6916_v16 = vpop.eup %6915 }
 0x3ed   :  { %970 = vperm.xlu0 %6836, %v6916_v16   ;;  %v6918_v30 = vpop.eup %6917  ;;  %v7990_v16 = vsub.s32 6, %v7765_v45 }
 0x3ef   :  { %11330 = vst [vmem:[#allocation33_spill] sm:$0xff] %v7990_v16 }
 0x3f1   :  { %v6920_v20 = vpop.eup %6919  ;;  %960 = vperm.xlu0 %6836, %v6918_v30   ;;  %v1130_v30 = vrot.slane %v7796_v54, %v7990_v16 }
 0x3f2   :  { %965 = vperm.xlu1 %6835, %v6920_v20  }
 0x3f6   :  { %1081 = vrot.lane.b32.xlu1 %v7604_v31, %s7445_s28 }
 0x45c   :  { %v991_v57 = vpop.permute.xlu1 %990 }
 0x45d   :  { %v999_v62 = vmul.f32 %v991_v57, %v7898_v56 }
 0x45f   :  { %6570 = vmatpush3.msra.mxu0 %v999_v62 }
 0x460   :  { %v981_v0 = vpop.permute.xlu1 %980  ;;  %6571 = vmatprep.subr.mxu0 %v11194_v2 }
 0x461   :  { %v997_v4 = vmul.f32 %v981_v0, %v7902_v61 }
 0x462   :  { %v986_v27 = vpop.permute.xlu0 %985 }
 0x463   :  { %v998_v15 = vmul.f32 %v986_v27, %v7913_v52 }
 0x464   :  { %v976_v21 = vpop.permute.xlu1 %975 }
 0x465   :  { %6572 = vmatpush3.msra.mxu0 %v998_v15  ;;  %v996_v31 = vmul.f32 %v976_v21, %v7906_v3  ;;  %v56_v3 = vld [vmem:[%s11187_s6] sm:$0xff] }
 0x466   :  { %6573 = vmatprep.subr.mxu0 %v11194_v2 }
 0x467   :  { %6574 = vmatpush3.msra.mxu0 %v997_v4 }
 0x468   :  { %v971_v5 = vpop.permute.xlu0 %970  ;;  %6575 = vmatprep.subr.mxu0 %v11194_v2 }
 0x469   :  { %v995_v56 = vmul.f32 %v971_v5, %v7916_v43  ;;  %6576 = vmatpush3.msra.mxu0 %v996_v31  ;;  %v1075_v43 = vld [vmem:[%s11190_s9 + $0x28] sm:$0xff] }
 0x46a   :  { %6577 = vmatprep.subr.mxu0 %v11194_v2 }
 0x46b   :  { %6578 = vmatpush3.msra.mxu0 %v995_v56 }
 0x46c   :  { %6579 = vmatprep.subr.mxu0 %v11194_v2  ;;  %v961_v52 = vpop.permute.xlu0 %960 }
 0x46d   :  { %v966_v6 = vpop.permute.xlu1 %965  ;;  %v993_v8 = vmul.f32 %v961_v52, %v7911_v32  ;;  %v1074_v32 = vld [vmem:[%s11190_s9 + $0x20] sm:$0xff]  ;;  %v1149_v52 = vrot.slane %v7796_v54, %v7891_v33 }
 0x46e   :  { %v994_v61 = vmul.f32 %v966_v6, %v7924_v51  ;;  %v1079_v51 = vpack.c.bf16 %v1075_v43, %v1074_v32 }
 0x470   :  { %6580 = vmatpush3.msra.mxu0 %v994_v61  ;;  %6589 = vmatpush3.bf16.msra.mxu1 %v1079_v51 }
 0x471   :  { %6581 = vmatprep.subr.mxu0 %v11194_v2  ;;  %6602 = vmatprep.subr.bf16.mxu1 %v11194_v2  ;;  %v1082_v20 = vpop.permute.xlu1 %1081 }
 0x472   :  { %6582 = vmatpush3.msra.mxu0 %v993_v8 }
 0x473   :  { %6584 = vmatmul.mubr.msk.f32.vlgmr.msra.gmra.mxu0 %vm1000_vm4, %v56_v3  ;;  %6594 = vmatprep.subr.bf16.mxu0 %v11194_v2 }
 0x474   :  { %6598 = vmatprep.mubr.msk.bf16.mxu0 %vm7442_vm1, %v11194_v2  ;;  %6595 = vmatpush3.bf16.msra.mxu0 %v1145_v48  ;;  %v1222_v48 = vld [vmem:[%s11189_s8 + $0x18] sm:$0xff] }
 0x475   :  { %6596 = vmatprep.subr.bf16.mxu0 %v11194_v2  ;;  %v1225_v9 = vpack.c.bf16 %v1222_v48, %v1221_v14 }
 0x478   :  { %6597 = vmatpush3.bf16.msra.mxu0 %v1144_v11  ;;  %v1220_v11 = vld [vmem:[%s11189_s8 + $0x8] sm:$0xff] }
 0x533   :  { %v1070_v12 = vpop.f32.mrf.mxu0 }
 0x534   :  { %v1078_v24 = vpack.c.bf16 %v1070_v12, %v1070_v12 }
 0x535   :  { %v6585_v25 = vpop.f32.mrf.mxu0 }
 0x536   :  { %6591 = vmatmul.mubr.msk.bf16.vlgmr.msra.gmra.mxu1 %vm313_vm2, %v1078_v24 }
 0x537   :  { %6606 = vmatprep.mubr.msk.bf16.mxu1 %vm7442_vm1, %v11194_v2  ;;  %6603 = vmatpush3.bf16.msra.mxu1 %v1225_v9 }
 0x538   :  { %6604 = vmatprep.subr.bf16.mxu1 %v11194_v2 }
 0x5f6   :  { %v1121_v28 = vpop.f32.mrf.mxu1 }
 0x5f7   :  { %v1122_v34 = vadd.f32 %v1121_v28, %v1082_v20 }
 0x5f8   :  { %v6592_v13 = vpop.f32.mrf.mxu1 }
 0x5f9   :  { %v1131_v57 = vadd.f32 %v1130_v30, %v1122_v34  ;;  %v1224_v30 = vpack.c.bf16 %v1220_v11, %v1219_v7  ;;  %v1210_v13 = vrot.slane %v7896_v63, %v7933_v17  ;;  %v1294_v7 = vrot.slane %v7796_v54, %v7768_v46 }
 0x5fa   :  { %v1124_v62 = vpop.f32.mrf.mxu1 }
 0x5fb   :  { %v1132_v0 = vsub.f32 0.0, %v1131_v57  ;;  %6605 = vmatpush3.bf16.msra.mxu1 %v1224_v30 }
 0x5fc   :  { %v6593_v27 = vpop.f32.mrf.mxu1  ;;  %6610 = vmatprep.subr.mxu1 %v11194_v2 }
 0x5fd   :  { %v1133_v15 = vmul.f32 1.442695, %v1132_v0  ;;  %v1215_v0 = vrot.slane %v7896_v63, %v7768_v46 }
 0x5ff   :  { %6921 = vpow2.f32 %v1133_v15 }
 0x60c   :  { %v6922_v21 = vpop.eup %6921 }
 0x60d   :  { %v1135_v4 = vadd.f32 1.0, %v6922_v21 }
 0x60f   :  { %6923 = vrcp.f32 %v1135_v4 }
 0x61c   :  { %v6924_v31 = vpop.eup %6923 }
 0x61d   :  { %v1138_v5 = vmul.f32 %v6924_v31, %v1131_v57  ;;  %v1320_v31 = vld [vmem:[%s11191_s10 + $0x38] sm:$0xff] }
 0x61e   :  { %1348 = vmatprep.subr.mxu0 %v1320_v31 }
 0x61f   :  { %v1143_v56 = vpack.c.bf16 %v1138_v5, %v1138_v5  ;;  %v1319_v5 = vld [vmem:[%s11191_s10 + $0x30] sm:$0xff] }
 0x621   :  { %6599 = vmatmul.mubr.msk.bf16.vlgmr.msra.gmra.mxu0 %vm313_vm2, %v1143_v56  ;;  %v1318_v56 = vld [vmem:[%s11191_s10 + $0x28] sm:$0xff] }
 0x622   :  { %1388 = vmatprep.mubr.f32.mxu0 %v11194_v2  ;;  %1349 = vmatpush1.msra.mxu0 %v1319_v5 }
 0x623   :  { %1350 = vmatprep.subr.mxu0 %v1318_v56 }
 0x6e1   :  { %v1187_v6 = vpop.f32.mrf.mxu0 }
 0x6e2   :  { %v1188_v61 = vadd.f32 %v1187_v6, %v1149_v52  ;;  %v1317_v52 = vld [vmem:[%s11191_s10 + $0x20] sm:$0xff]  ;;  %v1316_v6 = vld [vmem:[%s11191_s10 + $0x18] sm:$0xff] }
 0x6e3   :  { %v6600_v8 = vpop.f32.mrf.mxu0  ;;  %1351 = vmatpush1.msra.mxu0 %v1317_v52 }
 0x6e4   :  { %v1193_v3 = vsel %vm313_vm2, %v1188_v61, 0.0  ;;  %v1314_v8 = vld [vmem:[%s11191_s10 + $0x8] sm:$0xff]  ;;  %1352 = vmatprep.subr.mxu0 %v1316_v6 }
 0x6e5   :  { %1194 = vadd.xlane.f32.xlu0 %v1193_v3  ;;  %v1190_v32 = vpop.f32.mrf.mxu0  ;;  %v1313_v3 = vld [vmem:[%s11191_s10] sm:$0xff] }
 0x6e6   :  { %v8047_v32 = vsub.s32 3, %v7765_v45 }
 0x6e7   :  { %v6601_v43 = vpop.f32.mrf.mxu0 }
 0x6e8   :  { %11331 = vst [vmem:[#allocation34_spill] sm:$0xff] %v8047_v32  ;;  %v1272_v43 = vrot.slane %v7796_v54, %v8047_v32  ;;  %v1399_v59 = vrot.slane %v7896_v63, %v8047_v32 }
 0x76e   :  { %v1195_v51 = vpop.xlane.xlu0 %1194 }
 0x76f   :  { %v1197_v12 = vmul.f32 0.03125, %v1195_v51  ;;  %v1277_v51 = vrot.slane %v7896_v63, %v7771_v47 }
 0x771   :  { %v1198_v24 = vsub.f32 %v1188_v61, %v1197_v12  ;;  %v1315_v61 = vld [vmem:[%s11191_s10 + $0x10] sm:$0xff] }
 0x772   :  { %1353 = vmatpush1.msra.mxu0 %v1315_v61 }
 0x773   :  { %v1199_v25 = vmul.f32 %v1198_v24, %v1198_v24  ;;  %1354 = vmatprep.subr.mxu0 %v1314_v8 }
 0x774   :  { %1355 = vmatpush1.msra.mxu0 %v1313_v3 }
 0x775   :  { %v1200_v1 = vsel %vm313_vm2, %v1199_v25, 0.0  ;;  %6615 = vmatprep.subr.bf16.mxu0 %v11194_v2 }
 0x776   :  { %1201 = vadd.xlane.f32.xlu1 %v1200_v1 }
 0x7ff   :  { %v1202_v20 = vpop.xlane.xlu1 %1201 }
 0x800   :  { %v1203_v28 = vmul.f32 0.03125, %v1202_v20 }
 0x802   :  { %v1204_v34 = vadd.f32 1e-05, %v1203_v28 }
 0x804   :  { %6925 = vrsqrt.f32 %v1204_v34  ;;  %v1303_v34 = vrot.slane %v7796_v54, %v7933_v17 }
 0x811   :  { %v6926_v57 = vpop.eup %6925 }
 0x812   :  { %v1206_v62 = vmul.f32 %v6926_v57, %v1198_v24  ;;  %v1285_v24 = vrot.slane %v7796_v54, %v7771_v47  ;;  %v1395_v54 = vld [vmem:[%s11190_s9 + $0x80] sm:$0xff] }
 0x814   :  { %v1211_v27 = vmul.f32 %v1210_v13, %v1206_v62 }
 0x816   :  { %v1216_v15 = vadd.f32 %v1215_v0, %v1211_v27 }
 0x818   :  { %v6291_v21 = vclamps-f32 %v1216_v15, 10.0 }
 0x81a   :  { %v1223_v4 = vpack.c.bf16 %v6291_v21, %v6291_v21 }
 0x81c   :  { %6607 = vmatmul.mubr.msk.bf16.vlgmr.msra.gmra.mxu1 %vm313_vm2, %v1223_v4 }
 0x81d   :  { %6612 = vmatprep.mubr.msk.f32.mxu1 %vm7442_vm1, %v11194_v2  ;;  %6611 = vmatpush3.msra.mxu1 %v1395_v54 }
 0x81e   :  { %6623 = vmatprep.subr.bf16.mxu1 %v11194_v2 }
 0x8dc   :  { %v8053_v12 = vpop.f32.mrf.mxu1 }
 0x8dd   :  { %v1273_v25 = vmul.f32 %v1272_v43, %v8053_v12  ;;  %v1279_v1 = vrot.slane %v8053_v12, 7  ;;  %v1288_v14 = vrot.slane %v8053_v12, 6  ;;  %v1297_v48 = vrot.slane %v8053_v12, 5 }
 0x8de   :  { %v6608_v9 = vpop.f32.mrf.mxu1  ;;  %v2851_v35 = vsub.f32 0.0, %v8053_v12 }
 0x8df   :  { %v1278_v11 = vadd.f32 %v1277_v51, %v1273_v25  ;;  %v1281_v30 = vsel %vm1280_vm5, %v1279_v1, 0.0  ;;  %v1290_v20 = vsel %vm1289_vm6, %v1288_v14, 0.0  ;;  %v1299_v57 = vsel %vm1298_vm7, %v1297_v48, 0.0 }
 0x8e0   :  { %v1286_v28 = vmul.f32 %v1285_v24, %v1281_v30  ;;  %v1266_v13 = vpop.f32.mrf.mxu1  ;;  %v1295_v0 = vmul.f32 %v1294_v7, %v1290_v20  ;;  %v1304_v15 = vmul.f32 %v1303_v34, %v1299_v57 }
 0x8e2   :  { %v1287_v62 = vadd.f32 %v1286_v28, %v1278_v11  ;;  %v6609_v27 = vpop.f32.mrf.mxu1 }
 0x8e4   :  { %v1296_v21 = vadd.f32 %v1295_v0, %v1287_v62 }
 0x8e6   :  { %v1305_v4 = vadd.f32 %v1304_v15, %v1296_v21 }
 0x8e8   :  { %v1306_v31 = vsub.f32 0.0, %v1305_v4 }
 0x8ea   :  { %v1307_v5 = vmul.f32 1.442695, %v1306_v31 }
 0x8ec   :  { %6927 = vpow2.f32 %v1307_v5 }
 0x8f9   :  { %v6928_v56 = vpop.eup %6927 }
 0x8fa   :  { %v1309_v52 = vadd.f32 1.0, %v6928_v56 }
 0x8fc   :  { %6929 = vrcp.f32 %v1309_v52 }
 0x909   :  { %v6930_v6 = vpop.eup %6929 }
 0x90a   :  { %v8074_v61 = vmul.f32 %v6930_v6, %v1305_v4 }
 0x90c   :  { %11332 = vst [vmem:[#allocation35_spill] sm:$0xff] %v8074_v61  ;;  %6293 = vmatmul.mubr.msk.f32.vlgmr.msra.gmra.mxu0 %vm313_vm2, %v8074_v61 }
 0x90d   :  { %6619 = vmatprep.mubr.msk.bf16.mxu0 %vm7442_vm1, %v11194_v2 }
 0x9cc   :  { %v8084_v8 = vpop.f32.mrf.mxu0 }
 0x9cd   :  { %v8088_v3 = vrot.slane %v8084_v8, %v7933_v17  ;;  %v8099_v51 = vrot.slane %v8084_v8, %v7768_v46  ;;  %v8109_v24 = vrot.slane %v8084_v8, %v7771_v47  ;;  %v8121_v25 = vrot.slane %v8084_v8, %v8047_v32 }
 0x9ce   :  { %v1392_v43 = vpop.f32.mrf.mxu0  ;;  %v8133_v1 = vrot.slane %v8084_v8, %v7791_v53  ;;  %v8145_v14 = vrot.slane %v8084_v8, %v7874_v60  ;;  %v8157_v48 = vrot.slane %v8084_v8, %v7990_v16  ;;  %v8173_v7 = vrot.slane %v8084_v8, %v7891_v33 }
 0x9cf   :  { %1781 = vbcast.lane.b32.xlu1 %v8088_v3, 264  ;;  %1777 = vbcast.lane.b32.xlu0 %v8088_v3, 256  ;;  %v2852_v60 = vmul.f32 1.442695, %v2851_v35 }
 0x9d0   :  { %6613 = vmatmul.mubr.msk.f32.vlgmr.msra.gmra.mxu1 %vm72_vm0, %v1392_v43 }
 0x9d1   :  { %6627 = vmatprep.mubr.msk.bf16.mxu1 %vm7442_vm1, %v11194_v2 }
 0x9d3   :  { %1789 = vbcast.lane.b32.xlu1 %v8088_v3, 280  ;;  %1785 = vbcast.lane.b32.xlu0 %v8088_v3, 272 }
 0x9d7   :  { %1816 = vbcast.lane.b32.xlu1 %v8099_v51, 264  ;;  %1812 = vbcast.lane.b32.xlu0 %v8099_v51, 256 }
 0x9db   :  { %1820 = vbcast.lane.b32.xlu1 %v8099_v51, 272  ;;  %1793 = vbcast.lane.b32.xlu0 %v8088_v3, 288 }
 0x9df   :  { %1824 = vbcast.lane.b32.xlu1 %v8099_v51, 280  ;;  %1797 = vbcast.lane.b32.xlu0 %v8088_v3, 296 }
 0x9e3   :  { %1851 = vbcast.lane.b32.xlu1 %v8109_v24, 264  ;;  %1847 = vbcast.lane.b32.xlu0 %v8109_v24, 256 }
 0x9e7   :  { %1828 = vbcast.lane.b32.xlu1 %v8099_v51, 288  ;;  %1801 = vbcast.lane.b32.xlu0 %v8088_v3, 304 }
 0x9eb   :  { %1805 = vbcast.lane.b32.xlu1 %v8088_v3, 312  ;;  %1855 = vbcast.lane.b32.xlu0 %v8109_v24, 272 }
 0x9ef   :  { %1859 = vbcast.lane.b32.xlu1 %v8109_v24, 280  ;;  %1832 = vbcast.lane.b32.xlu0 %v8099_v51, 296 }
 0x9f3   :  { %1886 = vbcast.lane.b32.xlu1 %v8121_v25, 264  ;;  %1882 = vbcast.lane.b32.xlu0 %v8121_v25, 256 }
 0x9f7   :  { %1863 = vbcast.lane.b32.xlu1 %v8109_v24, 288  ;;  %1836 = vbcast.lane.b32.xlu0 %v8099_v51, 304 }
 0x9fb   :  { %1840 = vbcast.lane.b32.xlu1 %v8099_v51, 312  ;;  %1890 = vbcast.lane.b32.xlu0 %v8121_v25, 272 }
 0x9ff   :  { %1894 = vbcast.lane.b32.xlu1 %v8121_v25, 280  ;;  %1867 = vbcast.lane.b32.xlu0 %v8109_v24, 296 }
 0xa03   :  { %1921 = vbcast.lane.b32.xlu1 %v8133_v1, 264  ;;  %1917 = vbcast.lane.b32.xlu0 %v8133_v1, 256 }
 0xa07   :  { %1898 = vbcast.lane.b32.xlu1 %v8121_v25, 288  ;;  %1871 = vbcast.lane.b32.xlu0 %v8109_v24, 304 }
 0xa0b   :  { %1875 = vbcast.lane.b32.xlu1 %v8109_v24, 312  ;;  %1925 = vbcast.lane.b32.xlu0 %v8133_v1, 272 }
 0xa0f   :  { %1929 = vbcast.lane.b32.xlu1 %v8133_v1, 280  ;;  %1902 = vbcast.lane.b32.xlu0 %v8121_v25, 296 }
 0xa13   :  { %1956 = vbcast.lane.b32.xlu1 %v8145_v14, 264  ;;  %1952 = vbcast.lane.b32.xlu0 %v8145_v14, 256 }
 0xa17   :  { %1933 = vbcast.lane.b32.xlu1 %v8133_v1, 288  ;;  %1906 = vbcast.lane.b32.xlu0 %v8121_v25, 304 }
 0xa1b   :  { %1910 = vbcast.lane.b32.xlu1 %v8121_v25, 312  ;;  %1960 = vbcast.lane.b32.xlu0 %v8145_v14, 272 }
 0xa1f   :  { %1964 = vbcast.lane.b32.xlu1 %v8145_v14, 280  ;;  %1937 = vbcast.lane.b32.xlu0 %v8133_v1, 296 }
 0xa23   :  { %1991 = vbcast.lane.b32.xlu1 %v8157_v48, 264  ;;  %1987 = vbcast.lane.b32.xlu0 %v8157_v48, 256 }
 0xa27   :  { %1968 = vbcast.lane.b32.xlu1 %v8145_v14, 288  ;;  %1941 = vbcast.lane.b32.xlu0 %v8133_v1, 304 }
 0xa2b   :  { %2368 = vbcast.lane.b32.xlu1 %v8099_v51, 320  ;;  %1995 = vbcast.lane.b32.xlu0 %v8157_v48, 272 }
 0xa2f   :  { %2400 = vbcast.lane.b32.xlu1 %v8109_v24, 320  ;;  %2372 = vbcast.lane.b32.xlu0 %v8099_v51, 328 }
 0xa33   :  { %1945 = vbcast.lane.b32.xlu1 %v8133_v1, 312  ;;  %2404 = vbcast.lane.b32.xlu0 %v8109_v24, 328 }
 0xa37   :  { %1999 = vbcast.lane.b32.xlu1 %v8157_v48, 280  ;;  %1972 = vbcast.lane.b32.xlu0 %v8145_v14, 296 }
 0xa3b   :  { %2026 = vbcast.lane.b32.xlu1 %v8173_v7, 264  ;;  %2022 = vbcast.lane.b32.xlu0 %v8173_v7, 256 }
 0xa3f   :  { %2340 = vbcast.lane.b32.xlu1 %v8088_v3, 328  ;;  %2336 = vbcast.lane.b32.xlu0 %v8088_v3, 320 }
 0xa41   :  { %v8179_v9 = vpop.permute.xlu1 %1781  ;;  %v8181_v11 = vpop.permute.xlu0 %1777 }
 0xa43   :  { %2432 = vbcast.lane.b32.xlu1 %v8121_v25, 320  ;;  %2376 = vbcast.lane.b32.xlu0 %v8099_v51, 336 }
 0xa45   :  { %v8185_v30 = vpop.permute.xlu1 %1789  ;;  %v8187_v20 = vpop.permute.xlu0 %1785 }
 0xa46   :  { %11333 = vst [vmem:[#allocation36_spill] sm:$0xff] %v8185_v30 }
 0xa47   :  { %2408 = vbcast.lane.b32.xlu1 %v8109_v24, 336  ;;  %2436 = vbcast.lane.b32.xlu0 %v8121_v25, 328 }
 0xa49   :  { %v8191_v28 = vpop.permute.xlu1 %1816  ;;  %v8193_v34 = vpop.permute.xlu0 %1812 }
 0xa4b   :  { %2468 = vbcast.lane.b32.xlu1 %v8133_v1, 328  ;;  %2464 = vbcast.lane.b32.xlu0 %v8133_v1, 320 }
 0xa4d   :  { %v8197_v13 = vpop.permute.xlu1 %1820  ;;  %v8199_v57 = vpop.permute.xlu0 %1793 }
 0xa4e   :  { %11334 = vst [vmem:[#allocation37_spill] sm:$0xff] %v8199_v57 }
 0xa4f   :  { %2003 = vbcast.lane.b32.xlu1 %v8157_v48, 288  ;;  %1976 = vbcast.lane.b32.xlu0 %v8145_v14, 304 }
 0xa51   :  { %v8203_v62 = vpop.permute.xlu1 %1824  ;;  %v8205_v0 = vpop.permute.xlu0 %1797 }
 0xa52   :  { %11335 = vst [vmem:[#allocation38_spill] sm:$0xff] %v8203_v62  ;;  %11336 = vst [vmem:[#allocation39_spill] sm:$0xff] %v8205_v0 }
 0xa53   :  { %2344 = vbcast.lane.b32.xlu1 %v8088_v3, 336  ;;  %2030 = vbcast.lane.b32.xlu0 %v8173_v7, 272 }
 0xa55   :  { %v8209_v27 = vpop.permute.xlu1 %1851  ;;  %v8211_v15 = vpop.permute.xlu0 %1847 }
 0xa57   :  { %2440 = vbcast.lane.b32.xlu1 %v8121_v25, 336  ;;  %2380 = vbcast.lane.b32.xlu0 %v8099_v51, 344 }
 0xa59   :  { %v8215_v21 = vpop.permute.xlu1 %1828  ;;  %v8217_v4 = vpop.permute.xlu0 %1801 }
 0xa5a   :  { %11337 = vst [vmem:[#allocation40_spill] sm:$0xff] %v8215_v21  ;;  %11338 = vst [vmem:[#allocation41_spill] sm:$0xff] %v8217_v4 }
 0xa5b   :  { %2500 = vbcast.lane.b32.xlu1 %v8145_v14, 328  ;;  %2496 = vbcast.lane.b32.xlu0 %v8145_v14, 320 }
 0xa5d   :  { %v8221_v31 = vpop.permute.xlu1 %1805  ;;  %v8223_v5 = vpop.permute.xlu0 %1855 }
 0xa5f   :  { %2472 = vbcast.lane.b32.xlu1 %v8133_v1, 336  ;;  %2412 = vbcast.lane.b32.xlu0 %v8109_v24, 344 }
 0xa61   :  { %v8227_v56 = vpop.permute.xlu1 %1859  ;;  %v8229_v52 = vpop.permute.xlu0 %1832 }
 0xa62   :  { %11339 = vst [vmem:[#allocation42_spill] sm:$0xff] %v8227_v56  ;;  %11340 = vst [vmem:[#allocation43_spill] sm:$0xff] %v8229_v52 }
 0xa63   :  { %2532 = vbcast.lane.b32.xlu1 %v8157_v48, 328  ;;  %2528 = vbcast.lane.b32.xlu0 %v8157_v48, 320 }
 0xa65   :  { %v8233_v6 = vpop.permute.xlu1 %1886  ;;  %v8235_v54 = vpop.permute.xlu0 %1882 }
 0xa67   :  { %2007 = vbcast.lane.b32.xlu1 %v8157_v48, 296  ;;  %1980 = vbcast.lane.b32.xlu0 %v8145_v14, 312 }
 0xa69   :  { %v8239_v8 = vpop.permute.xlu1 %1863  ;;  %v8241_v43 = vpop.permute.xlu0 %1836 }
 0xa6a   :  { %11341 = vst [vmem:[#allocation44_spill] sm:$0xff] %v8239_v8  ;;  %11342 = vst [vmem:[#allocation45_spill] sm:$0xff] %v8241_v43 }
 0xa6b   :  { %2348 = vbcast.lane.b32.xlu1 %v8088_v3, 344  ;;  %2034 = vbcast.lane.b32.xlu0 %v8173_v7, 280 }
 0xa6d   :  { %v8245_v2 = vpop.permute.xlu1 %1840  ;;  %v8247_v18 = vpop.permute.xlu0 %1890 }
 0xa6e   :  { %11343 = vst [vmem:[#allocation46_spill] sm:$0xff] %v8247_v18 }
 0xa6f   :  { %2444 = vbcast.lane.b32.xlu1 %v8121_v25, 344  ;;  %2384 = vbcast.lane.b32.xlu0 %v8099_v51, 352 }
 0xa71   :  { %v8251_v22 = vpop.permute.xlu1 %1894  ;;  %v8253_v29 = vpop.permute.xlu0 %1867 }
 0xa72   :  { %11344 = vst [vmem:[#allocation47_spill] sm:$0xff] %v8251_v22  ;;  %11345 = vst [vmem:[#allocation48_spill] sm:$0xff] %v8253_v29 }
 0xa73   :  { %2560 = vbcast.lane.b32.xlu1 %v8173_v7, 320  ;;  %2504 = vbcast.lane.b32.xlu0 %v8145_v14, 336 }
 0xa75   :  { %v8257_v36 = vpop.permute.xlu1 %1921  ;;  %v8259_v42 = vpop.permute.xlu0 %1917 }
 0xa77   :  { %2416 = vbcast.lane.b32.xlu1 %v8109_v24, 352  ;;  %2564 = vbcast.lane.b32.xlu0 %v8173_v7, 328 }
 0xa79   :  { %v8263_v19 = vpop.permute.xlu1 %1898  ;;  %v8265_v23 = vpop.permute.xlu0 %1871 }
 0xa7a   :  { %11346 = vst [vmem:[#allocation49_spill] sm:$0xff] %v8263_v19  ;;  %11347 = vst [vmem:[#allocation50_spill] sm:$0xff] %v8265_v23 }
 0xa7b   :  { %2536 = vbcast.lane.b32.xlu1 %v8157_v48, 336  ;;  %2476 = vbcast.lane.b32.xlu0 %v8133_v1, 344 }
 0xa7d   :  { %v8269_v33 = vpop.permute.xlu1 %1875  ;;  %v8271_v26 = vpop.permute.xlu0 %1925 }
 0xa7e   :  { %11348 = vst [vmem:[#allocation51_spill] sm:$0xff] %v8271_v26 }
 0xa7f   :  { %2038 = vbcast.lane.b32.xlu1 %v8173_v7, 288  ;;  %2011 = vbcast.lane.b32.xlu0 %v8157_v48, 304 }
 0xa81   :  { %v8275_v38 = vpop.permute.xlu1 %1929  ;;  %v8277_v49 = vpop.permute.xlu0 %1902 }
 0xa82   :  { %11349 = vst [vmem:[#allocation52_spill] sm:$0xff] %v8275_v38  ;;  %11350 = vst [vmem:[#allocation53_spill] sm:$0xff] %v8277_v49 }
 0xa83   :  { %2388 = vbcast.lane.b32.xlu1 %v8099_v51, 360  ;;  %2352 = vbcast.lane.b32.xlu0 %v8088_v3, 352 }
 0xa85   :  { %v8281_v37 = vpop.permute.xlu1 %1956  ;;  %v8283_v44 = vpop.permute.xlu0 %1952 }
 0xa86   :  { %11351 = vst [vmem:[#allocation54_spill] sm:$0xff] %v8281_v37  ;;  %11352 = vst [vmem:[#allocation55_spill] sm:$0xff] %v8283_v44 }
 0xa87   :  { %2508 = vbcast.lane.b32.xlu1 %v8145_v14, 344  ;;  %2448 = vbcast.lane.b32.xlu0 %v8121_v25, 352 }
 0xa89   :  { %v8287_v55 = vpop.permute.xlu1 %1933  ;;  %v8289_v41 = vpop.permute.xlu0 %1906 }
 0xa8a   :  { %11353 = vst [vmem:[#allocation56_spill] sm:$0xff] %v8287_v55  ;;  %11354 = vst [vmem:[#allocation57_spill] sm:$0xff] %v8289_v41 }
 0xa8b   :  { %2420 = vbcast.lane.b32.xlu1 %v8109_v24, 360  ;;  %2568 = vbcast.lane.b32.xlu0 %v8173_v7, 336 }
 0xa8d   :  { %v8293_v10 = vpop.permute.xlu1 %1910  ;;  %v8295_v40 = vpop.permute.xlu0 %1960 }
 0xa8e   :  { %11355 = vst [vmem:[#allocation58_spill] sm:$0xff] %v8295_v40 }
 0xa8f   :  { %2540 = vbcast.lane.b32.xlu1 %v8157_v48, 344  ;;  %2480 = vbcast.lane.b32.xlu0 %v8133_v1, 352 }
 0xa90   :  { %v1469_v58 = vpop.f32.mrf.mxu1 }
 0xa91   :  { %v1470_v39 = vadd.f32 %v1469_v58, %v1399_v59  ;;  %v8302_v50 = vpop.permute.xlu1 %1964  ;;  %v8304_v46 = vpop.permute.xlu0 %1937 }
 0xa92   :  { %v6614_v47 = vpop.f32.mrf.mxu1 }
 0xa93   :  { %v1474_v16 = vmin.f32 %v1470_v39, 20.0  ;;  %2042 = vbcast.lane.b32.xlu1 %v8173_v7, 296  ;;  %2015 = vbcast.lane.b32.xlu0 %v8157_v48, 312  ;;  %vm1473_vm8 = vcmp.gt.f32.partialorder %v1470_v39, 20.0 }
 0xa95   :  { %v1475_v63 = vmul.f32 1.442695, %v1474_v16  ;;  %v8308_v32 = vpop.permute.xlu1 %1991  ;;  %v8310_v53 = vpop.permute.xlu0 %1987 }
 0xa97   :  { %6931 = vpow2.f32 %v1475_v63  ;;  %2392 = vbcast.lane.b32.xlu1 %v8099_v51, 368  ;;  %2356 = vbcast.lane.b32.xlu0 %v8088_v3, 360 }
 0xa98   :  { %6933 = vpow2.f32 %v2852_v60 }
 0xa99   :  { %v8314_v58 = vpop.permute.xlu1 %1968  ;;  %v8316_v47 = vpop.permute.xlu0 %1941 }
 0xa9b   :  { %2512 = vbcast.lane.b32.xlu1 %v8145_v14, 352  ;;  %2452 = vbcast.lane.b32.xlu0 %v8121_v25, 360 }
 0xa9d   :  { %v8320_v35 = vpop.permute.xlu1 %2368  ;;  %v8322_v59 = vpop.permute.xlu0 %1995 }
 0xa9e   :  { %11356 = vst [vmem:[#allocation59_spill] sm:$0xff] %v8320_v35 }
 0xa9f   :  { %2424 = vbcast.lane.b32.xlu1 %v8109_v24, 368  ;;  %2572 = vbcast.lane.b32.xlu0 %v8173_v7, 344 }
 0xaa1   :  { %v8326_v16 = vpop.permute.xlu1 %2400  ;;  %v8328_v63 = vpop.permute.xlu0 %2372 }
 0xaa2   :  { %11357 = vst [vmem:[#allocation60_spill] sm:$0xff] %v8326_v16  ;;  %11358 = vst [vmem:[#allocation61_spill] sm:$0xff] %v8328_v63 }
 0xaa3   :  { %2544 = vbcast.lane.b32.xlu1 %v8157_v48, 352  ;;  %2484 = vbcast.lane.b32.xlu0 %v8133_v1, 360 }
 0xaa4   :  { %v6932_v60 = vpop.eup %6931 }
 0xaa5   :  { %v1477_v41 = vadd.f32 1.0, %v6932_v60  ;;  %v8332_v23 = vpop.permute.xlu1 %1945  ;;  %v8334_v49 = vpop.permute.xlu0 %2404  ;;  %v7446_v60 = vmov 1966171168  }
 0xaa6   :  { %11359 = vst [vmem:[#allocation62_spill] sm:$0xff] %v8334_v49  ;;  %v6934_v43 = vpop.eup %6933  ;;  %v1493_v19 = vunpack.c.l.s4 %v7446_v60  ;;  %v8424_v49 = vld [vmem:[%s11190_s9 + $0x90] sm:$0xff] }
 0xaa7   :  { %6935 = vlog2.f32 %v1477_v41  ;;  %2360 = vbcast.lane.b32.xlu1 %v8088_v3, 368  ;;  %2046 = vbcast.lane.b32.xlu0 %v8173_v7, 304  ;;  %v2854_v4 = vadd.f32 1.0, %v6934_v43 }
 0xaa8   :  { %v1494_v41 = vunpack.c.0.s8 %v1493_v19 }
 0xaa9   :  { %v8338_v55 = vpop.permute.xlu1 %1999  ;;  %v8340_v29 = vpop.permute.xlu0 %1972  ;;  %6937 = vrcp.f32 %v2854_v4 }
 0xaaa   :  { %v8357_v4 = vsub.s32 %v1494_v41, %v7765_v45 }
 0xaab   :  { %2456 = vbcast.lane.b32.xlu1 %v8121_v25, 368  ;;  %2396 = vbcast.lane.b32.xlu0 %v8099_v51, 376 }
 0xaac   :  { %11361 = vst [vmem:[#allocation64_spill] sm:$0xff] %v8357_v4 }
 0xaad   :  { %v8344_v52 = vpop.permute.xlu1 %2026  ;;  %v8346_v0 = vpop.permute.xlu0 %2022 }
 0xaaf   :  { %2576 = vbcast.lane.b32.xlu1 %v8173_v7, 352  ;;  %2516 = vbcast.lane.b32.xlu0 %v8145_v14, 360 }
 0xab1   :  { %v8350_v43 = vpop.permute.xlu1 %2340  ;;  %v8352_v38 = vpop.permute.xlu0 %2336 }
 0xab2   :  { %11360 = vst [vmem:[#allocation63_spill] sm:$0xff] %v8350_v43 }
 0xab3   :  { %2488 = vbcast.lane.b32.xlu1 %v8133_v1, 368  ;;  %2428 = vbcast.lane.b32.xlu0 %v8109_v24, 376 }
 0xab4   :  { %v6936_v51 = vpop.eup %6935 }
 0xab5   :  { %v1479_v60 = vmul.f32 0.6931472, %v6936_v51  ;;  %v8359_v8 = vpop.permute.xlu1 %2432  ;;  %v8361_v40 = vpop.permute.xlu0 %2376 }
 0xab6   :  { %11362 = vst [vmem:[#allocation65_spill] sm:$0xff] %v8359_v8  ;;  %11363 = vst [vmem:[#allocation66_spill] sm:$0xff] %v8361_v40  ;;  %v6938_v51 = vpop.eup %6937 }
 0xab7   :  { %v1480_v21 = vsel %vm1473_vm8, %v1470_v39, %v1479_v60  ;;  %2050 = vbcast.lane.b32.xlu1 %v8173_v7, 312  ;;  %2548 = vbcast.lane.b32.xlu0 %v8157_v48, 360  ;;  %v8376_v60 = vmul.f32 %v6938_v51, %v8053_v12 }
 0xab8   :  { %v1489_v19 = vmul.f32 %v1480_v21, %v8074_v61  ;;  %v1491_v57 = vcombine.high %v1480_v21, %v1480_v21  ;;  %v1498_v24 = vrot.slane %v1480_v21, %v8357_v4 }
 0xab9   :  { %v8367_v22 = vpop.permute.xlu1 %2408  ;;  %v8369_v41 = vpop.permute.xlu0 %2436 }
 0xaba   :  { %11364 = vst [vmem:[#allocation67_spill] sm:$0xff] %v8367_v22  ;;  %11365 = vst [vmem:[#allocation68_spill] sm:$0xff] %v8369_v41  ;;  %v1505_v45 = vrot.slane %v1491_v57, %v8357_v4  ;;  %v1506_v56 = vcombine.high %v1498_v24, %v1498_v24  ;;  %v1514_v26 = vrot.slane %v1498_v24, %v8357_v4 }
 0xabb   :  { %2460 = vbcast.lane.b32.xlu1 %v8121_v25, 376  ;;  %2364 = vbcast.lane.b32.xlu0 %v8088_v3, 376  ;;  %v2053_v39 = vcombine.high %v1489_v19, %v1489_v19  ;;  %v2060_v24 = vrot.slane %v1489_v19, %v8357_v4  ;;  %v8390_v3 = vld [vmem:[%s11190_s9 + $0x88] sm:$0xff] }
 0xabc   :  { %v1528_v21 = vrot.slane %v1506_v56, %v8357_v4  ;;  %v1507_v40 = vcombine.high %v1505_v45, %v1505_v45  ;;  %v8384_v57 = vrot.slane %v1514_v26, %v7933_v17  ;;  %v1536_v12 = vcombine.high %v1514_v26, %v1514_v26 }
 0xabd   :  { %v8379_v61 = vpop.permute.xlu1 %2468  ;;  %v8381_v22 = vpop.permute.xlu0 %2464  ;;  %v2067_v25 = vrot.slane %v2053_v39, %v8357_v4  ;;  %v1521_v56 = vrot.slane %v1505_v45, %v8357_v4  ;;  %v2068_v41 = vcombine.high %v2060_v24, %v2060_v24 }
 0xabe   :  { %11366 = vst [vmem:[#allocation69_spill] sm:$0xff] %v8379_v61  ;;  %11367 = vst [vmem:[#allocation70_spill] sm:$0xff] %v8381_v22  ;;  %v8397_v51 = vrot.slane %v1528_v21, %v7933_v17  ;;  %v1535_v44 = vrot.slane %v1507_v40, %v8357_v4  ;;  %v1580_v26 = vmul.f32 %v8384_v57, %v8390_v3 }
 0xabf   :  { %2580 = vbcast.lane.b32.xlu1 %v8173_v7, 360  ;;  %2520 = vbcast.lane.b32.xlu0 %v8145_v14, 368  ;;  %v1538_v8 = vcombine.high %v1528_v21, %v1528_v21  ;;  %v8413_v62 = vrot.slane %v1536_v12, %v7933_v17  ;;  %v2069_v61 = vcombine.high %v2067_v25, %v2067_v25 }
 0xac0   :  { %v2083_v40 = vrot.slane %v2067_v25, %v8357_v4  ;;  %v1537_v39 = vcombine.high %v1521_v56, %v1521_v56  ;;  %v2076_v21 = vrot.slane %v2060_v24, %v8357_v4  ;;  %v1588_v45 = vmul.f32 %v8397_v51, %v8390_v3 }
 0xac1   :  { %v8399_v22 = vpop.permute.xlu1 %2003  ;;  %v8401_v19 = vpop.permute.xlu0 %1976  ;;  %v1644_v30 = vmul.f32 1.442695, %v1580_v26  ;;  %v1539_v25 = vcombine.high %v1535_v44, %v1535_v44  ;;  %v2090_v16 = vrot.slane %v2068_v41, %v8357_v4  ;;  %v8436_v18 = vrot.slane %v1538_v8, %v7933_v17 }
 0xac2   :  { %11368 = vst [vmem:[#allocation71_spill] sm:$0xff] %v8401_v19  ;;  %v8439_v26 = vrot.slane %v1535_v44, %v7933_v17  ;;  %v1660_v63 = vmul.f32 1.442695, %v1588_v45  ;;  %v2099_v41 = vcombine.high %v2083_v40, %v2083_v40  ;;  %v1596_v24 = vmul.f32 %v8413_v62, %v8390_v3 }
 0xac3   :  { %2552 = vbcast.lane.b32.xlu1 %v8157_v48, 368  ;;  %2492 = vbcast.lane.b32.xlu0 %v8133_v1, 376  ;;  %v8431_v1 = vrot.slane %v1521_v56, %v7933_v17  ;;  %11371 = vst [vmem:[#allocation74_spill] sm:$0xff] %v8436_v18  ;;  %6939 = vpow2.f32 %v1644_v30  ;;  %v2097_v56 = vrot.slane %v2069_v61, %v8357_v4 }
 0xac4   :  { %v1581_v8 = vmul.f32 %v8384_v57, %v8424_v49  ;;  %v8454_v44 = vrot.slane %v1537_v39, %v7933_v17  ;;  %v2098_v30 = vcombine.high %v2076_v21, %v2076_v21  ;;  %v8457_v45 = vrot.slane %v2083_v40, %v7933_v17 }
 0xac5   :  { %v8426_v12 = vpop.permute.xlu1 %2344  ;;  %v8428_v37 = vpop.permute.xlu0 %2030  ;;  %v1589_v43 = vmul.f32 %v8397_v51, %v8424_v49  ;;  %v2100_v35 = vcombine.high %v2090_v16, %v2090_v16  ;;  %v8468_v39 = vrot.slane %v1539_v25, %v7933_v17  ;;  %6941 = vpow2.f32 %v1660_v63 }
 0xac6   :  { %11369 = vst [vmem:[#allocation72_spill] sm:$0xff] %v8426_v12  ;;  %11370 = vst [vmem:[#allocation73_spill] sm:$0xff] %v8428_v37  ;;  %v8444_v12 = vld [vmem:[%s11190_s9 + $0xc0] sm:$0xff]  ;;  %v1676_v37 = vmul.f32 1.442695, %v1596_v24  ;;  %v8480_v24 = vrot.slane %v2099_v41, %v7933_v17  ;;  %v8484_v25 = vrot.slane %v2090_v16, %v7933_v17  ;;  %v8487_v63 = vrot.slane %v2098_v30, %v7933_v17 }
 0xac7   :  { %2584 = vbcast.lane.b32.xlu1 %v8173_v7, 368  ;;  %2524 = vbcast.lane.b32.xlu0 %v8145_v14, 376  ;;  %11372 = vst [vmem:[#allocation75_spill] sm:$0xff] %v8454_v44  ;;  %v1646_v19 = vmul.f32 1.442695, %v1581_v8  ;;  %v1587_v14 = vmul.f32 %v8384_v57, %v8444_v12  ;;  %11375 = vst [vmem:[#allocation78_spill] sm:$0xff] %v8468_v39  ;;  %v8471_v44 = vrot.slane %v2076_v21, %v7933_v17 }
 0xac8   :  { %v1595_v40 = vmul.f32 %v8397_v51, %v8444_v12  ;;  %v1662_v21 = vmul.f32 1.442695, %v1589_v43  ;;  %v8498_v41 = vmul.f32 %v8457_v45, %v8304_v46  ;;  %v1603_v16 = vmul.f32 %v8413_v62, %v8444_v12 }
 0xac9   :  { %v8461_v61 = vpop.permute.xlu1 %2440  ;;  %v8463_v4 = vpop.permute.xlu0 %2380  ;;  %v1658_v8 = vmul.f32 1.442695, %v1587_v14  ;;  %6943 = vpow2.f32 %v1646_v19  ;;  %v1597_v19 = vmul.f32 %v8413_v62, %v8424_v49  ;;  %v11378_v46 = vrot.slane %v8376_v60, 2 }
 0xaca   :  { %11373 = vst [vmem:[#allocation76_spill] sm:$0xff] %v8461_v61  ;;  %11374 = vst [vmem:[#allocation77_spill] sm:$0xff] %v8463_v4  ;;  %v2101_v61 = vcombine.high %v2097_v56, %v2097_v56  ;;  %v8477_v4 = vrot.slane %v2097_v56, %v7933_v17  ;;  %v8494_v56 = vrot.slane %v2100_v35, %v7933_v17  ;;  %6945 = vpow2.f32 %v1676_v37  ;;  %v8511_v35 = vld [vmem:[%s11190_s9 + $0x98] sm:$0xff] }
 0xacb   :  { %2588 = vbcast.lane.b32.xlu1 %v8173_v7, 376  ;;  %2556 = vbcast.lane.b32.xlu0 %v8157_v48, 376  ;;  %11376 = vst [vmem:[#allocation79_spill] sm:$0xff] %v8498_v41  ;;  %v8502_v48 = vmul.f32 %v8457_v45, %v8316_v47  ;;  %6947 = vpow2.f32 %v1658_v8  ;;  %v1674_v43 = vmul.f32 1.442695, %v1595_v40  ;;  %v8525_v30 = vmul.f32 %v8480_v24, %v8308_v32 }
 0xacc   :  { %v8517_v47 = vrot.slane %v2101_v61, %v7933_v17  ;;  %v8521_v37 = vmul.f32 %v8477_v4, %v8302_v50  ;;  %v8529_v14 = vmul.f32 %v8480_v24, %v8310_v53  ;;  %v11382_v40 = vrot.slane %v8376_v60, 1 }
 0xacd   :  { %v8489_v39 = vpop.permute.xlu1 %2500  ;;  %v8491_v7 = vpop.permute.xlu0 %2496  ;;  %11377 = vst [vmem:[#allocation80_spill] sm:$0xff] %v8502_v48  ;;  %11380 = vst [vmem:[#allocation82_spill] sm:$0xff] %v8525_v30  ;;  %v8536_v61 = vmul.f32 %v8477_v4, %v8314_v58  ;;  %6949 = vpow2.f32 %v1662_v21  ;;  %v1678_v8 = vmul.f32 1.442695, %v1597_v19  ;;  %v1604_v50 = vmul.f32 %v8436_v18, %v8390_v3 }
 0xace   :  { %11379 = vst [vmem:[#allocation81_spill] sm:$0xff] %v8521_v37  ;;  %11381 = vst [vmem:[#allocation83_spill] sm:$0xff] %v8529_v14  ;;  %v2142_v53 = vmul.f32 %v8471_v44, %v8181_v11  ;;  %v2150_v17 = vmul.f32 %v8484_v25, %v8193_v34  ;;  %v1590_v58 = vmul.f32 %v8397_v51, %v8511_v35  ;;  %6951 = vpow2.f32 %v1674_v43 }
 0xacf   :  { %2870 = vrot.lane.b32.xlu1 %v11378_v46, %s7444_s29  ;;  %2868 = vrot.lane.b32.xlu0 %v11382_v40, %s7444_s29  ;;  %11383 = vst [vmem:[#allocation84_spill] sm:$0xff] %v8536_v61  ;;  %v1582_v40 = vmul.f32 %v8384_v57, %v8511_v35  ;;  %v8554_v21 = vmul.f32 %v8480_v24, %v8322_v59  ;;  %v1690_v19 = vmul.f32 1.442695, %v1603_v16  ;;  %v1692_v48 = vmul.f32 1.442695, %v1604_v50 }
 0xad0   :  { %v11387_v41 = vrot.slane %v8376_v60, 3  ;;  %v6940_v11 = vpop.eup %6939  ;;  %v8561_v34 = vmul.f32 %v8487_v63, %v8211_v15  ;;  %v1611_v61 = vmul.f32 %v8436_v18, %v8444_v12  ;;  %6953 = vpow2.f32 %v1678_v8 }
 0xad1   :  { %v8540_v46 = vpop.permute.xlu1 %2472  ;;  %v8542_v32 = vpop.permute.xlu0 %2412  ;;  %11386 = vst [vmem:[#allocation87_spill] sm:$0xff] %v8554_v21  ;;  %v1648_v37 = vmul.f32 1.442695, %v1582_v40  ;;  %v2206_v59 = vmul.f32 0.0, %v6940_v11  ;;  %v1619_v16 = vmul.f32 %v8431_v1, %v8444_v12  ;;  %6955 = vpow2.f32 %v1692_v48 }
 0xad2   :  { %11384 = vst [vmem:[#allocation85_spill] sm:$0xff] %v8540_v46  ;;  %11385 = vst [vmem:[#allocation86_spill] sm:$0xff] %v8542_v32  ;;  %v2143_v50 = vmul.f32 %v8471_v44, %v8179_v9  ;;  %v1664_v8 = vmul.f32 1.442695, %v1590_v58  ;;  %v1613_v40 = vmul.f32 %v8431_v1, %v8424_v49  ;;  %v1598_v48 = vmul.f32 %v8413_v62, %v8511_v35 }
 0xad3   :  { %2872 = vrot.lane.b32.xlu1 %v11387_v41, %s7444_s29  ;;  %2866 = vrot.lane.b32.xlu0 %v8376_v60, %s7444_s29  ;;  %v1605_v41 = vmul.f32 %v8436_v18, %v8424_v49  ;;  %6957 = vpow2.f32 %v1648_v37  ;;  %v8579_v11 = vadd.f32 %v2206_v59, %v2142_v53  ;;  %v2151_v9 = vmul.f32 %v8484_v25, %v8191_v28  ;;  %v8599_v28 = vld [vmem:[%s11190_s9 + $0xa0] sm:$0xff] }
 0xad4   :  { %6959 = vpow2.f32 %v1690_v19  ;;  %v1706_v37 = vmul.f32 1.442695, %v1611_v61  ;;  %v2149_v58 = vmul.f32 %v8471_v44, %v8221_v31  ;;  %v1612_v53 = vmul.f32 %v8431_v1, %v8390_v3 }
 0xad5   :  { %v8571_v43 = vpop.permute.xlu1 %2532  ;;  %v8573_v15 = vpop.permute.xlu0 %2528  ;;  %v1694_v21 = vmul.f32 1.442695, %v1605_v41  ;;  %v11391_v19 = vrot.slane %v8376_v60, 4  ;;  %v1722_v41 = vmul.f32 1.442695, %v1619_v16  ;;  %v2157_v32 = vmul.f32 %v8484_v25, %v8245_v2 }
 0xad6   :  { %11388 = vst [vmem:[#allocation88_spill] sm:$0xff] %v8571_v43  ;;  %11389 = vst [vmem:[#allocation89_spill] sm:$0xff] %v8573_v15  ;;  %v11390_v43 = vrot.slane %v8376_v60, 5  ;;  %v6942_v15 = vpop.eup %6941  ;;  %v8615_v14 = vmul.f32 %v8494_v56, %v8293_v10  ;;  %v1680_v46 = vmul.f32 1.442695, %v1598_v48  ;;  %v11394_v10 = vrot.slane %v8376_v60, 6 }
 0xad7   :  { %2874 = vrot.lane.b32.xlu0 %v11391_v19, %s7444_s29  ;;  %v2222_v59 = vmul.f32 %v6942_v15, %v8579_v11  ;;  %6961 = vpow2.f32 %v1694_v21  ;;  %v6944_v30 = vpop.eup %6943  ;;  %v8609_v19 = vmul.f32 %v8487_v63, %v8269_v33  ;;  %v1708_v21 = vmul.f32 1.442695, %v1612_v53 }
 0xad8   :  { %2876 = vrot.lane.b32.xlu1 %v11390_v43, %s7444_s29  ;;  %v1710_v43 = vmul.f32 1.442695, %v1613_v40  ;;  %6963 = vpow2.f32 %v1664_v8  ;;  %v6946_v16 = vpop.eup %6945  ;;  %v2207_v40 = vmul.f32 0.0, %v6944_v30  ;;  %v8622_v33 = vmul.f32 %v8457_v45, %v8332_v23 }
 0xad9   :  { %v8601_v61 = vpop.permute.xlu1 %2007  ;;  %v8603_v31 = vpop.permute.xlu0 %1980  ;;  %v8611_v15 = vadd.f32 %v2222_v59, %v2150_v17  ;;  %6965 = vpow2.f32 %v1706_v37  ;;  %v2159_v17 = vmul.f32 %v8487_v63, %v8209_v27  ;;  %v1583_v30 = vmul.f32 %v8384_v57, %v8599_v28 }
 0xada   :  { %11392 = vst [vmem:[#allocation90_spill] sm:$0xff] %v8603_v31  ;;  %v11393_v31 = vrot.slane %v8376_v60, 7  ;;  %v6948_v2 = vpop.eup %6947  ;;  %v8632_v48 = vadd.f32 %v2207_v40, %v2143_v50  ;;  %6967 = vpow2.f32 %v1710_v43  ;;  %v8640_v27 = vmul.f32 %v8480_v24, %v8338_v55 }
 0xadb   :  { %2878 = vrot.lane.b32.xlu0 %v11394_v10, %s7444_s29  ;;  %v2238_v8 = vmul.f32 %v6946_v16, %v8611_v15  ;;  %v2213_v53 = vmul.f32 0.0, %v6948_v2  ;;  %v6950_v59 = vpop.eup %6949  ;;  %6969 = vpow2.f32 %v1708_v21  ;;  %v1650_v60 = vmul.f32 1.442695, %v1583_v30 }
 0xadc   :  { %2880 = vrot.lane.b32.xlu1 %v11393_v31, %s7444_s29  ;;  %11395 = vst [vmem:[#allocation91_spill] sm:$0xff] %v8640_v27  ;;  %v8644_v31 = vmul.f32 %v8477_v4, %v8340_v29  ;;  %v2223_v50 = vmul.f32 %v6950_v59, %v8632_v48  ;;  %6971 = vpow2.f32 %v1680_v46  ;;  %v1606_v43 = vmul.f32 %v8436_v18, %v8511_v35  ;;  %v6952_v40 = vpop.eup %6951  ;;  %v11406_v27 = vld [vmem:[#allocation71_spill] sm:$0xff] }
 0xadd   :  { %v8634_v37 = vpop.permute.xlu1 %2348  ;;  %v8636_v23 = vpop.permute.xlu0 %2034  ;;  %v8647_v16 = vadd.f32 %v2213_v53, %v2149_v58  ;;  %v8652_v2 = vadd.f32 %v2238_v8, %v8561_v34  ;;  %v8656_v55 = vmul.f32 %v8517_v47, %v8344_v52  ;;  %v8660_v29 = vmul.f32 %v8517_v47, %v8346_v0 }
 0xade   :  { %11396 = vst [vmem:[#allocation92_spill] sm:$0xff] %v8644_v31  ;;  %v2166_v58 = vmul.f32 %v8494_v56, %v8235_v54  ;;  %v6954_v21 = vpop.eup %6953  ;;  %v2231_v46 = vadd.f32 %v2223_v50, %v2151_v9  ;;  %6973 = vpow2.f32 %v1722_v41  ;;  %v2144_v34 = vmul.f32 %v8471_v44, %v8187_v20 }
 0xadf   :  { %11397 = vst [vmem:[#allocation93_spill] sm:$0xff] %v8647_v16  ;;  %11398 = vst [vmem:[#allocation94_spill] sm:$0xff] %v8656_v55  ;;  %v2229_v30 = vmul.f32 %v6952_v40, %v8647_v16  ;;  %v6956_v52 = vpop.eup %6955  ;;  %v2152_v0 = vmul.f32 %v8484_v25, %v8197_v13  ;;  %v8675_v53 = vmul.f32 %v8487_v63, %v8223_v5  ;;  %6975 = vpow2.f32 %v1650_v60 }
 0xae0   :  { %11399 = vst [vmem:[#allocation95_spill] sm:$0xff] %v8660_v29  ;;  %v2167_v54 = vmul.f32 %v8494_v56, %v8233_v6  ;;  %v6958_v9 = vpop.eup %6957  ;;  %v2239_v20 = vmul.f32 %v6954_v21, %v2231_v46  ;;  %v1696_v59 = vmul.f32 1.442695, %v1606_v43  ;;  %v1591_v50 = vmul.f32 %v8397_v51, %v8599_v28 }
 0xae1   :  { %v8667_v10 = vpop.permute.xlu1 %2444  ;;  %v8669_v8 = vpop.permute.xlu0 %2384  ;;  %v8679_v41 = vadd.f32 %v2229_v30, %v2157_v32  ;;  %v2254_v31 = vmul.f32 %v6956_v52, %v8652_v2  ;;  %v2208_v13 = vmul.f32 0.0, %v6958_v9  ;;  %v2175_v5 = vmul.f32 %v8457_v45, %v8257_v36 }
 0xae2   :  { %11400 = vst [vmem:[#allocation96_spill] sm:$0xff] %v8667_v10  ;;  %11401 = vst [vmem:[#allocation97_spill] sm:$0xff] %v8669_v8  ;;  %v6960_v40 = vpop.eup %6959  ;;  %v1621_v16 = vmul.f32 %v8439_v26, %v8424_v49  ;;  %v2247_v60 = vadd.f32 %v2239_v20, %v2159_v17  ;;  %v2590_v32 = vmul.f32 %v8352_v38, %v8579_v11  ;;  %6977 = vpow2.f32 %v1696_v59  ;;  %v11412_v8 = vld [vmem:[#allocation63_spill] sm:$0xff] }
 0xae3   :  { %11402 = vst [vmem:[#allocation98_spill] sm:$0xff] %v8679_v41  ;;  %v2245_v6 = vmul.f32 %v6960_v40, %v8679_v41  ;;  %v2174_v43 = vmul.f32 %v8457_v45, %v8259_v42  ;;  %v8697_v9 = vadd.f32 %v2208_v13, %v2144_v34  ;;  %v8701_v36 = vmul.f32 %v8480_v24, %v8399_v22  ;;  %v11409_v41 = vld [vmem:[#allocation73_spill] sm:$0xff] }
 0xae4   :  { %v6962_v52 = vpop.eup %6961  ;;  %v8705_v17 = vmul.f32 %v8477_v4, %v11406_v27  ;;  %v1620_v38 = vmul.f32 %v8439_v26, %v8390_v3  ;;  %v1666_v40 = vmul.f32 1.442695, %v1591_v50  ;;  %v2262_v34 = vadd.f32 %v2254_v31, %v2166_v58  ;;  %v11415_v50 = vld [vmem:[#allocation61_spill] sm:$0xff] }
 0xae5   :  { %v8693_v21 = vpop.permute.xlu1 %2560  ;;  %v8695_v30 = vpop.permute.xlu0 %2504  ;;  %11405 = vst [vmem:[#allocation101_spill] sm:$0xff] %v8701_v36  ;;  %v8710_v42 = vadd.f32 %v2245_v6, %v8609_v19  ;;  %v2255_v20 = vmul.f32 %v6962_v52, %v2247_v60  ;;  %v8715_v22 = vmul.f32 %v8517_v47, %v11409_v41  ;;  %v1726_v36 = vmul.f32 1.442695, %v1621_v16 }
 0xae6   :  { %11403 = vst [vmem:[#allocation99_spill] sm:$0xff] %v8693_v21  ;;  %11404 = vst [vmem:[#allocation100_spill] sm:$0xff] %v8695_v30  ;;  %v6964_v11 = vpop.eup %6963  ;;  %v2591_v21 = vmul.f32 %v11412_v8, %v8632_v48  ;;  %v2654_v19 = vsel %vm313_vm2, %v2590_v32, 0.0  ;;  %v2599_v52 = vmul.f32 %v11415_v50, %v2231_v46  ;;  %6979 = vpow2.f32 %v1666_v40  ;;  %v11417_v48 = vld [vmem:[#allocation36_spill] sm:$0xff] }
 0xae7   :  { %11407 = vst [vmem:[#allocation71_spill] sm:$0xff] %v8705_v17  ;;  %11408 = vst [vmem:[#allocation102_spill] sm:$0xff] %v8710_v42  ;;  %v2224_v13 = vmul.f32 %v6964_v11, %v8697_v9  ;;  %v6966_v27 = vpop.eup %6965  ;;  %v11411_v17 = vld [vmem:[#allocation59_spill] sm:$0xff]  ;;  %v2263_v6 = vadd.f32 %v2255_v20, %v2167_v54  ;;  %v11416_v11 = vld [vmem:[#allocation46_spill] sm:$0xff]  ;;  %v2145_v8 = vmul.f32 %v8471_v44, %v11417_v48  ;;  %6981 = vpow2.f32 %v1726_v36 }
 0xae8   :  { %11410 = vst [vmem:[#allocation73_spill] sm:$0xff] %v8715_v22  ;;  %v2598_v30 = vmul.f32 %v11411_v17, %v8611_v15  ;;  %v6968_v58 = vpop.eup %6967  ;;  %v8729_v16 = vmul.f32 %v8494_v56, %v11416_v11  ;;  %v1724_v22 = vmul.f32 1.442695, %v1620_v38  ;;  %v2261_v17 = vmul.f32 %v6966_v27, %v8710_v42  ;;  %v11418_v20 = vld [vmem:[#allocation60_spill] sm:$0xff]  ;;  %v11419_v27 = vld [vmem:[#allocation38_spill] sm:$0xff] }
 0xae9   :  { %v8722_v59 = vpop.permute.xlu1 %2416  ;;  %v8724_v31 = vpop.permute.xlu0 %2564  ;;  %v2232_v41 = vadd.f32 %v2224_v13, %v2152_v0  ;;  %v1614_v54 = vmul.f32 %v8431_v1, %v8511_v35  ;;  %v2606_v46 = vmul.f32 %v11418_v20, %v8652_v2  ;;  %v2271_v0 = vmul.f32 %v6968_v58, %v2263_v6  ;;  %v11422_v2 = vld [vmem:[#allocation62_spill] sm:$0xff] }
 0xaea   :  { %11413 = vst [vmem:[#allocation59_spill] sm:$0xff] %v8722_v59  ;;  %11414 = vst [vmem:[#allocation63_spill] sm:$0xff] %v8724_v31  ;;  %v6970_v15 = vpop.eup %6969  ;;  %v2675_v50 = vsel %vm313_vm2, %v2598_v30, 0.0  ;;  %v2655_v38 = vsel %vm313_vm2, %v2591_v21, 0.0  ;;  %v8742_v40 = vmul.f32 %v8484_v25, %v11419_v27  ;;  %v2676_v59 = vsel %vm313_vm2, %v2599_v52, 0.0  ;;  %v11426_v27 = vld [vmem:[#allocation68_spill] sm:$0xff] }
 0xaeb   :  { %v6972_v32 = vpop.eup %6971  ;;  %v2270_v13 = vmul.f32 %v6970_v15, %v2262_v34  ;;  %v2607_v58 = vmul.f32 %v11422_v2, %v2247_v60  ;;  %v11423_v15 = vld [vmem:[#allocation54_spill] sm:$0xff]  ;;  %6983 = vpow2.f32 %v1724_v22  ;;  %v8755_v30 = vadd.f32 %v2261_v17, %v8615_v14 }
 0xaec   :  { %v2240_v11 = vmul.f32 %v6972_v32, %v2232_v41  ;;  %v6974_v31 = vpop.eup %6973  ;;  %v8752_v36 = vmul.f32 %v8477_v4, %v11423_v15  ;;  %v11425_v32 = vld [vmem:[#allocation65_spill] sm:$0xff]  ;;  %v1712_v55 = vmul.f32 1.442695, %v1614_v54  ;;  %v2656_v29 = vadd.f32 %v2655_v38, %v2654_v19  ;;  %v11427_v15 = vld [vmem:[#allocation55_spill] sm:$0xff]  ;;  %v11428_v54 = vld [vmem:[#allocation66_spill] sm:$0xff] }
 0xaed   :  { %v8744_v48 = vpop.permute.xlu1 %2536  ;;  %v8746_v42 = vpop.permute.xlu0 %2476  ;;  %11424 = vst [vmem:[#allocation36_spill] sm:$0xff] %v8755_v30  ;;  %v2614_v20 = vmul.f32 %v11425_v32, %v2262_v34  ;;  %v2279_v52 = vadd.f32 %v2271_v0, %v2175_v5  ;;  %v2278_v10 = vadd.f32 %v2270_v13, %v2174_v43  ;;  %v2677_v60 = vadd.f32 %v2676_v59, %v2675_v50  ;;  %v11429_v5 = vld [vmem:[#allocation72_spill] sm:$0xff]  ;;  %v11430_v50 = vld [vmem:[#allocation69_spill] sm:$0xff] }
 0xaee   :  { %11420 = vst [vmem:[#allocation61_spill] sm:$0xff] %v8744_v48  ;;  %11421 = vst [vmem:[#allocation46_spill] sm:$0xff] %v8746_v42  ;;  %v6976_v21 = vpop.eup %6975  ;;  %v2615_v48 = vmul.f32 %v11426_v27, %v2263_v6  ;;  %v2696_v42 = vsel %vm313_vm2, %v2606_v46, 0.0  ;;  %v2248_v2 = vadd.f32 %v2240_v11, %v8675_v53  ;;  %v8763_v22 = vmul.f32 %v8477_v4, %v11427_v15  ;;  %v11431_v11 = vld [vmem:[#allocation70_spill] sm:$0xff] }
 0xaef   :  { %v1599_v14 = vmul.f32 %v8413_v62, %v8599_v28  ;;  %v2697_v6 = vsel %vm313_vm2, %v2607_v58, 0.0  ;;  %v2600_v19 = vmul.f32 %v11428_v54, %v2232_v41  ;;  %v2592_v43 = vmul.f32 %v11429_v5, %v8697_v9  ;;  %v6978_v13 = vpop.eup %6977  ;;  %v11432_v58 = vld [vmem:[#allocation75_spill] sm:$0xff] }
 0xaf0   :  { %v2209_v59 = vmul.f32 0.0, %v6976_v21  ;;  %v2277_v53 = vmul.f32 %v6974_v31, %v8755_v30  ;;  %v2717_v46 = vsel %vm313_vm2, %v2614_v20, 0.0  ;;  %v2718_v0 = vsel %vm313_vm2, %v2615_v48, 0.0  ;;  %v11433_v54 = vld [vmem:[#allocation67_spill] sm:$0xff] }
 0xaf1   :  { %v8767_v17 = vpop.permute.xlu1 %2038  ;;  %v8769_v34 = vpop.permute.xlu0 %2011  ;;  %6985 = vpow2.f32 %v1712_v55  ;;  %v2623_v38 = vmul.f32 %v11430_v50, %v2279_v52  ;;  %v2622_v32 = vmul.f32 %v11431_v11, %v2278_v10  ;;  %v1682_v27 = vmul.f32 1.442695, %v1599_v14 }
 0xaf2   :  { %v1628_v41 = vmul.f32 %v11432_v58, %v8390_v3  ;;  %v2698_v15 = vadd.f32 %v2697_v6, %v2696_v42  ;;  %v2608_v9 = vmul.f32 %v11433_v54, %v2248_v2  ;;  %v2256_v21 = vmul.f32 %v6978_v13, %v2248_v2 }
 0xaf3   :  { %v1629_v31 = vmul.f32 %v11432_v58, %v8424_v49  ;;  %v2678_v55 = vsel %vm313_vm2, %v2600_v19, 0.0  ;;  %v2657_v5 = vsel %vm313_vm2, %v2592_v43, 0.0  ;;  %v2217_v50 = vadd.f32 %v2209_v59, %v2145_v8  ;;  %v6980_v11 = vpop.eup %6979  ;;  %v8807_v8 = vld [vmem:[%s11190_s9 + $0xa8] sm:$0xff] }
 0xaf4   :  { %v1627_v14 = vmul.f32 %v8439_v26, %v8444_v12  ;;  %v8794_v42 = vadd.f32 %v2277_v53, %v8622_v33  ;;  %v8796_v6 = vadd.f32 %v2678_v55, %v2677_v60  ;;  %v8798_v2 = vadd.f32 %v2718_v0, %v2717_v46  ;;  %v6982_v33 = vpop.eup %6981  ;;  %v11435_v53 = vld [vmem:[#allocation51_spill] sm:$0xff] }
 0xaf5   :  { %v8785_v20 = vpop.permute.xlu1 %2388  ;;  %v8787_v48 = vpop.permute.xlu0 %2352  ;;  %v8800_v13 = vadd.f32 %v2657_v5, %v2656_v29  ;;  %v2739_v54 = vsel %vm313_vm2, %v2623_v38, 0.0  ;;  %v2738_v19 = vsel %vm313_vm2, %v2622_v32, 0.0  ;;  %6987 = vpow2.f32 %v1682_v27 }
 0xaf6   :  { %11434 = vst [vmem:[#allocation60_spill] sm:$0xff] %v8794_v42  ;;  %v1740_v43 = vmul.f32 1.442695, %v1628_v41  ;;  %v2699_v60 = vsel %vm313_vm2, %v2608_v9, 0.0  ;;  %v2264_v59 = vadd.f32 %v2256_v21, %v8729_v16  ;;  %v2176_v29 = vmul.f32 %v8457_v45, %v11435_v53  ;;  %v11437_v16 = vld [vmem:[#allocation42_spill] sm:$0xff] }
 0xaf7   :  { %v1742_v46 = vmul.f32 1.442695, %v1629_v31  ;;  %v2225_v32 = vmul.f32 %v6980_v11, %v2217_v50  ;;  %v2287_v27 = vmul.f32 %v6982_v33, %v2279_v52  ;;  %v1738_v41 = vmul.f32 1.442695, %v1627_v14 }
 0xaf8   :  { %v1607_v55 = vmul.f32 %v8436_v18, %v8599_v28  ;;  %v6984_v5 = vpop.eup %6983  ;;  %v8819_v30 = vadd.f32 %v2699_v60, %v2698_v15  ;;  %v8821_v9 = vadd.f32 %v2739_v54, %v2738_v19  ;;  %v8825_v21 = vmul.f32 %v8487_v63, %v11437_v16  ;;  %v11438_v15 = vld [vmem:[#allocation78_spill] sm:$0xff]  ;;  %v11441_v16 = vld [vmem:[#allocation76_spill] sm:$0xff] }
 0xaf9   :  { %v8813_v0 = vpop.permute.xlu1 %2508  ;;  %v8815_v38 = vpop.permute.xlu0 %2448  ;;  %v1584_v31 = vmul.f32 %v8384_v57, %v8807_v8  ;;  %v2286_v53 = vmul.f32 %v6984_v5, %v2278_v10  ;;  %6989 = vpow2.f32 %v1740_v43  ;;  %v1592_v52 = vmul.f32 %v8397_v51, %v8807_v8 }
 0xafa   :  { %11436 = vst [vmem:[#allocation38_spill] sm:$0xff] %v8815_v38  ;;  %v1698_v11 = vmul.f32 1.442695, %v1607_v55  ;;  %6991 = vpow2.f32 %v1742_v46  ;;  %v1636_v33 = vmul.f32 %v11438_v15, %v8390_v3  ;;  %v1622_v54 = vmul.f32 %v8439_v26, %v8511_v35 }
 0xafb   :  { %v1652_v14 = vmul.f32 1.442695, %v1584_v31  ;;  %v2616_v38 = vmul.f32 %v11441_v16, %v2264_v59  ;;  %v2233_v10 = vadd.f32 %v2225_v32, %v8742_v40  ;;  %v2295_v43 = vadd.f32 %v2287_v27, %v8752_v36 }
 0xafc   :  { %6993 = vpow2.f32 %v1738_v41  ;;  %v8844_v46 = vmul.f32 %v8480_v24, %v8601_v61  ;;  %v1668_v3 = vmul.f32 1.442695, %v1592_v52  ;;  %v1728_v55 = vmul.f32 1.442695, %v1622_v54 }
 0xafd   :  { %v8835_v19 = vpop.permute.xlu1 %2420  ;;  %v8837_v60 = vpop.permute.xlu0 %2568  ;;  %6995 = vpow2.f32 %v1652_v14  ;;  %v2294_v31 = vadd.f32 %v2286_v53, %v8763_v22  ;;  %v1600_v16 = vmul.f32 %v8413_v62, %v8807_v8  ;;  %v1637_v40 = vmul.f32 %v11438_v15, %v8424_v49  ;;  %v11445_v22 = vld [vmem:[#allocation77_spill] sm:$0xff]  ;;  %v8864_v49 = vld [vmem:[%s11190_s9 + $0xb0] sm:$0xff] }
 0xafe   :  { %11439 = vst [vmem:[#allocation62_spill] sm:$0xff] %v8835_v19  ;;  %11440 = vst [vmem:[#allocation54_spill] sm:$0xff] %v8837_v60  ;;  %v6986_v5 = vpop.eup %6985  ;;  %6997 = vpow2.f32 %v1698_v11  ;;  %v1756_v19 = vmul.f32 1.442695, %v1636_v33  ;;  %v1630_v36 = vmul.f32 %v11432_v58, %v8511_v35  ;;  %v1615_v61 = vmul.f32 %v8431_v1, %v8599_v28 }
 0xaff   :  { %11442 = vst [vmem:[#allocation65_spill] sm:$0xff] %v8844_v46  ;;  %v2272_v60 = vmul.f32 %v6986_v5, %v2264_v59  ;;  %v2601_v41 = vmul.f32 %v11445_v22, %v2233_v10  ;;  %v2631_v53 = vmul.f32 %v8489_v39, %v2295_v43  ;;  %6999 = vpow2.f32 %v1728_v55 }
 0xb00   :  { %v1684_v11 = vmul.f32 1.442695, %v1600_v16  ;;  %v2593_v59 = vmul.f32 %v8634_v37, %v2217_v50  ;;  %7001 = vpow2.f32 %v1668_v3  ;;  %v1758_v52 = vmul.f32 1.442695, %v1637_v40  ;;  %v11447_v3 = vld [vmem:[#allocation90_spill] sm:$0xff] }
 0xb01   :  { %v8855_v32 = vpop.permute.xlu1 %2540  ;;  %v8857_v27 = vpop.permute.xlu0 %2480  ;;  %v1744_v14 = vmul.f32 1.442695, %v1630_v36  ;;  %v2720_v33 = vsel %vm313_vm2, %v2616_v38, 0.0  ;;  %v2630_v54 = vmul.f32 %v8491_v7, %v2294_v31  ;;  %7003 = vpow2.f32 %v1756_v19 }
 0xb02   :  { %11443 = vst [vmem:[#allocation68_spill] sm:$0xff] %v8855_v32  ;;  %11444 = vst [vmem:[#allocation55_spill] sm:$0xff] %v8857_v27  ;;  %v1714_v5 = vmul.f32 1.442695, %v1615_v61  ;;  %v6988_v22 = vpop.eup %6987  ;;  %v8870_v39 = vadd.f32 %v2720_v33, %v8798_v2  ;;  %v2280_v55 = vadd.f32 %v2272_v60, %v2176_v29  ;;  %7005 = vpow2.f32 %v1684_v11  ;;  %v11449_v61 = vld [vmem:[#allocation85_spill] sm:$0xff] }
 0xb03   :  { %v1585_v16 = vmul.f32 %v8384_v57, %v8864_v49  ;;  %v2760_v50 = vsel %vm313_vm2, %v2631_v53, 0.0  ;;  %v2241_v38 = vmul.f32 %v6988_v22, %v2233_v10  ;;  %v8881_v7 = vmul.f32 %v8477_v4, %v11447_v3  ;;  %v11453_v3 = vld [vmem:[#allocation37_spill] sm:$0xff] }
 0xb04   :  { %7007 = vpow2.f32 %v1758_v52  ;;  %v2680_v2 = vsel %vm313_vm2, %v2601_v41, 0.0  ;;  %v2659_v29 = vsel %vm313_vm2, %v2593_v59, 0.0  ;;  %v2759_v40 = vsel %vm313_vm2, %v2630_v54, 0.0  ;;  %v11452_v54 = vld [vmem:[#allocation47_spill] sm:$0xff] }
 0xb05   :  { %v8874_v46 = vpop.permute.xlu1 %2042  ;;  %v8876_v37 = vpop.permute.xlu0 %2015  ;;  %7009 = vpow2.f32 %v1744_v14  ;;  %v1654_v19 = vmul.f32 1.442695, %v1585_v16  ;;  %v8886_v60 = vadd.f32 %v2680_v2, %v8796_v6  ;;  %v8891_v36 = vmul.f32 %v8517_v47, %v8636_v23 }
 0xb06   :  { %11446 = vst [vmem:[#allocation66_spill] sm:$0xff] %v8876_v37  ;;  %7011 = vpow2.f32 %v1714_v5  ;;  %v6990_v10 = vpop.eup %6989  ;;  %v2624_v53 = vmul.f32 %v11449_v61, %v2280_v55  ;;  %v1593_v41 = vmul.f32 %v8397_v51, %v8864_v49  ;;  %v1623_v11 = vmul.f32 %v8439_v26, %v8599_v28 }
 0xb07   :  { %11448 = vst [vmem:[#allocation72_spill] sm:$0xff] %v8891_v36  ;;  %7013 = vpow2.f32 %v1654_v19  ;;  %v6992_v52 = vpop.eup %6991  ;;  %v2249_v14 = vadd.f32 %v2241_v38, %v8825_v21  ;;  %v2302_v23 = vmul.f32 %v6990_v10, %v2294_v31  ;;  %v8904_v33 = vadd.f32 %v2659_v29, %v8800_v13  ;;  %v11454_v19 = vld [vmem:[#allocation40_spill] sm:$0xff]  ;;  %v11455_v21 = vld [vmem:[#allocation58_spill] sm:$0xff] }
 0xb08   :  { %v2169_v5 = vmul.f32 %v8494_v56, %v11452_v54  ;;  %v2303_v16 = vmul.f32 %v6992_v52, %v2295_v43  ;;  %v2146_v2 = vmul.f32 %v8471_v44, %v11453_v3  ;;  %v2154_v61 = vmul.f32 %v8484_v25, %v11454_v19  ;;  %v11456_v13 = vld [vmem:[#allocation44_spill] sm:$0xff] }
 0xb09   :  { %v8898_v59 = vpop.permute.xlu1 %2392  ;;  %v8900_v6 = vpop.permute.xlu0 %2356  ;;  %v1730_v36 = vmul.f32 1.442695, %v1623_v11  ;;  %v8912_v27 = vadd.f32 %v2760_v50, %v2759_v40  ;;  %v2184_v31 = vmul.f32 %v8477_v4, %v11455_v21  ;;  %v8918_v38 = vmul.f32 %v8487_v63, %v11456_v13  ;;  %v11457_v54 = vld [vmem:[#allocation52_spill] sm:$0xff]  ;;  %v11460_v4 = vld [vmem:[#allocation83_spill] sm:$0xff] }
 0xb0a   :  { %11450 = vst [vmem:[#allocation69_spill] sm:$0xff] %v8898_v59  ;;  %11451 = vst [vmem:[#allocation70_spill] sm:$0xff] %v8900_v6  ;;  %v6994_v22 = vpop.eup %6993  ;;  %v1608_v43 = vmul.f32 %v8436_v18, %v8807_v8  ;;  %v2741_v10 = vsel %vm313_vm2, %v2624_v53, 0.0  ;;  %v2177_v11 = vmul.f32 %v8457_v45, %v11457_v54  ;;  %v1670_v3 = vmul.f32 1.442695, %v1593_v41  ;;  %v11462_v6 = vld [vmem:[#allocation86_spill] sm:$0xff] }
 0xb0b   :  { %v6996_v59 = vpop.eup %6995  ;;  %v2310_v19 = vadd.f32 %v2302_v23, %v11460_v4  ;;  %v8932_v13 = vmul.f32 %v8517_v47, %v8767_v17  ;;  %7015 = vpow2.f32 %v1730_v36  ;;  %v2609_v53 = vmul.f32 %v11462_v6, %v2249_v14 }
 0xb0c   :  { %v6998_v29 = vpop.eup %6997  ;;  %v2210_v52 = vmul.f32 0.0, %v6996_v59  ;;  %v11463_v59 = vld [vmem:[#allocation82_spill] sm:$0xff]  ;;  %v8938_v41 = vmul.f32 %v8480_v24, %v8769_v34  ;;  %v2293_v23 = vmul.f32 %v6994_v22, %v8794_v42  ;;  %v1700_v17 = vmul.f32 1.442695, %v1608_v43 }
 0xb0d   :  { %v8925_v50 = vpop.permute.xlu1 %2512  ;;  %v8927_v40 = vpop.permute.xlu0 %2452  ;;  %v2257_v21 = vmul.f32 %v6998_v29, %v2249_v14  ;;  %11461 = vst [vmem:[#allocation51_spill] sm:$0xff] %v8932_v13  ;;  %v2311_v37 = vadd.f32 %v2303_v16, %v11463_v59  ;;  %7017 = vpow2.f32 %v1670_v3  ;;  %v11465_v13 = vld [vmem:[#allocation39_spill] sm:$0xff]  ;;  %v1601_v14 = vmul.f32 %v8413_v62, %v8864_v49  ;;  %v11469_v3 = vld [vmem:[#allocation88_spill] sm:$0xff] }
 0xb0e   :  { %11458 = vst [vmem:[#allocation75_spill] sm:$0xff] %v8925_v50  ;;  %11459 = vst [vmem:[#allocation67_spill] sm:$0xff] %v8927_v40  ;;  %v7000_v32 = vpop.eup %6999  ;;  %v2218_v18 = vadd.f32 %v2210_v52, %v2146_v2  ;;  %v8941_v50 = vadd.f32 %v2741_v10, %v8821_v9  ;;  %v2147_v6 = vmul.f32 %v8471_v44, %v11465_v13  ;;  %v11468_v52 = vld [vmem:[#allocation43_spill] sm:$0xff]  ;;  %v2701_v43 = vsel %vm313_vm2, %v2609_v53, 0.0 }
 0xb0f   :  { %11464 = vst [vmem:[#allocation42_spill] sm:$0xff] %v8938_v41  ;;  %v7002_v54 = vpop.eup %7001  ;;  %v2288_v29 = vmul.f32 %v7000_v32, %v2280_v55  ;;  %v2265_v9 = vadd.f32 %v2257_v21, %v2169_v5  ;;  %v8954_v32 = vmul.f32 %v8484_v25, %v11468_v52  ;;  %v1638_v55 = vmul.f32 %v11438_v15, %v8511_v35  ;;  %v11470_v35 = vld [vmem:[#allocation89_spill] sm:$0xff] }
 0xb10   :  { %v7004_v4 = vpop.eup %7003  ;;  %v2226_v36 = vmul.f32 %v7002_v54, %v2218_v18  ;;  %v2639_v13 = vmul.f32 %v11469_v3, %v2311_v37  ;;  %v8964_v5 = vadd.f32 %v2293_v23, %v8881_v7  ;;  %7019 = vpow2.f32 %v1700_v17 }
 0xb11   :  { %v8948_v16 = vpop.permute.xlu1 %2424  ;;  %v8950_v34 = vpop.permute.xlu0 %2572  ;;  %v2318_v10 = vmul.f32 %v7004_v4, %v2310_v19  ;;  %v2296_v54 = vadd.f32 %v2288_v29, %v2184_v31  ;;  %v1631_v21 = vmul.f32 %v11432_v58, %v8599_v28  ;;  %v2638_v52 = vmul.f32 %v11470_v35, %v2310_v19  ;;  %v11473_v29 = vld [vmem:[#allocation95_spill] sm:$0xff]  ;;  %v11475_v35 = vld [vmem:[#allocation49_spill] sm:$0xff] }
 0xb12   :  { %11466 = vst [vmem:[#allocation78_spill] sm:$0xff] %v8948_v16  ;;  %11467 = vst [vmem:[#allocation76_spill] sm:$0xff] %v8950_v34  ;;  %v7006_v2 = vpop.eup %7005  ;;  %v2234_v59 = vadd.f32 %v2226_v36, %v2154_v61  ;;  %v8961_v34 = vadd.f32 %v2701_v43, %v8819_v30  ;;  %v11471_v16 = vld [vmem:[#allocation96_spill] sm:$0xff]  ;;  %v1686_v3 = vmul.f32 1.442695, %v1601_v14  ;;  %v1616_v7 = vmul.f32 %v8431_v1, %v8807_v8 }
 0xb13   :  { %v7008_v22 = vpop.eup %7007  ;;  %v2617_v53 = vmul.f32 %v11471_v16, %v2265_v9  ;;  %v2326_v30 = vadd.f32 %v2318_v10, %v11473_v29  ;;  %v1760_v43 = vmul.f32 1.442695, %v1638_v55  ;;  %v2781_v17 = vsel %vm313_vm2, %v2639_v13, 0.0  ;;  %v11478_v13 = vld [vmem:[#allocation99_spill] sm:$0xff] }
 0xb14   :  { %v7010_v41 = vpop.eup %7009  ;;  %v2319_v42 = vmul.f32 %v7008_v22, %v2311_v37  ;;  %v2242_v40 = vmul.f32 %v7006_v2, %v2234_v59  ;;  %v8980_v37 = vmul.f32 %v8494_v56, %v11475_v35  ;;  %v11476_v22 = vld [vmem:[#allocation48_spill] sm:$0xff]  ;;  %v2780_v55 = vsel %vm313_vm2, %v2638_v52, 0.0 }
 0xb15   :  { %v7012_v4 = vpop.eup %7011  ;;  %v8970_v61 = vpop.permute.xlu0 %2484  ;;  %v2304_v19 = vmul.f32 %v7010_v41, %v2296_v54  ;;  %v8984_v10 = vmul.f32 %v8487_v63, %v11476_v22  ;;  %7021 = vpow2.f32 %v1686_v3  ;;  %v2722_v41 = vsel %vm313_vm2, %v2617_v53, 0.0  ;;  %v11481_v53 = vld [vmem:[#allocation100_spill] sm:$0xff] }
 0xb16   :  { %11472 = vst [vmem:[#allocation77_spill] sm:$0xff] %v8970_v61  ;;  %v7014_v31 = vpop.eup %7013  ;;  %v2273_v36 = vmul.f32 %v7012_v4, %v2265_v9  ;;  %v8975_v23 = vpop.permute.xlu1 %2544  ;;  %v1746_v9 = vmul.f32 1.442695, %v1631_v21  ;;  %v11477_v4 = vld [vmem:[#allocation94_spill] sm:$0xff]  ;;  %v2646_v35 = vmul.f32 %v11478_v13, %v2326_v30  ;;  %7023 = vpow2.f32 %v1760_v43  ;;  %v11480_v61 = vld [vmem:[#allocation87_spill] sm:$0xff] }
 0xb17   :  { %11474 = vst [vmem:[#allocation90_spill] sm:$0xff] %v8975_v23  ;;  %v2211_v16 = vmul.f32 0.0, %v7014_v31  ;;  %v2327_v29 = vadd.f32 %v2319_v42, %v11477_v4  ;;  %v2594_v23 = vmul.f32 %v8787_v48, %v2218_v18  ;;  %v2250_v21 = vadd.f32 %v2242_v40, %v8918_v38  ;;  %v9003_v18 = vld [vmem:[%s11190_s9 + $0xb8] sm:$0xff] }
 0xb18   :  { %v2281_v14 = vadd.f32 %v2273_v36, %v2177_v11  ;;  %v1716_v11 = vmul.f32 1.442695, %v1616_v7  ;;  %v7016_v31 = vpop.eup %7015  ;;  %v11479_v36 = vld [vmem:[#allocation97_spill] sm:$0xff]  ;;  %v8996_v52 = vadd.f32 %v2304_v19, %v11480_v61  ;;  %v2782_v48 = vadd.f32 %v2781_v17, %v2780_v55  ;;  %v11483_v38 = vld [vmem:[#allocation63_spill] sm:$0xff] }
 0xb19   :  { %v8989_v2 = vpop.permute.xlu0 %2046  ;;  %v2602_v22 = vmul.f32 %v11479_v36, %v2234_v59  ;;  %v8998_v42 = vadd.f32 %v2211_v16, %v2147_v6  ;;  %v2632_v3 = vmul.f32 %v11481_v53, %v2296_v54  ;;  %7025 = vpow2.f32 %v1746_v9  ;;  %v11482_v59 = vld [vmem:[#allocation59_spill] sm:$0xff]  ;;  %v11484_v61 = vld [vmem:[#allocation61_spill] sm:$0xff] }
 0xb1a   :  { %v2289_v30 = vmul.f32 %v7016_v31, %v2281_v14  ;;  %v9006_v43 = vpop.permute.xlu1 %2360  ;;  %v2610_v7 = vmul.f32 %v11482_v59, %v2250_v21  ;;  %v2647_v40 = vmul.f32 %v11483_v38, %v2327_v29  ;;  %v2640_v6 = vmul.f32 %v11484_v61, %v8996_v52  ;;  %v7018_v4 = vpop.eup %7017  ;;  %v11485_v29 = vld [vmem:[#allocation46_spill] sm:$0xff] }
 0xb1b   :  { %v2661_v19 = vsel %vm313_vm2, %v2594_v23, 0.0  ;;  %v9016_v17 = vadd.f32 %v2722_v41, %v8870_v39  ;;  %v2801_v54 = vsel %vm313_vm2, %v2646_v35, 0.0  ;;  %7027 = vpow2.f32 %v1716_v11  ;;  %v11486_v41 = vld [vmem:[#allocation81_spill] sm:$0xff] }
 0xb1c   :  { %v1586_v9 = vmul.f32 %v8384_v57, %v9003_v18  ;;  %v2682_v55 = vsel %vm313_vm2, %v2602_v22, 0.0  ;;  %v2625_v13 = vmul.f32 %v11485_v29, %v2281_v14  ;;  %v2227_v31 = vmul.f32 %v7018_v4, %v8998_v42 }
 0xb1d   :  { %v9013_v16 = vpop.permute.xlu0 %2396  ;;  %v1594_v23 = vmul.f32 %v8397_v51, %v9003_v18  ;;  %v2762_v36 = vsel %vm313_vm2, %v2632_v3, 0.0  ;;  %v9028_v39 = vadd.f32 %v2661_v19, %v8904_v33  ;;  %v2297_v35 = vadd.f32 %v2289_v30, %v11486_v41  ;;  %v7020_v53 = vpop.eup %7019 }
 0xb1e   :  { %v1656_v11 = vmul.f32 1.442695, %v1586_v9  ;;  %v2703_v57 = vsel %vm313_vm2, %v2610_v7, 0.0  ;;  %v2802_v22 = vsel %vm313_vm2, %v2647_v40, 0.0  ;;  %v2783_v14 = vsel %vm313_vm2, %v2640_v6, 0.0  ;;  %v9041_v61 = vpop.permute.xlu1 %2456 }
 0xb1f   :  { %v1635_v59 = vmul.f32 %v11432_v58, %v8444_v12  ;;  %v2683_v51 = vadd.f32 %v2682_v55, %v8886_v60  ;;  %v2763_v33 = vadd.f32 %v2762_v36, %v8912_v27  ;;  %v2633_v3 = vmul.f32 %v8813_v0, %v2297_v35  ;;  %v11487_v60 = vld [vmem:[#allocation56_spill] sm:$0xff]  ;;  %v11490_v36 = vld [vmem:[#allocation41_spill] sm:$0xff] }
 0xb20   :  { %v2258_v30 = vmul.f32 %v7020_v53, %v2250_v21  ;;  %v2743_v7 = vsel %vm313_vm2, %v2625_v13, 0.0  ;;  %v2235_v40 = vadd.f32 %v2227_v31, %v8954_v32  ;;  %7029 = vpow2.f32 %v1656_v11  ;;  %v11489_v31 = vld [vmem:[#allocation66_spill] sm:$0xff] }
 0xb21   :  { %v9036_v38 = vpop.permute.xlu0 %2516  ;;  %v1672_v6 = vmul.f32 1.442695, %v1594_v23  ;;  %v9046_v19 = vadd.f32 %v2703_v57, %v8961_v34  ;;  %v9048_v12 = vadd.f32 %v2802_v22, %v2801_v54  ;;  %v9050_v4 = vadd.f32 %v2783_v14, %v2782_v48  ;;  %v11491_v11 = vld [vmem:[#allocation38_spill] sm:$0xff] }
 0xb22   :  { %v2178_v27 = vmul.f32 %v8457_v45, %v11487_v60  ;;  %v2603_v0 = vmul.f32 %v8785_v20, %v2235_v40  ;;  %v9057_v21 = vmul.f32 %v8517_v47, %v8874_v46  ;;  %v1754_v9 = vmul.f32 1.442695, %v1635_v59  ;;  %v7022_v34 = vpop.eup %7021  ;;  %v11488_v20 = vld [vmem:[#allocation74_spill] sm:$0xff]  ;;  %v9079_v22 = vpop.permute.xlu1 %2576 }
 0xb23   :  { %v1624_v32 = vmul.f32 %v8439_v26, %v8807_v8  ;;  %v9064_v54 = vadd.f32 %v2743_v7, %v8941_v50  ;;  %v2764_v48 = vsel %vm313_vm2, %v2633_v3, 0.0  ;;  %v2266_v45 = vadd.f32 %v2258_v30, %v8980_v37  ;;  %v7024_v13 = vpop.eup %7023 }
 0xb24   :  { %v1609_v29 = vmul.f32 %v11488_v20, %v8864_v49  ;;  %v2243_v46 = vmul.f32 %v7022_v34, %v2235_v40  ;;  %v9072_v23 = vmul.f32 %v8480_v24, %v11489_v31  ;;  %7031 = vpow2.f32 %v1672_v6 }
 0xb25   :  { %v9061_v55 = vpop.permute.xlu0 %2428  ;;  %v2148_v41 = vmul.f32 %v8471_v44, %v11490_v36  ;;  %v2618_v50 = vmul.f32 %v11491_v11, %v2266_v45  ;;  %v1732_v53 = vmul.f32 1.442695, %v1624_v32  ;;  %v1602_v37 = vmul.f32 %v8413_v62, %v9003_v18  ;;  %v11493_v32 = vld [vmem:[#allocation73_spill] sm:$0xff] }
 0xb26   :  { %v1702_v57 = vmul.f32 1.442695, %v1609_v29  ;;  %v7026_v14 = vpop.eup %7025  ;;  %v2684_v59 = vsel %vm313_vm2, %v2603_v0, 0.0  ;;  %v9082_v3 = vadd.f32 %v2764_v48, %v2763_v33  ;;  %v2320_v24 = vmul.f32 %v7024_v13, %v8996_v52  ;;  %v11494_v29 = vld [vmem:[#allocation91_spill] sm:$0xff]  ;;  %v9109_v11 = vpop.permute.xlu1 %2488 }
 0xb27   :  { %7033 = vpow2.f32 %v1754_v9  ;;  %v2305_v30 = vmul.f32 %v7026_v14, %v2297_v35  ;;  %v1688_v44 = vmul.f32 1.442695, %v1602_v37  ;;  %v1639_v7 = vmul.f32 %v11438_v15, %v8599_v28  ;;  %v11492_v9 = vld [vmem:[#allocation62_spill] sm:$0xff]  ;;  %v11497_v14 = vld [vmem:[#allocation68_spill] sm:$0xff] }
 0xb28   :  { %7035 = vpow2.f32 %v1732_v53  ;;  %v7028_v6 = vpop.eup %7027  ;;  %v9090_v62 = vadd.f32 %v2243_v46, %v8984_v10  ;;  %v1632_v33 = vmul.f32 %v11432_v58, %v8807_v8  ;;  %v1617_v52 = vmul.f32 %v8431_v1, %v8864_v49  ;;  %v11495_v46 = vld [vmem:[#allocation70_spill] sm:$0xff] }
 0xb29   :  { %v9087_v40 = vpop.permute.xlu0 %2548  ;;  %7037 = vpow2.f32 %v1702_v57  ;;  %v2724_v35 = vsel %vm313_vm2, %v2618_v50, 0.0  ;;  %v2274_v60 = vmul.f32 %v7028_v6, %v2266_v45  ;;  %v1610_v28 = vmul.f32 %v11488_v20, %v9003_v18  ;;  %v11496_v57 = vld [vmem:[#allocation54_spill] sm:$0xff]  ;;  %v11498_v6 = vld [vmem:[#allocation55_spill] sm:$0xff] }
 0xb2a   :  { %7039 = vpow2.f32 %v1688_v44  ;;  %v9099_v0 = vadd.f32 %v2684_v59, %v2683_v51  ;;  %v2611_v10 = vmul.f32 %v11492_v9, %v9090_v62  ;;  %v2328_v34 = vadd.f32 %v2320_v24, %v11493_v32  ;;  %v11499_v32 = vld [vmem:[#allocation45_spill] sm:$0xff] }
 0xb2b   :  { %v1718_v48 = vmul.f32 1.442695, %v1617_v52  ;;  %v9105_v13 = vadd.f32 %v2305_v30, %v11494_v29  ;;  %v2595_v31 = vmul.f32 %v11495_v46, %v8998_v42  ;;  %v1762_v36 = vmul.f32 1.442695, %v1639_v7  ;;  %v9140_v46 = vpop.permute.xlu1 %2050 }
 0xb2c   :  { %v1704_v45 = vmul.f32 1.442695, %v1610_v28  ;;  %v9112_v20 = vadd.f32 %v2724_v35, %v9016_v17  ;;  %v1748_v51 = vmul.f32 1.442695, %v1632_v33  ;;  %v1625_v50 = vmul.f32 %v8439_v26, %v8864_v49 }
 0xb2d   :  { %7041 = vpow2.f32 %v1718_v48  ;;  %v7030_v53 = vpop.eup %7029  ;;  %v9117_v37 = vmul.f32 %v11496_v57, %v2328_v34  ;;  %v2641_v59 = vmul.f32 %v11497_v14, %v9105_v13  ;;  %v2282_v42 = vadd.f32 %v2274_v60, %v2178_v27  ;;  %v9121_v24 = vpop.permute.xlu0 %2364  ;;  %v11500_v48 = vld [vmem:[#allocation53_spill] sm:$0xff] }
 0xb2e   :  { %7043 = vpow2.f32 %v1704_v45  ;;  %v2705_v30 = vsel %vm313_vm2, %v2611_v10, 0.0  ;;  %v2212_v17 = vmul.f32 0.0, %v7030_v53  ;;  %v1734_v44 = vmul.f32 1.442695, %v1625_v50 }
 0xb2f   :  { %v1618_v7 = vmul.f32 %v8431_v1, %v9003_v18  ;;  %v2626_v33 = vmul.f32 %v11498_v6, %v2282_v42  ;;  %v2663_v52 = vsel %vm313_vm2, %v2595_v31, 0.0  ;;  %7045 = vpow2.f32 %v1762_v36 }
 0xb30   :  { %v1633_v35 = vmul.f32 %v11432_v58, %v8864_v49  ;;  %v2220_v28 = vadd.f32 %v2212_v17, %v2148_v41  ;;  %7047 = vpow2.f32 %v1748_v51  ;;  %v1640_v27 = vmul.f32 %v11438_v15, %v8807_v8 }
 0xb31   :  { %v1720_v60 = vmul.f32 1.442695, %v1618_v7  ;;  %v7032_v9 = vpop.eup %7031  ;;  %v9133_v10 = vadd.f32 %v2705_v30, %v9046_v19  ;;  %v2785_v1 = vsel %vm313_vm2, %v2641_v59, 0.0  ;;  %v2156_v34 = vmul.f32 %v8484_v25, %v11499_v32  ;;  %v11501_v19 = vld [vmem:[#allocation50_spill] sm:$0xff]  ;;  %v9146_v50 = vpop.permute.xlu0 %2520  ;;  %v11503_v7 = vld [vmem:[#allocation57_spill] sm:$0xff] }
 0xb32   :  { %v2171_v29 = vmul.f32 %v8494_v56, %v11500_v48  ;;  %v2228_v41 = vmul.f32 %v7032_v9, %v2220_v28  ;;  %v2664_v31 = vadd.f32 %v2663_v52, %v9028_v39  ;;  %7049 = vpow2.f32 %v1734_v44  ;;  %v11502_v39 = vld [vmem:[#allocation98_spill] sm:$0xff]  ;;  %v11505_v32 = vld [vmem:[#allocation69_spill] sm:$0xff] }
 0xb33   :  { %v1750_v8 = vmul.f32 1.442695, %v1633_v35  ;;  %v2745_v45 = vsel %vm313_vm2, %v2626_v33, 0.0  ;;  %v2164_v51 = vmul.f32 %v8487_v63, %v11501_v19  ;;  %7051 = vpow2.f32 %v1720_v60  ;;  %v11504_v60 = vld [vmem:[#allocation102_spill] sm:$0xff]  ;;  %v11508_v19 = vld [vmem:[#allocation93_spill] sm:$0xff] }
 0xb34   :  { %v7034_v36 = vpop.eup %7033  ;;  %v1626_v25 = vmul.f32 %v8439_v26, %v9003_v18  ;;  %v9151_v57 = vadd.f32 %v2785_v1, %v9050_v4  ;;  %v2236_v14 = vadd.f32 %v2228_v41, %v2156_v34  ;;  %v2605_v59 = vmul.f32 %v9013_v16, %v11502_v39  ;;  %v2461_v1 = vpop.permute.xlu1 %2460 }
 0xb35   :  { %v7036_v53 = vpop.eup %7035  ;;  %v1764_v30 = vmul.f32 1.442695, %v1640_v27  ;;  %v2309_v44 = vmul.f32 %v7034_v36, %v8964_v5  ;;  %v2172_v63 = vmul.f32 %v8494_v56, %v11503_v7  ;;  %v1634_v33 = vmul.f32 %v11432_v58, %v9003_v18  ;;  %v11511_v7 = vld [vmem:[#allocation60_spill] sm:$0xff] }
 0xb36   :  { %v7038_v17 = vpop.eup %7037  ;;  %v1736_v6 = vmul.f32 1.442695, %v1626_v25  ;;  %v9161_v52 = vadd.f32 %v2745_v45, %v9064_v54  ;;  %v2290_v4 = vmul.f32 %v7036_v53, %v2282_v42  ;;  %7053 = vpow2.f32 %v1750_v8  ;;  %v11507_v45 = vld [vmem:[#allocation36_spill] sm:$0xff] }
 0xb37   :  { %v7040_v26 = vpop.eup %7039  ;;  %v2259_v35 = vmul.f32 %v7038_v17, %v9090_v62  ;;  %v2596_v27 = vmul.f32 %v9006_v43, %v2220_v28  ;;  %v2613_v9 = vmul.f32 %v9061_v55, %v11504_v60  ;;  %v1641_v56 = vmul.f32 %v11438_v15, %v8864_v49  ;;  %v2493_v28 = vpop.permute.xlu0 %2492  ;;  %v11506_v55 = vld [vmem:[#allocation84_spill] sm:$0xff]  ;;  %v11510_v17 = vld [vmem:[#allocation79_spill] sm:$0xff] }
 0xb38   :  { %v2244_v16 = vmul.f32 %v7040_v26, %v2236_v14  ;;  %v2604_v58 = vmul.f32 %v11505_v32, %v2236_v14  ;;  %v2688_v54 = vsel %vm313_vm2, %v2605_v59, 0.0  ;;  %7055 = vpow2.f32 %v1764_v30  ;;  %v11509_v59 = vld [vmem:[#allocation67_spill] sm:$0xff]  ;;  %v11512_v26 = vld [vmem:[#allocation78_spill] sm:$0xff] }
 0xb39   :  { %v2267_v34 = vadd.f32 %v2259_v35, %v2171_v29  ;;  %v9172_v62 = vadd.f32 %v2309_v44, %v9072_v23  ;;  %7057 = vpow2.f32 %v1736_v6  ;;  %v1752_v43 = vmul.f32 1.442695, %v1634_v33 }
 0xb3a   :  { %v7042_v42 = vpop.eup %7041  ;;  %v2252_v48 = vadd.f32 %v2244_v16, %v2164_v51  ;;  %v2298_v8 = vadd.f32 %v2290_v4, %v11506_v55  ;;  %v2621_v49 = vmul.f32 %v2461_v1, %v11507_v45  ;;  %v2597_v29 = vmul.f32 %v9121_v24, %v11508_v19  ;;  %v11516_v45 = vld [vmem:[#allocation101_spill] sm:$0xff] }
 0xb3b   :  { %v7044_v41 = vpop.eup %7043  ;;  %v2275_v36 = vmul.f32 %v7042_v42, %v2267_v34  ;;  %v2665_v25 = vsel %vm313_vm2, %v2596_v27, 0.0  ;;  %v2709_v14 = vsel %vm313_vm2, %v2613_v9, 0.0  ;;  %v1766_v23 = vmul.f32 1.442695, %v1641_v56  ;;  %v11513_v56 = vld [vmem:[#allocation75_spill] sm:$0xff] }
 0xb3c   :  { %v2260_v53 = vmul.f32 %v7044_v41, %v2252_v48  ;;  %v7046_v39 = vpop.eup %7045  ;;  %v2686_v51 = vsel %vm313_vm2, %v2604_v58, 0.0  ;;  %v2619_v30 = vmul.f32 %v11509_v59, %v2267_v34  ;;  %v2629_v6 = vmul.f32 %v2493_v28, %v11511_v7  ;;  %v11514_v58 = vld [vmem:[#allocation77_spill] sm:$0xff]  ;;  %v11515_v41 = vld [vmem:[#allocation72_spill] sm:$0xff] }
 0xb3d   :  { %v2283_v44 = vadd.f32 %v2275_v36, %v11510_v17  ;;  %v7048_v33 = vpop.eup %7047  ;;  %v2612_v4 = vmul.f32 %v11512_v26, %v2252_v48  ;;  %v2321_v24 = vmul.f32 %v7046_v39, %v9105_v13  ;;  %7059 = vpow2.f32 %v1752_v43 }
 0xb3e   :  { %v2268_v35 = vadd.f32 %v2260_v53, %v2172_v63  ;;  %v2306_v16 = vmul.f32 %v7048_v33, %v2298_v8  ;;  %v2666_v27 = vadd.f32 %v2665_v25, %v2664_v31  ;;  %v2730_v60 = vsel %vm313_vm2, %v2621_v49, 0.0  ;;  %v2525_v33 = vpop.permute.xlu0 %2524 }
 0xb3f   :  { %v2667_v9 = vsel %vm313_vm2, %v2597_v29, 0.0  ;;  %v7050_v1 = vpop.eup %7049  ;;  %v2634_v32 = vmul.f32 %v11513_v56, %v2298_v8  ;;  %v2627_v34 = vmul.f32 %v11514_v58, %v2283_v44  ;;  %7061 = vpow2.f32 %v1766_v23  ;;  %v11517_v29 = vld [vmem:[#allocation92_spill] sm:$0xff] }
 0xb40   :  { %v2620_v42 = vmul.f32 %v9041_v61, %v2268_v35  ;;  %v7052_v28 = vpop.eup %7051  ;;  %v2687_v48 = vadd.f32 %v2686_v51, %v9099_v0  ;;  %v2726_v13 = vsel %vm313_vm2, %v2619_v30, 0.0  ;;  %v2291_v63 = vmul.f32 %v7050_v1, %v2283_v44  ;;  %v11518_v51 = vld [vmem:[#allocation80_spill] sm:$0xff]  ;;  %v9205_v30 = vpop.permute.xlu1 %2580  ;;  %v11519_v44 = vld [vmem:[#allocation90_spill] sm:$0xff] }
 0xb41   :  { %v2751_v31 = vsel %vm313_vm2, %v2629_v6, 0.0  ;;  %v2707_v43 = vsel %vm313_vm2, %v2612_v4, 0.0  ;;  %v9196_v55 = vadd.f32 %v2321_v24, %v11515_v41  ;;  %v2276_v36 = vmul.f32 %v7052_v28, %v2268_v35 }
 0xb42   :  { %v2668_v8 = vadd.f32 %v2667_v9, %v2666_v27  ;;  %v2314_v49 = vadd.f32 %v2306_v16, %v11516_v45  ;;  %v2728_v61 = vsel %vm313_vm2, %v2620_v42, 0.0  ;;  %v2689_v19 = vadd.f32 %v2688_v54, %v2687_v48 }
 0xb43   :  { %v2299_v25 = vadd.f32 %v2291_v63, %v11517_v29  ;;  %v7054_v0 = vpop.eup %7053  ;;  %v2766_v53 = vsel %vm313_vm2, %v2634_v32, 0.0  ;;  %v2727_v23 = vadd.f32 %v2726_v13, %v9112_v20  ;;  %v2747_v39 = vsel %vm313_vm2, %v2627_v34, 0.0  ;;  %v11521_v13 = vld [vmem:[#allocation71_spill] sm:$0xff]  ;;  %v2557_v29 = vpop.permute.xlu0 %2556 }
 0xb44   :  { %v2284_v59 = vadd.f32 %v2276_v36, %v11518_v51  ;;  %v2708_v17 = vadd.f32 %v2707_v43, %v9133_v10  ;;  %v2642_v7 = vmul.f32 %v11519_v44, %v2314_v49  ;;  %v2669_v35 = vrot.slane %v2668_v8, 4  ;;  %v11520_v10 = vld [vmem:[#allocation65_spill] sm:$0xff]  ;;  %v2553_v63 = vpop.permute.xlu1 %2552 }
 0xb45   :  { %v2635_v6 = vmul.f32 %v9036_v38, %v2299_v25  ;;  %v2307_v54 = vmul.f32 %v7054_v0, %v2299_v25  ;;  %v7056_v26 = vpop.eup %7055  ;;  %v2729_v4 = vadd.f32 %v2728_v61, %v2727_v23  ;;  %v1642_v20 = vmul.f32 %v11438_v15, %v9003_v18 }
 0xb46   :  { %v2628_v24 = vmul.f32 %v9109_v11, %v2284_v59  ;;  %v7058_v16 = vpop.eup %7057  ;;  %v2748_v27 = vadd.f32 %v2747_v39, %v9161_v52  ;;  %v2690_v9 = vrot.slane %v2689_v19, 4  ;;  %v2710_v1 = vadd.f32 %v2709_v14, %v2708_v17  ;;  %v11522_v39 = vld [vmem:[#allocation42_spill] sm:$0xff] }
 0xb47   :  { %v2315_v56 = vadd.f32 %v2307_v54, %v11520_v10  ;;  %v2767_v32 = vadd.f32 %v2766_v53, %v9082_v3  ;;  %v2731_v58 = vadd.f32 %v2730_v60, %v2729_v4  ;;  %v2292_v34 = vmul.f32 %v7058_v16, %v2284_v59  ;;  %v7385_v60 = vld [vmem:[%s11190_s9 + $0xc0] sm:$0xff] }
 0xb48   :  { %v2749_v38 = vsel %vm313_vm2, %v2628_v24, 0.0  ;;  %v2787_v42 = vsel %vm313_vm2, %v2642_v7, 0.0  ;;  %v2768_v11 = vsel %vm313_vm2, %v2635_v6, 0.0  ;;  %v2322_v48 = vmul.f32 %v7056_v26, %v2314_v49  ;;  %v9233_v26 = vpop.permute.xlu1 %2584  ;;  %v11523_v24 = vld [vmem:[#allocation51_spill] sm:$0xff]  ;;  %v11524_v10 = vld [vmem:[#allocation76_spill] sm:$0xff] }
 0xb49   :  { %v2750_v28 = vadd.f32 %v2749_v38, %v2748_v27  ;;  %v2643_v18 = vmul.f32 %v9087_v40, %v2315_v56  ;;  %v2300_v52 = vadd.f32 %v2292_v34, %v11521_v13  ;;  %v1768_v14 = vmul.f32 1.442695, %v1642_v20 }
 0xb4a   :  { %v2637_v43 = vmul.f32 %v2525_v33, %v8964_v5  ;;  %v7060_v41 = vpop.eup %7059  ;;  %v2691_v3 = vadd.f32 %v2690_v9, %v2689_v19  ;;  %v2711_v36 = vrot.slane %v2710_v1, 4  ;;  %v1643_v61 = vmul.f32 %v7385_v60, %v11438_v15  ;;  %v2869_v60 = vpop.permute.xlu0 %2868 }
 0xb4b   :  { %v2752_v45 = vadd.f32 %v2751_v31, %v2750_v28  ;;  %v2769_v25 = vadd.f32 %v2768_v11, %v2767_v32  ;;  %v2732_v40 = vrot.slane %v2731_v58, 4  ;;  %v2636_v49 = vmul.f32 %v9146_v50, %v2300_v52 }
 0xb4c   :  { %v2308_v0 = vmul.f32 %v7060_v41, %v2300_v52  ;;  %v7062_v53 = vpop.eup %7061  ;;  %v2789_v23 = vsel %vm313_vm2, %v2643_v18, 0.0  ;;  %7063 = vpow2.f32 %v1768_v14  ;;  %v2772_v19 = vsel %vm313_vm2, %v2637_v43, 0.0  ;;  %v11525_v18 = vld [vmem:[#allocation24_spill] sm:$0xff]  ;;  %v2589_v43 = vpop.permute.xlu1 %2588 }
 0xb4d   :  { %v2753_v5 = vrot.slane %v2752_v45, 4  ;;  %v2770_v31 = vsel %vm313_vm2, %v2636_v49, 0.0  ;;  %v1770_v59 = vmul.f32 1.442695, %v1643_v61  ;;  %v2645_v15 = vmul.f32 %v2557_v29, %v9172_v62 }
 0xb4e   :  { %v2316_v51 = vadd.f32 %v2308_v0, %v11522_v39  ;;  %v2788_v17 = vadd.f32 %v2787_v42, %v9151_v57  ;;  %v2712_v44 = vadd.f32 %v2711_v36, %v2710_v1  ;;  %v2670_v7 = vadd.f32 %v2669_v35, %v2668_v8 }
 0xb4f   :  { %v2771_v50 = vadd.f32 %v2770_v31, %v2769_v25  ;;  %v2733_v6 = vadd.f32 %v2732_v40, %v2731_v58  ;;  %v2754_v33 = vadd.f32 %v2753_v5, %v2752_v45  ;;  %7065 = vpow2.f32 %v1770_v59 }
 0xb50   :  { %v2644_v54 = vmul.f32 %v2553_v63, %v2316_v51  ;;  %v2692_v4 = vrot.slane %v2691_v3, 2  ;;  %v2330_v20 = vadd.f32 %v2322_v48, %v11523_v24  ;;  %v2790_v16 = vadd.f32 %v2789_v23, %v2788_v17 }
 0xb51   :  { %v2773_v27 = vadd.f32 %v2772_v19, %v2771_v50  ;;  %v2804_v9 = vsel %vm313_vm2, %v9117_v37, 0.0  ;;  %v2649_v57 = vmul.f32 %v11524_v10, %v9196_v55  ;;  %v2793_v35 = vsel %vm313_vm2, %v2645_v15, 0.0  ;;  %v9246_v37 = vld [vmem:[%s11190_s9 + $0xd0] sm:$0xff]  ;;  %v2871_v15 = vpop.permute.xlu1 %2870 }
 0xb52   :  { %v2791_v8 = vsel %vm313_vm2, %v2644_v54, 0.0  ;;  %v2650_v1 = vmul.f32 %v9079_v22, %v2330_v20  ;;  %v2671_v32 = vrot.slane %v2670_v7, 2  ;;  %v2713_v34 = vrot.slane %v2712_v44, 2 }
 0xb53   :  { %v2792_v38 = vadd.f32 %v2791_v8, %v2790_v16  ;;  %v2774_v58 = vrot.slane %v2773_v27, 4  ;;  %v2734_v42 = vrot.slane %v2733_v6, 2  ;;  %v2323_v11 = vmul.f32 %v7062_v53, %v2315_v56  ;;  %v2900_v16 = vld [vmem:[%s11190_s9 + $0x70] sm:$0xff] }
 0xb54   :  { %v2755_v28 = vrot.slane %v2754_v33, 2  ;;  %v2825_v55 = vrot.slane %v9246_v37, %v11525_v18  ;;  %v2693_v52 = vadd.f32 %v2692_v4, %v2691_v3  ;;  %v2805_v22 = vadd.f32 %v2804_v9, %v9048_v12 }
 0xb55   :  { %v2775_v48 = vadd.f32 %v2774_v58, %v2773_v27  ;;  %v2794_v13 = vadd.f32 %v2793_v35, %v2792_v38  ;;  %v2806_v63 = vsel %vm313_vm2, %v2649_v57, 0.0  ;;  %v2204_v14 = vmul.f32 %v8517_v47, %v8989_v2  ;;  %v11526_v2 = vld [vmem:[#allocation35_spill] sm:$0xff]  ;;  %v2898_v38 = vld [vmem:[%s11190_s9 + $0x60] sm:$0xff]  ;;  %v2899_v58 = vld [vmem:[%s11190_s9 + $0x68] sm:$0xff] }
 0xb56   :  { %v2331_v56 = vadd.f32 %v2323_v11, %v9057_v21  ;;  %v2808_v41 = vsel %vm313_vm2, %v2650_v1, 0.0  ;;  %v2672_v61 = vadd.f32 %v2671_v32, %v2670_v7  ;;  %v2714_v25 = vadd.f32 %v2713_v34, %v2712_v44  ;;  %v2901_v27 = vld [vmem:[%s11190_s9 + $0x78] sm:$0xff] }
 0xb57   :  { %v2776_v36 = vrot.slane %v2775_v48, 2  ;;  %v2795_v45 = vrot.slane %v2794_v13, 4  ;;  %v2735_v3 = vadd.f32 %v2734_v42, %v2733_v6  ;;  %v2756_v40 = vadd.f32 %v2755_v28, %v2754_v33  ;;  %v2867_v33 = vpop.permute.xlu0 %2866 }
 0xb58   :  { %v2651_v29 = vmul.f32 %v9205_v30, %v2331_v56  ;;  %v2807_v12 = vadd.f32 %v2806_v63, %v2805_v22  ;;  %v2694_v0 = vrot.slane %v2693_v52, 1  ;;  %v9258_v5 = vmul.f32 %v2825_v55, %v11526_v2  ;;  %v2873_v55 = vpop.permute.xlu1 %2872 }
 0xb59   :  { %v2796_v49 = vadd.f32 %v2795_v45, %v2794_v13  ;;  %v2777_v53 = vadd.f32 %v2776_v36, %v2775_v48  ;;  %v7064_v23 = vpop.eup %7063  ;;  %v2205_v21 = vmul.f32 %v8517_v47, %v9140_v46  ;;  %v2673_v59 = vrot.slane %v2672_v61, 1 }
 0xb5a   :  { %v2809_v19 = vadd.f32 %v2808_v41, %v2807_v12  ;;  %v2324_v31 = vmul.f32 %v7064_v23, %v2316_v51  ;;  %v2810_v30 = vsel %vm313_vm2, %v2651_v29, 0.0  ;;  %v2715_v17 = vrot.slane %v2714_v25, 1 }
 0xb5b   :  { %v2797_v39 = vrot.slane %v2796_v49, 2  ;;  %v2736_v44 = vrot.slane %v2735_v3, 1  ;;  %v2757_v7 = vrot.slane %v2756_v40, 1  ;;  %v2695_v54 = vadd.f32 %v2694_v0, %v2693_v52  ;;  %v2875_v56 = vpop.permute.xlu0 %2874 }
 0xb5c   :  { %v7066_v50 = vpop.eup %7065  ;;  %v2332_v6 = vadd.f32 %v2324_v31, %v2204_v14  ;;  %v2778_v4 = vrot.slane %v2777_v53, 1  ;;  %v2829_v47 = vrot.slane %v9258_v5, 2  ;;  %v2828_v46 = vrot.slane %v9258_v5, 1  ;;  %v2877_v2 = vpop.permute.xlu1 %2876 }
 0xb5d   :  { %v2798_v24 = vadd.f32 %v2797_v39, %v2796_v49  ;;  %v2325_v20 = vmul.f32 %v7066_v50, %v9172_v62  ;;  %v2830_v51 = vrot.slane %v9258_v5, 3  ;;  %v2811_v9 = vadd.f32 %v2810_v30, %v2809_v19 }
 0xb5e   :  { %v2652_v10 = vmul.f32 %v9233_v26, %v2332_v6  ;;  %v2674_v57 = vadd.f32 %v2673_v59, %v2672_v61  ;;  %v2716_v35 = vadd.f32 %v2715_v17, %v2714_v25  ;;  %v2737_v1 = vadd.f32 %v2736_v44, %v2735_v3 }
 0xb5f   :  { %v2799_v8 = vrot.slane %v2798_v24, 1  ;;  %v2333_v62 = vadd.f32 %v2325_v20, %v2205_v21  ;;  %v2758_v32 = vadd.f32 %v2757_v7, %v2756_v40  ;;  %v2844_v42 = vadd.f32 %v2828_v46, %v2695_v54  ;;  %v2879_v59 = vpop.permute.xlu0 %2878 }
 0xb60   :  { %v2812_v34 = vsel %vm313_vm2, %v2652_v10, 0.0  ;;  %v2779_v11 = vadd.f32 %v2778_v4, %v2777_v53  ;;  %v2911_v28 = vpack.c.bf16 %v2901_v27, %v2900_v16  ;;  %v2832_v48 = vrot.slane %v9258_v5, 5 }
 0xb61   :  { %v2653_v26 = vmul.f32 %v2589_v43, %v2333_v62  ;;  %v2831_v13 = vrot.slane %v9258_v5, 4  ;;  %v2800_v52 = vadd.f32 %v2799_v8, %v2798_v24  ;;  %v2813_v22 = vadd.f32 %v2812_v34, %v2811_v9 }
 0xb62   :  { %v2891_v63 = vmul.f32 %v2869_v60, %v2844_v42  ;;  %v2843_v14 = vadd.f32 %v9258_v5, %v2674_v57  ;;  %6616 = vmatpush3.bf16.msra.mxu0 %v2911_v28  ;;  %v2910_v41 = vpack.c.bf16 %v2899_v58, %v2898_v38  ;;  %v2845_v45 = vadd.f32 %v2829_v47, %v2716_v35  ;;  %v2881_v38 = vpop.permute.xlu1 %2880 }
 0xb63   :  { %v2814_v36 = vsel %vm313_vm2, %v2653_v26, 0.0  ;;  %v2847_v61 = vadd.f32 %v2831_v13, %v2758_v32  ;;  %v2833_v29 = vrot.slane %v9258_v5, 6  ;;  %v11527_v43 = vmov 0.0  }
 0xb64   :  { %6617 = vmatprep.subr.bf16.mxu0 %v11527_v43  ;;  %v2815_v25 = vadd.f32 %v2814_v36, %v2813_v22  ;;  %v2846_v3 = vadd.f32 %v2830_v51, %v2737_v1  ;;  %v2890_v40 = vmul.f32 %v2867_v33, %v2843_v14  ;;  %v2848_v12 = vadd.f32 %v2832_v48, %v2779_v11 }
 0xb65   :  { %v2892_v49 = vmul.f32 %v2871_v15, %v2845_v45  ;;  %v2849_v0 = vadd.f32 %v2833_v29, %v2800_v52  ;;  %v2903_v53 = vpack.c.bf16 %v2891_v63, %v2891_v63  ;;  %v2894_v21 = vmul.f32 %v2875_v56, %v2847_v61 }
 0xb66   :  { %v2816_v60 = vrot.slane %v2815_v25, 4  ;;  %v2893_v23 = vmul.f32 %v2873_v55, %v2846_v3  ;;  %6618 = vmatpush3.bf16.msra.mxu0 %v2910_v41  ;;  %v2902_v31 = vpack.c.bf16 %v2890_v40, %v2890_v40  ;;  %v2895_v39 = vmul.f32 %v2877_v2, %v2848_v12  ;;  %v3023_v40 = vld [vmem:[%s11188_s7 + $0x30] sm:$0xff]  ;;  %v3024_v12 = vld [vmem:[%s11188_s7 + $0x38] sm:$0xff] }
 0xb67   :  { %6631 = vmatprep.subr.mxu0 %v11527_v43  ;;  %v2904_v30 = vpack.c.bf16 %v2892_v49, %v2892_v49  ;;  %v2896_v17 = vmul.f32 %v2879_v59, %v2849_v0  ;;  %v2921_v7 = vunpack.c.l.b16 %v2903_v53  ;;  %v2906_v6 = vpack.c.bf16 %v2894_v21, %v2894_v21  ;;  %v3021_v49 = vld [vmem:[%s11188_s7 + $0x20] sm:$0xff] }
 0xb68   :  { %v2817_v19 = vadd.f32 %v2816_v60, %v2815_v25  ;;  %v2905_v50 = vpack.c.bf16 %v2893_v23, %v2893_v23  ;;  %v2920_v15 = vunpack.c.l.b16 %v2902_v31  ;;  %v2907_v54 = vpack.c.bf16 %v2895_v39, %v2895_v39  ;;  %v3022_v60 = vld [vmem:[%s11188_s7 + $0x28] sm:$0xff] }
 0xb69   :  { %v2922_v4 = vunpack.c.l.b16 %v2904_v30  ;;  %v2908_v24 = vpack.c.bf16 %v2896_v17, %v2896_v17  ;;  %v2928_v20 = vrot.slane %v2921_v7, 7  ;;  %v2924_v51 = vunpack.c.l.b16 %v2906_v6  ;;  %v11529_v30 = vld [vmem:[#allocation33_spill] sm:$0xff] }
 0xb6a   :  { %v2818_v44 = vrot.slane %v2817_v19, 2  ;;  %v2923_v47 = vunpack.c.l.b16 %v2905_v50  ;;  %v2834_v16 = vrot.slane %v9258_v5, 7  ;;  %v2925_v9 = vunpack.c.l.b16 %v2907_v54 }
 0xb6b   :  { %v2930_v27 = vsel %vm2929_vm9, %v2928_v20, %v2920_v15  ;;  %v2931_v57 = vrot.slane %v2922_v4, 6  ;;  %v2926_v8 = vunpack.c.l.b16 %v2908_v24  ;;  %v2937_v32 = vrot.slane %v2924_v51, 4  ;;  %v7388_v24 = vld [vmem:[%s11185_s4 + $0x8] sm:$0xff]  ;;  %v7389_v20 = vld [vmem:[%s11185_s4 + $0x10] sm:$0xff] }
 0xb6c   :  { %v2819_v33 = vadd.f32 %v2818_v44, %v2817_v19  ;;  %v2934_v62 = vrot.slane %v2923_v47, 5  ;;  %v2940_v58 = vrot.slane %v2925_v9, 3  ;;  %v3027_v0 = vpack.c.bf16 %v3024_v12, %v3023_v40  ;;  %v11528_v19 = vld [vmem:[#allocation30_spill] sm:$0xff]  ;;  %v7390_v47 = vld [vmem:[%s11185_s4 + $0x18] sm:$0xff]  ;;  %v7392_v51 = vld [vmem:[%s11185_s4 + $0x28] sm:$0xff] }
 0xb6d   :  { %v2933_v1 = vsel %vm2932_vm10, %v2931_v57, %v2930_v27  ;;  %v2943_v42 = vrot.slane %v2926_v8, 2  ;;  %v3026_v53 = vpack.c.bf16 %v3022_v60, %v3021_v49  ;;  %v3009_v31 = vrot.slane %v9246_v37, %v11528_v19  ;;  %v7394_v9 = vld [vmem:[%s11186_s5] sm:$0xff]  ;;  %v7396_v57 = vld [vmem:[%s11186_s5 + $0x10] sm:$0xff]  ;;  %v7397_v8 = vld [vmem:[%s11186_s5 + $0x18] sm:$0xff] }
 0xb6e   :  { %v2820_v46 = vrot.slane %v2819_v33, 1  ;;  %v2936_v5 = vsel %vm2935_vm11, %v2934_v62, %v2933_v1  ;;  %6624 = vmatpush3.bf16.msra.mxu1 %v3027_v0  ;;  %v3014_v17 = vrot.slane %v9246_v37, %v11529_v30  ;;  %v7387_v37 = vld [vmem:[%s11185_s4] sm:$0xff]  ;;  %v7400_v1 = vld [vmem:[%s11186_s5 + $0x30] sm:$0xff]  ;;  %v9441_v12 = vld [vmem:[%s11190_s9 + $0x1a8] sm:$0xff] }
 0xb6f   :  { %v2939_v28 = vsel %vm2938_vm12, %v2937_v32, %v2936_v5  ;;  %6625 = vmatprep.subr.bf16.mxu1 %v11527_v43  ;;  %v7398_v62 = vld [vmem:[%s11186_s5 + $0x20] sm:$0xff]  ;;  %v11532_v60 = vld [vmem:[#allocation23_spill] sm:$0xff] }
 0xb70   :  { %v2821_v10 = vadd.f32 %v2820_v46, %v2819_v33  ;;  %v2942_v55 = vsel %vm2941_vm13, %v2940_v58, %v2939_v28  ;;  %v7391_v46 = vld [vmem:[%s11185_s4 + $0x20] sm:$0xff] }
 0xb71   :  { %v2945_v48 = vsel %vm2944_vm14, %v2943_v42, %v2942_v55 }
 0xb72   :  { %v2850_v35 = vadd.f32 %v2834_v16, %v2821_v10  ;;  %6626 = vmatpush3.bf16.msra.mxu1 %v3026_v53  ;;  %v7393_v16 = vld [vmem:[%s11185_s4 + $0x30] sm:$0xff]  ;;  %v7395_v10 = vld [vmem:[%s11186_s5 + $0x8] sm:$0xff] }
 0xb73   :  { %6654 = vmatprep.subr.mxu1 %v11527_v43 }
 0xb74   :  { %v2897_v34 = vmul.f32 %v2881_v38, %v2850_v35  ;;  %v7399_v35 = vld [vmem:[%s11186_s5 + $0x28] sm:$0xff] }
 0xb76   :  { %v2909_v11 = vpack.c.bf16 %v2897_v34, %v2897_v34 }
 0xb78   :  { %v2927_v26 = vunpack.c.l.b16 %v2909_v11 }
 0xb7a   :  { %v2946_v13 = vrot.slane %v2927_v26, 1 }
 0xb7c   :  { %v2948_v52 = vsel %vm2947_vm15, %v2946_v13, %v2945_v48 }
 0xb7d   :  { %v2949_v22 = vpack.c.b16 %v2948_v52, %v2948_v52  ;;  %v3373_v52 = vld [vmem:[%s11190_s9 + $0xf0] sm:$0xff] }
 0xb7f   :  { %6620 = vmatmul.mubr.msk.bf16.vlgmr.msra.gmra.mxu0 %vm313_vm2, %v2949_v22  ;;  %v3374_v22 = vld [vmem:[%s11190_s9 + $0xf8] sm:$0xff] }
 0xb80   :  { %6633 = vmatprep.mubr.msk.f32.mxu0 %vm7442_vm1, %v11527_v43 }
 0xc3f   :  { %v2987_v63 = vpop.f32.mrf.mxu0 }
 0xc40   :  { %v2993_v14 = vsel %vm313_vm2, %v2987_v63, 0.0 }
 0xc41   :  { %2994 = vadd.xlane.f32.xlu0 %v2993_v14  ;;  %v6621_v56 = vpop.f32.mrf.mxu0 }
 0xc42   :  { %v3380_v56 = vpack.c.bf16 %v3374_v22, %v3373_v52 }
 0xc43   :  { %v2990_v41 = vpop.f32.mrf.mxu0 }
 0xc44   :  { %v3372_v41 = vld [vmem:[%s11190_s9 + $0xe8] sm:$0xff] }
 0xc45   :  { %v6622_v36 = vpop.f32.mrf.mxu0 }
 0xcca   :  { %v2995_v45 = vpop.xlane.xlu0 %2994 }
 0xccb   :  { %v2996_v61 = vmul.f32 0.03125, %v2995_v45 }
 0xccd   :  { %v2997_v29 = vsub.f32 %v2987_v63, %v2996_v61  ;;  %v3371_v63 = vld [vmem:[%s11190_s9 + $0xe0] sm:$0xff]  ;;  %v9430_v61 = vld [vmem:[%s11190_s9 + $0x1b8] sm:$0xff] }
 0xcce   :  { %v3379_v36 = vpack.c.bf16 %v3372_v41, %v3371_v63  ;;  %v11540_v63 = vld [vmem:[#allocation28_spill] sm:$0xff] }
 0xccf   :  { %v2998_v25 = vmul.f32 %v2997_v29, %v2997_v29 }
 0xcd1   :  { %v2999_v3 = vsel %vm313_vm2, %v2998_v25, 0.0 }
 0xcd2   :  { %3000 = vadd.xlane.f32.xlu1 %v2999_v3  ;;  %v11531_v3 = vld [vmem:[#allocation20_spill] sm:$0xff] }
 0xcd3   :  { %v3278_v40 = vrot.slane %v9430_v61, %v11531_v3 }
 0xcd5   :  { %v3279_v53 = vmul.f32 %v3278_v40, %v11532_v60 }
 0xd5b   :  { %v3001_v23 = vpop.xlane.xlu1 %3000 }
 0xd5c   :  { %v3002_v2 = vmul.f32 0.03125, %v3001_v23 }
 0xd5e   :  { %v3003_v21 = vadd.f32 1e-05, %v3002_v2  ;;  %v11533_v2 = vld [vmem:[#allocation15_spill] sm:$0xff] }
 0xd60   :  { %7067 = vrsqrt.f32 %v3003_v21 }
 0xd6d   :  { %v7068_v39 = vpop.eup %7067 }
 0xd6e   :  { %v3005_v59 = vmul.f32 %v7068_v39, %v2997_v29  ;;  %v11530_v29 = vld [vmem:[#allocation21_spill] sm:$0xff]  ;;  %v9448_v39 = vrot.slane %v9441_v12, %v11525_v18 }
 0xd6f   :  { %v9434_v25 = vrot.slane %v9430_v61, %v11530_v29 }
 0xd70   :  { %v3010_v44 = vmul.f32 %v3009_v31, %v3005_v59 }
 0xd71   :  { %v3297_v21 = vmul.f32 %v9434_v25, %v11533_v2 }
 0xd72   :  { %v3015_v7 = vadd.f32 %v3014_v17, %v3010_v44 }
 0xd74   :  { %v6296_v50 = vclamps-f32 %v3015_v7, 10.0  ;;  %v11534_v7 = vld [vmem:[#allocation12_spill] sm:$0xff] }
 0xd76   :  { %v3025_v6 = vpack.c.bf16 %v6296_v50, %v6296_v50  ;;  %v3280_v50 = vmul.f32 %v3278_v40, %v11534_v7 }
 0xd78   :  { %6628 = vmatmul.mubr.msk.bf16.vlgmr.msra.gmra.mxu1 %vm313_vm2, %v3025_v6 }
 0xd79   :  { %6656 = vmatprep.mubr.msk.f32.mxu1 %vm7442_vm1, %v11527_v43 }
 0xe38   :  { %v9322_v15 = vpop.f32.mrf.mxu1 }
 0xe39   :  { %3072 = vrot.lane.b32.xlu0 %v9322_v15, %s7444_s29  ;;  %6655 = vmatpush3.msra.mxu1 %v9322_v15 }
 0xe3a   :  { %v6629_v54 = vpop.f32.mrf.mxu1  ;;  %6657 = vmatmul.mubr.msk.f32.vlgmr.msra.gmra.mxu1 %vm72_vm0, %v7387_v37  ;;  %6689 = vmatprep.subr.mxu1 %v11527_v43 }
 0xe3b   :  { %6659 = vmatprep.mubr.msk.f32.mxu1 %vm7442_vm1, %v11527_v43  ;;  %v11535_v54 = vld [vmem:[#allocation25_spill] sm:$0xff] }
 0xe3c   :  { %v3068_v33 = vpop.f32.mrf.mxu1  ;;  %v3298_v37 = vmul.f32 %v9434_v25, %v11535_v54 }
 0xe3e   :  { %v6630_v4 = vpop.f32.mrf.mxu1  ;;  %6660 = vmatmul.mubr.msk.f32.gmra.mxu1 %vm72_vm0, %v7388_v24 }
 0xe3f   :  { %6662 = vmatprep.mubr.msk.f32.mxu1 %vm7442_vm1, %v11527_v43 }
 0xe42   :  { %6663 = vmatmul.mubr.msk.f32.gmra.mxu1 %vm72_vm0, %v7389_v20 }
 0xe43   :  { %6665 = vmatprep.mubr.msk.f32.mxu1 %vm7442_vm1, %v11527_v43 }
 0xe46   :  { %6666 = vmatmul.mubr.msk.f32.gmra.mxu1 %vm72_vm0, %v7390_v47 }
 0xe47   :  { %6668 = vmatprep.mubr.msk.f32.mxu1 %vm7442_vm1, %v11527_v43 }
 0xe4a   :  { %6669 = vmatmul.mubr.msk.f32.gmra.mxu1 %vm72_vm0, %v7391_v46 }
 0xe4b   :  { %6671 = vmatprep.mubr.msk.f32.mxu1 %vm7442_vm1, %v11527_v43 }
 0xe4e   :  { %6672 = vmatmul.mubr.msk.f32.gmra.mxu1 %vm72_vm0, %v7392_v51  ;;  %v11536_v51 = vld [vmem:[#allocation26_spill] sm:$0xff] }
 0xe4f   :  { %6674 = vmatprep.mubr.msk.f32.mxu1 %vm7442_vm1, %v11527_v43 }
 0xe52   :  { %6675 = vmatmul.mubr.msk.f32.gmra.mxu1 %vm72_vm0, %v7393_v16  ;;  %v3281_v16 = vmul.f32 %v3278_v40, %v11536_v51 }
 0xe53   :  { %6703 = vmatprep.mubr.msk.f32.mxu1 %vm7442_vm1, %v11527_v43 }
 0xeab   :  { %v3073_v27 = vpop.permute.xlu0 %3072 }
 0xeac   :  { %6632 = vmatpush3.msra.mxu0 %v3073_v27 }
 0xead   :  { %6634 = vmatmul.mubr.msk.f32.vlgmr.msra.gmra.mxu0 %vm72_vm0, %v7394_v9  ;;  %6677 = vmatprep.subr.bf16.mxu0 %v3380_v56  ;;  %v11537_v9 = vld [vmem:[#allocation16_spill] sm:$0xff] }
 0xeae   :  { %6636 = vmatprep.mubr.msk.f32.mxu0 %vm7442_vm1, %v11527_v43  ;;  %6678 = vmatpush3.bf16.msra.mxu0 %v3380_v56  ;;  %v3283_v56 = vmul.f32 %v3278_v40, %v11540_v63 }
 0xeaf   :  { %6679 = vmatprep.subr.bf16.mxu0 %v3379_v36 }
 0xeb1   :  { %6637 = vmatmul.mubr.msk.f32.gmra.mxu0 %vm72_vm0, %v7395_v10  ;;  %v3299_v10 = vmul.f32 %v9434_v25, %v11537_v9 }
 0xeb2   :  { %6639 = vmatprep.mubr.msk.f32.mxu0 %vm7442_vm1, %v11527_v43  ;;  %6680 = vmatpush3.bf16.msra.mxu0 %v3379_v36 }
 0xeb3   :  { %6714 = vmatprep.subr.bf16.mxu0 %v11527_v43 }
 0xeb5   :  { %6640 = vmatmul.mubr.msk.f32.gmra.mxu0 %vm72_vm0, %v7396_v57 }
 0xeb6   :  { %6642 = vmatprep.mubr.msk.f32.mxu0 %vm7442_vm1, %v11527_v43 }
 0xeb9   :  { %6643 = vmatmul.mubr.msk.f32.gmra.mxu0 %vm72_vm0, %v7397_v8 }
 0xeba   :  { %6645 = vmatprep.mubr.msk.f32.mxu0 %vm7442_vm1, %v11527_v43 }
 0xebd   :  { %6646 = vmatmul.mubr.msk.f32.gmra.mxu0 %vm72_vm0, %v7398_v62 }
 0xebe   :  { %6648 = vmatprep.mubr.msk.f32.mxu0 %vm7442_vm1, %v11527_v43 }
 0xec1   :  { %6649 = vmatmul.mubr.msk.f32.gmra.mxu0 %vm72_vm0, %v7399_v35 }
 0xec2   :  { %6651 = vmatprep.mubr.msk.f32.mxu0 %vm7442_vm1, %v11527_v43 }
 0xec5   :  { %6652 = vmatmul.mubr.msk.f32.gmra.mxu0 %vm72_vm0, %v7400_v1  ;;  %v11538_v1 = vld [vmem:[#allocation27_spill] sm:$0xff] }
 0xefa   :  { %v3241_v32 = vpop.f32.mrf.mxu1 }
 0xefc   :  { %v6658_v38 = vpop.f32.mrf.mxu1 }
 0xefe   :  { %v3246_v58 = vpop.f32.mrf.mxu1 }
 0xf00   :  { %v6661_v34 = vpop.f32.mrf.mxu1 }
 0xf02   :  { %v3251_v42 = vpop.f32.mrf.mxu1 }
 0xf04   :  { %v6664_v5 = vpop.f32.mrf.mxu1 }
 0xf05   :  { %v11539_v5 = vld [vmem:[#allocation17_spill] sm:$0xff] }
 0xf06   :  { %v3256_v11 = vpop.f32.mrf.mxu1 }
 0xf08   :  { %v6667_v28 = vpop.f32.mrf.mxu1 }
 0xf09   :  { %v3300_v28 = vmul.f32 %v9434_v25, %v11539_v5 }
 0xf0a   :  { %v3261_v26 = vpop.f32.mrf.mxu1 }
 0xf0c   :  { %v6670_v55 = vpop.f32.mrf.mxu1 }
 0xf0e   :  { %v9410_v48 = vpop.f32.mrf.mxu1 }
 0xf10   :  { %v6673_v13 = vpop.f32.mrf.mxu1 }
 0xf12   :  { %v9421_v14 = vpop.f32.mrf.mxu1 }
 0xf14   :  { %v6676_v45 = vpop.f32.mrf.mxu1 }
 0xf6d   :  { %v3141_v49 = vpop.f32.mrf.mxu0 }
 0xf6e   :  { %v3242_v0 = vadd.f32 %v3241_v32, %v3141_v49  ;;  %v3282_v32 = vmul.f32 %v3278_v40, %v11538_v1 }
 0xf6f   :  { %v6635_v23 = vpop.f32.mrf.mxu0 }
 0xf70   :  { %v3286_v31 = vadd.f32 %v3279_v53, %v3242_v0  ;;  %v11541_v0 = vld [vmem:[#allocation18_spill] sm:$0xff] }
 0xf71   :  { %v3146_v59 = vpop.f32.mrf.mxu0 }
 0xf72   :  { %v3304_v17 = vadd.f32 %v3297_v21, %v3286_v31  ;;  %v3247_v44 = vadd.f32 %v3246_v58, %v3146_v59  ;;  %v11542_v59 = vld [vmem:[#allocation13_spill] sm:$0xff] }
 0xf73   :  { %v6638_v6 = vpop.f32.mrf.mxu0 }
 0xf74   :  { %v9454_v33 = vadd.f32 %v9448_v39, %v3304_v17  ;;  %v3287_v4 = vadd.f32 %v3280_v50, %v3247_v44  ;;  %v3284_v17 = vmul.f32 %v3278_v40, %v11542_v59 }
 0xf75   :  { %v3151_v24 = vpop.f32.mrf.mxu0 }
 0xf76   :  { %v3322_v20 = vsub.f32 0.0, %v9454_v33  ;;  %v3305_v47 = vadd.f32 %v3298_v37, %v3287_v4  ;;  %v3252_v46 = vadd.f32 %v3251_v42, %v3151_v24 }
 0xf77   :  { %v6641_v27 = vpop.f32.mrf.mxu0 }
 0xf78   :  { %v3329_v57 = vmul.f32 1.442695, %v3322_v20  ;;  %v9461_v8 = vadd.f32 %v9448_v39, %v3305_v47  ;;  %v3288_v62 = vadd.f32 %v3281_v16, %v3252_v46  ;;  %v11544_v16 = vld [vmem:[#allocation14_spill] sm:$0xff] }
 0xf79   :  { %v3156_v35 = vpop.f32.mrf.mxu0  ;;  %v3285_v27 = vmul.f32 %v3278_v40, %v11544_v16 }
 0xf7a   :  { %7069 = vpow2.f32 %v3329_v57  ;;  %v3323_v38 = vsub.f32 0.0, %v9461_v8  ;;  %v3306_v58 = vadd.f32 %v3299_v10, %v3288_v62  ;;  %v3257_v34 = vadd.f32 %v3256_v11, %v3156_v35 }
 0xf7b   :  { %v6644_v42 = vpop.f32.mrf.mxu0  ;;  %v3301_v11 = vmul.f32 %v9434_v25, %v11541_v0 }
 0xf7c   :  { %v3331_v55 = vmul.f32 1.442695, %v3323_v38  ;;  %v9468_v13 = vadd.f32 %v9448_v39, %v3306_v58  ;;  %v3289_v52 = vadd.f32 %v3282_v32, %v3257_v34  ;;  %v11545_v32 = vld [vmem:[#allocation29_spill] sm:$0xff] }
 0xf7d   :  { %v3161_v22 = vpop.f32.mrf.mxu0 }
 0xf7e   :  { %7071 = vpow2.f32 %v3331_v55  ;;  %v3324_v41 = vsub.f32 0.0, %v9468_v13  ;;  %v3307_v36 = vadd.f32 %v3300_v28, %v3289_v52  ;;  %v3262_v45 = vadd.f32 %v3261_v26, %v3161_v22  ;;  %v11543_v26 = vld [vmem:[#allocation22_spill] sm:$0xff] }
 0xf7f   :  { %v6647_v49 = vpop.f32.mrf.mxu0  ;;  %v3302_v4 = vmul.f32 %v9434_v25, %v11543_v26 }
 0xf80   :  { %v3333_v53 = vmul.f32 1.442695, %v3324_v41  ;;  %v9475_v23 = vadd.f32 %v9448_v39, %v3307_v36  ;;  %v3290_v21 = vadd.f32 %v3283_v56, %v3262_v45 }
 0xf81   :  { %v3166_v31 = vpop.f32.mrf.mxu0 }
 0xf82   :  { %7073 = vpow2.f32 %v3333_v53  ;;  %v3325_v44 = vsub.f32 0.0, %v9475_v23  ;;  %v3308_v50 = vadd.f32 %v3301_v11, %v3290_v21  ;;  %v3267_v6 = vadd.f32 %v9410_v48, %v3166_v31 }
 0xf83   :  { %v6650_v37 = vpop.f32.mrf.mxu0  ;;  %v3303_v48 = vmul.f32 %v9434_v25, %v11545_v32 }
 0xf84   :  { %v3335_v24 = vmul.f32 1.442695, %v3325_v44  ;;  %v3319_v20 = vadd.f32 %v9448_v39, %v3308_v50  ;;  %v3291_v47 = vadd.f32 %v3284_v17, %v3267_v6 }
 0xf85   :  { %v3171_v46 = vpop.f32.mrf.mxu0 }
 0xf86   :  { %7075 = vpow2.f32 %v3335_v24  ;;  %v3326_v10 = vsub.f32 0.0, %v3319_v20  ;;  %v3309_v57 = vadd.f32 %v3302_v4, %v3291_v47  ;;  %v3272_v62 = vadd.f32 %v9421_v14, %v3171_v46 }
 0xf87   :  { %v7070_v35 = vpop.eup %7069  ;;  %v6653_v38 = vpop.f32.mrf.mxu0 }
 0xf88   :  { %v3343_v58 = vadd.f32 1.0, %v7070_v35  ;;  %v3337_v34 = vmul.f32 1.442695, %v3326_v10  ;;  %v3320_v42 = vadd.f32 %v9448_v39, %v3309_v57  ;;  %v3292_v28 = vadd.f32 %v3285_v27, %v3272_v62 }
 0xf8a   :  { %v3327_v55 = vsub.f32 0.0, %v3320_v42  ;;  %v3310_v52 = vadd.f32 %v3303_v48, %v3292_v28  ;;  %7077 = vpow2.f32 %v3337_v34 }
 0xf8b   :  { %v7072_v22 = vpop.eup %7071  ;;  %7079 = vrcp.f32 %v3343_v58 }
 0xf8c   :  { %v3344_v40 = vadd.f32 1.0, %v7072_v22  ;;  %v3339_v56 = vmul.f32 1.442695, %v3327_v55  ;;  %v3321_v41 = vadd.f32 %v9448_v39, %v3310_v52 }
 0xf8e   :  { %7081 = vrcp.f32 %v3344_v40  ;;  %v3328_v14 = vsub.f32 0.0, %v3321_v41 }
 0xf8f   :  { %v7074_v36 = vpop.eup %7073  ;;  %7083 = vpow2.f32 %v3339_v56 }
 0xf90   :  { %v3345_v25 = vadd.f32 1.0, %v7074_v36  ;;  %v3341_v45 = vmul.f32 1.442695, %v3328_v14 }
 0xf92   :  { %7085 = vpow2.f32 %v3341_v45 }
 0xf93   :  { %v7076_v49 = vpop.eup %7075  ;;  %7087 = vrcp.f32 %v3345_v25 }
 0xf94   :  { %v3346_v11 = vadd.f32 1.0, %v7076_v49 }
 0xf96   :  { %7089 = vrcp.f32 %v3346_v11 }
 0xf97   :  { %v7078_v53 = vpop.eup %7077 }
 0xf98   :  { %v7080_v21 = vpop.eup %7079  ;;  %v3347_v31 = vadd.f32 1.0, %v7078_v53 }
 0xf99   :  { %v3364_v50 = vmul.f32 %v7080_v21, %v9454_v33 }
 0xf9a   :  { %7091 = vrcp.f32 %v3347_v31 }
 0xf9b   :  { %v7082_v17 = vpop.eup %7081 }
 0xf9c   :  { %v7084_v44 = vpop.eup %7083  ;;  %v3365_v39 = vmul.f32 %v7082_v17, %v9461_v8 }
 0xf9d   :  { %v3348_v6 = vadd.f32 1.0, %v7084_v44 }
 0xf9e   :  { %v3375_v37 = vpack.c.bf16 %v3365_v39, %v3364_v50 }
 0xf9f   :  { %7093 = vrcp.f32 %v3348_v6  ;;  %v7086_v4 = vpop.eup %7085 }
 0xfa0   :  { %6681 = vmatprep.mubr.msk.bf16.mxu0 %vm313_vm2, %v3375_v37  ;;  %v7088_v24 = vpop.eup %7087  ;;  %v3349_v47 = vadd.f32 1.0, %v7086_v4 }
 0xfa1   :  { %v3366_v27 = vmul.f32 %v7088_v24, %v9468_v13  ;;  %v3384_v13 = vrot.slane %v9441_v12, %v11528_v19 }
 0xfa2   :  { %7095 = vrcp.f32 %v3349_v47 }
 0xfa3   :  { %v7090_v46 = vpop.eup %7089 }
 0xfa4   :  { %v3367_v10 = vmul.f32 %v7090_v46, %v9475_v23 }
 0xfa6   :  { %v3376_v57 = vpack.c.bf16 %v3367_v10, %v3366_v27 }
 0xfa7   :  { %v7092_v33 = vpop.eup %7091 }
 0xfa8   :  { %6682 = vmatmul.mubr.msk.bf16.vlgmr.msra.gmra.mxu0 %vm313_vm2, %v3376_v57  ;;  %v3368_v62 = vmul.f32 %v7092_v33, %v3319_v20  ;;  %v9513_v57 = vld [vmem:[%s11190_s9 + $0x1b0] sm:$0xff] }
 0xfac   :  { %v7094_v8 = vpop.eup %7093 }
 0xfad   :  { %v3369_v35 = vmul.f32 %v7094_v8, %v3320_v42 }
 0xfaf   :  { %v3377_v48 = vpack.c.bf16 %v3369_v35, %v3368_v62  ;;  %v7096_v38 = vpop.eup %7095 }
 0xfb0   :  { %v3370_v58 = vmul.f32 %v7096_v38, %v3321_v41 }
 0xfb1   :  { %6685 = vmatprep.mubr.msk.bf16.mxu0 %vm313_vm2, %v3377_v48  ;;  %v11546_v48 = vld [vmem:[#allocation31_spill] sm:$0xff] }
 0xfb2   :  { %v3378_v34 = vpack.c.bf16 %v3370_v58, %v3370_v58  ;;  %v3513_v38 = vrot.slane %v9513_v57, %v11546_v48 }
 0xfb4   :  { %6686 = vmatmul.mubr.msk.bf16.gmra.mxu0 %vm313_vm2, %v3378_v34 }
 0xfb5   :  { %6718 = vmatprep.mubr.msk.bf16.mxu0 %vm7442_vm1, %v11527_v43 }
0x1068   :  { %v6683_v23 = vpop.f32.mrf.mxu0 }
0x1069   :  { %v3440_v28 = vadd.f32 %v6683_v23, %v3384_v13 }
0x106a   :  { %v3431_v55 = vpop.f32.mrf.mxu0 }
0x106b   :  { %v3463_v52 = vsub.f32 0.0, %v3440_v28  ;;  %v9507_v31 = vadd.f32 %v3431_v55, %v3384_v13 }
0x106c   :  { %v6684_v42 = vpop.f32.mrf.mxu0 }
0x106d   :  { %v3472_v20 = vmul.f32 1.442695, %v3463_v52  ;;  %v9501_v22 = vadd.f32 %v6684_v42, %v3384_v13  ;;  %v3461_v47 = vsub.f32 0.0, %v9507_v31 }
0x106e   :  { %v3434_v40 = vpop.f32.mrf.mxu0 }
0x106f   :  { %7097 = vpow2.f32 %v3472_v20  ;;  %v3464_v56 = vsub.f32 0.0, %v9501_v22  ;;  %v9504_v41 = vadd.f32 %v3434_v40, %v3384_v13  ;;  %v3468_v10 = vmul.f32 1.442695, %v3461_v47 }
0x1071   :  { %v3474_v11 = vmul.f32 1.442695, %v3464_v56  ;;  %v3462_v53 = vsub.f32 0.0, %v9504_v41 }
0x1073   :  { %v3470_v24 = vmul.f32 1.442695, %v3462_v53 }
0x1074   :  { %v6687_v14 = vpop.f32.mrf.mxu0 }
0x1075   :  { %v3456_v36 = vadd.f32 %v6687_v14, %v3384_v13 }
0x1076   :  { %v3447_v25 = vpop.f32.mrf.mxu0 }
0x1077   :  { %v3467_v45 = vsub.f32 0.0, %v3456_v36  ;;  %v3448_v49 = vadd.f32 %v3447_v25, %v3384_v13 }
0x1078   :  { %v6688_v21 = vpop.f32.mrf.mxu0 }
0x1079   :  { %v3480_v17 = vmul.f32 1.442695, %v3467_v45  ;;  %v3465_v44 = vsub.f32 0.0, %v3448_v49 }
0x107a   :  { %v3450_v50 = vpop.f32.mrf.mxu0 }
0x107b   :  { %7099 = vpow2.f32 %v3480_v17  ;;  %v3476_v6 = vmul.f32 1.442695, %v3465_v44  ;;  %v3451_v37 = vadd.f32 %v3450_v50, %v3384_v13 }
0x107c   :  { %v7098_v39 = vpop.eup %7097  ;;  %7101 = vpow2.f32 %v3474_v11 }
0x107d   :  { %v3484_v4 = vadd.f32 1.0, %v7098_v39  ;;  %7103 = vpow2.f32 %v3476_v6  ;;  %v3466_v46 = vsub.f32 0.0, %v3451_v37 }
0x107f   :  { %7105 = vrcp.f32 %v3484_v4  ;;  %v3478_v27 = vmul.f32 1.442695, %v3466_v46 }
0x1080   :  { %7107 = vpow2.f32 %v3470_v24 }
0x1081   :  { %7109 = vpow2.f32 %v3478_v27 }
0x1082   :  { %7111 = vpow2.f32 %v3468_v10 }
0x1088   :  { %v7100_v33 = vpop.eup %7099 }
0x1089   :  { %v7102_v8 = vpop.eup %7101  ;;  %v3488_v62 = vadd.f32 1.0, %v7100_v33 }
0x108a   :  { %v7104_v35 = vpop.eup %7103  ;;  %v3485_v23 = vadd.f32 1.0, %v7102_v8 }
0x108b   :  { %7113 = vrcp.f32 %v3488_v62  ;;  %v3486_v34 = vadd.f32 1.0, %v7104_v35  ;;  %v11547_v35 = vld [vmem:[#allocation32_spill] sm:$0xff] }
0x108c   :  { %v7106_v58 = vpop.eup %7105 }
0x108d   :  { %v9517_v13 = vmul.f32 %v7106_v58, %v3440_v28  ;;  %v7108_v55 = vpop.eup %7107  ;;  %7115 = vrcp.f32 %v3486_v34  ;;  %v3545_v58 = vrot.slane %v9430_v61, %v11547_v35 }
0x108e   :  { %v7110_v52 = vpop.eup %7109  ;;  %7117 = vrcp.f32 %v3485_v23  ;;  %v3483_v56 = vadd.f32 1.0, %v7108_v55 }
0x108f   :  { %v3516_v20 = vmul.f32 %v3513_v38, %v9517_v13  ;;  %v3487_v42 = vadd.f32 1.0, %v7110_v52  ;;  %v7112_v14 = vpop.eup %7111 }
0x1090   :  { %v3482_v25 = vadd.f32 1.0, %v7112_v14 }
0x1091   :  { %v3527_v40 = vsel %vm313_vm2, %v3516_v20, 0.0  ;;  %7119 = vrcp.f32 %v3487_v42 }
0x1092   :  { %3528 = vadd.xlane.f32.xlu0 %v3527_v40  ;;  %7121 = vrcp.f32 %v3483_v56 }
0x1093   :  { %7123 = vrcp.f32 %v3482_v25 }
0x1098   :  { %v7114_v45 = vpop.eup %7113 }
0x1099   :  { %v9521_v28 = vmul.f32 %v7114_v45, %v3456_v36 }
0x109a   :  { %v7116_v11 = vpop.eup %7115 }
0x109b   :  { %v9523_v53 = vmul.f32 %v7116_v11, %v3448_v49  ;;  %v3520_v21 = vmul.f32 %v3513_v38, %v9521_v28  ;;  %v7118_v17 = vpop.eup %7117 }
0x109c   :  { %v9531_v4 = vmul.f32 %v7118_v17, %v9501_v22 }
0x109d   :  { %v3539_v44 = vsel %vm313_vm2, %v3520_v21, 0.0  ;;  %v3518_v50 = vmul.f32 %v3513_v38, %v9523_v53 }
0x109e   :  { %v7120_v39 = vpop.eup %7119  ;;  %3540 = vadd.xlane.f32.xlu1 %v3539_v44  ;;  %v3517_v27 = vmul.f32 %v3513_v38, %v9531_v4 }
0x109f   :  { %v9528_v6 = vmul.f32 %v7120_v39, %v3451_v37  ;;  %v3533_v36 = vsel %vm313_vm2, %v3518_v50, 0.0  ;;  %v7122_v49 = vpop.eup %7121 }
0x10a0   :  { %v9536_v47 = vmul.f32 %v7122_v49, %v9504_v41  ;;  %v7124_v10 = vpop.eup %7123  ;;  %v3530_v22 = vsel %vm313_vm2, %v3517_v27, 0.0 }
0x10a1   :  { %v3519_v24 = vmul.f32 %v3513_v38, %v9528_v6  ;;  %v9541_v37 = vmul.f32 %v7124_v10, %v9507_v31 }
0x10a2   :  { %3534 = vadd.xlane.f32.xlu1 %v3533_v36  ;;  %v3515_v33 = vmul.f32 %v3513_v38, %v9536_v47 }
0x10a3   :  { %v3536_v46 = vsel %vm313_vm2, %v3519_v24, 0.0  ;;  %v3514_v62 = vmul.f32 %v3513_v38, %v9541_v37 }
0x10a4   :  { %v3524_v8 = vsel %vm313_vm2, %v3515_v33, 0.0 }
0x10a5   :  { %v3521_v41 = vsel %vm313_vm2, %v3514_v62, 0.0 }
0x10a6   :  { %3537 = vadd.xlane.f32.xlu1 %v3536_v46 }
0x10aa   :  { %3531 = vadd.xlane.f32.xlu1 %v3530_v22 }
0x10ae   :  { %3525 = vadd.xlane.f32.xlu1 %v3524_v8 }
0x10b2   :  { %3522 = vadd.xlane.f32.xlu1 %v3521_v41 }
0x111b   :  { %v3529_v34 = vpop.xlane.xlu0 %3528 }
0x111c   :  { %v3548_v55 = vadd.f32 %v3545_v58, %v3529_v34 }
0x111e   :  { %v3555_v56 = vsub.f32 0.0, %v3548_v55 }
0x1120   :  { %v3564_v11 = vmul.f32 1.442695, %v3555_v56 }
0x1127   :  { %v3541_v23 = vpop.xlane.xlu1 %3540 }
0x1128   :  { %v3552_v31 = vadd.f32 %v3545_v58, %v3541_v23 }
0x112a   :  { %v3559_v52 = vsub.f32 0.0, %v3552_v31 }
0x112b   :  { %v3535_v20 = vpop.xlane.xlu1 %3534 }
0x112c   :  { %v3572_v42 = vmul.f32 1.442695, %v3559_v52  ;;  %v3550_v40 = vadd.f32 %v3545_v58, %v3535_v20 }
0x112e   :  { %7125 = vpow2.f32 %v3572_v42  ;;  %v3557_v14 = vsub.f32 0.0, %v3550_v40 }
0x112f   :  { %v3538_v25 = vpop.xlane.xlu1 %3537 }
0x1130   :  { %v3568_v38 = vmul.f32 1.442695, %v3557_v14  ;;  %v3551_v45 = vadd.f32 %v3545_v58, %v3538_v25 }
0x1132   :  { %7127 = vpow2.f32 %v3568_v38  ;;  %v3558_v21 = vsub.f32 0.0, %v3551_v45 }
0x1133   :  { %v3532_v17 = vpop.xlane.xlu1 %3531  ;;  %7129 = vpow2.f32 %v3564_v11 }
0x1134   :  { %v3570_v44 = vmul.f32 1.442695, %v3558_v21  ;;  %v3549_v61 = vadd.f32 %v3545_v58, %v3532_v17 }
0x1136   :  { %7131 = vpow2.f32 %v3570_v44  ;;  %v3556_v50 = vsub.f32 0.0, %v3549_v61 }
0x1137   :  { %v3526_v39 = vpop.xlane.xlu1 %3525 }
0x1138   :  { %v3566_v36 = vmul.f32 1.442695, %v3556_v50  ;;  %v3547_v24 = vadd.f32 %v3545_v58, %v3526_v39 }
0x113a   :  { %7133 = vpow2.f32 %v3566_v36  ;;  %v3554_v49 = vsub.f32 0.0, %v3547_v24 }
0x113b   :  { %v7126_v46 = vpop.eup %7125  ;;  %v3523_v27 = vpop.xlane.xlu1 %3522 }
0x113c   :  { %v3580_v10 = vadd.f32 1.0, %v7126_v46  ;;  %v3562_v22 = vmul.f32 1.442695, %v3554_v49  ;;  %v3546_v33 = vadd.f32 %v3545_v58, %v3523_v27 }
0x113e   :  { %7135 = vrcp.f32 %v3580_v10  ;;  %v3553_v8 = vsub.f32 0.0, %v3546_v33 }
0x113f   :  { %v7128_v62 = vpop.eup %7127  ;;  %7137 = vpow2.f32 %v3562_v22 }
0x1140   :  { %v3578_v41 = vadd.f32 1.0, %v7128_v62  ;;  %v3560_v34 = vmul.f32 1.442695, %v3553_v8  ;;  %v7130_v23 = vpop.eup %7129  ;;  %v3708_v8 = vld [vmem:[%s11190_s9 + $0x108] sm:$0xff] }
0x1141   :  { %v3576_v52 = vadd.f32 1.0, %v7130_v23 }
0x1142   :  { %7139 = vrcp.f32 %v3578_v41 }
0x1143   :  { %v7132_v31 = vpop.eup %7131  ;;  %7141 = vpow2.f32 %v3560_v34 }
0x1144   :  { %v3579_v55 = vadd.f32 1.0, %v7132_v31  ;;  %v3774_v31 = vld [vmem:[%s11190_s9 + $0x130] sm:$0xff] }
0x1146   :  { %7143 = vrcp.f32 %v3579_v55  ;;  %v3775_v55 = vld [vmem:[%s11190_s9 + $0x138] sm:$0xff] }
0x1147   :  { %v7134_v20 = vpop.eup %7133  ;;  %7145 = vrcp.f32 %v3576_v52  ;;  %v3772_v52 = vld [vmem:[%s11190_s9 + $0x120] sm:$0xff] }
0x1148   :  { %v3577_v42 = vadd.f32 1.0, %v7134_v20  ;;  %v3778_v20 = vpack.c.bf16 %v3775_v55, %v3774_v31 }
0x114a   :  { %7147 = vrcp.f32 %v3577_v42  ;;  %v3773_v42 = vld [vmem:[%s11190_s9 + $0x128] sm:$0xff]  ;;  %6715 = vmatpush3.bf16.msra.mxu0 %v3778_v20 }
0x114b   :  { %v7136_v40 = vpop.eup %7135  ;;  %6716 = vmatprep.subr.bf16.mxu0 %v11527_v43 }
0x114c   :  { %v7138_v56 = vpop.eup %7137  ;;  %3627 = vperm.xlu1 %6835, %v7136_v40   ;;  %v3777_v40 = vpack.c.bf16 %v3773_v42, %v3772_v52  ;;  %v3842_v52 = vrot.slane %v9513_v57, %v11547_v35 }
0x114d   :  { %v3575_v58 = vadd.f32 1.0, %v7138_v56  ;;  %v3763_v56 = vrot.slane %v9441_v12, %v11529_v30 }
0x114e   :  { %6717 = vmatpush3.bf16.msra.mxu0 %v3777_v40  ;;  %v3847_v40 = vrot.slane %v9513_v57, %v11531_v3 }
0x114f   :  { %v7140_v14 = vpop.eup %7139  ;;  %7149 = vrcp.f32 %v3575_v58 }
0x1150   :  { %v7142_v25 = vpop.eup %7141  ;;  %3617 = vperm.xlu1 %6835, %v7140_v14  }
0x1151   :  { %v3574_v38 = vadd.f32 1.0, %v7142_v25 }
0x1153   :  { %v7144_v45 = vpop.eup %7143  ;;  %7151 = vrcp.f32 %v3574_v38 }
0x1154   :  { %3622 = vperm.xlu1 %6835, %v7144_v45   ;;  %v7146_v11 = vpop.eup %7145 }
0x1157   :  { %v7148_v21 = vpop.eup %7147 }
0x1158   :  { %3607 = vperm.xlu1 %6835, %v7146_v11   ;;  %3612 = vperm.xlu0 %6836, %v7148_v21  }
0x115c   :  { %v7150_v17 = vpop.eup %7149 }
0x115d   :  { %3602 = vperm.xlu1 %6835, %v7150_v17  }
0x1160   :  { %v7152_v44 = vpop.eup %7151 }
0x1161   :  { %3597 = vperm.xlu1 %6835, %v7152_v44  }
0x1165   :  { %3714 = vrot.lane.b32.xlu1 %v9322_v15, %s7445_s28 }
0x11c7   :  { %v3628_v61 = vpop.permute.xlu1 %3627 }
0x11c8   :  { %v3636_v50 = vmul.f32 %v3628_v61, %v9521_v28 }
0x11ca   :  { %6690 = vmatpush3.msra.mxu1 %v3636_v50 }
0x11cb   :  { %v3618_v39 = vpop.permute.xlu1 %3617  ;;  %6691 = vmatprep.subr.mxu1 %v11527_v43 }
0x11cc   :  { %v3634_v49 = vmul.f32 %v3618_v39, %v9523_v53  ;;  %v3709_v53 = vld [vmem:[%s11190_s9 + $0x110] sm:$0xff] }
0x11cf   :  { %v3623_v36 = vpop.permute.xlu1 %3622 }
0x11d0   :  { %v3635_v24 = vmul.f32 %v3623_v36, %v9528_v6 }
0x11d2   :  { %6692 = vmatpush3.msra.mxu1 %v3635_v24 }
0x11d3   :  { %v3613_v46 = vpop.permute.xlu0 %3612  ;;  %6693 = vmatprep.subr.mxu1 %v11527_v43  ;;  %v3608_v27 = vpop.permute.xlu1 %3607 }
0x11d4   :  { %v3633_v10 = vmul.f32 %v3613_v46, %v9531_v4  ;;  %6694 = vmatpush3.msra.mxu1 %v3634_v49  ;;  %v3632_v15 = vmul.f32 %v3608_v27, %v9517_v13  ;;  %v3710_v4 = vld [vmem:[%s11190_s9 + $0x118] sm:$0xff]  ;;  %v3782_v49 = vrot.slane %v9441_v12, %v11546_v48 }
0x11d5   :  { %6695 = vmatprep.subr.mxu1 %v11527_v43  ;;  %v3713_v33 = vpack.c.bf16 %v3710_v4, %v3709_v53 }
0x11d6   :  { %6696 = vmatpush3.msra.mxu1 %v3633_v10 }
0x11d7   :  { %6697 = vmatprep.subr.mxu1 %v11527_v43 }
0x11d8   :  { %v3603_v28 = vpop.permute.xlu1 %3602  ;;  %6698 = vmatpush3.msra.mxu1 %v3632_v15 }
0x11d9   :  { %v3631_v6 = vmul.f32 %v3603_v28, %v9536_v47  ;;  %6699 = vmatprep.subr.mxu1 %v11527_v43  ;;  %v7401_v47 = vld [vmem:[%s11187_s6] sm:$0xff] }
0x11db   :  { %6700 = vmatpush3.msra.mxu1 %v3631_v6 }
0x11dc   :  { %v3598_v22 = vpop.permute.xlu1 %3597  ;;  %6701 = vmatprep.subr.mxu1 %v11527_v43 }
0x11dd   :  { %v3630_v13 = vmul.f32 %v3598_v22, %v9541_v37  ;;  %v3707_v37 = vld [vmem:[%s11190_s9 + $0x100] sm:$0xff] }
0x11de   :  { %v3712_v62 = vpack.c.bf16 %v3708_v8, %v3707_v37  ;;  %v3854_v37 = vld [vmem:[%s11189_s8 + $0x38] sm:$0xff]  ;;  %v3851_v8 = vld [vmem:[%s11189_s8 + $0x20] sm:$0xff] }
0x11df   :  { %6702 = vmatpush3.msra.mxu1 %v3630_v13 }
0x11e0   :  { %6704 = vmatmul.mubr.msk.f32.vlgmr.msra.gmra.mxu1 %vm1000_vm4, %v7401_v47  ;;  %6706 = vmatprep.subr.bf16.mxu1 %v11527_v43  ;;  %v3715_v58 = vpop.permute.xlu1 %3714  ;;  %v3853_v47 = vld [vmem:[%s11189_s8 + $0x30] sm:$0xff] }
0x11e1   :  { %6707 = vmatpush3.bf16.msra.mxu1 %v3713_v33  ;;  %6710 = vmatprep.mubr.msk.bf16.mxu1 %vm7442_vm1, %v11527_v43 }
0x11e2   :  { %6708 = vmatprep.subr.bf16.mxu1 %v11527_v43 }
0x11e5   :  { %6709 = vmatpush3.bf16.msra.mxu1 %v3712_v62  ;;  %v3857_v62 = vpack.c.bf16 %v3854_v37, %v3853_v47  ;;  %v3932_v37 = vrot.slane %v9441_v12, %v11547_v35 }
0x11e6   :  { %6722 = vmatprep.subr.bf16.mxu1 %v11527_v43 }
0x12a0   :  { %v3703_v41 = vpop.f32.mrf.mxu1 }
0x12a1   :  { %v3711_v34 = vpack.c.bf16 %v3703_v41, %v3703_v41  ;;  %v3852_v41 = vld [vmem:[%s11189_s8 + $0x28] sm:$0xff] }
0x12a2   :  { %v6705_v23 = vpop.f32.mrf.mxu1 }
0x12a3   :  { %6711 = vmatmul.mubr.msk.bf16.vlgmr.msra.gmra.mxu1 %vm313_vm2, %v3711_v34  ;;  %v3856_v34 = vpack.c.bf16 %v3852_v41, %v3851_v8 }
0x12a4   :  { %6726 = vmatprep.mubr.msk.bf16.mxu1 %vm7442_vm1, %v11527_v43  ;;  %6723 = vmatpush3.bf16.msra.mxu1 %v3857_v62 }
0x12a5   :  { %6724 = vmatprep.subr.bf16.mxu1 %v11527_v43 }
0x12a8   :  { %6725 = vmatpush3.bf16.msra.mxu1 %v3856_v34 }
0x12a9   :  { %6730 = vmatprep.subr.mxu1 %v11527_v43 }
0x1363   :  { %v3754_v14 = vpop.f32.mrf.mxu1 }
0x1364   :  { %v3755_v25 = vadd.f32 %v3754_v14, %v3715_v58 }
0x1365   :  { %v6712_v38 = vpop.f32.mrf.mxu1 }
0x1366   :  { %v3764_v45 = vadd.f32 %v3763_v56, %v3755_v25  ;;  %v3949_v38 = vld [vmem:[%s11191_s10 + $0x78] sm:$0xff] }
0x1367   :  { %v3757_v11 = vpop.f32.mrf.mxu1  ;;  %3977 = vmatprep.subr.mxu0 %v3949_v38 }
0x1368   :  { %v3765_v21 = vsub.f32 0.0, %v3764_v45  ;;  %v3947_v11 = vld [vmem:[%s11191_s10 + $0x68] sm:$0xff] }
0x1369   :  { %v6713_v17 = vpop.f32.mrf.mxu1 }
0x136a   :  { %v3766_v44 = vmul.f32 1.442695, %v3765_v21  ;;  %v3946_v21 = vld [vmem:[%s11191_s10 + $0x60] sm:$0xff]  ;;  %v3945_v17 = vld [vmem:[%s11191_s10 + $0x58] sm:$0xff] }
0x136c   :  { %7153 = vpow2.f32 %v3766_v44  ;;  %v3944_v44 = vld [vmem:[%s11191_s10 + $0x50] sm:$0xff] }
0x1379   :  { %v7154_v61 = vpop.eup %7153 }
0x137a   :  { %v3768_v50 = vadd.f32 1.0, %v7154_v61  ;;  %v3943_v61 = vld [vmem:[%s11191_s10 + $0x48] sm:$0xff] }
0x137c   :  { %7155 = vrcp.f32 %v3768_v50  ;;  %v3942_v50 = vld [vmem:[%s11191_s10 + $0x40] sm:$0xff] }
0x1389   :  { %v7156_v39 = vpop.eup %7155 }
0x138a   :  { %v3771_v36 = vmul.f32 %v7156_v39, %v3764_v45  ;;  %v3948_v45 = vld [vmem:[%s11191_s10 + $0x70] sm:$0xff] }
0x138b   :  { %v11548_v39 = vld [vmem:[#allocation34_spill] sm:$0xff] }
0x138c   :  { %v3776_v24 = vpack.c.bf16 %v3771_v36, %v3771_v36  ;;  %v3904_v36 = vrot.slane %v9441_v12, %v11548_v39  ;;  %v4028_v7 = vrot.slane %v9513_v57, %v11548_v39 }
0x138e   :  { %6719 = vmatmul.mubr.msk.bf16.vlgmr.msra.gmra.mxu0 %vm313_vm2, %v3776_v24  ;;  %v3909_v24 = vrot.slane %v9513_v57, %v11530_v29 }
0x138f   :  { %4017 = vmatprep.mubr.f32.mxu0 %v11527_v43  ;;  %3978 = vmatpush1.msra.mxu0 %v3948_v45 }
0x1390   :  { %3979 = vmatprep.subr.mxu0 %v3947_v11 }
0x1391   :  { %3980 = vmatpush1.msra.mxu0 %v3946_v21 }
0x1392   :  { %3981 = vmatprep.subr.mxu0 %v3945_v17 }
0x1393   :  { %3982 = vmatpush1.msra.mxu0 %v3944_v44 }
0x1394   :  { %3983 = vmatprep.subr.mxu0 %v3943_v61 }
0x1395   :  { %3984 = vmatpush1.msra.mxu0 %v3942_v50 }
0x1396   :  { %6735 = vmatprep.subr.bf16.mxu0 %v11527_v43 }
0x144e   :  { %v3820_v46 = vpop.f32.mrf.mxu0 }
0x144f   :  { %v3821_v27 = vadd.f32 %v3820_v46, %v3782_v49  ;;  %v3916_v46 = vrot.slane %v9441_v12, %v11530_v29 }
0x1450   :  { %v6720_v10 = vpop.f32.mrf.mxu0 }
0x1451   :  { %v3826_v15 = vsel %vm313_vm2, %v3821_v27, 0.0 }
0x1452   :  { %3827 = vadd.xlane.f32.xlu1 %v3826_v15  ;;  %v3823_v28 = vpop.f32.mrf.mxu0 }
0x1454   :  { %v6721_v6 = vpop.f32.mrf.mxu0 }
0x1455   :  { %v3924_v6 = vrot.slane %v9441_v12, %v11531_v3  ;;  %v4024_v12 = vld [vmem:[%s11190_s9 + $0x160] sm:$0xff] }
0x14db   :  { %v3828_v53 = vpop.xlane.xlu1 %3827 }
0x14dc   :  { %v3829_v4 = vmul.f32 0.03125, %v3828_v53 }
0x14de   :  { %v3830_v22 = vsub.f32 %v3821_v27, %v3829_v4 }
0x14e0   :  { %v3831_v13 = vmul.f32 %v3830_v22, %v3830_v22 }
0x14e2   :  { %v3832_v33 = vsel %vm313_vm2, %v3831_v13, 0.0 }
0x14e3   :  { %3833 = vadd.xlane.f32.xlu0 %v3832_v33 }
0x156c   :  { %v3834_v23 = vpop.xlane.xlu0 %3833 }
0x156d   :  { %v3835_v31 = vmul.f32 0.03125, %v3834_v23 }
0x156f   :  { %v3836_v55 = vadd.f32 1e-05, %v3835_v31 }
0x1571   :  { %7157 = vrsqrt.f32 %v3836_v55 }
0x157e   :  { %v7158_v20 = vpop.eup %7157 }
0x157f   :  { %v3838_v42 = vmul.f32 %v7158_v20, %v3830_v22 }
0x1581   :  { %v3843_v56 = vmul.f32 %v3842_v52, %v3838_v42 }
0x1583   :  { %v3848_v58 = vadd.f32 %v3847_v40, %v3843_v56 }
0x1585   :  { %v6319_v14 = vclamps-f32 %v3848_v58, 10.0 }
0x1587   :  { %v3855_v25 = vpack.c.bf16 %v6319_v14, %v6319_v14 }
0x1589   :  { %6727 = vmatmul.mubr.msk.bf16.vlgmr.msra.gmra.mxu1 %vm313_vm2, %v3855_v25 }
0x158a   :  { %6732 = vmatprep.mubr.msk.f32.mxu1 %vm7442_vm1, %v11527_v43  ;;  %6731 = vmatpush3.msra.mxu1 %v4024_v12 }
0x158b   :  { %6743 = vmatprep.subr.bf16.mxu1 %v11527_v43 }
0x1649   :  { %v9660_v49 = vpop.f32.mrf.mxu1 }
0x164a   :  { %v3905_v27 = vmul.f32 %v3904_v36, %v9660_v49  ;;  %v3911_v10 = vrot.slane %v9660_v49, 7  ;;  %v3919_v15 = vrot.slane %v9660_v49, 6  ;;  %v3927_v28 = vrot.slane %v9660_v49, 5 }
0x164b   :  { %v6728_v53 = vpop.f32.mrf.mxu1  ;;  %v5480_v63 = vsub.f32 0.0, %v9660_v49 }
0x164c   :  { %v3910_v4 = vadd.f32 %v3909_v24, %v3905_v27  ;;  %v3912_v13 = vsel %vm1280_vm5, %v3911_v10, 0.0  ;;  %v3920_v33 = vsel %vm1289_vm6, %v3919_v15, 0.0  ;;  %v3928_v62 = vsel %vm1298_vm7, %v3927_v28, 0.0 }
0x164d   :  { %v3917_v47 = vmul.f32 %v3916_v46, %v3912_v13  ;;  %v3898_v8 = vpop.f32.mrf.mxu1  ;;  %v3925_v34 = vmul.f32 %v3924_v6, %v3920_v33  ;;  %v3933_v31 = vmul.f32 %v3932_v37, %v3928_v62  ;;  %v5481_v9 = vmul.f32 1.442695, %v5480_v63 }
0x164f   :  { %v3918_v41 = vadd.f32 %v3917_v47, %v3910_v4  ;;  %v6729_v23 = vpop.f32.mrf.mxu1 }
0x1651   :  { %v3926_v55 = vadd.f32 %v3925_v34, %v3918_v41 }
0x1653   :  { %v3934_v52 = vadd.f32 %v3933_v31, %v3926_v55 }
0x1655   :  { %v3935_v20 = vsub.f32 0.0, %v3934_v52 }
0x1657   :  { %v3936_v42 = vmul.f32 1.442695, %v3935_v20 }
0x1659   :  { %7159 = vpow2.f32 %v3936_v42 }
0x1666   :  { %v7160_v40 = vpop.eup %7159 }
0x1667   :  { %v3938_v56 = vadd.f32 1.0, %v7160_v40 }
0x1669   :  { %7161 = vrcp.f32 %v3938_v56 }
0x166a   :  { %7163 = vpow2.f32 %v5481_v9 }
0x1676   :  { %v7162_v58 = vpop.eup %7161 }
0x1677   :  { %v9678_v14 = vmul.f32 %v7162_v58, %v3934_v52 }
0x1679   :  { %6321 = vmatmul.mubr.msk.f32.vlgmr.msra.gmra.mxu0 %vm313_vm2, %v9678_v14 }
0x167a   :  { %6739 = vmatprep.mubr.msk.bf16.mxu0 %vm7442_vm1, %v11527_v43 }
0x1739   :  { %v9688_v25 = vpop.f32.mrf.mxu0 }
0x173a   :  { %v9692_v38 = vrot.slane %v9688_v25, %v11547_v35  ;;  %v9703_v11 = vrot.slane %v9688_v25, %v11531_v3  ;;  %v9713_v21 = vrot.slane %v9688_v25, %v11530_v29  ;;  %v9725_v17 = vrot.slane %v9688_v25, %v11548_v39 }
0x173b   :  { %v4021_v45 = vpop.f32.mrf.mxu0  ;;  %v9737_v44 = vrot.slane %v9688_v25, %v11525_v18  ;;  %v9749_v61 = vrot.slane %v9688_v25, %v11528_v19  ;;  %v9761_v50 = vrot.slane %v9688_v25, %v11529_v30  ;;  %v9777_v36 = vrot.slane %v9688_v25, %v11546_v48 }
0x173c   :  { %4410 = vbcast.lane.b32.xlu1 %v9692_v38, 264  ;;  %4406 = vbcast.lane.b32.xlu0 %v9692_v38, 256 }
0x173d   :  { %6733 = vmatmul.mubr.msk.f32.vlgmr.msra.gmra.mxu1 %vm72_vm0, %v4021_v45 }
0x173e   :  { %6747 = vmatprep.mubr.msk.bf16.mxu1 %vm7442_vm1, %v11527_v43 }
0x1740   :  { %4414 = vbcast.lane.b32.xlu1 %v9692_v38, 272  ;;  %4418 = vbcast.lane.b32.xlu0 %v9692_v38, 280 }
0x1744   :  { %4441 = vbcast.lane.b32.xlu1 %v9703_v11, 256  ;;  %4445 = vbcast.lane.b32.xlu0 %v9703_v11, 264 }
0x1748   :  { %4422 = vbcast.lane.b32.xlu1 %v9692_v38, 288  ;;  %4449 = vbcast.lane.b32.xlu0 %v9703_v11, 272 }
0x174c   :  { %4426 = vbcast.lane.b32.xlu1 %v9692_v38, 296  ;;  %4453 = vbcast.lane.b32.xlu0 %v9703_v11, 280 }
0x1750   :  { %4476 = vbcast.lane.b32.xlu1 %v9713_v21, 256  ;;  %4480 = vbcast.lane.b32.xlu0 %v9713_v21, 264 }
0x1754   :  { %4430 = vbcast.lane.b32.xlu1 %v9692_v38, 304  ;;  %4457 = vbcast.lane.b32.xlu0 %v9703_v11, 288 }
0x1758   :  { %4484 = vbcast.lane.b32.xlu1 %v9713_v21, 272  ;;  %4434 = vbcast.lane.b32.xlu0 %v9692_v38, 312 }
0x175c   :  { %4461 = vbcast.lane.b32.xlu1 %v9703_v11, 296  ;;  %4488 = vbcast.lane.b32.xlu0 %v9713_v21, 280 }
0x1760   :  { %4511 = vbcast.lane.b32.xlu1 %v9725_v17, 256  ;;  %4515 = vbcast.lane.b32.xlu0 %v9725_v17, 264 }
0x1764   :  { %4465 = vbcast.lane.b32.xlu1 %v9703_v11, 304  ;;  %4492 = vbcast.lane.b32.xlu0 %v9713_v21, 288 }
0x1768   :  { %4519 = vbcast.lane.b32.xlu1 %v9725_v17, 272  ;;  %4469 = vbcast.lane.b32.xlu0 %v9703_v11, 312 }
0x176c   :  { %4496 = vbcast.lane.b32.xlu1 %v9713_v21, 296  ;;  %4523 = vbcast.lane.b32.xlu0 %v9725_v17, 280 }
0x1770   :  { %4546 = vbcast.lane.b32.xlu1 %v9737_v44, 256  ;;  %4550 = vbcast.lane.b32.xlu0 %v9737_v44, 264 }
0x1774   :  { %4500 = vbcast.lane.b32.xlu1 %v9713_v21, 304  ;;  %4527 = vbcast.lane.b32.xlu0 %v9725_v17, 288 }
0x1778   :  { %4554 = vbcast.lane.b32.xlu1 %v9737_v44, 272  ;;  %4504 = vbcast.lane.b32.xlu0 %v9713_v21, 312 }
0x177c   :  { %4531 = vbcast.lane.b32.xlu1 %v9725_v17, 296  ;;  %4558 = vbcast.lane.b32.xlu0 %v9737_v44, 280 }
0x1780   :  { %4581 = vbcast.lane.b32.xlu1 %v9749_v61, 256  ;;  %4585 = vbcast.lane.b32.xlu0 %v9749_v61, 264 }
0x1784   :  { %4535 = vbcast.lane.b32.xlu1 %v9725_v17, 304  ;;  %4562 = vbcast.lane.b32.xlu0 %v9737_v44, 288 }
0x1788   :  { %4589 = vbcast.lane.b32.xlu1 %v9749_v61, 272  ;;  %4539 = vbcast.lane.b32.xlu0 %v9725_v17, 312 }
0x178c   :  { %4566 = vbcast.lane.b32.xlu1 %v9737_v44, 296  ;;  %4593 = vbcast.lane.b32.xlu0 %v9749_v61, 280 }
0x1790   :  { %4616 = vbcast.lane.b32.xlu1 %v9761_v50, 256  ;;  %4620 = vbcast.lane.b32.xlu0 %v9761_v50, 264 }
0x1794   :  { %4570 = vbcast.lane.b32.xlu1 %v9737_v44, 304  ;;  %4597 = vbcast.lane.b32.xlu0 %v9749_v61, 288 }
0x1798   :  { %4624 = vbcast.lane.b32.xlu1 %v9761_v50, 272  ;;  %4997 = vbcast.lane.b32.xlu0 %v9703_v11, 320 }
0x179c   :  { %5001 = vbcast.lane.b32.xlu1 %v9703_v11, 328  ;;  %5029 = vbcast.lane.b32.xlu0 %v9713_v21, 320 }
0x17a0   :  { %5033 = vbcast.lane.b32.xlu1 %v9713_v21, 328  ;;  %4574 = vbcast.lane.b32.xlu0 %v9737_v44, 312 }
0x17a4   :  { %4601 = vbcast.lane.b32.xlu1 %v9749_v61, 296  ;;  %4628 = vbcast.lane.b32.xlu0 %v9761_v50, 280 }
0x17a8   :  { %4651 = vbcast.lane.b32.xlu1 %v9777_v36, 256  ;;  %4655 = vbcast.lane.b32.xlu0 %v9777_v36, 264 }
0x17ac   :  { %4965 = vbcast.lane.b32.xlu1 %v9692_v38, 320  ;;  %4969 = vbcast.lane.b32.xlu0 %v9692_v38, 328 }
0x17ae   :  { %v9783_v24 = vpop.permute.xlu1 %4410  ;;  %v9785_v46 = vpop.permute.xlu0 %4406 }
0x17b0   :  { %5005 = vbcast.lane.b32.xlu1 %v9703_v11, 336  ;;  %5061 = vbcast.lane.b32.xlu0 %v9725_v17, 320 }
0x17b2   :  { %v9789_v27 = vpop.permute.xlu1 %4414  ;;  %v9791_v48 = vpop.permute.xlu0 %4418 }
0x17b4   :  { %5065 = vbcast.lane.b32.xlu1 %v9725_v17, 328  ;;  %5037 = vbcast.lane.b32.xlu0 %v9713_v21, 336 }
0x17b6   :  { %v9795_v10 = vpop.permute.xlu1 %4441  ;;  %v9797_v15 = vpop.permute.xlu0 %4445 }
0x17b8   :  { %5093 = vbcast.lane.b32.xlu1 %v9737_v44, 320  ;;  %5097 = vbcast.lane.b32.xlu0 %v9737_v44, 328 }
0x17ba   :  { %v9801_v28 = vpop.permute.xlu1 %4422  ;;  %v9803_v6 = vpop.permute.xlu0 %4449 }
0x17bb   :  { %11550 = vst [vmem:[#allocation85_spill] sm:$0xff] %v9801_v28 }
0x17bc   :  { %4605 = vbcast.lane.b32.xlu1 %v9749_v61, 304  ;;  %4632 = vbcast.lane.b32.xlu0 %v9761_v50, 288 }
0x17be   :  { %v9807_v53 = vpop.permute.xlu1 %4426  ;;  %v9809_v4 = vpop.permute.xlu0 %4453 }
0x17bf   :  { %11551 = vst [vmem:[#allocation47_spill] sm:$0xff] %v9807_v53  ;;  %v5454_v53 = vrot.slane %v9513_v57, %v11525_v18 }
0x17c0   :  { %4659 = vbcast.lane.b32.xlu1 %v9777_v36, 272  ;;  %4973 = vbcast.lane.b32.xlu0 %v9692_v38, 336 }
0x17c2   :  { %v9813_v22 = vpop.permute.xlu1 %4476  ;;  %v9815_v13 = vpop.permute.xlu0 %4480 }
0x17c4   :  { %5009 = vbcast.lane.b32.xlu1 %v9703_v11, 344  ;;  %5069 = vbcast.lane.b32.xlu0 %v9725_v17, 336 }
0x17c6   :  { %v9819_v33 = vpop.permute.xlu1 %4430  ;;  %v9821_v47 = vpop.permute.xlu0 %4457 }
0x17c7   :  { %11552 = vst [vmem:[#allocation37_spill] sm:$0xff] %v9819_v33  ;;  %11553 = vst [vmem:[#allocation40_spill] sm:$0xff] %v9821_v47 }
0x17c8   :  { %5125 = vbcast.lane.b32.xlu1 %v9749_v61, 320  ;;  %5129 = vbcast.lane.b32.xlu0 %v9749_v61, 328 }
0x17ca   :  { %v9825_v37 = vpop.permute.xlu1 %4484  ;;  %v9827_v8 = vpop.permute.xlu0 %4434 }
0x17cb   :  { %11554 = vst [vmem:[#allocation58_spill] sm:$0xff] %v9827_v8 }
0x17cc   :  { %5041 = vbcast.lane.b32.xlu1 %v9713_v21, 344  ;;  %5101 = vbcast.lane.b32.xlu0 %v9737_v44, 336 }
0x17ce   :  { %v9831_v62 = vpop.permute.xlu1 %4461  ;;  %v9833_v41 = vpop.permute.xlu0 %4488 }
0x17cf   :  { %11555 = vst [vmem:[#allocation44_spill] sm:$0xff] %v9831_v62 }
0x17d0   :  { %5157 = vbcast.lane.b32.xlu1 %v9761_v50, 320  ;;  %5161 = vbcast.lane.b32.xlu0 %v9761_v50, 328 }
0x17d2   :  { %v9837_v34 = vpop.permute.xlu1 %4511  ;;  %v9839_v23 = vpop.permute.xlu0 %4515 }
0x17d4   :  { %4609 = vbcast.lane.b32.xlu1 %v9749_v61, 312  ;;  %4636 = vbcast.lane.b32.xlu0 %v9761_v50, 296 }
0x17d6   :  { %v9843_v31 = vpop.permute.xlu1 %4465  ;;  %v9845_v55 = vpop.permute.xlu0 %4492 }
0x17d7   :  { %11556 = vst [vmem:[#allocation52_spill] sm:$0xff] %v9843_v31  ;;  %11557 = vst [vmem:[#allocation83_spill] sm:$0xff] %v9845_v55 }
0x17d8   :  { %4663 = vbcast.lane.b32.xlu1 %v9777_v36, 280  ;;  %4977 = vbcast.lane.b32.xlu0 %v9692_v38, 344 }
0x17da   :  { %v9849_v52 = vpop.permute.xlu1 %4519  ;;  %v9851_v20 = vpop.permute.xlu0 %4469 }
0x17db   :  { %11558 = vst [vmem:[#allocation86_spill] sm:$0xff] %v9851_v20 }
0x17dc   :  { %5013 = vbcast.lane.b32.xlu1 %v9703_v11, 352  ;;  %5073 = vbcast.lane.b32.xlu0 %v9725_v17, 344 }
0x17de   :  { %v9855_v42 = vpop.permute.xlu1 %4496  ;;  %v9857_v40 = vpop.permute.xlu0 %4523 }
0x17df   :  { %11559 = vst [vmem:[#allocation82_spill] sm:$0xff] %v9855_v42  ;;  %11560 = vst [vmem:[#allocation39_spill] sm:$0xff] %v9857_v40 }
0x17e0   :  { %5133 = vbcast.lane.b32.xlu1 %v9749_v61, 336  ;;  %5189 = vbcast.lane.b32.xlu0 %v9777_v36, 320 }
0x17e2   :  { %v9861_v56 = vpop.permute.xlu1 %4546  ;;  %v9863_v58 = vpop.permute.xlu0 %4550 }
0x17e4   :  { %5193 = vbcast.lane.b32.xlu1 %v9777_v36, 328  ;;  %5045 = vbcast.lane.b32.xlu0 %v9713_v21, 352 }
0x17e6   :  { %v9867_v12 = vpop.permute.xlu1 %4500  ;;  %v9869_v25 = vpop.permute.xlu0 %4527 }
0x17e7   :  { %11561 = vst [vmem:[#allocation43_spill] sm:$0xff] %v9867_v12  ;;  %11562 = vst [vmem:[#allocation88_spill] sm:$0xff] %v9869_v25 }
0x17e8   :  { %5105 = vbcast.lane.b32.xlu1 %v9737_v44, 344  ;;  %5165 = vbcast.lane.b32.xlu0 %v9761_v50, 336 }
0x17ea   :  { %v9873_v45 = vpop.permute.xlu1 %4554  ;;  %v9875_v32 = vpop.permute.xlu0 %4504 }
0x17eb   :  { %11563 = vst [vmem:[#allocation89_spill] sm:$0xff] %v9875_v32 }
0x17ec   :  { %4640 = vbcast.lane.b32.xlu1 %v9761_v50, 304  ;;  %4667 = vbcast.lane.b32.xlu0 %v9777_v36, 288 }
0x17ee   :  { %v9879_v16 = vpop.permute.xlu1 %4531  ;;  %v9881_v26 = vpop.permute.xlu0 %4558 }
0x17ef   :  { %11564 = vst [vmem:[#allocation96_spill] sm:$0xff] %v9879_v16  ;;  %11565 = vst [vmem:[#allocation95_spill] sm:$0xff] %v9881_v26 }
0x17f0   :  { %4981 = vbcast.lane.b32.xlu1 %v9692_v38, 352  ;;  %5017 = vbcast.lane.b32.xlu0 %v9703_v11, 360 }
0x17f2   :  { %v9885_v59 = vpop.permute.xlu1 %4581  ;;  %v9887_v0 = vpop.permute.xlu0 %4585 }
0x17f4   :  { %5077 = vbcast.lane.b32.xlu1 %v9725_v17, 352  ;;  %5137 = vbcast.lane.b32.xlu0 %v9749_v61, 344 }
0x17f6   :  { %v9892_v5 = vpop.permute.xlu1 %4535  ;;  %v9894_v1 = vpop.permute.xlu0 %4562 }
0x17f7   :  { %11566 = vst [vmem:[#allocation49_spill] sm:$0xff] %v9892_v5  ;;  %11567 = vst [vmem:[#allocation48_spill] sm:$0xff] %v9894_v1 }
0x17f8   :  { %5197 = vbcast.lane.b32.xlu1 %v9777_v36, 336  ;;  %5049 = vbcast.lane.b32.xlu0 %v9713_v21, 360 }
0x17fa   :  { %v9898_v51 = vpop.permute.xlu1 %4589  ;;  %v9900_v54 = vpop.permute.xlu0 %4539 }
0x17fb   :  { %11568 = vst [vmem:[#allocation94_spill] sm:$0xff] %v9898_v51  ;;  %11569 = vst [vmem:[#allocation99_spill] sm:$0xff] %v9900_v54  ;;  %v11577_v51 = vld [vmem:[#allocation64_spill] sm:$0xff] }
0x17fc   :  { %5109 = vbcast.lane.b32.xlu1 %v9737_v44, 352  ;;  %5169 = vbcast.lane.b32.xlu0 %v9761_v50, 344 }
0x17fd   :  { %v4098_v29 = vpop.f32.mrf.mxu1 }
0x17fe   :  { %v4099_v2 = vadd.f32 %v4098_v29, %v4028_v7  ;;  %v9906_v60 = vpop.permute.xlu1 %4566  ;;  %v9908_v3 = vpop.permute.xlu0 %4593 }
0x17ff   :  { %v6734_v30 = vpop.f32.mrf.mxu1 }
0x1800   :  { %v4103_v63 = vmin.f32 %v4099_v2, 20.0  ;;  %4644 = vbcast.lane.b32.xlu1 %v9761_v50, 312  ;;  %4671 = vbcast.lane.b32.xlu0 %v9777_v36, 296  ;;  %vm4102_vm5 = vcmp.gt.f32.partialorder %v4099_v2, 20.0 }
0x1802   :  { %v4104_v19 = vmul.f32 1.442695, %v4103_v63  ;;  %v9912_v43 = vpop.permute.xlu1 %4616  ;;  %v9914_v39 = vpop.permute.xlu0 %4620 }
0x1803   :  { %11570 = vst [vmem:[#allocation97_spill] sm:$0xff] %v9914_v39  ;;  %v7164_v63 = vpop.eup %7163 }
0x1804   :  { %7165 = vpow2.f32 %v4104_v19  ;;  %4985 = vbcast.lane.b32.xlu1 %v9692_v38, 360  ;;  %5021 = vbcast.lane.b32.xlu0 %v9703_v11, 368  ;;  %v5483_v19 = vadd.f32 1.0, %v7164_v63 }
0x1806   :  { %v9918_v29 = vpop.permute.xlu1 %4570  ;;  %v9920_v7 = vpop.permute.xlu0 %4597  ;;  %7167 = vrcp.f32 %v5483_v19 }
0x1808   :  { %5081 = vbcast.lane.b32.xlu1 %v9725_v17, 360  ;;  %5141 = vbcast.lane.b32.xlu0 %v9749_v61, 352 }
0x180a   :  { %v9924_v30 = vpop.permute.xlu1 %4624  ;;  %v9926_v9 = vpop.permute.xlu0 %4997 }
0x180b   :  { %11571 = vst [vmem:[#allocation87_spill] sm:$0xff] %v9924_v30 }
0x180c   :  { %5201 = vbcast.lane.b32.xlu1 %v9777_v36, 344  ;;  %5053 = vbcast.lane.b32.xlu0 %v9713_v21, 368 }
0x180e   :  { %v9930_v54 = vpop.permute.xlu1 %5001  ;;  %v9932_v32 = vpop.permute.xlu0 %5029 }
0x180f   :  { %11572 = vst [vmem:[#allocation100_spill] sm:$0xff] %v9930_v54  ;;  %11573 = vst [vmem:[#allocation59_spill] sm:$0xff] %v9932_v32 }
0x1810   :  { %5113 = vbcast.lane.b32.xlu1 %v9737_v44, 360  ;;  %5173 = vbcast.lane.b32.xlu0 %v9761_v50, 352 }
0x1811   :  { %v7166_v5 = vpop.eup %7165 }
0x1812   :  { %v4106_v20 = vadd.f32 1.0, %v7166_v5  ;;  %v9936_v8 = vpop.permute.xlu1 %5033  ;;  %v9938_v12 = vpop.permute.xlu0 %4574 }
0x1813   :  { %11574 = vst [vmem:[#allocation63_spill] sm:$0xff] %v9936_v8  ;;  %v7168_v33 = vpop.eup %7167 }
0x1814   :  { %7169 = vlog2.f32 %v4106_v20  ;;  %4675 = vbcast.lane.b32.xlu1 %v9777_v36, 304  ;;  %4989 = vbcast.lane.b32.xlu0 %v9692_v38, 368  ;;  %v9961_v1 = vmul.f32 %v7168_v33, %v9660_v49 }
0x1816   :  { %v9942_v63 = vpop.permute.xlu1 %4601  ;;  %v9944_v16 = vpop.permute.xlu0 %4628 }
0x1818   :  { %5025 = vbcast.lane.b32.xlu1 %v9703_v11, 376  ;;  %5085 = vbcast.lane.b32.xlu0 %v9725_v17, 368 }
0x181a   :  { %v9948_v31 = vpop.permute.xlu1 %4651  ;;  %v9950_v5 = vpop.permute.xlu0 %4655 }
0x181c   :  { %5145 = vbcast.lane.b32.xlu1 %v9749_v61, 360  ;;  %5205 = vbcast.lane.b32.xlu0 %v9777_v36, 352 }
0x181e   :  { %v9954_v20 = vpop.permute.xlu1 %4965  ;;  %v9956_v19 = vpop.permute.xlu0 %4969 }
0x1820   :  { %5057 = vbcast.lane.b32.xlu1 %v9713_v21, 376  ;;  %5117 = vbcast.lane.b32.xlu0 %v9737_v44, 368 }
0x1821   :  { %v7170_v11 = vpop.eup %7169 }
0x1822   :  { %v4108_v42 = vmul.f32 0.6931472, %v7170_v11  ;;  %v9963_v25 = vpop.permute.xlu1 %5005  ;;  %v9965_v62 = vpop.permute.xlu0 %5061 }
0x1823   :  { %11575 = vst [vmem:[#allocation61_spill] sm:$0xff] %v9963_v25  ;;  %11576 = vst [vmem:[#allocation46_spill] sm:$0xff] %v9965_v62 }
0x1824   :  { %v4109_v26 = vsel %vm4102_vm5, %v4099_v2, %v4108_v42  ;;  %5177 = vbcast.lane.b32.xlu1 %v9761_v50, 360  ;;  %4679 = vbcast.lane.b32.xlu0 %v9777_v36, 312 }
0x1825   :  { %v4118_v21 = vmul.f32 %v4109_v26, %v9678_v14  ;;  %v4120_v55 = vcombine.high %v4109_v26, %v4109_v26  ;;  %v4127_v49 = vrot.slane %v4109_v26, %v11577_v51  ;;  %v9984_v26 = vmul.f32 %v5454_v53, %v9678_v14 }
0x1826   :  { %v9973_v33 = vpop.permute.xlu1 %5065  ;;  %v9975_v11 = vpop.permute.xlu0 %5037 }
0x1827   :  { %11578 = vst [vmem:[#allocation81_spill] sm:$0xff] %v9973_v33  ;;  %11579 = vst [vmem:[#allocation56_spill] sm:$0xff] %v9975_v11  ;;  %v4134_v42 = vrot.slane %v4120_v55, %v11577_v51  ;;  %v4135_v18 = vcombine.high %v4127_v49, %v4127_v49  ;;  %v4143_v28 = vrot.slane %v4127_v49, %v11577_v51 }
0x1828   :  { %v4682_v30 = vcombine.high %v4118_v21, %v4118_v21  ;;  %11580 = vst [vmem:[#allocation74_spill] sm:$0xff] %v9984_v26  ;;  %v4689_v39 = vrot.slane %v4118_v21, %v11577_v51  ;;  %4993 = vbcast.lane.b32.xlu1 %v9692_v38, 376  ;;  %5089 = vbcast.lane.b32.xlu0 %v9725_v17, 376 }
0x1829   :  { %v4136_v2 = vcombine.high %v4134_v42, %v4134_v42  ;;  %v4150_v55 = vrot.slane %v4134_v42, %v11577_v51  ;;  %v4157_v40 = vrot.slane %v4135_v18, %v11577_v51  ;;  %v4165_v49 = vcombine.high %v4143_v28, %v4143_v28 }
0x182a   :  { %v4696_v11 = vrot.slane %v4682_v30, %v11577_v51  ;;  %v4697_v14 = vcombine.high %v4689_v39, %v4689_v39  ;;  %v4705_v53 = vrot.slane %v4689_v39, %v11577_v51  ;;  %v9995_v21 = vpop.permute.xlu1 %5093  ;;  %v9997_v38 = vpop.permute.xlu0 %5097  ;;  %v10002_v42 = vrot.slane %v4143_v28, %v11547_v35  ;;  %v10011_v39 = vld [vmem:[%s11190_s9 + $0x168] sm:$0xff] }
0x182b   :  { %11581 = vst [vmem:[#allocation66_spill] sm:$0xff] %v9995_v21  ;;  %11582 = vst [vmem:[#allocation41_spill] sm:$0xff] %v9997_v38  ;;  %v4164_v47 = vrot.slane %v4136_v2, %v11577_v51  ;;  %v4166_v57 = vcombine.high %v4150_v55, %v4150_v55  ;;  %v4167_v33 = vcombine.high %v4157_v40, %v4157_v40 }
0x182c   :  { %11583 = vst [vmem:[#allocation38_spill] sm:$0xff] %v10002_v42  ;;  %v10005_v18 = vrot.slane %v4157_v40, %v11547_v35  ;;  %v4698_v30 = vcombine.high %v4696_v11, %v4696_v11  ;;  %v4712_v25 = vrot.slane %v4696_v11, %v11577_v51  ;;  %11585 = vst [vmem:[#allocation73_spill] sm:$0xff] %v10011_v39  ;;  %5149 = vbcast.lane.b32.xlu1 %v9749_v61, 368 }
0x182d   :  { %v4168_v17 = vcombine.high %v4164_v47, %v4164_v47  ;;  %v10016_v38 = vrot.slane %v4165_v49, %v11547_v35  ;;  %v10019_v28 = vrot.slane %v4167_v33, %v11547_v35  ;;  %v10022_v40 = vrot.slane %v4150_v55, %v11547_v35  ;;  %5209 = vbcast.lane.b32.xlu0 %v9777_v36, 360 }
0x182e   :  { %11584 = vst [vmem:[#allocation62_spill] sm:$0xff] %v10005_v18  ;;  %v4719_v11 = vrot.slane %v4697_v14, %v11577_v51  ;;  %v4726_v21 = vrot.slane %v4698_v30, %v11577_v51  ;;  %v4727_v8 = vcombine.high %v4705_v53, %v4705_v53  ;;  %v4728_v62 = vcombine.high %v4712_v25, %v4712_v25  ;;  %v10027_v54 = vpop.permute.xlu1 %4605  ;;  %v10029_v2 = vpop.permute.xlu0 %4632 }
0x182f   :  { %11586 = vst [vmem:[#allocation91_spill] sm:$0xff] %v10016_v38  ;;  %11587 = vst [vmem:[#allocation70_spill] sm:$0xff] %v10022_v40  ;;  %v10032_v49 = vrot.slane %v4164_v47, %v11547_v35  ;;  %v10035_v33 = vrot.slane %v4166_v57, %v11547_v35  ;;  %v10038_v55 = vrot.slane %v4712_v25, %v11547_v35 }
0x1830   :  { %v4209_v14 = vmul.f32 %v10002_v42, %v10011_v39  ;;  %v10043_v51 = vrot.slane %v4168_v17, %v11547_v35  ;;  %v4729_v30 = vcombine.high %v4719_v11, %v4719_v11  ;;  %v4730_v26 = vcombine.high %v4726_v21, %v4726_v21  ;;  %5121 = vbcast.lane.b32.xlu1 %v9737_v44, 376 }
0x1831   :  { %11588 = vst [vmem:[#allocation54_spill] sm:$0xff] %v10032_v49  ;;  %11589 = vst [vmem:[#allocation68_spill] sm:$0xff] %v10035_v33  ;;  %v10046_v32 = vrot.slane %v4705_v53, %v11547_v35  ;;  %v10050_v47 = vrot.slane %v4719_v11, %v11547_v35  ;;  %v10053_v57 = vrot.slane %v4727_v8, %v11547_v35  ;;  %5181 = vbcast.lane.b32.xlu0 %v9761_v50, 368 }
0x1832   :  { %11590 = vst [vmem:[#allocation55_spill] sm:$0xff] %v10038_v55  ;;  %11591 = vst [vmem:[#allocation45_spill] sm:$0xff] %v10043_v51  ;;  %v10056_v25 = vrot.slane %v4726_v21, %v11547_v35  ;;  %v10059_v33 = vrot.slane %v4728_v62, %v11547_v35  ;;  %v10064_v53 = vmul.f32 %v10038_v55, %v9906_v60  ;;  %v4273_v17 = vmul.f32 1.442695, %v4209_v14  ;;  %v10075_v21 = vld [vmem:[%s11190_s9 + $0x170] sm:$0xff]  ;;  %v10077_v62 = vpop.permute.xlu1 %4659  ;;  %v10079_v11 = vpop.permute.xlu0 %4973 }
0x1833   :  { %11592 = vst [vmem:[#allocation53_spill] sm:$0xff] %v10046_v32  ;;  %11593 = vst [vmem:[#allocation50_spill] sm:$0xff] %v10053_v57  ;;  %v10068_v44 = vmul.f32 %v10038_v55, %v9918_v29  ;;  %v4217_v8 = vmul.f32 %v10005_v18, %v10011_v39  ;;  %v10082_v60 = vrot.slane %v4729_v30, %v11547_v35 }
0x1834   :  { %11594 = vst [vmem:[#allocation98_spill] sm:$0xff] %v10059_v33  ;;  %11595 = vst [vmem:[#allocation57_spill] sm:$0xff] %v10064_v53  ;;  %v10085_v53 = vrot.slane %v4730_v26, %v11547_v35  ;;  %v10089_v29 = vmul.f32 %v10056_v25, %v9908_v3  ;;  %v10093_v14 = vmul.f32 %v10056_v25, %v9920_v7  ;;  %7171 = vpow2.f32 %v4273_v17 }
0x1835   :  { %11596 = vst [vmem:[#allocation102_spill] sm:$0xff] %v10068_v44  ;;  %11597 = vst [vmem:[#allocation69_spill] sm:$0xff] %v10082_v60  ;;  %v10097_v44 = vmul.f32 %v10059_v33, %v9912_v43  ;;  %v4289_v51 = vmul.f32 1.442695, %v4217_v8  ;;  %v10101_v30 = vmul.f32 %v10046_v32, %v9785_v46  ;;  %5153 = vbcast.lane.b32.xlu1 %v9749_v61, 376  ;;  %5213 = vbcast.lane.b32.xlu0 %v9777_v36, 368 }
0x1836   :  { %11598 = vst [vmem:[#allocation84_spill] sm:$0xff] %v10085_v53  ;;  %11599 = vst [vmem:[#allocation36_spill] sm:$0xff] %v10089_v29  ;;  %v10106_v3 = vmul.f32 %v10050_v47, %v9795_v10  ;;  %v4210_v7 = vmul.f32 %v10002_v42, %v10075_v21  ;;  %v4218_v26 = vmul.f32 %v10005_v18, %v10075_v21  ;;  %v10127_v8 = vpop.permute.xlu1 %5009  ;;  %v10129_v17 = vpop.permute.xlu0 %5069 }
0x1837   :  { %11600 = vst [vmem:[#allocation93_spill] sm:$0xff] %v10093_v14  ;;  %11601 = vst [vmem:[#allocation67_spill] sm:$0xff] %v10097_v44  ;;  %v10114_v43 = vmul.f32 %v10046_v32, %v9783_v24  ;;  %7173 = vpow2.f32 %v4289_v51  ;;  %v10119_v61 = vmul.f32 %v10050_v47, %v9797_v15  ;;  %v4225_v46 = vmul.f32 %v10016_v38, %v10011_v39  ;;  %v10140_v14 = vld [vmem:[%s11190_s9 + $0x178] sm:$0xff] }
0x1838   :  { %v10125_v10 = vmul.f32 %v10053_v57, %v9813_v22  ;;  %v4275_v24 = vmul.f32 1.442695, %v4210_v7  ;;  %v4291_v35 = vmul.f32 1.442695, %v4218_v26  ;;  %v4226_v51 = vmul.f32 %v10016_v38, %v10075_v21  ;;  %11602 = vst [vmem:[#allocation79_spill] sm:$0xff] %v10140_v14 }
0x1839   :  { %v10135_v15 = vmul.f32 %v10053_v57, %v9815_v13  ;;  %v4305_v22 = vmul.f32 1.442695, %v4225_v46  ;;  %v10144_v29 = vmul.f32 %v10038_v55, %v9938_v12  ;;  %v10148_v7 = vmul.f32 %v10056_v25, %v9942_v63  ;;  %5185 = vbcast.lane.b32.xlu1 %v9761_v50, 376  ;;  %5217 = vbcast.lane.b32.xlu0 %v9777_v36, 376 }
0x183a   :  { %v10152_v26 = vmul.f32 %v10059_v33, %v9944_v16  ;;  %7175 = vpow2.f32 %v4275_v24  ;;  %v4307_v13 = vmul.f32 1.442695, %v4226_v51  ;;  %v10157_v44 = vmul.f32 %v10085_v53, %v9948_v31  ;;  %v10172_v46 = vpop.permute.xlu1 %5125  ;;  %v10174_v31 = vpop.permute.xlu0 %5129 }
0x183b   :  { %11603 = vst [vmem:[#allocation60_spill] sm:$0xff] %v10144_v29  ;;  %11604 = vst [vmem:[#allocation78_spill] sm:$0xff] %v10148_v7  ;;  %v10161_v12 = vmul.f32 %v10085_v53, %v9950_v5  ;;  %7177 = vpow2.f32 %v4291_v35  ;;  %v4211_v63 = vmul.f32 %v10002_v42, %v10140_v14  ;;  %v4219_v16 = vmul.f32 %v10005_v18, %v10140_v14 }
0x183c   :  { %11605 = vst [vmem:[#allocation75_spill] sm:$0xff] %v10152_v26  ;;  %11606 = vst [vmem:[#allocation77_spill] sm:$0xff] %v10157_v44  ;;  %v10170_v50 = vmul.f32 %v10046_v32, %v9789_v27  ;;  %7179 = vpow2.f32 %v4305_v22  ;;  %v10178_v5 = vmul.f32 %v10050_v47, %v9803_v6  ;;  %v4233_v35 = vmul.f32 %v10019_v28, %v10011_v39 }
0x183d   :  { %11607 = vst [vmem:[#allocation72_spill] sm:$0xff] %v10161_v12  ;;  %v10184_v36 = vmul.f32 %v10082_v60, %v9837_v34  ;;  %7181 = vpow2.f32 %v4307_v13  ;;  %v4277_v24 = vmul.f32 1.442695, %v4211_v63  ;;  %v4293_v27 = vmul.f32 1.442695, %v4219_v16 }
0x183e   :  { %v4234_v51 = vmul.f32 %v10019_v28, %v10075_v21  ;;  %v11608_v22 = vrot.slane %v9961_v1, 1  ;;  %v4321_v29 = vmul.f32 1.442695, %v4233_v35  ;;  %v10193_v6 = vmul.f32 %v10082_v60, %v9839_v23  ;;  %v10213_v35 = vld [vmem:[%s11190_s9 + $0x180] sm:$0xff] }
0x183f   :  { %v4227_v7 = vmul.f32 %v10016_v38, %v10140_v14  ;;  %v10199_v34 = vmul.f32 %v10053_v57, %v9825_v37  ;;  %v11609_v13 = vrot.slane %v9961_v1, 2  ;;  %7183 = vpow2.f32 %v4277_v24  ;;  %v10215_v37 = vpop.permute.xlu1 %5041 }
0x1840   :  { %5497 = vrot.lane.b32.xlu1 %v11608_v22, %s7444_s29  ;;  %v4323_v63 = vmul.f32 1.442695, %v4234_v51  ;;  %v4241_v16 = vmul.f32 %v10022_v40, %v10011_v39  ;;  %v10208_v23 = vmul.f32 %v10038_v55, %v9861_v56  ;;  %v10217_v22 = vpop.permute.xlu0 %5101  ;;  %7185 = vpow2.f32 %v4293_v27 }
0x1841   :  { %5499 = vrot.lane.b32.xlu0 %v11609_v13, %s7444_s29  ;;  %v4309_v13 = vmul.f32 1.442695, %v4227_v7  ;;  %v4242_v24 = vmul.f32 %v10022_v40, %v10075_v21  ;;  %v10223_v51 = vmul.f32 %v10038_v55, %v9863_v58  ;;  %7187 = vpow2.f32 %v4321_v29  ;;  %v7172_v7 = vpop.eup %7171 }
0x1842   :  { %v4337_v56 = vmul.f32 1.442695, %v4241_v16  ;;  %v10227_v26 = vmul.f32 %v10056_v25, %v10027_v54  ;;  %v10231_v12 = vmul.f32 %v10059_v33, %v10029_v2  ;;  %7189 = vpow2.f32 %v4323_v63 }
0x1843   :  { %v4339_v27 = vmul.f32 1.442695, %v4242_v24  ;;  %v10237_v58 = vmul.f32 %v10085_v53, %v10077_v62  ;;  %v4212_v29 = vmul.f32 %v10002_v42, %v10213_v35  ;;  %v11613_v54 = vrot.slane %v9961_v1, 3  ;;  %v10250_v24 = vpop.permute.xlu1 %5157 }
0x1844   :  { %11610 = vst [vmem:[#allocation101_spill] sm:$0xff] %v10227_v26  ;;  %11611 = vst [vmem:[#allocation92_spill] sm:$0xff] %v10231_v12  ;;  %5495 = vrot.lane.b32.xlu1 %v9961_v1, %s7444_s29  ;;  %v4835_v16 = vmul.f32 0.0, %v7172_v7  ;;  %7191 = vpow2.f32 %v4309_v13  ;;  %v4220_v2 = vmul.f32 %v10005_v18, %v10213_v35  ;;  %v10248_v63 = vmul.f32 %v10046_v32, %v9791_v48  ;;  %v10252_v62 = vpop.permute.xlu0 %5161  ;;  %v7174_v26 = vpop.eup %7173 }
0x1845   :  { %11612 = vst [vmem:[#allocation80_spill] sm:$0xff] %v10237_v58  ;;  %5501 = vrot.lane.b32.xlu0 %v11613_v54, %s7444_s29  ;;  %11614 = vst [vmem:[#allocation90_spill] sm:$0xff] %v10252_v62  ;;  %7193 = vpow2.f32 %v4337_v56  ;;  %v4279_v12 = vmul.f32 1.442695, %v4212_v29  ;;  %v10256_v58 = vmul.f32 %v10050_v47, %v9809_v4  ;;  %v4235_v13 = vmul.f32 %v10019_v28, %v10140_v14 }
0x1846   :  { %v4843_v7 = vadd.f32 %v4835_v16, %v10101_v30  ;;  %7195 = vpow2.f32 %v4339_v27  ;;  %v4295_v54 = vmul.f32 1.442695, %v4220_v2  ;;  %v10263_v48 = vmul.f32 %v10082_v60, %v9849_v52 }
0x1847   :  { %v11615_v44 = vrot.slane %v9961_v1, 4  ;;  %7197 = vpow2.f32 %v4279_v12  ;;  %v4325_v56 = vmul.f32 1.442695, %v4235_v13  ;;  %v4249_v4 = vmul.f32 %v10032_v49, %v10011_v39  ;;  %v7176_v27 = vpop.eup %7175  ;;  %v10280_v12 = vpop.permute.xlu1 %4609 }
0x1848   :  { %v10272_v29 = vmul.f32 %v10056_v25, %v9885_v59  ;;  %v11616_v30 = vrot.slane %v9961_v1, 5  ;;  %v4851_v52 = vmul.f32 %v7174_v26, %v4843_v7  ;;  %v5219_v16 = vmul.f32 %v9954_v20, %v4843_v7  ;;  %v10282_v2 = vpop.permute.xlu0 %4636  ;;  %v7178_v13 = vpop.eup %7177 }
0x1849   :  { %5503 = vrot.lane.b32.xlu1 %v11615_v44, %s7444_s29  ;;  %7199 = vpow2.f32 %v4295_v54  ;;  %v4250_v44 = vmul.f32 %v10032_v49, %v10075_v21  ;;  %v4836_v62 = vmul.f32 0.0, %v7176_v27  ;;  %v4353_v59 = vmul.f32 1.442695, %v4249_v4 }
0x184a   :  { %5505 = vrot.lane.b32.xlu0 %v11616_v30, %s7444_s29  ;;  %7201 = vpow2.f32 %v4325_v56  ;;  %v10286_v60 = vmul.f32 %v10056_v25, %v9887_v0  ;;  %v7180_v30 = vpop.eup %7179  ;;  %v4859_v26 = vadd.f32 %v4851_v52, %v10106_v3  ;;  %v5283_v20 = vsel %vm313_vm2, %v5219_v16, 0.0 }
0x184b   :  { %v4355_v7 = vmul.f32 1.442695, %v4250_v44  ;;  %v4228_v54 = vmul.f32 %v10016_v38, %v10213_v35  ;;  %v11617_v49 = vrot.slane %v9961_v1, 6  ;;  %v7182_v27 = vpop.eup %7181  ;;  %v4844_v56 = vadd.f32 %v4836_v62, %v10114_v43  ;;  %v10306_v44 = vpop.permute.xlu1 %4663 }
0x184c   :  { %7203 = vpow2.f32 %v4353_v59  ;;  %v10298_v0 = vmul.f32 %v10053_v57, %v9833_v41  ;;  %v4243_v3 = vmul.f32 %v10022_v40, %v10140_v14  ;;  %v11618_v4 = vrot.slane %v9961_v1, 7  ;;  %v10308_v43 = vpop.permute.xlu0 %4977  ;;  %v7184_v62 = vpop.eup %7183 }
0x184d   :  { %5507 = vrot.lane.b32.xlu1 %v11617_v49, %s7444_s29  ;;  %v5227_v52 = vmul.f32 %v9926_v9, %v4859_v26  ;;  %v4867_v16 = vmul.f32 %v7180_v30, %v4859_v26  ;;  %7205 = vpow2.f32 %v4355_v7  ;;  %v4311_v49 = vmul.f32 1.442695, %v4228_v54  ;;  %v7186_v1 = vpop.eup %7185 }
0x184e   :  { %5509 = vrot.lane.b32.xlu0 %v11618_v4, %s7444_s29  ;;  %v4852_v59 = vmul.f32 %v7178_v13, %v4844_v56  ;;  %v5220_v41 = vmul.f32 %v9956_v19, %v4844_v56  ;;  %v4341_v57 = vmul.f32 1.442695, %v4243_v3  ;;  %v10313_v40 = vmul.f32 %v10038_v55, %v9873_v45  ;;  %v7188_v26 = vpop.eup %7187  ;;  %v11619_v19 = vld [vmem:[#allocation68_spill] sm:$0xff]  ;;  %v11620_v3 = vld [vmem:[#allocation59_spill] sm:$0xff] }
0x184f   :  { %v5304_v4 = vsel %vm313_vm2, %v5227_v52, 0.0  ;;  %v4875_v9 = vadd.f32 %v4867_v16, %v10125_v10  ;;  %v4837_v30 = vmul.f32 0.0, %v7184_v62  ;;  %7207 = vpow2.f32 %v4311_v49  ;;  %v7190_v56 = vpop.eup %7189  ;;  %v10323_v14 = vpop.permute.xlu1 %5013  ;;  %v11623_v49 = vld [vmem:[#allocation100_spill] sm:$0xff] }
0x1850   :  { %v4860_v7 = vadd.f32 %v4852_v59, %v10119_v61  ;;  %v5284_v54 = vsel %vm313_vm2, %v5220_v41, 0.0  ;;  %7209 = vpow2.f32 %v4341_v57  ;;  %v4257_v13 = vmul.f32 %v11619_v19, %v10011_v39  ;;  %11621 = vst [vmem:[#allocation65_spill] sm:$0xff] %v10323_v14  ;;  %v10325_v10 = vpop.permute.xlu0 %5073 }
0x1851   :  { %v5235_v45 = vmul.f32 %v11620_v3, %v4875_v9  ;;  %v5285_v55 = vadd.f32 %v5284_v54, %v5283_v20  ;;  %v4845_v38 = vadd.f32 %v4837_v30, %v10170_v50  ;;  %v4883_v52 = vmul.f32 %v7188_v26, %v4875_v9  ;;  %11622 = vst [vmem:[#allocation71_spill] sm:$0xff] %v10325_v10  ;;  %v7192_v16 = vpop.eup %7191 }
0x1852   :  { %v5228_v61 = vmul.f32 %v11623_v49, %v4860_v7  ;;  %v4868_v62 = vmul.f32 %v7182_v27, %v4860_v7  ;;  %v4369_v59 = vmul.f32 1.442695, %v4257_v13  ;;  %v4258_v57 = vmul.f32 %v11619_v19, %v10075_v21  ;;  %v7194_v41 = vpop.eup %7193  ;;  %v11624_v49 = vld [vmem:[#allocation46_spill] sm:$0xff] }
0x1853   :  { %v5325_v39 = vsel %vm313_vm2, %v5235_v45, 0.0  ;;  %v4853_v3 = vmul.f32 %v7186_v1, %v4845_v38  ;;  %v4891_v20 = vadd.f32 %v4883_v52, %v10184_v36  ;;  %v5221_v50 = vmul.f32 %v10079_v11, %v4845_v38  ;;  %v7196_v9 = vpop.eup %7195  ;;  %v10337_v45 = vpop.permute.xlu1 %5133  ;;  %v11625_v38 = vld [vmem:[#allocation63_spill] sm:$0xff] }
0x1854   :  { %v5305_v30 = vsel %vm313_vm2, %v5228_v61, 0.0  ;;  %v4876_v26 = vadd.f32 %v4868_v62, %v10135_v15  ;;  %7211 = vpow2.f32 %v4369_v59  ;;  %v4371_v54 = vmul.f32 1.442695, %v4258_v57  ;;  %v7198_v27 = vpop.eup %7197  ;;  %v10339_v1 = vpop.permute.xlu0 %5189  ;;  %v11626_v59 = vld [vmem:[#allocation61_spill] sm:$0xff] }
0x1855   :  { %v5306_v7 = vadd.f32 %v5305_v30, %v5304_v4  ;;  %v4861_v13 = vadd.f32 %v4853_v3, %v10178_v5  ;;  %v5243_v10 = vmul.f32 %v11624_v49, %v4891_v20  ;;  %v4899_v14 = vmul.f32 %v7194_v41, %v4891_v20 }
0x1856   :  { %v7200_v36 = vpop.eup %7199  ;;  %v5236_v11 = vmul.f32 %v11625_v38, %v4876_v26  ;;  %v4884_v52 = vmul.f32 %v7190_v56, %v4876_v26  ;;  %v5286_v61 = vsel %vm313_vm2, %v5221_v50, 0.0  ;;  %v4838_v15 = vmul.f32 0.0, %v7198_v27  ;;  %v11627_v38 = vld [vmem:[#allocation66_spill] sm:$0xff] }
0x1857   :  { %v7202_v62 = vpop.eup %7201  ;;  %v5229_v57 = vmul.f32 %v11626_v59, %v4861_v13  ;;  %v5346_v4 = vsel %vm313_vm2, %v5243_v10, 0.0  ;;  %v4869_v5 = vmul.f32 %v7192_v16, %v4861_v13  ;;  %v4907_v3 = vadd.f32 %v4899_v14, %v10208_v23  ;;  %v10354_v10 = vpop.permute.xlu1 %5193  ;;  %v11628_v13 = vld [vmem:[#allocation81_spill] sm:$0xff] }
0x1858   :  { %v5326_v41 = vsel %vm313_vm2, %v5236_v11, 0.0  ;;  %v4892_v20 = vadd.f32 %v4884_v52, %v10193_v6  ;;  %v10348_v30 = vadd.f32 %v5286_v61, %v5285_v55  ;;  %v4846_v49 = vadd.f32 %v4838_v15, %v10248_v63  ;;  %v10356_v16 = vpop.permute.xlu0 %5045  ;;  %v11629_v52 = vld [vmem:[#allocation56_spill] sm:$0xff] }
0x1859   :  { %v7204_v56 = vpop.eup %7203  ;;  %v5327_v26 = vadd.f32 %v5326_v41, %v5325_v39  ;;  %v5307_v50 = vsel %vm313_vm2, %v5229_v57, 0.0  ;;  %v4877_v27 = vadd.f32 %v4869_v5, %v10199_v34  ;;  %v5251_v59 = vmul.f32 %v11627_v38, %v4907_v3 }
0x185a   :  { %v7206_v14 = vpop.eup %7205  ;;  %v5308_v23 = vadd.f32 %v5307_v50, %v5306_v7  ;;  %v5244_v6 = vmul.f32 %v11628_v13, %v4892_v20  ;;  %v4900_v55 = vmul.f32 %v7196_v9, %v4892_v20  ;;  %v4854_v11 = vmul.f32 %v7200_v36, %v4846_v49 }
0x185b   :  { %v5237_v63 = vmul.f32 %v11629_v52, %v4877_v27  ;;  %v5367_v39 = vsel %vm313_vm2, %v5251_v59, 0.0  ;;  %v4885_v61 = vmul.f32 %v7202_v62, %v4877_v27  ;;  %v4915_v15 = vmul.f32 %v7204_v56, %v4907_v3  ;;  %v10367_v20 = vpop.permute.xlu1 %5105  ;;  %v11630_v56 = vld [vmem:[#allocation41_spill] sm:$0xff] }
0x185c   :  { %v7208_v57 = vpop.eup %7207  ;;  %v5347_v34 = vsel %vm313_vm2, %v5244_v6, 0.0  ;;  %v4908_v5 = vadd.f32 %v4900_v55, %v10223_v51  ;;  %v4862_v41 = vadd.f32 %v4854_v11, %v10256_v58  ;;  %7213 = vpow2.f32 %v4371_v54  ;;  %v10369_v62 = vpop.permute.xlu0 %5165 }
0x185d   :  { %v7210_v38 = vpop.eup %7209  ;;  %v5348_v7 = vadd.f32 %v5347_v34, %v5346_v4  ;;  %v5328_v50 = vsel %vm313_vm2, %v5237_v63, 0.0  ;;  %v4893_v9 = vadd.f32 %v4885_v61, %v10263_v48  ;;  %v4923_v36 = vadd.f32 %v4915_v15, %v10272_v29 }
0x185e   :  { %v5329_v3 = vadd.f32 %v5328_v50, %v5327_v26  ;;  %v5252_v27 = vmul.f32 %v11630_v56, %v4908_v5  ;;  %v5230_v51 = vmul.f32 %v10127_v8, %v4862_v41  ;;  %v4916_v59 = vmul.f32 %v7206_v14, %v4908_v5  ;;  %v10389_v14 = vld [vmem:[%s11190_s9 + $0x188] sm:$0xff] }
0x185f   :  { %v5245_v58 = vmul.f32 %v10129_v17, %v4893_v9  ;;  %v5259_v54 = vmul.f32 %v10172_v46, %v4923_v36  ;;  %v4870_v4 = vmul.f32 %v7208_v57, %v4862_v41  ;;  %v4901_v13 = vmul.f32 %v7210_v38, %v4893_v9  ;;  %11632 = vst [vmem:[#allocation51_spill] sm:$0xff] %v10389_v14  ;;  %v10391_v52 = vpop.permute.xlu1 %4640 }
0x1860   :  { %v5368_v48 = vsel %vm313_vm2, %v5252_v27, 0.0  ;;  %v5309_v29 = vsel %vm313_vm2, %v5230_v51, 0.0  ;;  %v4924_v6 = vadd.f32 %v4916_v59, %v10286_v60  ;;  %v10380_v26 = vmul.f32 %v10056_v25, %v10280_v12  ;;  %v10393_v60 = vpop.permute.xlu0 %4667  ;;  %v11636_v59 = vld [vmem:[#allocation97_spill] sm:$0xff] }
0x1861   :  { %v7212_v55 = vpop.eup %7211  ;;  %v5369_v11 = vadd.f32 %v5368_v48, %v5367_v39  ;;  %v10382_v8 = vadd.f32 %v5309_v29, %v5308_v23  ;;  %v5349_v17 = vsel %vm313_vm2, %v5245_v58, 0.0  ;;  %v5388_v46 = vsel %vm313_vm2, %v5259_v54, 0.0  ;;  %v11637_v54 = vld [vmem:[#allocation87_spill] sm:$0xff]  ;;  %v11638_v48 = vld [vmem:[#allocation85_spill] sm:$0xff] }
0x1862   :  { %11631 = vst [vmem:[#allocation42_spill] sm:$0xff] %v10380_v26  ;;  %v10395_v63 = vadd.f32 %v5349_v17, %v5348_v7  ;;  %v5260_v12 = vmul.f32 %v10174_v31, %v4924_v6  ;;  %v10399_v23 = vadd.f32 %v4870_v4, %v10298_v0  ;;  %v10402_v39 = vadd.f32 %v4901_v13, %v10313_v40  ;;  %v11641_v17 = vld [vmem:[#allocation54_spill] sm:$0xff]  ;;  %v11654_v26 = vld [vmem:[#allocation95_spill] sm:$0xff] }
0x1863   :  { %v4931_v61 = vmul.f32 %v7212_v55, %v4923_v36  ;;  %v10406_v15 = vmul.f32 %v10059_v33, %v10282_v2  ;;  %v10410_v57 = vmul.f32 %v10085_v53, %v10306_v44  ;;  %v5222_v34 = vmul.f32 %v10308_v43, %v4846_v49  ;;  %v11635_v2 = vld [vmem:[#allocation67_spill] sm:$0xff]  ;;  %v10428_v49 = vpop.permute.xlu1 %4981 }
0x1864   :  { %v5389_v5 = vsel %vm313_vm2, %v5260_v12, 0.0  ;;  %v5238_v31 = vmul.f32 %v10215_v37, %v10399_v23  ;;  %v5253_v40 = vmul.f32 %v10217_v22, %v10402_v39  ;;  %v4213_v0 = vmul.f32 %v10002_v42, %v10389_v14  ;;  %v10430_v7 = vpop.permute.xlu0 %5017 }
0x1865   :  { %11633 = vst [vmem:[#allocation76_spill] sm:$0xff] %v10406_v15  ;;  %11634 = vst [vmem:[#allocation35_spill] sm:$0xff] %v10410_v57  ;;  %v10420_v41 = vadd.f32 %v5389_v5, %v5388_v46  ;;  %v10423_v38 = vadd.f32 %v4931_v61, %v11635_v2  ;;  %v5288_v44 = vsel %vm313_vm2, %v5222_v34, 0.0  ;;  %v4221_v43 = vmul.f32 %v10005_v18, %v10389_v14  ;;  %v11644_v2 = vld [vmem:[#allocation39_spill] sm:$0xff] }
0x1866   :  { %v5330_v37 = vsel %vm313_vm2, %v5238_v31, 0.0  ;;  %v5370_v22 = vsel %vm313_vm2, %v5253_v40, 0.0  ;;  %v10435_v50 = vadd.f32 %v5288_v44, %v10348_v30  ;;  %v4281_v9 = vmul.f32 1.442695, %v4213_v0  ;;  %v11642_v31 = vld [vmem:[#allocation73_spill] sm:$0xff] }
0x1867   :  { %v10437_v36 = vadd.f32 %v5330_v37, %v5329_v3  ;;  %v10439_v56 = vadd.f32 %v5370_v22, %v5369_v11  ;;  %v5267_v27 = vmul.f32 %v10250_v24, %v10423_v38  ;;  %v4297_v51 = vmul.f32 1.442695, %v4221_v43  ;;  %v11639_v24 = vld [vmem:[#allocation40_spill] sm:$0xff]  ;;  %v11640_v11 = vld [vmem:[#allocation79_spill] sm:$0xff]  ;;  %v10462_v12 = vpop.permute.xlu1 %5077  ;;  %v11643_v40 = vld [vmem:[#allocation45_spill] sm:$0xff] }
0x1868   :  { %v4820_v58 = vmul.f32 %v10059_v33, %v11636_v59  ;;  %v10447_v4 = vmul.f32 %v10059_v33, %v11637_v54  ;;  %7215 = vpow2.f32 %v4281_v9  ;;  %v4236_v30 = vmul.f32 %v10019_v28, %v10213_v35  ;;  %v10464_v61 = vpop.permute.xlu0 %5137  ;;  %v11645_v44 = vld [vmem:[#allocation69_spill] sm:$0xff]  ;;  %v11646_v9 = vld [vmem:[#allocation91_spill] sm:$0xff] }
0x1869   :  { %v7214_v13 = vpop.eup %7213  ;;  %v5409_v3 = vsel %vm313_vm2, %v5267_v27, 0.0  ;;  %v10454_v29 = vmul.f32 %v10046_v32, %v11638_v48  ;;  %v10458_v55 = vmul.f32 %v10050_v47, %v11639_v24  ;;  %v4251_v46 = vmul.f32 %v11641_v17, %v11640_v11 }
0x186a   :  { %v4932_v34 = vmul.f32 %v7214_v13, %v4924_v6  ;;  %7217 = vpow2.f32 %v4297_v51  ;;  %v4327_v5 = vmul.f32 1.442695, %v4236_v30  ;;  %v4265_v0 = vmul.f32 %v11643_v40, %v11642_v31  ;;  %v11647_v51 = vld [vmem:[#allocation70_spill] sm:$0xff] }
0x186b   :  { %v10470_v43 = vmul.f32 %v11645_v44, %v11644_v2  ;;  %v4357_v37 = vmul.f32 1.442695, %v4251_v46  ;;  %v4266_v22 = vmul.f32 %v11643_v40, %v10075_v21  ;;  %v4229_v27 = vmul.f32 %v11646_v9, %v10389_v14  ;;  %v10483_v30 = vld [vmem:[%s11190_s9 + $0x190] sm:$0xff]  ;;  %v10489_v46 = vpop.permute.xlu1 %5197 }
0x186c   :  { %v10476_v59 = vadd.f32 %v4932_v34, %v4820_v58  ;;  %7219 = vpow2.f32 %v4327_v5  ;;  %v4385_v6 = vmul.f32 1.442695, %v4265_v0  ;;  %v4244_v54 = vmul.f32 %v11647_v51, %v10213_v35  ;;  %v11648_v13 = vld [vmem:[#allocation94_spill] sm:$0xff]  ;;  %v10491_v58 = vpop.permute.xlu0 %5049 }
0x186d   :  { %7221 = vpow2.f32 %v4357_v37  ;;  %v10487_v48 = vmul.f32 %v10056_v25, %v11648_v13  ;;  %v4387_v21 = vmul.f32 1.442695, %v4266_v22  ;;  %v4313_v24 = vmul.f32 1.442695, %v4229_v27  ;;  %v11649_v34 = vld [vmem:[#allocation90_spill] sm:$0xff]  ;;  %v11652_v13 = vld [vmem:[#allocation83_spill] sm:$0xff] }
0x186e   :  { %v5268_v5 = vmul.f32 %v11649_v34, %v10476_v59  ;;  %7223 = vpow2.f32 %v4385_v6  ;;  %v4343_v31 = vmul.f32 1.442695, %v4244_v54  ;;  %v4259_v0 = vmul.f32 %v11619_v19, %v11640_v11 }
0x186f   :  { %7225 = vpow2.f32 %v4387_v21  ;;  %v10499_v2 = vmul.f32 %v10059_v33, %v10391_v52  ;;  %v10503_v25 = vmul.f32 %v10085_v53, %v10393_v60  ;;  %v4214_v37 = vmul.f32 %v10002_v42, %v10483_v30  ;;  %v11653_v21 = vld [vmem:[#allocation50_spill] sm:$0xff]  ;;  %v10516_v60 = vpop.permute.xlu1 %5109 }
0x1870   :  { %v5410_v22 = vsel %vm313_vm2, %v5268_v5, 0.0  ;;  %7227 = vpow2.f32 %v4313_v24  ;;  %v4373_v27 = vmul.f32 1.442695, %v4259_v0  ;;  %v4222_v6 = vmul.f32 %v10005_v18, %v10483_v30  ;;  %v10518_v33 = vpop.permute.xlu0 %5169  ;;  %v11656_v0 = vld [vmem:[#allocation47_spill] sm:$0xff] }
0x1871   :  { %11650 = vst [vmem:[#allocation31_spill] sm:$0xff] %v10499_v2  ;;  %11651 = vst [vmem:[#allocation19_spill] sm:$0xff] %v10503_v25  ;;  %v10510_v54 = vadd.f32 %v5410_v22, %v5409_v3  ;;  %v10514_v52 = vmul.f32 %v11653_v21, %v11652_v13  ;;  %7229 = vpow2.f32 %v4343_v31  ;;  %v4283_v34 = vmul.f32 1.442695, %v4214_v37  ;;  %v11655_v2 = vld [vmem:[#allocation55_spill] sm:$0xff]  ;;  %v11657_v13 = vld [vmem:[#allocation44_spill] sm:$0xff] }
0x1872   :  { %v10522_v5 = vmul.f32 %v11655_v2, %v11654_v26  ;;  %7231 = vpow2.f32 %v4373_v27  ;;  %v4299_v24 = vmul.f32 1.442695, %v4222_v6  ;;  %v4237_v3 = vmul.f32 %v10019_v28, %v10389_v14  ;;  %v11658_v6 = vld [vmem:[#allocation88_spill] sm:$0xff] }
0x1873   :  { %7233 = vpow2.f32 %v4283_v34  ;;  %v10528_v22 = vmul.f32 %v10046_v32, %v11656_v0  ;;  %v4252_v31 = vmul.f32 %v11641_v17, %v10213_v35  ;;  %v4267_v37 = vmul.f32 %v11643_v40, %v11640_v11  ;;  %v10546_v11 = vpop.permute.xlu1 %4644 }
0x1874   :  { %v10536_v26 = vmul.f32 %v10050_v47, %v11657_v13  ;;  %v4329_v27 = vmul.f32 1.442695, %v4237_v3  ;;  %v10540_v15 = vmul.f32 %v11645_v44, %v11658_v6  ;;  %v4230_v34 = vmul.f32 %v11646_v9, %v10483_v30  ;;  %11659 = vst [vmem:[#allocation64_spill] sm:$0xff] %v10546_v11  ;;  %v4672_v40 = vpop.permute.xlu0 %4671  ;;  %v10551_v3 = vld [vmem:[%s11190_s9 + $0x198] sm:$0xff]  ;;  %v11661_v11 = vld [vmem:[#allocation48_spill] sm:$0xff] }
0x1875   :  { %v7216_v0 = vpop.eup %7215  ;;  %7235 = vpow2.f32 %v4299_v24  ;;  %v4359_v25 = vmul.f32 1.442695, %v4252_v31  ;;  %v4389_v57 = vmul.f32 1.442695, %v4267_v37  ;;  %v4245_v17 = vmul.f32 %v11647_v51, %v10389_v14  ;;  %v11660_v31 = vld [vmem:[#allocation82_spill] sm:$0xff] }
0x1876   :  { %v4839_v13 = vmul.f32 0.0, %v7216_v0  ;;  %7237 = vpow2.f32 %v4329_v27  ;;  %v4315_v6 = vmul.f32 1.442695, %v4230_v34  ;;  %v4260_v44 = vmul.f32 %v11619_v19, %v10213_v35 }
0x1877   :  { %v7218_v24 = vpop.eup %7217  ;;  %7239 = vpow2.f32 %v4359_v25  ;;  %v10557_v37 = vmul.f32 %v11653_v21, %v11660_v31  ;;  %v4345_v51 = vmul.f32 1.442695, %v4245_v17  ;;  %v10561_v9 = vmul.f32 %v11655_v2, %v11661_v11  ;;  %v10569_v19 = vpop.permute.xlu1 %4985  ;;  %v11664_v2 = vld [vmem:[#allocation37_spill] sm:$0xff] }
0x1878   :  { %v4847_v14 = vadd.f32 %v4839_v13, %v10454_v29  ;;  %7241 = vpow2.f32 %v4389_v57  ;;  %v4375_v0 = vmul.f32 1.442695, %v4260_v44  ;;  %v4215_v27 = vmul.f32 %v10002_v42, %v10551_v3  ;;  %v10571_v31 = vpop.permute.xlu0 %5021 }
0x1879   :  { %v7220_v34 = vpop.eup %7219  ;;  %7243 = vpow2.f32 %v4315_v6  ;;  %v10567_v25 = vmul.f32 %v10085_v53, %v4672_v40  ;;  %11663 = vst [vmem:[#allocation100_spill] sm:$0xff] %v10571_v31  ;;  %v4223_v17 = vmul.f32 %v10005_v18, %v10551_v3  ;;  %v10577_v29 = vmul.f32 %v10046_v32, %v11664_v2 }
0x187a   :  { %v7222_v57 = vpop.eup %7221  ;;  %v4855_v44 = vmul.f32 %v7218_v24, %v4847_v14  ;;  %v4886_v11 = vmul.f32 %v7220_v34, %v10399_v23  ;;  %v5223_v13 = vmul.f32 %v10428_v49, %v4847_v14  ;;  %7245 = vpow2.f32 %v4345_v51  ;;  %v11667_v34 = vld [vmem:[#allocation77_spill] sm:$0xff] }
0x187b   :  { %11662 = vst [vmem:[#allocation59_spill] sm:$0xff] %v10567_v25  ;;  %v7224_v40 = vpop.eup %7223  ;;  %v4917_v6 = vmul.f32 %v7222_v57, %v10402_v39  ;;  %7247 = vpow2.f32 %v4375_v0  ;;  %v4285_v25 = vmul.f32 1.442695, %v4215_v27  ;;  %v4301_v53 = vmul.f32 1.442695, %v4223_v17  ;;  %v10591_v39 = vpop.permute.xlu1 %5081  ;;  %v11665_v0 = vld [vmem:[#allocation65_spill] sm:$0xff] }
0x187c   :  { %v7226_v31 = vpop.eup %7225  ;;  %v4863_v18 = vadd.f32 %v4855_v44, %v10458_v55  ;;  %v4894_v42 = vadd.f32 %v4886_v11, %v10470_v43  ;;  %v4947_v2 = vmul.f32 %v7224_v40, %v10423_v38  ;;  %v5290_v24 = vsel %vm313_vm2, %v5223_v13, 0.0  ;;  %v10593_v51 = vpop.permute.xlu0 %5141  ;;  %v11666_v27 = vld [vmem:[#allocation71_spill] sm:$0xff] }
0x187d   :  { %v7228_v32 = vpop.eup %7227  ;;  %v4925_v23 = vadd.f32 %v4917_v6, %v10487_v48  ;;  %v4948_v14 = vmul.f32 %v7226_v31, %v10476_v59  ;;  %v10589_v49 = vadd.f32 %v5290_v24, %v10435_v50  ;;  %7249 = vpow2.f32 %v4285_v25  ;;  %v11668_v59 = vld [vmem:[#allocation72_spill] sm:$0xff] }
0x187e   :  { %v7230_v55 = vpop.eup %7229  ;;  %v5231_v43 = vmul.f32 %v11665_v0, %v4863_v18  ;;  %v5246_v38 = vmul.f32 %v11666_v27, %v4894_v42  ;;  %v4955_v17 = vadd.f32 %v4947_v2, %v11667_v34  ;;  %v4871_v57 = vmul.f32 %v7228_v32, %v4863_v18 }
0x187f   :  { %v7232_v44 = vpop.eup %7231  ;;  %v5261_v48 = vmul.f32 %v10337_v45, %v4925_v23  ;;  %v4956_v31 = vadd.f32 %v4948_v14, %v11668_v59  ;;  %v4902_v50 = vmul.f32 %v7230_v55, %v4894_v42  ;;  %7251 = vpow2.f32 %v4301_v53  ;;  %v10610_v42 = vpop.permute.xlu1 %5201 }
0x1880   :  { %v7234_v25 = vpop.eup %7233  ;;  %v5311_v11 = vsel %vm313_vm2, %v5231_v43, 0.0  ;;  %v5351_v13 = vsel %vm313_vm2, %v5246_v38, 0.0  ;;  %v5275_v40 = vmul.f32 %v10339_v1, %v4955_v17  ;;  %v4879_v6 = vadd.f32 %v4871_v57, %v10514_v52  ;;  %v10612_v53 = vpop.permute.xlu0 %5053 }
0x1881   :  { %v10605_v24 = vadd.f32 %v5311_v11, %v10382_v8  ;;  %v5352_v32 = vadd.f32 %v5351_v13, %v10395_v63  ;;  %v5391_v18 = vsel %vm313_vm2, %v5261_v48, 0.0  ;;  %v5276_v45 = vmul.f32 %v10354_v10, %v4956_v31 }
0x1882   :  { %v7236_v2 = vpop.eup %7235  ;;  %v5392_v14 = vadd.f32 %v5391_v18, %v10420_v41  ;;  %v5430_v1 = vsel %vm313_vm2, %v5275_v40, 0.0  ;;  %v5239_v52 = vmul.f32 %v10356_v16, %v4879_v6  ;;  %v4910_v8 = vadd.f32 %v4902_v50, %v10522_v5 }
0x1883   :  { %v7238_v55 = vpop.eup %7237  ;;  %v5431_v63 = vsel %vm313_vm2, %v5276_v45, 0.0  ;;  %v4933_v0 = vmul.f32 %v7232_v44, %v4925_v23  ;;  %v4840_v43 = vmul.f32 0.0, %v7234_v25  ;;  %v4238_v10 = vmul.f32 %v10019_v28, %v10483_v30  ;;  %v10628_v44 = vpop.permute.xlu1 %5113 }
0x1884   :  { %v7240_v27 = vpop.eup %7239  ;;  %v5432_v38 = vadd.f32 %v5431_v63, %v5430_v1  ;;  %v5332_v34 = vsel %vm313_vm2, %v5239_v52, 0.0  ;;  %v5254_v41 = vmul.f32 %v10367_v20, %v4910_v8  ;;  %v4887_v17 = vmul.f32 %v7238_v55, %v4879_v6  ;;  %v10630_v59 = vpop.permute.xlu0 %5173  ;;  %v11669_v20 = vld [vmem:[#allocation52_spill] sm:$0xff] }
0x1885   :  { %v7242_v57 = vpop.eup %7241  ;;  %v10624_v16 = vadd.f32 %v5332_v34, %v10437_v36  ;;  %v4941_v5 = vadd.f32 %v4933_v0, %v10447_v4  ;;  %v4848_v48 = vadd.f32 %v4840_v43, %v10528_v22  ;;  %v4918_v23 = vmul.f32 %v7240_v27, %v4910_v8  ;;  %v11670_v6 = vld [vmem:[#allocation36_spill] sm:$0xff] }
0x1886   :  { %v7244_v31 = vpop.eup %7243  ;;  %v5372_v50 = vsel %vm313_vm2, %v5254_v41, 0.0  ;;  %v4895_v25 = vadd.f32 %v4887_v17, %v10540_v15  ;;  %v10636_v11 = vmul.f32 %v10050_v47, %v11669_v20  ;;  %v4331_v36 = vmul.f32 1.442695, %v4238_v10  ;;  %v11671_v34 = vld [vmem:[#allocation80_spill] sm:$0xff] }
0x1887   :  { %v7246_v13 = vpop.eup %7245  ;;  %v5373_v4 = vadd.f32 %v5372_v50, %v10439_v56  ;;  %v5269_v22 = vmul.f32 %v10369_v62, %v4941_v5  ;;  %v4856_v40 = vmul.f32 %v7236_v2, %v4848_v48  ;;  %v4926_v18 = vadd.f32 %v4918_v23, %v11670_v6  ;;  %v4676_v56 = vpop.permute.xlu1 %4675  ;;  %v11672_v23 = vld [vmem:[#allocation75_spill] sm:$0xff] }
0x1888   :  { %v7248_v45 = vpop.eup %7247  ;;  %v5247_v1 = vmul.f32 %v10462_v12, %v4895_v25  ;;  %v4949_v52 = vmul.f32 %v7242_v57, %v4941_v5  ;;  %v4903_v8 = vmul.f32 %v7246_v13, %v4895_v25  ;;  %v5224_v15 = vmul.f32 %v10569_v19, %v4848_v48  ;;  %v4990_v10 = vpop.permute.xlu0 %4989 }
0x1889   :  { %v5412_v55 = vsel %vm313_vm2, %v5269_v22, 0.0  ;;  %v4864_v63 = vadd.f32 %v4856_v40, %v10536_v26  ;;  %v5262_v0 = vmul.f32 %v10464_v61, %v4926_v18  ;;  %v4934_v43 = vmul.f32 %v7248_v45, %v4926_v18  ;;  %v11673_v45 = vld [vmem:[#allocation51_spill] sm:$0xff] }
0x188a   :  { %v7250_v62 = vpop.eup %7249  ;;  %v5413_v2 = vadd.f32 %v5412_v55, %v10510_v54  ;;  %v5353_v27 = vsel %vm313_vm2, %v5247_v1, 0.0  ;;  %v4957_v12 = vadd.f32 %v4949_v52, %v11671_v34  ;;  %v10650_v41 = vadd.f32 %v4903_v8, %v10561_v9  ;;  %v11674_v1 = vld [vmem:[#allocation54_spill] sm:$0xff] }
0x188b   :  { %v5232_v19 = vmul.f32 %v10430_v7, %v4864_v63  ;;  %v10653_v17 = vadd.f32 %v5353_v27, %v5352_v32  ;;  %v5393_v26 = vsel %vm313_vm2, %v5262_v0, 0.0  ;;  %v4872_v61 = vmul.f32 %v7244_v31, %v4864_v63  ;;  %v10669_v31 = vpop.permute.xlu1 %5025  ;;  %v11678_v63 = vld [vmem:[#allocation69_spill] sm:$0xff]  ;;  %v11679_v27 = vld [vmem:[#allocation70_spill] sm:$0xff] }
0x188c   :  { %v7252_v57 = vpop.eup %7251  ;;  %v10656_v5 = vadd.f32 %v5393_v26, %v5392_v14  ;;  %v5277_v48 = vmul.f32 %v10489_v46, %v4957_v12  ;;  %v5255_v54 = vmul.f32 %v10516_v60, %v10650_v41  ;;  %v10662_v50 = vadd.f32 %v4934_v43, %v11672_v23  ;;  %v10676_v13 = vpop.permute.xlu0 %5085  ;;  %v11680_v12 = vld [vmem:[#allocation68_spill] sm:$0xff]  ;;  %v11681_v26 = vld [vmem:[#allocation43_spill] sm:$0xff] }
0x188d   :  { %v5313_v9 = vsel %vm313_vm2, %v5232_v19, 0.0  ;;  %v10666_v7 = vadd.f32 %v4872_v61, %v10557_v37  ;;  %v5292_v32 = vsel %vm313_vm2, %v5224_v15, 0.0  ;;  %v4841_v25 = vmul.f32 0.0, %v7250_v62  ;;  %v10706_v62 = vld [vmem:[%s11190_s9 + $0x1a0] sm:$0xff] }
0x188e   :  { %v5314_v14 = vadd.f32 %v5313_v9, %v10605_v24  ;;  %v5433_v46 = vsel %vm313_vm2, %v5277_v48, 0.0  ;;  %v5374_v20 = vsel %vm313_vm2, %v5255_v54, 0.0  ;;  %v5270_v60 = vmul.f32 %v10518_v33, %v10662_v50  ;;  %v11682_v9 = vld [vmem:[#allocation38_spill] sm:$0xff] }
0x188f   :  { %v10678_v22 = vadd.f32 %v5433_v46, %v5432_v38  ;;  %v5240_v37 = vmul.f32 %v10491_v58, %v10666_v7  ;;  %v10682_v40 = vadd.f32 %v5374_v20, %v5373_v4  ;;  %v5293_v6 = vadd.f32 %v5292_v32, %v10589_v49  ;;  %v11675_v38 = vld [vmem:[#allocation45_spill] sm:$0xff]  ;;  %v11676_v58 = vld [vmem:[#allocation91_spill] sm:$0xff]  ;;  %v10696_v55 = vpop.permute.xlu1 %5145  ;;  %v11684_v20 = vld [vmem:[#allocation62_spill] sm:$0xff] }
0x1890   :  { %v5414_v24 = vsel %vm313_vm2, %v5270_v60, 0.0  ;;  %v4849_v18 = vadd.f32 %v4841_v25, %v10577_v29  ;;  %7253 = vpow2.f32 %v4331_v36  ;;  %v4253_v52 = vmul.f32 %v11674_v1, %v11673_v45  ;;  %v11677_v36 = vld [vmem:[#allocation96_spill] sm:$0xff]  ;;  %v10719_v48 = vpop.permute.xlu0 %5205 }
0x1891   :  { %v5334_v33 = vsel %vm313_vm2, %v5240_v37, 0.0  ;;  %v10690_v8 = vadd.f32 %v5414_v24, %v5413_v2  ;;  %v4268_v15 = vmul.f32 %v11675_v38, %v10213_v35  ;;  %v4231_v4 = vmul.f32 %v11676_v58, %v10551_v3  ;;  %v11683_v25 = vld [vmem:[#allocation100_spill] sm:$0xff] }
0x1892   :  { %v10699_v49 = vadd.f32 %v5334_v33, %v10624_v16  ;;  %v4857_v29 = vmul.f32 %v7252_v57, %v4849_v18  ;;  %v4800_v0 = vmul.f32 %v11678_v63, %v11677_v36  ;;  %v4361_v43 = vmul.f32 1.442695, %v4253_v52  ;;  %v11685_v37 = vld [vmem:[#allocation84_spill] sm:$0xff] }
0x1893   :  { %v4391_v2 = vmul.f32 1.442695, %v4268_v15  ;;  %v4317_v35 = vmul.f32 1.442695, %v4231_v4  ;;  %v4246_v34 = vmul.f32 %v11679_v27, %v10483_v30  ;;  %v4261_v19 = vmul.f32 %v11680_v12, %v11673_v45  ;;  %v10733_v52 = vpop.permute.xlu1 %5057  ;;  %v11686_v4 = vld [vmem:[#allocation58_spill] sm:$0xff] }
0x1894   :  { %v10713_v16 = vadd.f32 %v4857_v29, %v10636_v11  ;;  %7255 = vpow2.f32 %v4361_v43  ;;  %v10717_v61 = vmul.f32 %v11653_v21, %v11681_v26  ;;  %v5225_v57 = vmul.f32 %v4990_v10, %v4849_v18  ;;  %v11687_v29 = vld [vmem:[#allocation53_spill] sm:$0xff] }
0x1895   :  { %7257 = vpow2.f32 %v4391_v2  ;;  %v4347_v54 = vmul.f32 1.442695, %v4246_v34  ;;  %v4377_v23 = vmul.f32 1.442695, %v4261_v19  ;;  %v4216_v32 = vmul.f32 %v11682_v9, %v10706_v62  ;;  %v11688_v2 = vld [vmem:[#allocation86_spill] sm:$0xff] }
0x1896   :  { %v5233_v46 = vmul.f32 %v11683_v25, %v10713_v16  ;;  %7259 = vpow2.f32 %v4317_v35  ;;  %v5294_v11 = vsel %vm313_vm2, %v5225_v57, 0.0  ;;  %v4224_v60 = vmul.f32 %v11684_v20, %v10706_v62  ;;  %v11689_v35 = vld [vmem:[#allocation49_spill] sm:$0xff]  ;;  %v10758_v57 = vpop.permute.xlu0 %5117 }
0x1897   :  { %7261 = vpow2.f32 %v4347_v54  ;;  %v10729_v10 = vmul.f32 %v11685_v37, %v4676_v56  ;;  %v10731_v24 = vadd.f32 %v5294_v11, %v5293_v6  ;;  %v4287_v18 = vmul.f32 1.442695, %v4216_v32  ;;  %v10768_v20 = vpop.permute.xlu1 %5177 }
0x1898   :  { %v5315_v33 = vsel %vm313_vm2, %v5233_v46, 0.0  ;;  %7263 = vpow2.f32 %v4377_v23  ;;  %v4303_v15 = vmul.f32 1.442695, %v4224_v60  ;;  %v10738_v36 = vmul.f32 %v11687_v29, %v11686_v4  ;;  %v11690_v46 = vld [vmem:[#allocation89_spill] sm:$0xff] }
0x1899   :  { %v10740_v43 = vadd.f32 %v5315_v33, %v5314_v14  ;;  %7265 = vpow2.f32 %v4287_v18  ;;  %v10744_v56 = vmul.f32 %v10050_v47, %v11688_v2  ;;  %v4239_v6 = vmul.f32 %v10019_v28, %v10551_v3 }
0x189a   :  { %v10750_v34 = vmul.f32 %v11678_v63, %v11689_v35  ;;  %v4254_v19 = vmul.f32 %v11674_v1, %v10483_v30  ;;  %v4269_v26 = vmul.f32 %v11675_v38, %v11673_v45  ;;  %v4232_v14 = vmul.f32 %v11676_v58, %v10706_v62 }
0x189b   :  { %7267 = vpow2.f32 %v4303_v15  ;;  %v4333_v47 = vmul.f32 1.442695, %v4239_v6  ;;  %v4247_v54 = vmul.f32 %v11679_v27, %v10551_v3  ;;  %v4262_v23 = vmul.f32 %v11680_v12, %v10483_v30  ;;  %v11691_v15 = vld [vmem:[#allocation99_spill] sm:$0xff] }
0x189c   :  { %v4363_v9 = vmul.f32 1.442695, %v4254_v19  ;;  %v4393_v32 = vmul.f32 1.442695, %v4269_v26  ;;  %v4319_v25 = vmul.f32 1.442695, %v4232_v14  ;;  %v10766_v11 = vmul.f32 %v11653_v21, %v11690_v46 }
0x189d   :  { %v7254_v45 = vpop.eup %7253  ;;  %7269 = vpow2.f32 %v4333_v47  ;;  %v4349_v58 = vmul.f32 1.442695, %v4247_v54  ;;  %v4379_v60 = vmul.f32 1.442695, %v4262_v23  ;;  %v4240_v18 = vmul.f32 %v10019_v28, %v10706_v62  ;;  %v10783_v28 = vpop.permute.xlu0 %4679 }
0x189e   :  { %v4888_v33 = vmul.f32 %v7254_v45, %v10666_v7  ;;  %7271 = vpow2.f32 %v4363_v9  ;;  %v10775_v4 = vmul.f32 %v11678_v63, %v11691_v15  ;;  %v4255_v21 = vmul.f32 %v11674_v1, %v10551_v3 }
0x189f   :  { %7273 = vpow2.f32 %v4393_v32  ;;  %v4335_v29 = vmul.f32 1.442695, %v4240_v18  ;;  %v4270_v2 = vmul.f32 %v11675_v38, %v10483_v30  ;;  %v4248_v6 = vmul.f32 %v11679_v27, %v10706_v62  ;;  %v4994_v32 = vpop.permute.xlu1 %4993 }
0x18a0   :  { %v4896_v35 = vadd.f32 %v4888_v33, %v4800_v0  ;;  %7275 = vpow2.f32 %v4319_v25  ;;  %v4365_v7 = vmul.f32 1.442695, %v4255_v21  ;;  %v4263_v63 = vmul.f32 %v11680_v12, %v10551_v3  ;;  %v11693_v33 = vld [vmem:[#allocation35_spill] sm:$0xff] }
0x18a1   :  { %v7256_v19 = vpop.eup %7255  ;;  %7277 = vpow2.f32 %v4349_v58  ;;  %v4395_v26 = vmul.f32 1.442695, %v4270_v2  ;;  %v4351_v14 = vmul.f32 1.442695, %v4248_v6  ;;  %v4256_v47 = vmul.f32 %v11674_v1, %v10706_v62  ;;  %v11692_v1 = vld [vmem:[#allocation93_spill] sm:$0xff]  ;;  %v10803_v6 = vpop.permute.xlu0 %5089 }
0x18a2   :  { %v7258_v54 = vpop.eup %7257  ;;  %v5248_v30 = vmul.f32 %v10591_v39, %v4896_v35  ;;  %v4919_v27 = vmul.f32 %v7256_v19, %v10650_v41  ;;  %7279 = vpow2.f32 %v4379_v60  ;;  %v4381_v0 = vmul.f32 1.442695, %v4263_v63 }
0x18a3   :  { %v7260_v23 = vpop.eup %7259  ;;  %v4950_v9 = vmul.f32 %v7258_v54, %v10662_v50  ;;  %7281 = vpow2.f32 %v4335_v29  ;;  %v4367_v25 = vmul.f32 1.442695, %v4256_v47  ;;  %v4271_v46 = vmul.f32 %v11675_v38, %v10551_v3 }
0x18a4   :  { %v7262_v45 = vpop.eup %7261  ;;  %v5355_v58 = vsel %vm313_vm2, %v5248_v30, 0.0  ;;  %v4927_v18 = vadd.f32 %v4919_v27, %v11692_v1  ;;  %v4873_v39 = vmul.f32 %v7260_v23, %v10713_v16  ;;  %7283 = vpow2.f32 %v4365_v7  ;;  %v11694_v7 = vld [vmem:[#allocation57_spill] sm:$0xff]  ;;  %v10814_v30 = vpop.permute.xlu1 %5149 }
0x18a5   :  { %v7264_v41 = vpop.eup %7263  ;;  %v10798_v60 = vadd.f32 %v5355_v58, %v10653_v17  ;;  %v4958_v50 = vadd.f32 %v4950_v9, %v11693_v33  ;;  %v4904_v15 = vmul.f32 %v7262_v45, %v4896_v35  ;;  %7285 = vpow2.f32 %v4395_v26  ;;  %v11695_v26 = vld [vmem:[#allocation92_spill] sm:$0xff] }
0x18a6   :  { %v7266_v21 = vpop.eup %7265  ;;  %v5263_v29 = vmul.f32 %v10593_v51, %v4927_v18  ;;  %v4881_v3 = vadd.f32 %v4873_v39, %v10717_v61  ;;  %v4935_v2 = vmul.f32 %v7264_v41, %v4927_v18  ;;  %7287 = vpow2.f32 %v4351_v14 }
0x18a7   :  { %v5278_v16 = vmul.f32 %v10610_v42, %v4958_v50  ;;  %v4912_v63 = vadd.f32 %v4904_v15, %v11694_v7  ;;  %v4842_v19 = vmul.f32 0.0, %v7266_v21  ;;  %7289 = vpow2.f32 %v4381_v0  ;;  %v11696_v21 = vld [vmem:[#allocation78_spill] sm:$0xff] }
0x18a8   :  { %v7268_v17 = vpop.eup %7267  ;;  %v5395_v47 = vsel %vm313_vm2, %v5263_v29, 0.0  ;;  %v5241_v35 = vmul.f32 %v10612_v53, %v4881_v3  ;;  %v4943_v54 = vadd.f32 %v4935_v2, %v11695_v26  ;;  %7291 = vpow2.f32 %v4367_v25 }
0x18a9   :  { %v5396_v51 = vadd.f32 %v5395_v47, %v10656_v5  ;;  %v5435_v61 = vsel %vm313_vm2, %v5278_v16, 0.0  ;;  %v5256_v14 = vmul.f32 %v10628_v44, %v4912_v63  ;;  %v4850_v42 = vadd.f32 %v4842_v19, %v10738_v36 }
0x18aa   :  { %v7270_v27 = vpop.eup %7269  ;;  %v5436_v0 = vadd.f32 %v5435_v61, %v10678_v22  ;;  %v5336_v23 = vsel %vm313_vm2, %v5241_v35, 0.0  ;;  %v5271_v53 = vmul.f32 %v10630_v59, %v4943_v54  ;;  %v4397_v9 = vmul.f32 1.442695, %v4271_v46  ;;  %v10823_v22 = vpop.permute.xlu0 %5209 }
0x18ab   :  { %v7272_v45 = vpop.eup %7271  ;;  %v5337_v25 = vadd.f32 %v5336_v23, %v10699_v49  ;;  %v5376_v5 = vsel %vm313_vm2, %v5256_v14, 0.0  ;;  %v4858_v58 = vmul.f32 %v7268_v17, %v4850_v42  ;;  %v4889_v1 = vmul.f32 %v7270_v27, %v4881_v3  ;;  %v11698_v27 = vld [vmem:[#allocation102_spill] sm:$0xff] }
0x18ac   :  { %v7274_v44 = vpop.eup %7273  ;;  %v5377_v36 = vadd.f32 %v5376_v5, %v10682_v40  ;;  %v5416_v18 = vsel %vm313_vm2, %v5271_v53, 0.0  ;;  %v4920_v39 = vmul.f32 %v7272_v45, %v4912_v63  ;;  %v5226_v41 = vmul.f32 %v4994_v32, %v4850_v42  ;;  %v10835_v63 = vpop.permute.xlu1 %5121 }
0x18ad   :  { %v7276_v33 = vpop.eup %7275  ;;  %v5417_v59 = vadd.f32 %v5416_v18, %v10690_v8  ;;  %v4866_v46 = vadd.f32 %v4858_v58, %v10744_v56  ;;  %v4897_v49 = vadd.f32 %v4889_v1, %v10750_v34  ;;  %v4951_v50 = vmul.f32 %v7274_v44, %v4943_v54  ;;  %v11697_v8 = vld [vmem:[#allocation19_spill] sm:$0xff]  ;;  %v11699_v58 = vld [vmem:[#allocation76_spill] sm:$0xff] }
0x18ae   :  { %v7278_v15 = vpop.eup %7277  ;;  %v4928_v29 = vadd.f32 %v4920_v39, %v11696_v21  ;;  %v5296_v3 = vsel %vm313_vm2, %v5226_v41, 0.0  ;;  %7293 = vpow2.f32 %v4397_v9  ;;  %v4264_v40 = vmul.f32 %v11680_v12, %v10706_v62  ;;  %v5182_v53 = vpop.permute.xlu0 %5181 }
0x18af   :  { %v7280_v32 = vpop.eup %7279  ;;  %v5234_v2 = vmul.f32 %v10669_v31, %v4866_v46  ;;  %v5249_v16 = vmul.f32 %v10676_v13, %v4897_v49  ;;  %v4959_v7 = vadd.f32 %v4951_v50, %v11697_v8  ;;  %v4874_v56 = vmul.f32 %v7276_v33, %v4866_v46 }
0x18b0   :  { %v7282_v34 = vpop.eup %7281  ;;  %v5264_v19 = vmul.f32 %v10696_v55, %v4928_v29  ;;  %v4905_v17 = vmul.f32 %v7278_v15, %v4897_v49  ;;  %v4936_v47 = vmul.f32 %v7280_v32, %v4928_v29  ;;  %v5297_v35 = vadd.f32 %v5296_v3, %v10731_v24 }
0x18b1   :  { %v7284_v26 = vpop.eup %7283  ;;  %v5317_v12 = vsel %vm313_vm2, %v5234_v2, 0.0  ;;  %v5357_v54 = vsel %vm313_vm2, %v5249_v16, 0.0  ;;  %v5279_v31 = vmul.f32 %v10719_v48, %v4959_v7  ;;  %v4882_v13 = vadd.f32 %v4874_v56, %v10766_v11 }
0x18b2   :  { %v7286_v61 = vpop.eup %7285  ;;  %v5318_v14 = vadd.f32 %v5317_v12, %v10740_v43  ;;  %v5358_v42 = vadd.f32 %v5357_v54, %v10798_v60  ;;  %v5397_v55 = vsel %vm313_vm2, %v5264_v19, 0.0  ;;  %v4913_v23 = vadd.f32 %v4905_v17, %v11698_v27  ;;  %v11702_v54 = vld [vmem:[#allocation60_spill] sm:$0xff] }
0x18b3   :  { %v7288_v24 = vpop.eup %7287  ;;  %v5398_v9 = vadd.f32 %v5397_v55, %v5396_v51  ;;  %v5437_v45 = vsel %vm313_vm2, %v5279_v31, 0.0  ;;  %v5242_v5 = vmul.f32 %v10733_v52, %v4882_v13  ;;  %v4944_v48 = vadd.f32 %v4936_v47, %v11699_v58  ;;  %v5154_v51 = vpop.permute.xlu1 %5153 }
0x18b4   :  { %v7290_v1 = vpop.eup %7289  ;;  %v5319_v11 = vrot.slane %v5318_v14, 4  ;;  %v5438_v44 = vadd.f32 %v5437_v45, %v5436_v0  ;;  %v5257_v43 = vmul.f32 %v10758_v57, %v4913_v23  ;;  %v5298_v18 = vrot.slane %v5297_v35, 4  ;;  %v11700_v57 = vld [vmem:[#allocation101_spill] sm:$0xff] }
0x18b5   :  { %v7292_v60 = vpop.eup %7291  ;;  %v5338_v39 = vsel %vm313_vm2, %v5242_v5, 0.0  ;;  %v5272_v41 = vmul.f32 %v10768_v20, %v4944_v48  ;;  %v4890_v33 = vmul.f32 %v7282_v34, %v4882_v13  ;;  %v4921_v46 = vmul.f32 %v7284_v26, %v4913_v23  ;;  %v5214_v20 = vpop.permute.xlu0 %5213 }
0x18b6   :  { %v5320_v49 = vadd.f32 %v5319_v11, %v5318_v14  ;;  %v5339_v50 = vadd.f32 %v5338_v39, %v5337_v25  ;;  %v5378_v52 = vsel %vm313_vm2, %v5257_v43, 0.0  ;;  %v5299_v15 = vadd.f32 %v5298_v18, %v5297_v35  ;;  %v11703_v14 = vld [vmem:[#allocation31_spill] sm:$0xff] }
0x18b7   :  { %v5379_v21 = vadd.f32 %v5378_v52, %v5377_v36  ;;  %v5418_v29 = vsel %vm313_vm2, %v5272_v41, 0.0  ;;  %v4898_v0 = vadd.f32 %v4890_v33, %v10775_v4  ;;  %v4929_v3 = vadd.f32 %v4921_v46, %v11700_v57  ;;  %v5530_v18 = vld [vmem:[%s11190_s9 + $0x158] sm:$0xff]  ;;  %v5527_v52 = vld [vmem:[%s11190_s9 + $0x140] sm:$0xff] }
0x18b8   :  { %v5321_v32 = vrot.slane %v5320_v49, 2  ;;  %v5340_v2 = vrot.slane %v5339_v50, 4  ;;  %v5419_v16 = vadd.f32 %v5418_v29, %v5417_v59  ;;  %v5300_v8 = vrot.slane %v5299_v15, 2  ;;  %v11701_v59 = vld [vmem:[#allocation59_spill] sm:$0xff] }
0x18b9   :  { %v5250_v7 = vmul.f32 %v10803_v6, %v4898_v0  ;;  %v5265_v56 = vmul.f32 %v10814_v30, %v4929_v3  ;;  %v4952_v25 = vmul.f32 %v7286_v61, %v4944_v48  ;;  %v4906_v34 = vmul.f32 %v7288_v24, %v4898_v0  ;;  %v10865_v6 = vpop.permute.xlu1 %5185  ;;  %v10870_v45 = vpop.permute.xlu0 %5217 }
0x18ba   :  { %v5341_v19 = vadd.f32 %v5340_v2, %v5339_v50  ;;  %v4937_v17 = vmul.f32 %v7290_v1, %v4929_v3  ;;  %v4383_v36 = vmul.f32 1.442695, %v4264_v40  ;;  %v4272_v47 = vmul.f32 %v11675_v38, %v10706_v62 }
0x18bb   :  { %v7294_v4 = vpop.eup %7293  ;;  %v5359_v35 = vsel %vm313_vm2, %v5250_v7, 0.0  ;;  %v5399_v26 = vsel %vm313_vm2, %v5265_v56, 0.0  ;;  %v4960_v12 = vadd.f32 %v4952_v25, %v11701_v59  ;;  %v4914_v31 = vadd.f32 %v4906_v34, %v11702_v54 }
0x18bc   :  { %v5342_v30 = vrot.slane %v5341_v19, 2  ;;  %v5360_v13 = vadd.f32 %v5359_v35, %v5358_v42  ;;  %v5400_v61 = vadd.f32 %v5399_v26, %v5398_v9  ;;  %v4945_v55 = vadd.f32 %v4937_v17, %v11703_v14  ;;  %v11704_v42 = vld [vmem:[#allocation42_spill] sm:$0xff] }
0x18bd   :  { %v5280_v40 = vmul.f32 %v10823_v22, %v4960_v12  ;;  %v5258_v38 = vmul.f32 %v10835_v63, %v4914_v31  ;;  %v4922_v62 = vmul.f32 %v7292_v60, %v4914_v31  ;;  %7295 = vpow2.f32 %v4383_v36  ;;  %v5498_v33 = vpop.permute.xlu1 %5497  ;;  %v5500_v2 = vpop.permute.xlu0 %5499  ;;  %v11709_v14 = vld [vmem:[#allocation98_spill] sm:$0xff] }
0x18be   :  { %v5361_v27 = vrot.slane %v5360_v13, 4  ;;  %v5273_v23 = vmul.f32 %v5182_v53, %v4945_v55  ;;  %v4953_v24 = vmul.f32 %v7294_v4, %v4945_v55  ;;  %v4399_v5 = vmul.f32 1.442695, %v4272_v47  ;;  %v5529_v53 = vld [vmem:[%s11190_s9 + $0x150] sm:$0xff] }
0x18bf   :  { %v5439_v58 = vsel %vm313_vm2, %v5280_v40, 0.0  ;;  %v5380_v48 = vsel %vm313_vm2, %v5258_v38, 0.0  ;;  %v4930_v9 = vadd.f32 %v4922_v62, %v11704_v42  ;;  %v5322_v1 = vadd.f32 %v5321_v32, %v5320_v49  ;;  %v11705_v47 = vld [vmem:[#allocation74_spill] sm:$0xff] }
0x18c0   :  { %v5362_v11 = vadd.f32 %v5361_v27, %v5360_v13  ;;  %v5440_v43 = vadd.f32 %v5439_v58, %v5438_v44  ;;  %v5381_v22 = vadd.f32 %v5380_v48, %v5379_v21  ;;  %v5420_v63 = vsel %vm313_vm2, %v5273_v23, 0.0  ;;  %v5528_v21 = vld [vmem:[%s11190_s9 + $0x148] sm:$0xff] }
0x18c1   :  { %v10882_v60 = vadd.f32 %v5420_v63, %v5419_v16  ;;  %v5266_v39 = vmul.f32 %v5154_v51, %v4930_v9  ;;  %v4961_v41 = vadd.f32 %v4953_v24, %v10729_v10  ;;  %7297 = vpow2.f32 %v4399_v5  ;;  %v5496_v26 = vpop.permute.xlu1 %5495  ;;  %v5502_v5 = vpop.permute.xlu0 %5501 }
0x18c2   :  { %v5363_v46 = vrot.slane %v5362_v11, 2  ;;  %v5382_v44 = vrot.slane %v5381_v22, 4  ;;  %v5323_v49 = vrot.slane %v5322_v1, 1  ;;  %v5343_v50 = vadd.f32 %v5342_v30, %v5341_v19 }
0x18c3   :  { %v5401_v29 = vsel %vm313_vm2, %v5266_v39, 0.0  ;;  %v5281_v0 = vmul.f32 %v5214_v20, %v4961_v41  ;;  %v5301_v51 = vadd.f32 %v5300_v8, %v5299_v15  ;;  %v5540_v57 = vpack.c.bf16 %v5530_v18, %v5529_v53 }
0x18c4   :  { %v5383_v10 = vadd.f32 %v5382_v44, %v5381_v22  ;;  %v5402_v3 = vadd.f32 %v5401_v29, %v5400_v61  ;;  %v5324_v32 = vadd.f32 %v5323_v49, %v5322_v1  ;;  %v5344_v16 = vrot.slane %v5343_v50, 1  ;;  %v11708_v61 = vld [vmem:[#allocation64_spill] sm:$0xff] }
0x18c5   :  { %v5441_v7 = vsel %vm313_vm2, %v5281_v0, 0.0  ;;  %v5302_v56 = vrot.slane %v5301_v51, 1  ;;  %v5364_v25 = vadd.f32 %v5363_v46, %v5362_v11  ;;  %6736 = vmatpush3.bf16.msra.mxu0 %v5540_v57  ;;  %v5539_v34 = vpack.c.bf16 %v5528_v21, %v5527_v52  ;;  %v5504_v44 = vpop.permute.xlu1 %5503 }
0x18c6   :  { %v5384_v19 = vrot.slane %v5383_v10, 2  ;;  %v5403_v17 = vrot.slane %v5402_v3, 4  ;;  %v10893_v36 = vadd.f32 %v5441_v7, %v5440_v43  ;;  %v11706_v4 = vrot.slane %v11705_v47, 1 }
0x18c7   :  { %v11707_v15 = vmov 0.0   ;;  %v5458_v8 = vrot.slane %v11705_v47, 2  ;;  %v5345_v35 = vadd.f32 %v5344_v16, %v5343_v50  ;;  %v5303_v59 = vadd.f32 %v5302_v56, %v5301_v51 }
0x18c8   :  { %v5473_v20 = vadd.f32 %v11706_v4, %v5324_v32  ;;  %6737 = vmatprep.subr.bf16.mxu0 %v11707_v15  ;;  %v5365_v12 = vrot.slane %v5364_v25, 1  ;;  %v5404_v54 = vadd.f32 %v5403_v17, %v5402_v3  ;;  %v5459_v30 = vrot.slane %v11705_v47, 3  ;;  %v5506_v17 = vpop.permute.xlu0 %5505 }
0x18c9   :  { %v5385_v13 = vadd.f32 %v5384_v19, %v5383_v10  ;;  %v4826_v55 = vmul.f32 %v11709_v14, %v11708_v61  ;;  %v5474_v40 = vadd.f32 %v5458_v8, %v5345_v35  ;;  %v5472_v38 = vadd.f32 %v11705_v47, %v5303_v59  ;;  %6738 = vmatpush3.bf16.msra.mxu0 %v5539_v34 }
0x18ca   :  { %v5520_v31 = vmul.f32 %v5498_v33, %v5473_v20  ;;  %v5366_v62 = vadd.f32 %v5365_v12, %v5364_v25  ;;  %v7296_v27 = vpop.eup %7295  ;;  %v5405_v23 = vrot.slane %v5404_v54, 2  ;;  %v5460_v58 = vrot.slane %v11705_v47, 4  ;;  %6751 = vmatprep.subr.mxu0 %v11707_v15 }
0x18cb   :  { %v5386_v48 = vrot.slane %v5385_v13, 1  ;;  %v4938_v42 = vmul.f32 %v7296_v27, %v4930_v9  ;;  %v5521_v1 = vmul.f32 %v5500_v2, %v5474_v40  ;;  %v5519_v11 = vmul.f32 %v5496_v26, %v5472_v38 }
0x18cc   :  { %v5532_v24 = vpack.c.bf16 %v5520_v31, %v5520_v31  ;;  %v5475_v43 = vadd.f32 %v5459_v30, %v5366_v62  ;;  %v4834_v22 = vmul.f32 %v11685_v37, %v10783_v28  ;;  %v5406_v18 = vadd.f32 %v5405_v23, %v5404_v54 }
0x18cd   :  { %v5387_v53 = vadd.f32 %v5386_v48, %v5385_v13  ;;  %v4946_v39 = vadd.f32 %v4938_v42, %v4826_v55  ;;  %v5533_v41 = vpack.c.bf16 %v5521_v1, %v5521_v1  ;;  %v5531_v33 = vpack.c.bf16 %v5519_v11, %v5519_v11  ;;  %v5508_v48 = vpop.permute.xlu1 %5507 }
0x18ce   :  { %v5550_v63 = vunpack.c.l.b16 %v5532_v24  ;;  %v5522_v46 = vmul.f32 %v5502_v5, %v5475_v43  ;;  %v7298_v49 = vpop.eup %7297  ;;  %v5407_v21 = vrot.slane %v5406_v18, 1  ;;  %v5461_v37 = vrot.slane %v11705_v47, 5 }
0x18cf   :  { %v5476_v52 = vadd.f32 %v5460_v58, %v5387_v53  ;;  %v5274_v9 = vmul.f32 %v10865_v6, %v4946_v39  ;;  %v4954_v29 = vmul.f32 %v7298_v49, %v4946_v39  ;;  %v5551_v0 = vunpack.c.l.b16 %v5533_v41 }
0x18d0   :  { %v5557_v50 = vrot.slane %v5550_v63, 7  ;;  %v5549_v51 = vunpack.c.l.b16 %v5531_v33  ;;  %v5534_v57 = vpack.c.bf16 %v5522_v46, %v5522_v46  ;;  %v5408_v28 = vadd.f32 %v5407_v21, %v5406_v18  ;;  %v5510_v63 = vpop.permute.xlu0 %5509 }
0x18d1   :  { %v5523_v10 = vmul.f32 %v5504_v44, %v5476_v52  ;;  %v5422_v3 = vsel %vm313_vm2, %v5274_v9, 0.0  ;;  %v4962_v32 = vadd.f32 %v4954_v29, %v4834_v22  ;;  %v5559_v2 = vrot.slane %v5551_v0, 6 }
0x18d2   :  { %v5558_v16 = vsel %vm2929_vm9, %v5557_v50, %v5549_v51  ;;  %v5423_v7 = vadd.f32 %v5422_v3, %v10882_v60  ;;  %v5552_v56 = vunpack.c.l.b16 %v5534_v57  ;;  %v5477_v34 = vadd.f32 %v5461_v37, %v5408_v28  ;;  %v5643_v28 = vld [vmem:[%s11189_s8 + $0x50] sm:$0xff]  ;;  %v5644_v3 = vld [vmem:[%s11189_s8 + $0x58] sm:$0xff] }
0x18d3   :  { %v5535_v25 = vpack.c.bf16 %v5523_v10, %v5523_v10  ;;  %v5282_v6 = vmul.f32 %v10870_v45, %v4962_v32  ;;  %v5560_v19 = vsel %vm2932_vm10, %v5559_v2, %v5558_v16  ;;  %v5462_v23 = vrot.slane %v11705_v47, 6  ;;  %v5641_v32 = vld [vmem:[%s11189_s8 + $0x40] sm:$0xff]  ;;  %v5642_v16 = vld [vmem:[%s11189_s8 + $0x48] sm:$0xff] }
0x18d4   :  { %v5424_v4 = vrot.slane %v5423_v7, 4  ;;  %v5561_v20 = vrot.slane %v5552_v56, 5  ;;  %v5524_v35 = vmul.f32 %v5506_v17, %v5477_v34  ;;  %v5463_v1 = vrot.slane %v11705_v47, 7 }
0x18d5   :  { %v5553_v8 = vunpack.c.l.b16 %v5535_v25  ;;  %v5443_v26 = vsel %vm313_vm2, %v5282_v6, 0.0  ;;  %v5647_v2 = vpack.c.bf16 %v5644_v3, %v5643_v28  ;;  %v7402_v6 = vld [vmem:[%s11190_s9 + $0x1b0] sm:$0xff] }
0x18d6   :  { %v5425_v59 = vadd.f32 %v5424_v4, %v5423_v7  ;;  %v5444_v12 = vadd.f32 %v5443_v26, %v10893_v36  ;;  %v5562_v54 = vsel %vm2935_vm11, %v5561_v20, %v5560_v19  ;;  %v5536_v31 = vpack.c.bf16 %v5524_v35, %v5524_v35  ;;  %v11710_v19 = vld [vmem:[#allocation30_spill] sm:$0xff] }
0x18d7   :  { %v5563_v60 = vrot.slane %v5553_v8, 4  ;;  %6744 = vmatpush3.bf16.msra.mxu1 %v5647_v2  ;;  %v5646_v7 = vpack.c.bf16 %v5642_v16, %v5641_v32  ;;  %v5631_v17 = vrot.slane %v7402_v6, %v11710_v19  ;;  %v11711_v8 = vld [vmem:[#allocation33_spill] sm:$0xff]  ;;  %v11714_v2 = vld [vmem:[#allocation23_spill] sm:$0xff] }
0x18d8   :  { %v5426_v30 = vrot.slane %v5425_v59, 2  ;;  %v5445_v13 = vrot.slane %v5444_v12, 4  ;;  %v5554_v61 = vunpack.c.l.b16 %v5536_v31  ;;  %6745 = vmatprep.subr.bf16.mxu1 %v11707_v15  ;;  %v5636_v35 = vrot.slane %v7402_v6, %v11711_v8  ;;  %v11716_v6 = vld [vmem:[#allocation21_spill] sm:$0xff]  ;;  %v11717_v8 = vld [vmem:[#allocation12_spill] sm:$0xff] }
0x18d9   :  { %v5564_v45 = vsel %vm2938_vm12, %v5563_v60, %v5562_v54 }
0x18da   :  { %v5446_v14 = vadd.f32 %v5445_v13, %v5444_v12  ;;  %v5427_v55 = vadd.f32 %v5426_v30, %v5425_v59  ;;  %v5565_v40 = vrot.slane %v5554_v61, 3  ;;  %v7403_v30 = vld [vmem:[%s11186_s5] sm:$0xff]  ;;  %v7404_v61 = vld [vmem:[%s11186_s5 + $0x8] sm:$0xff] }
0x18db   :  { %6746 = vmatpush3.bf16.msra.mxu1 %v5646_v7 }
0x18dc   :  { %v5447_v38 = vrot.slane %v5446_v14, 2  ;;  %v5428_v62 = vrot.slane %v5427_v55, 1  ;;  %v5566_v27 = vsel %vm2941_vm13, %v5565_v40, %v5564_v45  ;;  %6774 = vmatprep.subr.mxu1 %v11707_v15  ;;  %v7407_v40 = vld [vmem:[%s11186_s5 + $0x20] sm:$0xff] }
0x18de   :  { %v5429_v24 = vadd.f32 %v5428_v62, %v5427_v55  ;;  %v5448_v36 = vadd.f32 %v5447_v38, %v5446_v14  ;;  %v7405_v14 = vld [vmem:[%s11186_s5 + $0x10] sm:$0xff]  ;;  %v7406_v55 = vld [vmem:[%s11186_s5 + $0x18] sm:$0xff]  ;;  %v7408_v38 = vld [vmem:[%s11186_s5 + $0x28] sm:$0xff] }
0x18df   :  { %v7409_v62 = vld [vmem:[%s11186_s5 + $0x30] sm:$0xff] }
0x18e0   :  { %v5478_v5 = vadd.f32 %v5462_v23, %v5429_v24  ;;  %v5449_v58 = vrot.slane %v5448_v36, 1  ;;  %v7410_v23 = vld [vmem:[%s11185_s4] sm:$0xff]  ;;  %v7411_v24 = vld [vmem:[%s11185_s4 + $0x8] sm:$0xff] }
0x18e2   :  { %v5525_v42 = vmul.f32 %v5508_v48, %v5478_v5  ;;  %v5450_v11 = vadd.f32 %v5449_v58, %v5448_v36  ;;  %v7412_v36 = vld [vmem:[%s11185_s4 + $0x10] sm:$0xff]  ;;  %v7413_v5 = vld [vmem:[%s11185_s4 + $0x18] sm:$0xff]  ;;  %v7414_v58 = vld [vmem:[%s11185_s4 + $0x20] sm:$0xff] }
0x18e3   :  { %v7415_v48 = vld [vmem:[%s11185_s4 + $0x28] sm:$0xff] }
0x18e4   :  { %v5537_v43 = vpack.c.bf16 %v5525_v42, %v5525_v42  ;;  %v5479_v22 = vadd.f32 %v5463_v1, %v5450_v11  ;;  %v7416_v42 = vld [vmem:[%s11185_s4 + $0x30] sm:$0xff] }
0x18e6   :  { %v5555_v53 = vunpack.c.l.b16 %v5537_v43  ;;  %v5526_v18 = vmul.f32 %v5510_v63, %v5479_v22 }
0x18e8   :  { %v5567_v39 = vrot.slane %v5555_v53, 2  ;;  %v5538_v41 = vpack.c.bf16 %v5526_v18, %v5526_v18 }
0x18ea   :  { %v5568_v33 = vsel %vm2944_vm14, %v5567_v39, %v5566_v27  ;;  %v5556_v46 = vunpack.c.l.b16 %v5538_v41 }
0x18ec   :  { %v5569_v44 = vrot.slane %v5556_v46, 1 }
0x18ee   :  { %v5570_v49 = vsel %vm2947_vm15, %v5569_v44, %v5568_v33 }
0x18ef   :  { %v5571_v50 = vpack.c.b16 %v5570_v49, %v5570_v49  ;;  %v5994_v49 = vld [vmem:[%s11190_s9 + $0x1d0] sm:$0xff] }
0x18f1   :  { %6740 = vmatmul.mubr.msk.bf16.vlgmr.msra.gmra.mxu0 %vm313_vm2, %v5571_v50  ;;  %v5995_v50 = vld [vmem:[%s11190_s9 + $0x1d8] sm:$0xff] }
0x18f2   :  { %6753 = vmatprep.mubr.msk.f32.mxu0 %vm7442_vm1, %v11707_v15 }
0x19b1   :  { %v5609_v47 = vpop.f32.mrf.mxu0 }
0x19b2   :  { %v5615_v52 = vsel %vm313_vm2, %v5609_v47, 0.0 }
0x19b3   :  { %5616 = vadd.xlane.f32.xlu1 %v5615_v52  ;;  %v6741_v21 = vpop.f32.mrf.mxu0 }
0x19b4   :  { %v6001_v21 = vpack.c.bf16 %v5995_v50, %v5994_v49 }
0x19b5   :  { %v5612_v9 = vpop.f32.mrf.mxu0 }
0x19b6   :  { %v5993_v9 = vld [vmem:[%s11190_s9 + $0x1c8] sm:$0xff] }
0x19b7   :  { %v6742_v29 = vpop.f32.mrf.mxu0 }
0x1a3c   :  { %v5617_v0 = vpop.xlane.xlu1 %5616 }
0x1a3d   :  { %v5618_v51 = vmul.f32 0.03125, %v5617_v0 }
0x1a3f   :  { %v5619_v57 = vsub.f32 %v5609_v47, %v5618_v51  ;;  %v5992_v47 = vld [vmem:[%s11190_s9 + $0x1c0] sm:$0xff] }
0x1a40   :  { %v6000_v29 = vpack.c.bf16 %v5993_v9, %v5992_v47  ;;  %v11054_v51 = vld [vmem:[%s11190_s9 + $0x1e0] sm:$0xff]  ;;  %v11724_v9 = vld [vmem:[#allocation18_spill] sm:$0xff] }
0x1a41   :  { %v5620_v10 = vmul.f32 %v5619_v57, %v5619_v57  ;;  %v11067_v19 = vrot.slane %v11054_v51, %v11716_v6 }
0x1a43   :  { %v5621_v37 = vsel %vm313_vm2, %v5620_v10, 0.0 }
0x1a44   :  { %5622 = vadd.xlane.f32.xlu0 %v5621_v37  ;;  %v11713_v37 = vld [vmem:[#allocation32_spill] sm:$0xff] }
0x1a45   :  { %v5899_v28 = vrot.slane %v11054_v51, %v11713_v37 }
0x1a47   :  { %v5900_v16 = vmul.f32 %v5899_v28, %v11714_v2 }
0x1acd   :  { %v5623_v56 = vpop.xlane.xlu0 %5622 }
0x1ace   :  { %v5624_v25 = vmul.f32 0.03125, %v5623_v56  ;;  %v11715_v56 = vld [vmem:[#allocation15_spill] sm:$0xff] }
0x1ad0   :  { %v5625_v34 = vadd.f32 1e-05, %v5624_v25 }
0x1ad2   :  { %7299 = vrsqrt.f32 %v5625_v34 }
0x1adf   :  { %v7300_v4 = vpop.eup %7299 }
0x1ae0   :  { %v5627_v20 = vmul.f32 %v7300_v4, %v5619_v57  ;;  %v11712_v57 = vld [vmem:[#allocation20_spill] sm:$0xff] }
0x1ae1   :  { %v11058_v10 = vrot.slane %v11054_v51, %v11712_v57 }
0x1ae2   :  { %v5632_v26 = vmul.f32 %v5631_v17, %v5627_v20 }
0x1ae3   :  { %v5918_v25 = vmul.f32 %v11058_v10, %v11715_v56 }
0x1ae4   :  { %v5637_v59 = vadd.f32 %v5636_v35, %v5632_v26  ;;  %v5901_v35 = vmul.f32 %v5899_v28, %v11717_v8 }
0x1ae6   :  { %v6324_v12 = vclamps-f32 %v5637_v59, 10.0  ;;  %v11718_v59 = vld [vmem:[#allocation25_spill] sm:$0xff] }
0x1ae8   :  { %v5645_v54 = vpack.c.bf16 %v6324_v12, %v6324_v12  ;;  %5640 = vst.msk [vmem:[#allocation2] sm:$0xff] %vm313_vm2, %v6324_v12  ;;  %v5919_v12 = vmul.f32 %v11058_v10, %v11718_v59 }
0x1aea   :  { %6748 = vmatmul.mubr.msk.bf16.vlgmr.msra.gmra.mxu1 %vm313_vm2, %v5645_v54 }
0x1aeb   :  { %6776 = vmatprep.mubr.msk.f32.mxu1 %vm7442_vm1, %v11707_v15 }
0x1baa   :  { %v5685_v60 = vpop.f32.mrf.mxu1 }
0x1bab   :  { %5693 = vrot.lane.b32.xlu0 %v5685_v60, %s7444_s29  ;;  %6775 = vmatpush3.msra.mxu1 %v5685_v60 }
0x1bac   :  { %v6749_v31 = vpop.f32.mrf.mxu1  ;;  %6777 = vmatmul.mubr.msk.f32.vlgmr.msra.gmra.mxu1 %vm72_vm0, %v7403_v30  ;;  %6809 = vmatprep.subr.mxu1 %v11707_v15 }
0x1bad   :  { %6779 = vmatprep.mubr.msk.f32.mxu1 %vm7442_vm1, %v11707_v15 }
0x1bae   :  { %v5688_v13 = vpop.f32.mrf.mxu1 }
0x1bb0   :  { %v6750_v45 = vpop.f32.mrf.mxu1  ;;  %6780 = vmatmul.mubr.msk.f32.gmra.mxu1 %vm72_vm0, %v7404_v61  ;;  %v11719_v61 = vld [vmem:[#allocation26_spill] sm:$0xff] }
0x1bb1   :  { %6782 = vmatprep.mubr.msk.f32.mxu1 %vm7442_vm1, %v11707_v15 }
0x1bb4   :  { %6783 = vmatmul.mubr.msk.f32.gmra.mxu1 %vm72_vm0, %v7405_v14  ;;  %v5902_v14 = vmul.f32 %v5899_v28, %v11719_v61 }
0x1bb5   :  { %6785 = vmatprep.mubr.msk.f32.mxu1 %vm7442_vm1, %v11707_v15 }
0x1bb8   :  { %6786 = vmatmul.mubr.msk.f32.gmra.mxu1 %vm72_vm0, %v7406_v55 }
0x1bb9   :  { %6788 = vmatprep.mubr.msk.f32.mxu1 %vm7442_vm1, %v11707_v15 }
0x1bbc   :  { %6789 = vmatmul.mubr.msk.f32.gmra.mxu1 %vm72_vm0, %v7407_v40  ;;  %v11720_v40 = vld [vmem:[#allocation16_spill] sm:$0xff] }
0x1bbd   :  { %6791 = vmatprep.mubr.msk.f32.mxu1 %vm7442_vm1, %v11707_v15 }
0x1bc0   :  { %6792 = vmatmul.mubr.msk.f32.gmra.mxu1 %vm72_vm0, %v7408_v38  ;;  %v5920_v38 = vmul.f32 %v11058_v10, %v11720_v40 }
0x1bc1   :  { %6794 = vmatprep.mubr.msk.f32.mxu1 %vm7442_vm1, %v11707_v15 }
0x1bc4   :  { %6795 = vmatmul.mubr.msk.f32.gmra.mxu1 %vm72_vm0, %v7409_v62 }
0x1bc5   :  { %6823 = vmatprep.mubr.msk.f32.mxu1 %vm7442_vm1, %v11707_v15 }
0x1c1d   :  { %v5694_v27 = vpop.permute.xlu0 %5693 }
0x1c1e   :  { %6752 = vmatpush3.msra.mxu0 %v5694_v27 }
0x1c1f   :  { %6754 = vmatmul.mubr.msk.f32.vlgmr.msra.gmra.mxu0 %vm72_vm0, %v7410_v23  ;;  %6797 = vmatprep.subr.bf16.mxu0 %v6001_v21 }
0x1c20   :  { %6756 = vmatprep.mubr.msk.f32.mxu0 %vm7442_vm1, %v11707_v15  ;;  %6798 = vmatpush3.bf16.msra.mxu0 %v6001_v21 }
0x1c21   :  { %6799 = vmatprep.subr.bf16.mxu0 %v6000_v29 }
0x1c23   :  { %6757 = vmatmul.mubr.msk.f32.gmra.mxu0 %vm72_vm0, %v7411_v24 }
0x1c24   :  { %6759 = vmatprep.mubr.msk.f32.mxu0 %vm7442_vm1, %v11707_v15  ;;  %6800 = vmatpush3.bf16.msra.mxu0 %v6000_v29 }
0x1c27   :  { %6760 = vmatmul.mubr.msk.f32.gmra.mxu0 %vm72_vm0, %v7412_v36  ;;  %v11721_v36 = vld [vmem:[#allocation27_spill] sm:$0xff] }
0x1c28   :  { %6762 = vmatprep.mubr.msk.f32.mxu0 %vm7442_vm1, %v11707_v15 }
0x1c2b   :  { %6763 = vmatmul.mubr.msk.f32.gmra.mxu0 %vm72_vm0, %v7413_v5  ;;  %v5903_v5 = vmul.f32 %v5899_v28, %v11721_v36 }
0x1c2c   :  { %6765 = vmatprep.mubr.msk.f32.mxu0 %vm7442_vm1, %v11707_v15 }
0x1c2f   :  { %6766 = vmatmul.mubr.msk.f32.gmra.mxu0 %vm72_vm0, %v7414_v58 }
0x1c30   :  { %6768 = vmatprep.mubr.msk.f32.mxu0 %vm7442_vm1, %v11707_v15 }
0x1c33   :  { %6769 = vmatmul.mubr.msk.f32.gmra.mxu0 %vm72_vm0, %v7415_v48 }
0x1c34   :  { %6771 = vmatprep.mubr.msk.f32.mxu0 %vm7442_vm1, %v11707_v15 }
0x1c37   :  { %6772 = vmatmul.mubr.msk.f32.gmra.mxu0 %vm72_vm0, %v7416_v42 }
0x1c6c   :  { %v5862_v1 = vpop.f32.mrf.mxu1 }
0x1c6e   :  { %v6778_v11 = vpop.f32.mrf.mxu1 }
0x1c6f   :  { %v11722_v11 = vld [vmem:[#allocation17_spill] sm:$0xff] }
0x1c70   :  { %v5867_v43 = vpop.f32.mrf.mxu1 }
0x1c72   :  { %v6781_v22 = vpop.f32.mrf.mxu1 }
0x1c74   :  { %v5872_v63 = vpop.f32.mrf.mxu1 }
0x1c76   :  { %v6784_v53 = vpop.f32.mrf.mxu1 }
0x1c78   :  { %v5877_v18 = vpop.f32.mrf.mxu1 }
0x1c7a   :  { %v6787_v39 = vpop.f32.mrf.mxu1 }
0x1c7c   :  { %v5882_v41 = vpop.f32.mrf.mxu1 }
0x1c7e   :  { %v6790_v33 = vpop.f32.mrf.mxu1 }
0x1c7f   :  { %v11723_v33 = vld [vmem:[#allocation28_spill] sm:$0xff] }
0x1c80   :  { %v11035_v46 = vpop.f32.mrf.mxu1 }
0x1c82   :  { %v6793_v44 = vpop.f32.mrf.mxu1 }
0x1c83   :  { %v5904_v44 = vmul.f32 %v5899_v28, %v11723_v33 }
0x1c84   :  { %v11046_v52 = vpop.f32.mrf.mxu1 }
0x1c86   :  { %v6796_v0 = vpop.f32.mrf.mxu1 }
0x1cdf   :  { %v5762_v3 = vpop.f32.mrf.mxu0 }
0x1ce0   :  { %v5863_v32 = vadd.f32 %v5862_v1, %v5762_v3  ;;  %v11725_v3 = vld [vmem:[#allocation13_spill] sm:$0xff] }
0x1ce1   :  { %v6755_v7 = vpop.f32.mrf.mxu0 }
0x1ce2   :  { %v5907_v34 = vadd.f32 %v5900_v16, %v5863_v32  ;;  %v5905_v32 = vmul.f32 %v5899_v28, %v11725_v3 }
0x1ce3   :  { %v5767_v17 = vpop.f32.mrf.mxu0 }
0x1ce4   :  { %v5925_v4 = vadd.f32 %v5918_v25, %v5907_v34  ;;  %v5868_v20 = vadd.f32 %v5867_v43, %v5767_v17  ;;  %v5921_v43 = vmul.f32 %v11058_v10, %v11722_v11 }
0x1ce5   :  { %v6758_v26 = vpop.f32.mrf.mxu0 }
0x1ce6   :  { %v11073_v54 = vadd.f32 %v11067_v19, %v5925_v4  ;;  %v5908_v60 = vadd.f32 %v5901_v35, %v5868_v20  ;;  %v11727_v35 = vld [vmem:[#allocation14_spill] sm:$0xff] }
0x1ce7   :  { %v5772_v31 = vpop.f32.mrf.mxu0  ;;  %v5906_v26 = vmul.f32 %v5899_v28, %v11727_v35 }
0x1ce8   :  { %v5943_v30 = vsub.f32 0.0, %v11073_v54  ;;  %v5926_v13 = vadd.f32 %v5919_v12, %v5908_v60  ;;  %v5873_v45 = vadd.f32 %v5872_v63, %v5772_v31 }
0x1ce9   :  { %v6761_v55 = vpop.f32.mrf.mxu0 }
0x1cea   :  { %v5950_v62 = vmul.f32 1.442695, %v5943_v30  ;;  %v11080_v27 = vadd.f32 %v11067_v19, %v5926_v13  ;;  %v5909_v23 = vadd.f32 %v5902_v14, %v5873_v45  ;;  %v11728_v30 = vld [vmem:[#allocation29_spill] sm:$0xff] }
0x1ceb   :  { %v5777_v24 = vpop.f32.mrf.mxu0 }
0x1cec   :  { %7301 = vpow2.f32 %v5950_v62  ;;  %v5944_v58 = vsub.f32 0.0, %v11080_v27  ;;  %v5927_v48 = vadd.f32 %v5920_v38, %v5909_v23  ;;  %v5878_v42 = vadd.f32 %v5877_v18, %v5777_v24 }
0x1ced   :  { %v6764_v1 = vpop.f32.mrf.mxu0  ;;  %v5922_v18 = vmul.f32 %v11058_v10, %v11724_v9 }
0x1cee   :  { %v5952_v22 = vmul.f32 1.442695, %v5944_v58  ;;  %v11087_v63 = vadd.f32 %v11067_v19, %v5927_v48  ;;  %v5910_v53 = vadd.f32 %v5903_v5, %v5878_v42 }
0x1cef   :  { %v5782_v39 = vpop.f32.mrf.mxu0 }
0x1cf0   :  { %7303 = vpow2.f32 %v5952_v22  ;;  %v5945_v49 = vsub.f32 0.0, %v11087_v63  ;;  %v5928_v50 = vadd.f32 %v5921_v43, %v5910_v53  ;;  %v5883_v47 = vadd.f32 %v5882_v41, %v5782_v39  ;;  %v11726_v41 = vld [vmem:[#allocation22_spill] sm:$0xff] }
0x1cf1   :  { %v6767_v21 = vpop.f32.mrf.mxu0  ;;  %v5923_v34 = vmul.f32 %v11058_v10, %v11726_v41 }
0x1cf2   :  { %v5954_v29 = vmul.f32 1.442695, %v5945_v49  ;;  %v11094_v0 = vadd.f32 %v11067_v19, %v5928_v50  ;;  %v5911_v57 = vadd.f32 %v5904_v44, %v5883_v47 }
0x1cf3   :  { %v5787_v37 = vpop.f32.mrf.mxu0 }
0x1cf4   :  { %7305 = vpow2.f32 %v5954_v29  ;;  %v5946_v16 = vsub.f32 0.0, %v11094_v0  ;;  %v5929_v7 = vadd.f32 %v5922_v18, %v5911_v57  ;;  %v5888_v56 = vadd.f32 %v11035_v46, %v5787_v37 }
0x1cf5   :  { %v6770_v25 = vpop.f32.mrf.mxu0  ;;  %v5924_v46 = vmul.f32 %v11058_v10, %v11728_v30 }
0x1cf6   :  { %v5956_v6 = vmul.f32 1.442695, %v5946_v16  ;;  %v5940_v17 = vadd.f32 %v11067_v19, %v5929_v7  ;;  %v5912_v4 = vadd.f32 %v5905_v32, %v5888_v56 }
0x1cf7   :  { %v5792_v20 = vpop.f32.mrf.mxu0 }
0x1cf8   :  { %7307 = vpow2.f32 %v5956_v6  ;;  %v5947_v59 = vsub.f32 0.0, %v5940_v17  ;;  %v5930_v12 = vadd.f32 %v5923_v34, %v5912_v4  ;;  %v5893_v60 = vadd.f32 %v11046_v52, %v5792_v20  ;;  %v11729_v4 = vld [vmem:[#allocation34_spill] sm:$0xff] }
0x1cf9   :  { %v7302_v31 = vpop.eup %7301  ;;  %v6773_v13 = vpop.f32.mrf.mxu0 }
0x1cfa   :  { %v5964_v45 = vadd.f32 1.0, %v7302_v31  ;;  %v5958_v14 = vmul.f32 1.442695, %v5947_v59  ;;  %v5941_v55 = vadd.f32 %v11067_v19, %v5930_v12  ;;  %v5913_v40 = vadd.f32 %v5906_v26, %v5893_v60 }
0x1cfc   :  { %v5948_v38 = vsub.f32 0.0, %v5941_v55  ;;  %v5931_v62 = vadd.f32 %v5924_v46, %v5913_v40  ;;  %7309 = vpow2.f32 %v5958_v14 }
0x1cfd   :  { %v7304_v23 = vpop.eup %7303  ;;  %7311 = vrcp.f32 %v5964_v45 }
0x1cfe   :  { %v5965_v28 = vadd.f32 1.0, %v7304_v23  ;;  %v5960_v24 = vmul.f32 1.442695, %v5948_v38  ;;  %v5942_v5 = vadd.f32 %v11067_v19, %v5931_v62 }
0x1d00   :  { %7313 = vrcp.f32 %v5965_v28  ;;  %v5949_v52 = vsub.f32 0.0, %v5942_v5 }
0x1d01   :  { %v7306_v58 = vpop.eup %7305  ;;  %7315 = vpow2.f32 %v5960_v24 }
0x1d02   :  { %v5966_v10 = vadd.f32 1.0, %v7306_v58  ;;  %v5962_v48 = vmul.f32 1.442695, %v5949_v52 }
0x1d04   :  { %7317 = vpow2.f32 %v5962_v48 }
0x1d05   :  { %v7308_v42 = vpop.eup %7307  ;;  %7319 = vrcp.f32 %v5966_v10 }
0x1d06   :  { %v5967_v1 = vadd.f32 1.0, %v7308_v42 }
0x1d08   :  { %7321 = vrcp.f32 %v5967_v1 }
0x1d09   :  { %v7310_v11 = vpop.eup %7309 }
0x1d0a   :  { %v7312_v43 = vpop.eup %7311  ;;  %v5968_v22 = vadd.f32 1.0, %v7310_v11 }
0x1d0b   :  { %v5985_v44 = vmul.f32 %v7312_v43, %v11073_v54 }
0x1d0c   :  { %7323 = vrcp.f32 %v5968_v22 }
0x1d0d   :  { %v7314_v53 = vpop.eup %7313 }
0x1d0e   :  { %v7316_v39 = vpop.eup %7315  ;;  %v5986_v19 = vmul.f32 %v7314_v53, %v11080_v27 }
0x1d0f   :  { %v5969_v49 = vadd.f32 1.0, %v7316_v39 }
0x1d10   :  { %v5996_v50 = vpack.c.bf16 %v5986_v19, %v5985_v44 }
0x1d11   :  { %7325 = vrcp.f32 %v5969_v49  ;;  %v7318_v47 = vpop.eup %7317 }
0x1d12   :  { %6801 = vmatprep.mubr.msk.bf16.mxu0 %vm313_vm2, %v5996_v50  ;;  %v7320_v21 = vpop.eup %7319  ;;  %v5970_v9 = vadd.f32 1.0, %v7318_v47 }
0x1d13   :  { %v5987_v29 = vmul.f32 %v7320_v21, %v11087_v63 }
0x1d14   :  { %7327 = vrcp.f32 %v5970_v9 }
0x1d15   :  { %v7322_v18 = vpop.eup %7321 }
0x1d16   :  { %v5988_v57 = vmul.f32 %v7322_v18, %v11094_v0  ;;  %v6005_v0 = vrot.slane %v11054_v51, %v11729_v4 }
0x1d18   :  { %v5997_v37 = vpack.c.bf16 %v5988_v57, %v5987_v29 }
0x1d19   :  { %v7324_v54 = vpop.eup %7323 }
0x1d1a   :  { %6802 = vmatmul.mubr.msk.bf16.vlgmr.msra.gmra.mxu0 %vm313_vm2, %v5997_v37  ;;  %v5989_v32 = vmul.f32 %v7324_v54, %v5940_v17  ;;  %v11730_v37 = vld [vmem:[#allocation24_spill] sm:$0xff] }
0x1d1b   :  { %v6134_v54 = vrot.slane %v11054_v51, %v11730_v37 }
0x1d1e   :  { %v7326_v27 = vpop.eup %7325 }
0x1d1f   :  { %v5990_v16 = vmul.f32 %v7326_v27, %v5941_v55 }
0x1d21   :  { %v5998_v7 = vpack.c.bf16 %v5990_v16, %v5989_v32  ;;  %v7328_v56 = vpop.eup %7327 }
0x1d22   :  { %v5991_v25 = vmul.f32 %v7328_v56, %v5942_v5 }
0x1d23   :  { %6805 = vmatprep.mubr.msk.bf16.mxu0 %vm313_vm2, %v5998_v7 }
0x1d24   :  { %v5999_v41 = vpack.c.bf16 %v5991_v25, %v5991_v25 }
0x1d26   :  { %6806 = vmatmul.mubr.msk.bf16.gmra.mxu0 %vm313_vm2, %v5999_v41 }
0x1dda   :  { %v6803_v34 = vpop.f32.mrf.mxu0 }
0x1ddb   :  { %v11120_v60 = vadd.f32 %v6803_v34, %v6005_v0 }
0x1ddc   :  { %v6052_v6 = vpop.f32.mrf.mxu0 }
0x1ddd   :  { %v6084_v55 = vsub.f32 0.0, %v11120_v60  ;;  %v11124_v62 = vadd.f32 %v6052_v6, %v6005_v0 }
0x1dde   :  { %v6804_v63 = vpop.f32.mrf.mxu0 }
0x1ddf   :  { %v11118_v59 = vadd.f32 %v6804_v63, %v6005_v0  ;;  %v6093_v58 = vmul.f32 1.442695, %v6084_v55  ;;  %v6082_v10 = vsub.f32 0.0, %v11124_v62 }
0x1de0   :  { %v6055_v20 = vpop.f32.mrf.mxu0 }
0x1de1   :  { %v6056_v26 = vadd.f32 %v6055_v20, %v6005_v0  ;;  %v6085_v31 = vsub.f32 0.0, %v11118_v59  ;;  %v6089_v11 = vmul.f32 1.442695, %v6082_v10 }
0x1de3   :  { %v6083_v17 = vsub.f32 0.0, %v6056_v26  ;;  %v6095_v40 = vmul.f32 1.442695, %v6085_v31 }
0x1de5   :  { %v6091_v12 = vmul.f32 1.442695, %v6083_v17 }
0x1de6   :  { %v6807_v30 = vpop.f32.mrf.mxu0 }
0x1de7   :  { %7329 = vpow2.f32 %v6091_v12  ;;  %v6077_v46 = vadd.f32 %v6807_v30, %v6005_v0 }
0x1de8   :  { %v6068_v13 = vpop.f32.mrf.mxu0 }
0x1de9   :  { %v6088_v45 = vsub.f32 0.0, %v6077_v46  ;;  %v6069_v14 = vadd.f32 %v6068_v13, %v6005_v0 }
0x1dea   :  { %v6808_v38 = vpop.f32.mrf.mxu0 }
0x1deb   :  { %v6101_v23 = vmul.f32 1.442695, %v6088_v45  ;;  %v6086_v28 = vsub.f32 0.0, %v6069_v14 }
0x1dec   :  { %v6071_v24 = vpop.f32.mrf.mxu0 }
0x1ded   :  { %7331 = vpow2.f32 %v6101_v23  ;;  %v6097_v5 = vmul.f32 1.442695, %v6086_v28  ;;  %v6072_v52 = vadd.f32 %v6071_v24, %v6005_v0  ;;  %v228_v23 = vadd.f32 1e-08, %v11725_v3 }
0x1dee   :  { %7333 = vpow2.f32 %v6095_v40  ;;  %v227_v28 = vadd.f32 1e-08, %v11723_v33  ;;  %v225_v24 = vadd.f32 1e-08, %v11719_v61 }
0x1def   :  { %7335 = vpow2.f32 %v6097_v5  ;;  %v6087_v48 = vsub.f32 0.0, %v6072_v52  ;;  %vm267_vm6 = vcmp.eq.f32.partialorder %v228_v23, inf  ;;  %vm269_vm9 = vcmp.eq.f32.partialorder %v228_v23, 0.0 }
0x1df0   :  { %7337 = vpow2.f32 %v6093_v58  ;;  %v11146_v58 = vadd.f32 1e-08, %v11714_v2  ;;  %vm262_vm8 = vcmp.eq.f32.partialorder %v227_v28, 0.0  ;;  %vm246_vm11 = vcmp.eq.f32.partialorder %v225_v24, inf }
0x1df1   :  { %v6099_v42 = vmul.f32 1.442695, %v6087_v48  ;;  %v249_v37 = vand.u32 2147483648, %v225_v24  ;;  %vm248_vm13 = vcmp.eq.f32.partialorder %v225_v24, 0.0 }
0x1df2   :  { %vm232_vm14 = vcmp.eq.f32.partialorder %v11146_v58, inf  ;;  %vm234_vm5 = vcmp.eq.f32.partialorder %v11146_v58, 0.0 }
0x1df3   :  { %7339 = vpow2.f32 %v6099_v42 }
0x1df4   :  { %v7330_v1 = vpop.eup %7329 }
0x1df5   :  { %v6104_v43 = vadd.f32 1.0, %v7330_v1 }
0x1df7   :  { %7341 = vrcp.f32 %v6104_v43 }
0x1df8   :  { %7343 = vpow2.f32 %v6089_v11 }
0x1dfa   :  { %v7332_v22 = vpop.eup %7331 }
0x1dfb   :  { %v7334_v53 = vpop.eup %7333  ;;  %v6109_v39 = vadd.f32 1.0, %v7332_v22  ;;  %v263_v22 = vand.u32 2147483648, %v227_v28 }
0x1dfc   :  { %v7336_v44 = vpop.eup %7335  ;;  %v6106_v49 = vadd.f32 1.0, %v7334_v53  ;;  %v270_v53 = vand.u32 2147483648, %v228_v23 }
0x1dfd   :  { %7345 = vrcp.f32 %v6109_v39  ;;  %v6107_v19 = vadd.f32 1.0, %v7336_v44  ;;  %v7338_v50 = vpop.eup %7337 }
0x1dfe   :  { %v6105_v18 = vadd.f32 1.0, %v7338_v50 }
0x1dff   :  { %7347 = vrcp.f32 %v6107_v19 }
0x1e00   :  { %v7340_v47 = vpop.eup %7339  ;;  %7349 = vrcp.f32 %v6106_v49 }
0x1e01   :  { %v6108_v21 = vadd.f32 1.0, %v7340_v47 }
0x1e03   :  { %7351 = vrcp.f32 %v6108_v21 }
0x1e04   :  { %v7342_v9 = vpop.eup %7341  ;;  %7353 = vrcp.f32 %v6105_v18 }
0x1e05   :  { %v7344_v29 = vpop.eup %7343  ;;  %v6125_v57 = vmul.f32 %v7342_v9, %v6056_v26 }
0x1e06   :  { %v6103_v32 = vadd.f32 1.0, %v7344_v29 }
0x1e07   :  { %v6136_v27 = vmul.f32 %v6134_v54, %v6125_v57 }
0x1e08   :  { %7355 = vrcp.f32 %v6103_v32 }
0x1e09   :  { %v6145_v16 = vsel %vm313_vm2, %v6136_v27, 0.0 }
0x1e0a   :  { %6146 = vadd.xlane.f32.xlu0 %v6145_v16  ;;  %v7346_v7 = vpop.eup %7345 }
0x1e0b   :  { %v6130_v56 = vmul.f32 %v7346_v7, %v6077_v46 }
0x1e0c   :  { %v7348_v25 = vpop.eup %7347 }
0x1e0d   :  { %v6128_v41 = vmul.f32 %v7348_v25, %v6069_v14  ;;  %v6141_v34 = vmul.f32 %v6134_v54, %v6130_v56  ;;  %v7350_v6 = vpop.eup %7349 }
0x1e0e   :  { %v6127_v51 = vmul.f32 %v7350_v6, %v11118_v59 }
0x1e0f   :  { %v6160_v63 = vsel %vm313_vm2, %v6141_v34, 0.0  ;;  %v6139_v4 = vmul.f32 %v6134_v54, %v6128_v41  ;;  %v235_v41 = vand.u32 2147483648, %v11146_v58 }
0x1e10   :  { %v7352_v0 = vpop.eup %7351  ;;  %6161 = vadd.xlane.f32.xlu1 %v6160_v63  ;;  %v6138_v46 = vmul.f32 %v6134_v54, %v6127_v51  ;;  %v11731_v51 = vld [vmem:[#allocation8_spill] sm:$0xff] }
0x1e11   :  { %v6129_v20 = vmul.f32 %v7352_v0, %v6072_v52  ;;  %v6154_v26 = vsel %vm313_vm2, %v6139_v4, 0.0  ;;  %v7354_v12 = vpop.eup %7353  ;;  %v224_v52 = vadd.f32 1e-08, %v11717_v8 }
0x1e12   :  { %v6126_v31 = vmul.f32 %v7354_v12, %v11120_v60  ;;  %v6151_v14 = vsel %vm313_vm2, %v6138_v46, 0.0  ;;  %v229_v60 = vadd.f32 1e-08, %v11727_v35 }
0x1e13   :  { %v6140_v17 = vmul.f32 %v6134_v54, %v6129_v20  ;;  %vm239_vm12 = vcmp.eq.f32.partialorder %v224_v52, inf  ;;  %v242_v16 = vand.u32 2147483648, %v224_v52  ;;  %vm241_vm15 = vcmp.eq.f32.partialorder %v224_v52, 0.0 }
0x1e14   :  { %6155 = vadd.xlane.f32.xlu1 %v6154_v26  ;;  %v6137_v55 = vmul.f32 %v6134_v54, %v6126_v31  ;;  %7357 = vrsqrt.f32 %v229_v60  ;;  %vm274_vm0 = vcmp.eq.f32.partialorder %v229_v60, inf  ;;  %v277_v10 = vand.u32 2147483648, %v229_v60 }
0x1e15   :  { %v6157_v30 = vsel %vm313_vm2, %v6140_v17, 0.0  ;;  %v7356_v13 = vpop.eup %7355  ;;  %7359 = vrsqrt.f32 %v228_v23  ;;  %vm276_vm1 = vcmp.eq.f32.partialorder %v229_v60, 0.0 }
0x1e16   :  { %v6124_v45 = vmul.f32 %v7356_v13, %v11124_v62  ;;  %v6148_v59 = vsel %vm313_vm2, %v6137_v55, 0.0  ;;  %v226_v62 = vadd.f32 1e-08, %v11721_v36  ;;  %7361 = vrsqrt.f32 %v227_v28 }
0x1e18   :  { %6158 = vadd.xlane.f32.xlu1 %v6157_v30  ;;  %v6135_v40 = vmul.f32 %v6134_v54, %v6124_v45  ;;  %7363 = vrsqrt.f32 %v226_v62  ;;  %vm253_vm7 = vcmp.eq.f32.partialorder %v226_v62, inf  ;;  %v256_v49 = vand.u32 2147483648, %v226_v62  ;;  %v11732_v45 = vld [vmem:[#allocation6_spill] sm:$0xff] }
0x1e19   :  { %7365 = vrsqrt.f32 %v225_v24  ;;  %vm255_vm10 = vcmp.eq.f32.partialorder %v226_v62, 0.0 }
0x1e1a   :  { %v6142_v38 = vsel %vm313_vm2, %v6135_v40, 0.0  ;;  %7367 = vrsqrt.f32 %v224_v52  ;;  %vm260_vm2 = vcmp.eq.f32.partialorder %v227_v28, inf  ;;  %v11733_v40 = vld [vmem:[#allocation11_spill] sm:$0xff] }
0x1e1b   :  { %7369 = vrsqrt.f32 %v11146_v58 }
0x1e1c   :  { %6152 = vadd.xlane.f32.xlu1 %v6151_v14 }
0x1e20   :  { %6149 = vadd.xlane.f32.xlu1 %v6148_v59 }
0x1e21   :  { %v7358_v5 = vpop.eup %7357 }
0x1e22   :  { %v273_v35 = vmul.f32 %v7358_v5, %v229_v60  ;;  %v7360_v3 = vpop.eup %7359 }
0x1e23   :  { %v7362_v36 = vpop.eup %7361  ;;  %v266_v61 = vmul.f32 %v7360_v3, %v228_v23 }
0x1e24   :  { %6143 = vadd.xlane.f32.xlu1 %v6142_v38  ;;  %v275_v33 = vsel %vm274_vm0, %v229_v60, %v273_v35  ;;  %v259_v11 = vmul.f32 %v7362_v36, %v227_v28  ;;  %v11735_v35 = vld [vmem:[#allocation9_spill] sm:$0xff] }
0x1e25   :  { %v278_v48 = vsel %vm276_vm1, %v277_v10, %v275_v33  ;;  %v7364_v42 = vpop.eup %7363  ;;  %v268_v2 = vsel %vm267_vm6, %v228_v23, %v266_v61 }
0x1e26   :  { %v285_v1 = vadd.f32 1.0, %v278_v48  ;;  %v252_v8 = vmul.f32 %v7364_v42, %v226_v62  ;;  %v7366_v43 = vpop.eup %7365  ;;  %v261_v39 = vsel %vm260_vm2, %v227_v28, %v259_v11  ;;  %v271_v19 = vsel %vm269_vm9, %v270_v53, %v268_v2  ;;  %v11734_v28 = vld [vmem:[#allocation10_spill] sm:$0xff]  ;;  %v11736_v48 = vld [vmem:[#allocation7_spill] sm:$0xff]  ;;  %v11737_v11 = vld [vmem:[#allocation5_spill] sm:$0xff] }
0x1e27   :  { %v7368_v44 = vpop.eup %7367  ;;  %v245_v47 = vmul.f32 %v7366_v43, %v225_v24  ;;  %v264_v9 = vsel %vm262_vm8, %v263_v22, %v261_v39  ;;  %v284_v29 = vadd.f32 1.0, %v271_v19  ;;  %v7417_v22 = vld [vmem:[%s11187_s6] sm:$0xff] }
0x1e28   :  { %7371 = vrcp.f32 %v285_v1  ;;  %v254_v50 = vsel %vm253_vm7, %v226_v62, %v252_v8  ;;  %v7370_v21 = vpop.eup %7369  ;;  %v238_v18 = vmul.f32 %v7368_v44, %v224_v52  ;;  %v283_v54 = vadd.f32 1.0, %v264_v9 }
0x1e29   :  { %v257_v57 = vsel %vm255_vm10, %v256_v49, %v254_v50  ;;  %v247_v27 = vsel %vm246_vm11, %v225_v24, %v245_v47  ;;  %v231_v32 = vmul.f32 %v7370_v21, %v11146_v58  ;;  %7373 = vrcp.f32 %v284_v29 }
0x1e2a   :  { %v240_v7 = vsel %vm239_vm12, %v224_v52, %v238_v18  ;;  %v282_v56 = vadd.f32 1.0, %v257_v57  ;;  %v250_v25 = vsel %vm248_vm13, %v249_v37, %v247_v27  ;;  %7375 = vrcp.f32 %v283_v54 }
0x1e2b   :  { %v233_v34 = vsel %vm232_vm14, %v11146_v58, %v231_v32  ;;  %v243_v6 = vsel %vm241_vm15, %v242_v16, %v240_v7  ;;  %v281_v63 = vadd.f32 1.0, %v250_v25 }
0x1e2c   :  { %7377 = vrcp.f32 %v282_v56  ;;  %v236_v0 = vsel %vm234_vm5, %v235_v41, %v233_v34  ;;  %v280_v20 = vadd.f32 1.0, %v243_v6 }
0x1e2d   :  { %7379 = vrcp.f32 %v281_v63  ;;  %v279_v17 = vadd.f32 1.0, %v236_v0 }
0x1e2e   :  { %7381 = vrcp.f32 %v280_v20 }
0x1e2f   :  { %7383 = vrcp.f32 %v279_v17 }
0x1e35   :  { %v7372_v4 = vpop.eup %7371 }
0x1e36   :  { %v299_v26 = vmul.f32 %v7372_v4, %v11731_v51  ;;  %v7374_v30 = vpop.eup %7373 }
0x1e37   :  { %v7376_v13 = vpop.eup %7375  ;;  %v297_v14 = vmul.f32 %v7374_v30, %v11732_v45 }
0x1e38   :  { %v295_v38 = vmul.f32 %v7376_v13, %v11733_v40 }
0x1e39   :  { %v7378_v55 = vpop.eup %7377 }
0x1e3a   :  { %v293_v62 = vmul.f32 %v7378_v55, %v11734_v28  ;;  %v7380_v24 = vpop.eup %7379 }
0x1e3b   :  { %v7382_v58 = vpop.eup %7381  ;;  %v291_v33 = vmul.f32 %v7380_v24, %v11735_v35 }
0x1e3c   :  { %v7384_v3 = vpop.eup %7383  ;;  %v289_v61 = vmul.f32 %v7382_v58, %v11736_v48 }
0x1e3d   :  { %v287_v2 = vmul.f32 %v7384_v3, %v11737_v11 }
0x1e93   :  { %v6147_v10 = vpop.xlane.xlu0 %6146 }
0x1e94   :  { %v6164_v1 = vmul.f32 %v6147_v10, %v289_v61 }
0x1e99   :  { %v6162_v12 = vpop.xlane.xlu1 %6161 }
0x1e9a   :  { %v6169_v31 = vmul.f32 %v6162_v12, %v299_v26 }
0x1e9c   :  { %6810 = vmatpush3.msra.mxu1 %v6169_v31 }
0x1e9d   :  { %v6156_v46 = vpop.xlane.xlu1 %6155  ;;  %6811 = vmatprep.subr.mxu1 %v11707_v15 }
0x1e9e   :  { %v6167_v23 = vmul.f32 %v6156_v46, %v295_v38 }
0x1ea1   :  { %v6159_v59 = vpop.xlane.xlu1 %6158 }
0x1ea2   :  { %v6168_v60 = vmul.f32 %v6159_v59, %v297_v14 }
0x1ea4   :  { %6812 = vmatpush3.msra.mxu1 %v6168_v60 }
0x1ea5   :  { %6813 = vmatprep.subr.mxu1 %v11707_v15  ;;  %v6153_v5 = vpop.xlane.xlu1 %6152 }
0x1ea6   :  { %v6166_v52 = vmul.f32 %v6153_v5, %v293_v62  ;;  %6814 = vmatpush3.msra.mxu1 %v6167_v23 }
0x1ea7   :  { %6815 = vmatprep.subr.mxu1 %v11707_v15 }
0x1ea8   :  { %6816 = vmatpush3.msra.mxu1 %v6166_v52 }
0x1ea9   :  { %v6150_v36 = vpop.xlane.xlu1 %6149  ;;  %6817 = vmatprep.subr.mxu1 %v11707_v15 }
0x1eaa   :  { %v6165_v42 = vmul.f32 %v6150_v36, %v291_v33 }
0x1eac   :  { %6818 = vmatpush3.msra.mxu1 %v6165_v42 }
0x1ead   :  { %6819 = vmatprep.subr.mxu1 %v11707_v15  ;;  %v6144_v8 = vpop.xlane.xlu1 %6143 }
0x1eae   :  { %v6163_v43 = vmul.f32 %v6144_v8, %v287_v2  ;;  %6820 = vmatpush3.msra.mxu1 %v6164_v1 }
0x1eaf   :  { %6821 = vmatprep.subr.mxu1 %v11707_v15 }
0x1eb0   :  { %6822 = vmatpush3.msra.mxu1 %v6163_v43 }
0x1eb1   :  { %6824 = vmatmul.mubr.msk.f32.vlgmr.msra.gmra.mxu1 %vm1000_vm4, %v7417_v22 }
0x1eb2   :  { %7430 = shalt.err (!%p7427_p4)
}
0x1eb3   :  { %6253 = dma.vmem_to_hbm [thread:$0]  %s6251_s15, 128, %s11192_s11, [#allocation3]   ;;  %v7418_v44 = vld [vmem:[%s11182_s1] sm:$0xff] }
0x1f71   :  { %v6236_v15 = vpop.f32.mrf.mxu1 }
0x1f72   :  { %v6241_v53 = vmul.f32 0.01, %v6236_v15 }
0x1f73   :  { %v6825_v39 = vpop.f32.mrf.mxu1 }
0x1f74   :  { %v6242_v19 = vadd.f32 %v7418_v44, %v6241_v53 }
0x1f76   :  { %6243 = vst.msk [vmem:[%s11193_s12] sm:$0xff] %vm201_vm3, %v6242_v19 }
0x1f77   :  { %7439 = dma.done.wait [#allocation3], 128  }
0x1f78   :  { %7440 = vsyncadd [#allocation3], 4294967168 }
0x1f79   :  { %6261 = vsyncpa [#allocation3], 1 }

</bundles_post_ra>
